<compile_context>
chip_gen: v7x
topology: tpu7x:2x2x1
jax: 0.10.0
libtpu: 0.0.40
codegen_flags: <defaults>
</compile_context>

<pallas_src>
import functools
import math

import numpy as np
import jax
import jax.numpy as jnp
from jax import lax
from jax.experimental import pallas as pl
from jax.experimental.pallas import tpu as pltpu

BN_EPS = 1e-5
# eval-mode BatchNorm with default init (gamma=1, beta=0, running_mean=0, running_var=1)
BN_SCALE = float(1.0 / math.sqrt(1.0 + BN_EPS))


def _prelu(v, alpha):
    return jnp.where(v >= 0, v, alpha * v)


# ----------------------------------------------------------------------------
# Single fused kernel: scattering operators + ST_GCNN stack + re-layout + temporal head
# ----------------------------------------------------------------------------
def _fused_kernel(alphas_ref, x_ref, adj2_ref, wmat_ref, wvec_ref,
                  txw_ref, txb_ref, mask_ref,
                  out_ref, stout_ref, slab_ref, *,
                  chans, N, TV, T_in, V, C_in, T_out, n_tx,
                  wp, hpwp, ph, pw, ext, offsets):
    L = len(chans) - 1
    rows = N * hpwp

    # identity matrix for the wavelet construction
    rix = lax.broadcasted_iota(jnp.int32, (TV, TV), 0)
    cix = lax.broadcasted_iota(jnp.int32, (TV, TV), 1)
    eye = (rix == cix).astype(jnp.float32)

    # ------------- ST_GCNN stack, channels x (V*T) transposed layout, per batch -------------
    xb = [x_ref[n] for n in range(N)]                     # each (C_in, TV), lanes = (v, t)
    for l in range(L):
        cin, cout = chans[l], chans[l + 1]
        a_sc = alphas_ref[3 * l + 0]
        a_att = alphas_ref[3 * l + 1]
        a_out = alphas_ref[3 * l + 2]

        # scattering operators (shared across batch), BN1d eval scale folded in.
        A = adj2_ref[l, 0]                                # permuted raw adjacency
        At = adj2_ref[l, 1]                               # its transpose
        As = jnp.maximum(jnp.maximum(A, At), 0.0)         # relu(elementwise max(A, A^T))
        denom = jnp.sum(As * As)                          # ||.||_F^2 (no sqrt; 0/0 -> inf, like torch)
        P = 0.5 * (eye + As / denom)                      # symmetric
        S1t = At * BN_SCALE                               # raw-adjacency branch (right-multiply needs A^T)
        S2 = (eye - P) * BN_SCALE                         # H   (symmetric)
        S3 = (P - jnp.dot(P, P, preferred_element_type=jnp.float32)) * BN_SCALE   # H2 (symmetric)

        w1 = wmat_ref[l, 0, :cout, :cin]
        wr = wmat_ref[l, 1, :cout, :cin]
        b1 = wvec_ref[l, :cout, 0:1]
        br = wvec_ref[l, :cout, 1:2]
        w_in = wvec_ref[l, :cout, 2:3]
        w_sc = wvec_ref[l, :cout, 3:4]

        for n in range(N):
            x = xb[n]                                                       # (cin, TV)
            h = jnp.dot(w1, x, preferred_element_type=jnp.float32) + b1     # fcn 1x1 conv
            res = jnp.dot(wr, x, preferred_element_type=jnp.float32) + br   # residual conv (+BN)
            # three scattering branches + PReLU
            o1 = _prelu(jnp.dot(h, S1t, preferred_element_type=jnp.float32), a_sc)
            o2 = _prelu(jnp.dot(h, S2, preferred_element_type=jnp.float32), a_sc)
            o3 = _prelu(jnp.dot(h, S3, preferred_element_type=jnp.float32), a_sc)
            # spectral attention: per-(t,v) score for each branch, exact softmax over the 3
            base = jnp.sum(h * w_in, axis=0, keepdims=True)                 # (1, TV)
            s1 = _prelu(base + jnp.sum(o1 * w_sc, axis=0, keepdims=True), a_att)
            s2 = _prelu(base + jnp.sum(o2 * w_sc, axis=0, keepdims=True), a_att)
            s3 = _prelu(base + jnp.sum(o3 * w_sc, axis=0, keepdims=True), a_att)
            m = jnp.maximum(jnp.maximum(s1, s2), s3)
            e1 = jnp.exp(s1 - m)
            e2 = jnp.exp(s2 - m)
            e3 = jnp.exp(s3 - m)
            wsum = e1 + e2 + e3
            # softmax-weighted mean of the 3 branches (/3) + GNN residual
            g = (e1 * o1 + e2 * o2 + e3 * o3) / wsum * (1.0 / 3.0) + h
            # tcn BN (eval) + ST residual + PReLU
            xb[n] = _prelu(g * BN_SCALE + res, a_out)                       # (cout, TV)

    # stash the ST output so the head re-layout below can use plain ref slicing
    for n in range(N):
        stout_ref[n, :, :] = xb[n]                        # (C_in, TV), lanes = (v, t)

    # ---- in-kernel re-layout to the head's padded slab: rows = (n, v_pad, c_pad), lanes = t ----
    slab_ref[...] = jnp.zeros(slab_ref.shape, slab_ref.dtype)   # zero borders written once
    for n in range(N):
        for v in range(V):
            r = ext + n * hpwp + (v + pw) * wp + ph
            slab_ref[r:r + C_in, 0:T_in] = stout_ref[n, :, v * T_in:(v + 1) * T_in]

    # ------------- temporal CNN head: each 3x3 "same" conv = 9 row-shifted matmuls -------------
    mask = mask_ref[...]
    xcur = None
    for i in range(n_tx):
        acc = jnp.zeros((rows, T_out), jnp.float32)
        for k, off in enumerate(offsets):
            acc = acc + jnp.dot(slab_ref[ext + off:ext + off + rows, :],
                                txw_ref[i, k],
                                preferred_element_type=jnp.float32)
        y = _prelu(acc + txb_ref[i], alphas_ref[3 * L + i])    # conv + folded BN + PReLU
        xcur = y * mask if i == 0 else (y + xcur) * mask       # inter-layer residual, re-zero borders
        if i + 1 < n_tx:
            slab_ref[ext:ext + rows, 0:T_out] = xcur
    out_ref[...] = xcur


# ----------------------------------------------------------------------------
# One-time (outside jit) parameter folding / packing
# ----------------------------------------------------------------------------
def prepare_params(params, cfg):
    C_in = cfg['input_channels']
    T_in, T_out, V = cfg['T_in'], cfg['T_out'], cfg['V']
    kh, kw = cfg['txc_kernel']
    n_tx = cfg['n_tx']
    TV = T_in * V

    st, tx = params['st'], params['tx']
    L = len(st)
    chans = [C_in] + [int(np.asarray(p['fcn_w']).shape[0]) for p in st]
    cmax = max(chans)

    # lane-order permutation: new index a = v*T_in + t  <->  torch index t*V + v
    perm = np.array([(a % T_in) * V + (a // T_in) for a in range(TV)], dtype=np.int64)

    adj2 = np.zeros((L, 2, TV, TV), np.float32)
    wmat = np.zeros((L, 2, cmax, cmax), np.float32)
    wvec = np.zeros((L, cmax, 4), np.float32)
    alphas = np.zeros((3 * L + n_tx,), np.float32)
    for l, p in enumerate(st):
        cin, cout = chans[l], chans[l + 1]
        a = np.asarray(p['adj'], np.float32)[np.ix_(perm, perm)]
        adj2[l, 0] = a
        adj2[l, 1] = a.T
        wmat[l, 0, :cout, :cin] = np.asarray(p['fcn_w'], np.float32).reshape(cout, cin)
        wmat[l, 1, :cout, :cin] = np.asarray(p['res_w'], np.float32).reshape(cout, cin) * BN_SCALE
        wvec[l, :cout, 0] = np.asarray(p['fcn_b'], np.float32)
        wvec[l, :cout, 1] = np.asarray(p['res_b'], np.float32) * BN_SCALE
        aw = np.asarray(p['att_w'], np.float32)
        wvec[l, :cout, 2] = aw[:cout]
        wvec[l, :cout, 3] = aw[cout:]
        alphas[3 * l + 0] = float(p['alpha_scatter'])
        alphas[3 * l + 1] = float(p['alpha_att'])
        alphas[3 * l + 2] = float(p['alpha_out'])

    ph, pw = (kh - 1) // 2, (kw - 1) // 2     # pad along C (conv "H") and V (conv "W")
    wp = C_in + 2 * ph                        # slab minor spatial extent (channels dim of conv)
    hp = V + 2 * pw                           # slab major spatial extent (joints dim of conv)
    hpwp = hp * wp
    ext = pw * wp + ph                        # largest |tap row offset|
    slab_lanes = max(T_in, T_out)
    offsets = tuple((j - pw) * wp + (i - ph) for i in range(kh) for j in range(kw))

    txw = np.zeros((n_tx, kh * kw, slab_lanes, T_out), np.float32)
    txb = np.zeros((n_tx, 1, T_out), np.float32)
    for idx, tp in enumerate(tx):
        w = np.asarray(tp['w'], np.float32)           # (T_out, t_in, kh, kw)
        t_in = w.shape[1]
        for i in range(kh):
            for j in range(kw):
                txw[idx, i * kw + j, :t_in, :] = w[:, :, i, j].T * BN_SCALE   # fold eval BN2d
        txb[idx, 0, :] = np.asarray(tp['b'], np.float32) * BN_SCALE
        alphas[3 * L + idx] = float(tp['alpha'])

    arrays = dict(alphas=jnp.asarray(alphas), adj2=jnp.asarray(adj2),
                  wmat=jnp.asarray(wmat), wvec=jnp.asarray(wvec),
                  txw=jnp.asarray(txw), txb=jnp.asarray(txb))
    static = dict(chans=tuple(chans), TV=TV, T_in=T_in, V=V, C_in=C_in, T_out=T_out,
                  n_tx=n_tx, ph=ph, pw=pw, wp=wp, hp=hp, hpwp=hpwp, ext=ext,
                  slab_lanes=slab_lanes, offsets=offsets)
    return arrays, static


# ----------------------------------------------------------------------------
# Jitted forward: tiny input/output layout glue + ONE pallas_call
# ----------------------------------------------------------------------------
def model_forward(x, arrays, static):
    s = static
    N = x.shape[0]
    C_in, T_in, V, TV = s['C_in'], s['T_in'], s['V'], s['TV']
    T_out, n_tx = s['T_out'], s['n_tx']
    ph, pw, wp, hp = s['ph'], s['pw'], s['wp'], s['hp']
    hpwp, ext, slab_lanes = s['hpwp'], s['ext'], s['slab_lanes']
    rows = N * hpwp

    # lane order (v, t): matches the permuted adjacency produced by prepare_params
    x_alt = jnp.transpose(x.astype(jnp.float32), (0, 1, 3, 2)).reshape(N, C_in, TV)

    # interior-row mask of the padded conv slab (trace-time constant, no runtime op)
    m = np.zeros((hp, wp), np.float32)
    m[pw:pw + V, ph:ph + C_in] = 1.0
    mask = jnp.asarray(np.tile(m.reshape(1, hp * wp), (N, 1)).reshape(rows, 1))

    kernel = functools.partial(
        _fused_kernel, chans=s['chans'], N=N, TV=TV, T_in=T_in, V=V, C_in=C_in,
        T_out=T_out, n_tx=n_tx, wp=wp, hpwp=hpwp, ph=ph, pw=pw, ext=ext,
        offsets=s['offsets'])

    dense = [x_alt, arrays['adj2'], arrays['wmat'], arrays['wvec'],
             arrays['txw'], arrays['txb'], mask]
    in_specs = [pl.BlockSpec(memory_space=pltpu.MemorySpace.SMEM)]
    in_specs += [pl.BlockSpec(a.shape, lambda i, nd=a.ndim: (0,) * nd) for a in dense]

    out70 = pl.pallas_call(
        kernel,
        grid=(1,),
        in_specs=in_specs,
        out_specs=pl.BlockSpec((rows, T_out), lambda i: (0, 0)),
        out_shape=jax.ShapeDtypeStruct((rows, T_out), jnp.float32),
        scratch_shapes=[pltpu.VMEM((N, C_in, TV), jnp.float32),
                        pltpu.VMEM((rows + 2 * ext, slab_lanes), jnp.float32)],
    )(arrays['alphas'], *dense)

    # (N, hp, wp, T_out) -> interior -> (N, T_out, C_in, V)
    y = out70.reshape(N, hp, wp, T_out)[:, pw:pw + V, ph:ph + C_in, :]
    return jnp.transpose(y, (0, 3, 2, 1))


# ----------------------------------------------------------------------------
# Deterministic parameter initialization (matches the torch module's shapes / init scales)
# ----------------------------------------------------------------------------
def _uniform(key, shape, bound):
    return jax.random.uniform(key, shape, jnp.float32, minval=-bound, maxval=bound)


def init_params(key, cfg):
    C_in, T_in, T_out, V = cfg['input_channels'], cfg['T_in'], cfg['T_out'], cfg['V']
    TV = T_in * V
    chans = [C_in, 64, 32, 64, C_in]
    keys = iter(jax.random.split(key, 64))
    st = []
    for l in range(4):
        cin, cout = chans[l], chans[l + 1]
        kb = 1.0 / (cin ** 0.5)                    # 1x1 conv fan_in
        st.append(dict(
            fcn_w=_uniform(next(keys), (cout, cin, 1, 1), kb),
            fcn_b=_uniform(next(keys), (cout,), kb),
            res_w=_uniform(next(keys), (cout, cin, 1, 1), kb),
            res_b=_uniform(next(keys), (cout,), kb),
            adj=_uniform(next(keys), (TV, TV), 1.0 / (TV ** 0.5)),
            att_w=_uniform(next(keys), (2 * cout,), 1.0 / ((2 * cout) ** 0.5)),
            alpha_scatter=jnp.float32(0.25),       # PReLU defaults
            alpha_att=jnp.float32(0.25),
            alpha_out=jnp.float32(0.25),
        ))
    kh, kw = cfg['txc_kernel']
    tchans = [T_in] + [T_out] * cfg['n_tx']
    tx = []
    for i in range(cfg['n_tx']):
        cin, cout = tchans[i], tchans[i + 1]
        kb = 1.0 / ((cin * kh * kw) ** 0.5)
        tx.append(dict(
            w=_uniform(next(keys), (cout, cin, kh, kw), kb),
            b=_uniform(next(keys), (cout,), kb),
            alpha=jnp.float32(0.25),
        ))
    return dict(st=st, tx=tx)


if __name__ == "__main__":
    cfg = dict(input_channels=3, T_in=8, T_out=4, V=5, n_tx=2, txc_kernel=(3, 3))
    key = jax.random.PRNGKey(0)
    pkey, xkey = jax.random.split(key)
    params = init_params(pkey, cfg)
    # Input: (N, in_channels, T_in, V)
    x = jax.random.normal(xkey, (2, cfg['input_channels'], cfg['T_in'], cfg['V']), jnp.float32)

    arrays, static = prepare_params(params, cfg)           # one-time folding, outside jit
    fwd = jax.jit(functools.partial(model_forward, static=static))
    out = jax.block_until_ready(fwd(x, arrays))

    assert out.shape == (2, cfg['T_out'], cfg['input_channels'], cfg['V']), out.shape
    assert bool(jnp.isfinite(out).all())
    print("KERNEL_OK")
</pallas_src>

<mosaic_0001>
module attributes {stable_mosaic.version = 11 : i64} {
  func.func @_fused_kernel(%arg0: i32, %arg1: memref<14xf32, #tpu.memory_space<smem>>, %arg2: memref<2x3x40xf32, #tpu.memory_space<vmem>>, %arg3: memref<4x2x40x40xf32, #tpu.memory_space<vmem>>, %arg4: memref<4x2x64x64xf32, #tpu.memory_space<vmem>>, %arg5: memref<4x64x4xf32, #tpu.memory_space<vmem>>, %arg6: memref<2x9x8x4xf32, #tpu.memory_space<vmem>>, %arg7: memref<2x1x4xf32, #tpu.memory_space<vmem>>, %arg8: memref<70x1xf32, #tpu.memory_space<vmem>>, %arg9: memref<70x4xf32, #tpu.memory_space<vmem>>, %arg10: memref<2x3x40xf32, #tpu.memory_space<vmem>>, %arg11: memref<82x8xf32, #tpu.memory_space<vmem>>) attributes {dimension_semantics = [#tpu.dimension_semantics<arbitrary>], iteration_bounds = array<i64: 1>, scalar_prefetch = 0 : i64, scratch_operands = 2 : i64, tpu.core_type = #tpu.core_type<tc>, window_params = [{transform_indices = @transform_0, window_bounds = array<i64: 14>}, {pipeline_mode = #tpu.pipeline_mode<synchronous>, transform_indices = @transform_1, window_bounds = array<i64: 2, 3, 40>}, {pipeline_mode = #tpu.pipeline_mode<synchronous>, transform_indices = @transform_2, window_bounds = array<i64: 4, 2, 40, 40>}, {pipeline_mode = #tpu.pipeline_mode<synchronous>, transform_indices = @transform_3, window_bounds = array<i64: 4, 2, 64, 64>}, {pipeline_mode = #tpu.pipeline_mode<synchronous>, transform_indices = @transform_4, window_bounds = array<i64: 4, 64, 4>}, {pipeline_mode = #tpu.pipeline_mode<synchronous>, transform_indices = @transform_5, window_bounds = array<i64: 2, 9, 8, 4>}, {pipeline_mode = #tpu.pipeline_mode<synchronous>, transform_indices = @transform_6, window_bounds = array<i64: 2, 1, 4>}, {pipeline_mode = #tpu.pipeline_mode<synchronous>, transform_indices = @transform_7, window_bounds = array<i64: 70, 1>}, {pipeline_mode = #tpu.pipeline_mode<synchronous>, transform_indices = @transform_8, window_bounds = array<i64: 70, 4>}]} {
    %0 = tpu.iota {dimensions = array<i32: 0>} : vector<40x40xi32>
    %1 = tpu.iota {dimensions = array<i32: 1>} : vector<40x40xi32>
    %2 = arith.cmpi eq, %0, %1 : vector<40x40xi32>
    %3 = arith.extui %2 : vector<40x40xi1> to vector<40x40xi32>
    %4 = arith.sitofp %3 : vector<40x40xi32> to vector<40x40xf32>
    %c0 = arith.constant 0 : index
    %c0_0 = arith.constant 0 : index
    %c0_1 = arith.constant 0 : index
    %5 = vector.load %arg2[%c0, %c0_0, %c0_1] : memref<2x3x40xf32, #tpu.memory_space<vmem>>, vector<1x3x40xf32>
    %6 = vector.shape_cast %5 : vector<1x3x40xf32> to vector<3x40xf32>
    %c1 = arith.constant 1 : index
    %c0_2 = arith.constant 0 : index
    %c0_3 = arith.constant 0 : index
    %7 = vector.load %arg2[%c1, %c0_2, %c0_3] : memref<2x3x40xf32, #tpu.memory_space<vmem>>, vector<1x3x40xf32>
    %8 = vector.shape_cast %7 : vector<1x3x40xf32> to vector<3x40xf32>
    %c0_4 = arith.constant 0 : index
    %9 = memref.load %arg1[%c0_4] : memref<14xf32, #tpu.memory_space<smem>>
    %c1_5 = arith.constant 1 : index
    %10 = memref.load %arg1[%c1_5] : memref<14xf32, #tpu.memory_space<smem>>
    %c2 = arith.constant 2 : index
    %11 = memref.load %arg1[%c2] : memref<14xf32, #tpu.memory_space<smem>>
    %c0_6 = arith.constant 0 : index
    %c0_7 = arith.constant 0 : index
    %c0_8 = arith.constant 0 : index
    %c0_9 = arith.constant 0 : index
    %12 = vector.load %arg3[%c0_6, %c0_7, %c0_8, %c0_9] : memref<4x2x40x40xf32, #tpu.memory_space<vmem>>, vector<1x1x40x40xf32>
    %13 = vector.shape_cast %12 : vector<1x1x40x40xf32> to vector<40x40xf32>
    %c0_10 = arith.constant 0 : index
    %c1_11 = arith.constant 1 : index
    %c0_12 = arith.constant 0 : index
    %c0_13 = arith.constant 0 : index
    %14 = vector.load %arg3[%c0_10, %c1_11, %c0_12, %c0_13] : memref<4x2x40x40xf32, #tpu.memory_space<vmem>>, vector<1x1x40x40xf32>
    %15 = vector.shape_cast %14 : vector<1x1x40x40xf32> to vector<40x40xf32>
    %16 = arith.maximumf %13, %15 : vector<40x40xf32>
    %cst = arith.constant 0.000000e+00 : f32
    %17 = vector.broadcast %cst : f32 to vector<40x40xf32>
    %18 = arith.maximumf %16, %17 : vector<40x40xf32>
    %19 = arith.mulf %18, %18 : vector<40x40xf32>
    %20 = vector.shape_cast %19 : vector<40x40xf32> to vector<1x40x40xf32>
    %cst_14 = arith.constant dense<0.000000e+00> : vector<1xf32>
    %21 = vector.multi_reduction <add>, %20, %cst_14 [1, 2] : vector<1x40x40xf32> to vector<1xf32>
    %22 = vector.shape_cast %21 : vector<1xf32> to vector<1x1x1xf32>
    %23 = vector.extract %22[0, 0, 0] : f32 from vector<1x1x1xf32>
    %24 = vector.broadcast %23 : f32 to vector<40x40xf32>
    %25 = arith.divf %18, %24 : vector<40x40xf32>
    %26 = arith.addf %4, %25 : vector<40x40xf32>
    %cst_15 = arith.constant 5.000000e-01 : f32
    %27 = vector.broadcast %cst_15 : f32 to vector<40x40xf32>
    %28 = arith.mulf %27, %26 : vector<40x40xf32>
    %cst_16 = arith.constant 0.999994993 : f32
    %29 = vector.broadcast %cst_16 : f32 to vector<40x40xf32>
    %30 = arith.mulf %15, %29 : vector<40x40xf32>
    %31 = arith.subf %4, %28 : vector<40x40xf32>
    %cst_17 = arith.constant 0.999994993 : f32
    %32 = vector.broadcast %cst_17 : f32 to vector<40x40xf32>
    %33 = arith.mulf %31, %32 : vector<40x40xf32>
    %cst_18 = arith.constant dense<0.000000e+00> : vector<40x40xf32>
    %34 = tpu.matmul %28, %28, %cst_18 {dimension_numbers = #tpu.dot_dimension_numbers<[1], [0], [0], [1], [0, 0, 1, 1], [], []>} : vector<40x40xf32>, vector<40x40xf32>, vector<40x40xf32> -> vector<40x40xf32>
    %35 = arith.subf %28, %34 : vector<40x40xf32>
    %cst_19 = arith.constant 0.999994993 : f32
    %36 = vector.broadcast %cst_19 : f32 to vector<40x40xf32>
    %37 = arith.mulf %35, %36 : vector<40x40xf32>
    %c0_20 = arith.constant 0 : index
    %c0_21 = arith.constant 0 : index
    %c0_22 = arith.constant 0 : index
    %c0_23 = arith.constant 0 : index
    %38 = vector.load %arg4[%c0_20, %c0_21, %c0_22, %c0_23] : memref<4x2x64x64xf32, #tpu.memory_space<vmem>>, vector<1x1x64x3xf32>
    %39 = vector.shape_cast %38 : vector<1x1x64x3xf32> to vector<64x3xf32>
    %c0_24 = arith.constant 0 : index
    %c1_25 = arith.constant 1 : index
    %c0_26 = arith.constant 0 : index
    %c0_27 = arith.constant 0 : index
    %40 = vector.load %arg4[%c0_24, %c1_25, %c0_26, %c0_27] : memref<4x2x64x64xf32, #tpu.memory_space<vmem>>, vector<1x1x64x3xf32>
    %41 = vector.shape_cast %40 : vector<1x1x64x3xf32> to vector<64x3xf32>
    %c0_28 = arith.constant 0 : index
    %c0_29 = arith.constant 0 : index
    %c0_30 = arith.constant 0 : index
    %42 = vector.load %arg5[%c0_28, %c0_29, %c0_30] : memref<4x64x4xf32, #tpu.memory_space<vmem>>, vector<1x64x1xf32>
    %43 = vector.shape_cast %42 : vector<1x64x1xf32> to vector<64x1xf32>
    %c0_31 = arith.constant 0 : index
    %c0_32 = arith.constant 0 : index
    %c1_33 = arith.constant 1 : index
    %44 = vector.load %arg5[%c0_31, %c0_32, %c1_33] : memref<4x64x4xf32, #tpu.memory_space<vmem>>, vector<1x64x1xf32>
    %45 = vector.shape_cast %44 : vector<1x64x1xf32> to vector<64x1xf32>
    %c0_34 = arith.constant 0 : index
    %c0_35 = arith.constant 0 : index
    %c2_36 = arith.constant 2 : index
    %46 = vector.load %arg5[%c0_34, %c0_35, %c2_36] : memref<4x64x4xf32, #tpu.memory_space<vmem>>, vector<1x64x1xf32>
    %47 = vector.shape_cast %46 : vector<1x64x1xf32> to vector<64x1xf32>
    %c0_37 = arith.constant 0 : index
    %c0_38 = arith.constant 0 : index
    %c3 = arith.constant 3 : index
    %48 = vector.load %arg5[%c0_37, %c0_38, %c3] : memref<4x64x4xf32, #tpu.memory_space<vmem>>, vector<1x64x1xf32>
    %49 = vector.shape_cast %48 : vector<1x64x1xf32> to vector<64x1xf32>
    %cst_39 = arith.constant dense<0.000000e+00> : vector<64x40xf32>
    %50 = tpu.matmul %39, %6, %cst_39 {dimension_numbers = #tpu.dot_dimension_numbers<[1], [0], [0], [1], [0, 0, 1, 1], [], []>} : vector<64x3xf32>, vector<3x40xf32>, vector<64x40xf32> -> vector<64x40xf32>
    %51 = vector.broadcast %43 : vector<64x1xf32> to vector<64x40xf32>
    %52 = arith.addf %50, %51 : vector<64x40xf32>
    %cst_40 = arith.constant dense<0.000000e+00> : vector<64x40xf32>
    %53 = tpu.matmul %41, %6, %cst_40 {dimension_numbers = #tpu.dot_dimension_numbers<[1], [0], [0], [1], [0, 0, 1, 1], [], []>} : vector<64x3xf32>, vector<3x40xf32>, vector<64x40xf32> -> vector<64x40xf32>
    %54 = vector.broadcast %45 : vector<64x1xf32> to vector<64x40xf32>
    %55 = arith.addf %53, %54 : vector<64x40xf32>
    %cst_41 = arith.constant dense<0.000000e+00> : vector<64x40xf32>
    %56 = tpu.matmul %52, %30, %cst_41 {dimension_numbers = #tpu.dot_dimension_numbers<[1], [0], [0], [1], [0, 0, 1, 1], [], []>} : vector<64x40xf32>, vector<40x40xf32>, vector<64x40xf32> -> vector<64x40xf32>
    %cst_42 = arith.constant 0.000000e+00 : f32
    %57 = vector.broadcast %cst_42 : f32 to vector<64x40xf32>
    %58 = arith.cmpf oge, %56, %57 : vector<64x40xf32>
    %59 = vector.broadcast %9 : f32 to vector<64x40xf32>
    %60 = arith.mulf %59, %56 : vector<64x40xf32>
    %61 = arith.select %58, %56, %60 : vector<64x40xi1>, vector<64x40xf32>
    %cst_43 = arith.constant dense<0.000000e+00> : vector<64x40xf32>
    %62 = tpu.matmul %52, %33, %cst_43 {dimension_numbers = #tpu.dot_dimension_numbers<[1], [0], [0], [1], [0, 0, 1, 1], [], []>} : vector<64x40xf32>, vector<40x40xf32>, vector<64x40xf32> -> vector<64x40xf32>
    %cst_44 = arith.constant 0.000000e+00 : f32
    %63 = vector.broadcast %cst_44 : f32 to vector<64x40xf32>
    %64 = arith.cmpf oge, %62, %63 : vector<64x40xf32>
    %65 = vector.broadcast %9 : f32 to vector<64x40xf32>
    %66 = arith.mulf %65, %62 : vector<64x40xf32>
    %67 = arith.select %64, %62, %66 : vector<64x40xi1>, vector<64x40xf32>
    %cst_45 = arith.constant dense<0.000000e+00> : vector<64x40xf32>
    %68 = tpu.matmul %52, %37, %cst_45 {dimension_numbers = #tpu.dot_dimension_numbers<[1], [0], [0], [1], [0, 0, 1, 1], [], []>} : vector<64x40xf32>, vector<40x40xf32>, vector<64x40xf32> -> vector<64x40xf32>
    %cst_46 = arith.constant 0.000000e+00 : f32
    %69 = vector.broadcast %cst_46 : f32 to vector<64x40xf32>
    %70 = arith.cmpf oge, %68, %69 : vector<64x40xf32>
    %71 = vector.broadcast %9 : f32 to vector<64x40xf32>
    %72 = arith.mulf %71, %68 : vector<64x40xf32>
    %73 = arith.select %70, %68, %72 : vector<64x40xi1>, vector<64x40xf32>
    %74 = vector.broadcast %47 : vector<64x1xf32> to vector<64x40xf32>
    %75 = arith.mulf %52, %74 : vector<64x40xf32>
    %cst_47 = arith.constant dense<0.000000e+00> : vector<40xf32>
    %76 = vector.multi_reduction <add>, %75, %cst_47 [0] : vector<64x40xf32> to vector<40xf32>
    %77 = vector.shape_cast %76 : vector<40xf32> to vector<1x40xf32>
    %78 = vector.broadcast %49 : vector<64x1xf32> to vector<64x40xf32>
    %79 = arith.mulf %61, %78 : vector<64x40xf32>
    %cst_48 = arith.constant dense<0.000000e+00> : vector<40xf32>
    %80 = vector.multi_reduction <add>, %79, %cst_48 [0] : vector<64x40xf32> to vector<40xf32>
    %81 = vector.shape_cast %80 : vector<40xf32> to vector<1x40xf32>
    %82 = arith.addf %77, %81 : vector<1x40xf32>
    %cst_49 = arith.constant 0.000000e+00 : f32
    %83 = vector.broadcast %cst_49 : f32 to vector<1x40xf32>
    %84 = arith.cmpf oge, %82, %83 : vector<1x40xf32>
    %85 = vector.broadcast %10 : f32 to vector<1x40xf32>
    %86 = arith.mulf %85, %82 : vector<1x40xf32>
    %87 = arith.select %84, %82, %86 : vector<1x40xi1>, vector<1x40xf32>
    %88 = vector.broadcast %49 : vector<64x1xf32> to vector<64x40xf32>
    %89 = arith.mulf %67, %88 : vector<64x40xf32>
    %cst_50 = arith.constant dense<0.000000e+00> : vector<40xf32>
    %90 = vector.multi_reduction <add>, %89, %cst_50 [0] : vector<64x40xf32> to vector<40xf32>
    %91 = vector.shape_cast %90 : vector<40xf32> to vector<1x40xf32>
    %92 = arith.addf %77, %91 : vector<1x40xf32>
    %cst_51 = arith.constant 0.000000e+00 : f32
    %93 = vector.broadcast %cst_51 : f32 to vector<1x40xf32>
    %94 = arith.cmpf oge, %92, %93 : vector<1x40xf32>
    %95 = vector.broadcast %10 : f32 to vector<1x40xf32>
    %96 = arith.mulf %95, %92 : vector<1x40xf32>
    %97 = arith.select %94, %92, %96 : vector<1x40xi1>, vector<1x40xf32>
    %98 = vector.broadcast %49 : vector<64x1xf32> to vector<64x40xf32>
    %99 = arith.mulf %73, %98 : vector<64x40xf32>
    %cst_52 = arith.constant dense<0.000000e+00> : vector<40xf32>
    %100 = vector.multi_reduction <add>, %99, %cst_52 [0] : vector<64x40xf32> to vector<40xf32>
    %101 = vector.shape_cast %100 : vector<40xf32> to vector<1x40xf32>
    %102 = arith.addf %77, %101 : vector<1x40xf32>
    %cst_53 = arith.constant 0.000000e+00 : f32
    %103 = vector.broadcast %cst_53 : f32 to vector<1x40xf32>
    %104 = arith.cmpf oge, %102, %103 : vector<1x40xf32>
    %105 = vector.broadcast %10 : f32 to vector<1x40xf32>
    %106 = arith.mulf %105, %102 : vector<1x40xf32>
    %107 = arith.select %104, %102, %106 : vector<1x40xi1>, vector<1x40xf32>
    %108 = arith.maximumf %87, %97 : vector<1x40xf32>
    %109 = arith.maximumf %108, %107 : vector<1x40xf32>
    %110 = arith.subf %87, %109 : vector<1x40xf32>
    %111 = math.exp %110 : vector<1x40xf32>
    %112 = arith.subf %97, %109 : vector<1x40xf32>
    %113 = math.exp %112 : vector<1x40xf32>
    %114 = arith.subf %107, %109 : vector<1x40xf32>
    %115 = math.exp %114 : vector<1x40xf32>
    %116 = arith.addf %111, %113 : vector<1x40xf32>
    %117 = arith.addf %116, %115 : vector<1x40xf32>
    %118 = vector.broadcast %111 : vector<1x40xf32> to vector<64x40xf32>
    %119 = arith.mulf %118, %61 : vector<64x40xf32>
    %120 = vector.broadcast %113 : vector<1x40xf32> to vector<64x40xf32>
    %121 = arith.mulf %120, %67 : vector<64x40xf32>
    %122 = arith.addf %119, %121 : vector<64x40xf32>
    %123 = vector.broadcast %115 : vector<1x40xf32> to vector<64x40xf32>
    %124 = arith.mulf %123, %73 : vector<64x40xf32>
    %125 = arith.addf %122, %124 : vector<64x40xf32>
    %126 = vector.broadcast %117 : vector<1x40xf32> to vector<64x40xf32>
    %127 = arith.divf %125, %126 : vector<64x40xf32>
    %cst_54 = arith.constant 0.333333343 : f32
    %128 = vector.broadcast %cst_54 : f32 to vector<64x40xf32>
    %129 = arith.mulf %127, %128 : vector<64x40xf32>
    %130 = arith.addf %129, %52 : vector<64x40xf32>
    %cst_55 = arith.constant 0.999994993 : f32
    %131 = vector.broadcast %cst_55 : f32 to vector<64x40xf32>
    %132 = arith.mulf %130, %131 : vector<64x40xf32>
    %133 = arith.addf %132, %55 : vector<64x40xf32>
    %cst_56 = arith.constant 0.000000e+00 : f32
    %134 = vector.broadcast %cst_56 : f32 to vector<64x40xf32>
    %135 = arith.cmpf oge, %133, %134 : vector<64x40xf32>
    %136 = vector.broadcast %11 : f32 to vector<64x40xf32>
    %137 = arith.mulf %136, %133 : vector<64x40xf32>
    %138 = arith.select %135, %133, %137 : vector<64x40xi1>, vector<64x40xf32>
    %cst_57 = arith.constant dense<0.000000e+00> : vector<64x40xf32>
    %139 = tpu.matmul %39, %8, %cst_57 {dimension_numbers = #tpu.dot_dimension_numbers<[1], [0], [0], [1], [0, 0, 1, 1], [], []>} : vector<64x3xf32>, vector<3x40xf32>, vector<64x40xf32> -> vector<64x40xf32>
    %140 = vector.broadcast %43 : vector<64x1xf32> to vector<64x40xf32>
    %141 = arith.addf %139, %140 : vector<64x40xf32>
    %cst_58 = arith.constant dense<0.000000e+00> : vector<64x40xf32>
    %142 = tpu.matmul %41, %8, %cst_58 {dimension_numbers = #tpu.dot_dimension_numbers<[1], [0], [0], [1], [0, 0, 1, 1], [], []>} : vector<64x3xf32>, vector<3x40xf32>, vector<64x40xf32> -> vector<64x40xf32>
    %143 = vector.broadcast %45 : vector<64x1xf32> to vector<64x40xf32>
    %144 = arith.addf %142, %143 : vector<64x40xf32>
    %cst_59 = arith.constant dense<0.000000e+00> : vector<64x40xf32>
    %145 = tpu.matmul %141, %30, %cst_59 {dimension_numbers = #tpu.dot_dimension_numbers<[1], [0], [0], [1], [0, 0, 1, 1], [], []>} : vector<64x40xf32>, vector<40x40xf32>, vector<64x40xf32> -> vector<64x40xf32>
    %cst_60 = arith.constant 0.000000e+00 : f32
    %146 = vector.broadcast %cst_60 : f32 to vector<64x40xf32>
    %147 = arith.cmpf oge, %145, %146 : vector<64x40xf32>
    %148 = vector.broadcast %9 : f32 to vector<64x40xf32>
    %149 = arith.mulf %148, %145 : vector<64x40xf32>
    %150 = arith.select %147, %145, %149 : vector<64x40xi1>, vector<64x40xf32>
    %cst_61 = arith.constant dense<0.000000e+00> : vector<64x40xf32>
    %151 = tpu.matmul %141, %33, %cst_61 {dimension_numbers = #tpu.dot_dimension_numbers<[1], [0], [0], [1], [0, 0, 1, 1], [], []>} : vector<64x40xf32>, vector<40x40xf32>, vector<64x40xf32> -> vector<64x40xf32>
    %cst_62 = arith.constant 0.000000e+00 : f32
    %152 = vector.broadcast %cst_62 : f32 to vector<64x40xf32>
    %153 = arith.cmpf oge, %151, %152 : vector<64x40xf32>
    %154 = vector.broadcast %9 : f32 to vector<64x40xf32>
    %155 = arith.mulf %154, %151 : vector<64x40xf32>
    %156 = arith.select %153, %151, %155 : vector<64x40xi1>, vector<64x40xf32>
    %cst_63 = arith.constant dense<0.000000e+00> : vector<64x40xf32>
    %157 = tpu.matmul %141, %37, %cst_63 {dimension_numbers = #tpu.dot_dimension_numbers<[1], [0], [0], [1], [0, 0, 1, 1], [], []>} : vector<64x40xf32>, vector<40x40xf32>, vector<64x40xf32> -> vector<64x40xf32>
    %cst_64 = arith.constant 0.000000e+00 : f32
    %158 = vector.broadcast %cst_64 : f32 to vector<64x40xf32>
    %159 = arith.cmpf oge, %157, %158 : vector<64x40xf32>
    %160 = vector.broadcast %9 : f32 to vector<64x40xf32>
    %161 = arith.mulf %160, %157 : vector<64x40xf32>
    %162 = arith.select %159, %157, %161 : vector<64x40xi1>, vector<64x40xf32>
    %163 = vector.broadcast %47 : vector<64x1xf32> to vector<64x40xf32>
    %164 = arith.mulf %141, %163 : vector<64x40xf32>
    %cst_65 = arith.constant dense<0.000000e+00> : vector<40xf32>
    %165 = vector.multi_reduction <add>, %164, %cst_65 [0] : vector<64x40xf32> to vector<40xf32>
    %166 = vector.shape_cast %165 : vector<40xf32> to vector<1x40xf32>
    %167 = vector.broadcast %49 : vector<64x1xf32> to vector<64x40xf32>
    %168 = arith.mulf %150, %167 : vector<64x40xf32>
    %cst_66 = arith.constant dense<0.000000e+00> : vector<40xf32>
    %169 = vector.multi_reduction <add>, %168, %cst_66 [0] : vector<64x40xf32> to vector<40xf32>
    %170 = vector.shape_cast %169 : vector<40xf32> to vector<1x40xf32>
    %171 = arith.addf %166, %170 : vector<1x40xf32>
    %cst_67 = arith.constant 0.000000e+00 : f32
    %172 = vector.broadcast %cst_67 : f32 to vector<1x40xf32>
    %173 = arith.cmpf oge, %171, %172 : vector<1x40xf32>
    %174 = vector.broadcast %10 : f32 to vector<1x40xf32>
    %175 = arith.mulf %174, %171 : vector<1x40xf32>
    %176 = arith.select %173, %171, %175 : vector<1x40xi1>, vector<1x40xf32>
    %177 = vector.broadcast %49 : vector<64x1xf32> to vector<64x40xf32>
    %178 = arith.mulf %156, %177 : vector<64x40xf32>
    %cst_68 = arith.constant dense<0.000000e+00> : vector<40xf32>
    %179 = vector.multi_reduction <add>, %178, %cst_68 [0] : vector<64x40xf32> to vector<40xf32>
    %180 = vector.shape_cast %179 : vector<40xf32> to vector<1x40xf32>
    %181 = arith.addf %166, %180 : vector<1x40xf32>
    %cst_69 = arith.constant 0.000000e+00 : f32
    %182 = vector.broadcast %cst_69 : f32 to vector<1x40xf32>
    %183 = arith.cmpf oge, %181, %182 : vector<1x40xf32>
    %184 = vector.broadcast %10 : f32 to vector<1x40xf32>
    %185 = arith.mulf %184, %181 : vector<1x40xf32>
    %186 = arith.select %183, %181, %185 : vector<1x40xi1>, vector<1x40xf32>
    %187 = vector.broadcast %49 : vector<64x1xf32> to vector<64x40xf32>
    %188 = arith.mulf %162, %187 : vector<64x40xf32>
    %cst_70 = arith.constant dense<0.000000e+00> : vector<40xf32>
    %189 = vector.multi_reduction <add>, %188, %cst_70 [0] : vector<64x40xf32> to vector<40xf32>
    %190 = vector.shape_cast %189 : vector<40xf32> to vector<1x40xf32>
    %191 = arith.addf %166, %190 : vector<1x40xf32>
    %cst_71 = arith.constant 0.000000e+00 : f32
    %192 = vector.broadcast %cst_71 : f32 to vector<1x40xf32>
    %193 = arith.cmpf oge, %191, %192 : vector<1x40xf32>
    %194 = vector.broadcast %10 : f32 to vector<1x40xf32>
    %195 = arith.mulf %194, %191 : vector<1x40xf32>
    %196 = arith.select %193, %191, %195 : vector<1x40xi1>, vector<1x40xf32>
    %197 = arith.maximumf %176, %186 : vector<1x40xf32>
    %198 = arith.maximumf %197, %196 : vector<1x40xf32>
    %199 = arith.subf %176, %198 : vector<1x40xf32>
    %200 = math.exp %199 : vector<1x40xf32>
    %201 = arith.subf %186, %198 : vector<1x40xf32>
    %202 = math.exp %201 : vector<1x40xf32>
    %203 = arith.subf %196, %198 : vector<1x40xf32>
    %204 = math.exp %203 : vector<1x40xf32>
    %205 = arith.addf %200, %202 : vector<1x40xf32>
    %206 = arith.addf %205, %204 : vector<1x40xf32>
    %207 = vector.broadcast %200 : vector<1x40xf32> to vector<64x40xf32>
    %208 = arith.mulf %207, %150 : vector<64x40xf32>
    %209 = vector.broadcast %202 : vector<1x40xf32> to vector<64x40xf32>
    %210 = arith.mulf %209, %156 : vector<64x40xf32>
    %211 = arith.addf %208, %210 : vector<64x40xf32>
    %212 = vector.broadcast %204 : vector<1x40xf32> to vector<64x40xf32>
    %213 = arith.mulf %212, %162 : vector<64x40xf32>
    %214 = arith.addf %211, %213 : vector<64x40xf32>
    %215 = vector.broadcast %206 : vector<1x40xf32> to vector<64x40xf32>
    %216 = arith.divf %214, %215 : vector<64x40xf32>
    %cst_72 = arith.constant 0.333333343 : f32
    %217 = vector.broadcast %cst_72 : f32 to vector<64x40xf32>
    %218 = arith.mulf %216, %217 : vector<64x40xf32>
    %219 = arith.addf %218, %141 : vector<64x40xf32>
    %cst_73 = arith.constant 0.999994993 : f32
    %220 = vector.broadcast %cst_73 : f32 to vector<64x40xf32>
    %221 = arith.mulf %219, %220 : vector<64x40xf32>
    %222 = arith.addf %221, %144 : vector<64x40xf32>
    %cst_74 = arith.constant 0.000000e+00 : f32
    %223 = vector.broadcast %cst_74 : f32 to vector<64x40xf32>
    %224 = arith.cmpf oge, %222, %223 : vector<64x40xf32>
    %225 = vector.broadcast %11 : f32 to vector<64x40xf32>
    %226 = arith.mulf %225, %222 : vector<64x40xf32>
    %227 = arith.select %224, %222, %226 : vector<64x40xi1>, vector<64x40xf32>
    %c3_75 = arith.constant 3 : index
    %228 = memref.load %arg1[%c3_75] : memref<14xf32, #tpu.memory_space<smem>>
    %c4 = arith.constant 4 : index
    %229 = memref.load %arg1[%c4] : memref<14xf32, #tpu.memory_space<smem>>
    %c5 = arith.constant 5 : index
    %230 = memref.load %arg1[%c5] : memref<14xf32, #tpu.memory_space<smem>>
    %c1_76 = arith.constant 1 : index
    %c0_77 = arith.constant 0 : index
    %c0_78 = arith.constant 0 : index
    %c0_79 = arith.constant 0 : index
    %231 = vector.load %arg3[%c1_76, %c0_77, %c0_78, %c0_79] : memref<4x2x40x40xf32, #tpu.memory_space<vmem>>, vector<1x1x40x40xf32>
    %232 = vector.shape_cast %231 : vector<1x1x40x40xf32> to vector<40x40xf32>
    %c1_80 = arith.constant 1 : index
    %c1_81 = arith.constant 1 : index
    %c0_82 = arith.constant 0 : index
    %c0_83 = arith.constant 0 : index
    %233 = vector.load %arg3[%c1_80, %c1_81, %c0_82, %c0_83] : memref<4x2x40x40xf32, #tpu.memory_space<vmem>>, vector<1x1x40x40xf32>
    %234 = vector.shape_cast %233 : vector<1x1x40x40xf32> to vector<40x40xf32>
    %235 = arith.maximumf %232, %234 : vector<40x40xf32>
    %cst_84 = arith.constant 0.000000e+00 : f32
    %236 = vector.broadcast %cst_84 : f32 to vector<40x40xf32>
    %237 = arith.maximumf %235, %236 : vector<40x40xf32>
    %238 = arith.mulf %237, %237 : vector<40x40xf32>
    %239 = vector.shape_cast %238 : vector<40x40xf32> to vector<1x40x40xf32>
    %cst_85 = arith.constant dense<0.000000e+00> : vector<1xf32>
    %240 = vector.multi_reduction <add>, %239, %cst_85 [1, 2] : vector<1x40x40xf32> to vector<1xf32>
    %241 = vector.shape_cast %240 : vector<1xf32> to vector<1x1x1xf32>
    %242 = vector.extract %241[0, 0, 0] : f32 from vector<1x1x1xf32>
    %243 = vector.broadcast %242 : f32 to vector<40x40xf32>
    %244 = arith.divf %237, %243 : vector<40x40xf32>
    %245 = arith.addf %4, %244 : vector<40x40xf32>
    %cst_86 = arith.constant 5.000000e-01 : f32
    %246 = vector.broadcast %cst_86 : f32 to vector<40x40xf32>
    %247 = arith.mulf %246, %245 : vector<40x40xf32>
    %cst_87 = arith.constant 0.999994993 : f32
    %248 = vector.broadcast %cst_87 : f32 to vector<40x40xf32>
    %249 = arith.mulf %234, %248 : vector<40x40xf32>
    %250 = arith.subf %4, %247 : vector<40x40xf32>
    %cst_88 = arith.constant 0.999994993 : f32
    %251 = vector.broadcast %cst_88 : f32 to vector<40x40xf32>
    %252 = arith.mulf %250, %251 : vector<40x40xf32>
    %cst_89 = arith.constant dense<0.000000e+00> : vector<40x40xf32>
    %253 = tpu.matmul %247, %247, %cst_89 {dimension_numbers = #tpu.dot_dimension_numbers<[1], [0], [0], [1], [0, 0, 1, 1], [], []>} : vector<40x40xf32>, vector<40x40xf32>, vector<40x40xf32> -> vector<40x40xf32>
    %254 = arith.subf %247, %253 : vector<40x40xf32>
    %cst_90 = arith.constant 0.999994993 : f32
    %255 = vector.broadcast %cst_90 : f32 to vector<40x40xf32>
    %256 = arith.mulf %254, %255 : vector<40x40xf32>
    %c1_91 = arith.constant 1 : index
    %c0_92 = arith.constant 0 : index
    %c0_93 = arith.constant 0 : index
    %c0_94 = arith.constant 0 : index
    %257 = vector.load %arg4[%c1_91, %c0_92, %c0_93, %c0_94] : memref<4x2x64x64xf32, #tpu.memory_space<vmem>>, vector<1x1x32x64xf32>
    %258 = vector.shape_cast %257 : vector<1x1x32x64xf32> to vector<32x64xf32>
    %c1_95 = arith.constant 1 : index
    %c1_96 = arith.constant 1 : index
    %c0_97 = arith.constant 0 : index
    %c0_98 = arith.constant 0 : index
    %259 = vector.load %arg4[%c1_95, %c1_96, %c0_97, %c0_98] : memref<4x2x64x64xf32, #tpu.memory_space<vmem>>, vector<1x1x32x64xf32>
    %260 = vector.shape_cast %259 : vector<1x1x32x64xf32> to vector<32x64xf32>
    %c1_99 = arith.constant 1 : index
    %c0_100 = arith.constant 0 : index
    %c0_101 = arith.constant 0 : index
    %261 = vector.load %arg5[%c1_99, %c0_100, %c0_101] : memref<4x64x4xf32, #tpu.memory_space<vmem>>, vector<1x32x1xf32>
    %262 = vector.shape_cast %261 : vector<1x32x1xf32> to vector<32x1xf32>
    %c1_102 = arith.constant 1 : index
    %c0_103 = arith.constant 0 : index
    %c1_104 = arith.constant 1 : index
    %263 = vector.load %arg5[%c1_102, %c0_103, %c1_104] : memref<4x64x4xf32, #tpu.memory_space<vmem>>, vector<1x32x1xf32>
    %264 = vector.shape_cast %263 : vector<1x32x1xf32> to vector<32x1xf32>
    %c1_105 = arith.constant 1 : index
    %c0_106 = arith.constant 0 : index
    %c2_107 = arith.constant 2 : index
    %265 = vector.load %arg5[%c1_105, %c0_106, %c2_107] : memref<4x64x4xf32, #tpu.memory_space<vmem>>, vector<1x32x1xf32>
    %266 = vector.shape_cast %265 : vector<1x32x1xf32> to vector<32x1xf32>
    %c1_108 = arith.constant 1 : index
    %c0_109 = arith.constant 0 : index
    %c3_110 = arith.constant 3 : index
    %267 = vector.load %arg5[%c1_108, %c0_109, %c3_110] : memref<4x64x4xf32, #tpu.memory_space<vmem>>, vector<1x32x1xf32>
    %268 = vector.shape_cast %267 : vector<1x32x1xf32> to vector<32x1xf32>
    %cst_111 = arith.constant dense<0.000000e+00> : vector<32x40xf32>
    %269 = tpu.matmul %258, %138, %cst_111 {dimension_numbers = #tpu.dot_dimension_numbers<[1], [0], [0], [1], [0, 0, 1, 1], [], []>} : vector<32x64xf32>, vector<64x40xf32>, vector<32x40xf32> -> vector<32x40xf32>
    %270 = vector.broadcast %262 : vector<32x1xf32> to vector<32x40xf32>
    %271 = arith.addf %269, %270 : vector<32x40xf32>
    %cst_112 = arith.constant dense<0.000000e+00> : vector<32x40xf32>
    %272 = tpu.matmul %260, %138, %cst_112 {dimension_numbers = #tpu.dot_dimension_numbers<[1], [0], [0], [1], [0, 0, 1, 1], [], []>} : vector<32x64xf32>, vector<64x40xf32>, vector<32x40xf32> -> vector<32x40xf32>
    %273 = vector.broadcast %264 : vector<32x1xf32> to vector<32x40xf32>
    %274 = arith.addf %272, %273 : vector<32x40xf32>
    %cst_113 = arith.constant dense<0.000000e+00> : vector<32x40xf32>
    %275 = tpu.matmul %271, %249, %cst_113 {dimension_numbers = #tpu.dot_dimension_numbers<[1], [0], [0], [1], [0, 0, 1, 1], [], []>} : vector<32x40xf32>, vector<40x40xf32>, vector<32x40xf32> -> vector<32x40xf32>
    %cst_114 = arith.constant 0.000000e+00 : f32
    %276 = vector.broadcast %cst_114 : f32 to vector<32x40xf32>
    %277 = arith.cmpf oge, %275, %276 : vector<32x40xf32>
    %278 = vector.broadcast %228 : f32 to vector<32x40xf32>
    %279 = arith.mulf %278, %275 : vector<32x40xf32>
    %280 = arith.select %277, %275, %279 : vector<32x40xi1>, vector<32x40xf32>
    %cst_115 = arith.constant dense<0.000000e+00> : vector<32x40xf32>
    %281 = tpu.matmul %271, %252, %cst_115 {dimension_numbers = #tpu.dot_dimension_numbers<[1], [0], [0], [1], [0, 0, 1, 1], [], []>} : vector<32x40xf32>, vector<40x40xf32>, vector<32x40xf32> -> vector<32x40xf32>
    %cst_116 = arith.constant 0.000000e+00 : f32
    %282 = vector.broadcast %cst_116 : f32 to vector<32x40xf32>
    %283 = arith.cmpf oge, %281, %282 : vector<32x40xf32>
    %284 = vector.broadcast %228 : f32 to vector<32x40xf32>
    %285 = arith.mulf %284, %281 : vector<32x40xf32>
    %286 = arith.select %283, %281, %285 : vector<32x40xi1>, vector<32x40xf32>
    %cst_117 = arith.constant dense<0.000000e+00> : vector<32x40xf32>
    %287 = tpu.matmul %271, %256, %cst_117 {dimension_numbers = #tpu.dot_dimension_numbers<[1], [0], [0], [1], [0, 0, 1, 1], [], []>} : vector<32x40xf32>, vector<40x40xf32>, vector<32x40xf32> -> vector<32x40xf32>
    %cst_118 = arith.constant 0.000000e+00 : f32
    %288 = vector.broadcast %cst_118 : f32 to vector<32x40xf32>
    %289 = arith.cmpf oge, %287, %288 : vector<32x40xf32>
    %290 = vector.broadcast %228 : f32 to vector<32x40xf32>
    %291 = arith.mulf %290, %287 : vector<32x40xf32>
    %292 = arith.select %289, %287, %291 : vector<32x40xi1>, vector<32x40xf32>
    %293 = vector.broadcast %266 : vector<32x1xf32> to vector<32x40xf32>
    %294 = arith.mulf %271, %293 : vector<32x40xf32>
    %cst_119 = arith.constant dense<0.000000e+00> : vector<40xf32>
    %295 = vector.multi_reduction <add>, %294, %cst_119 [0] : vector<32x40xf32> to vector<40xf32>
    %296 = vector.shape_cast %295 : vector<40xf32> to vector<1x40xf32>
    %297 = vector.broadcast %268 : vector<32x1xf32> to vector<32x40xf32>
    %298 = arith.mulf %280, %297 : vector<32x40xf32>
    %cst_120 = arith.constant dense<0.000000e+00> : vector<40xf32>
    %299 = vector.multi_reduction <add>, %298, %cst_120 [0] : vector<32x40xf32> to vector<40xf32>
    %300 = vector.shape_cast %299 : vector<40xf32> to vector<1x40xf32>
    %301 = arith.addf %296, %300 : vector<1x40xf32>
    %cst_121 = arith.constant 0.000000e+00 : f32
    %302 = vector.broadcast %cst_121 : f32 to vector<1x40xf32>
    %303 = arith.cmpf oge, %301, %302 : vector<1x40xf32>
    %304 = vector.broadcast %229 : f32 to vector<1x40xf32>
    %305 = arith.mulf %304, %301 : vector<1x40xf32>
    %306 = arith.select %303, %301, %305 : vector<1x40xi1>, vector<1x40xf32>
    %307 = vector.broadcast %268 : vector<32x1xf32> to vector<32x40xf32>
    %308 = arith.mulf %286, %307 : vector<32x40xf32>
    %cst_122 = arith.constant dense<0.000000e+00> : vector<40xf32>
    %309 = vector.multi_reduction <add>, %308, %cst_122 [0] : vector<32x40xf32> to vector<40xf32>
    %310 = vector.shape_cast %309 : vector<40xf32> to vector<1x40xf32>
    %311 = arith.addf %296, %310 : vector<1x40xf32>
    %cst_123 = arith.constant 0.000000e+00 : f32
    %312 = vector.broadcast %cst_123 : f32 to vector<1x40xf32>
    %313 = arith.cmpf oge, %311, %312 : vector<1x40xf32>
    %314 = vector.broadcast %229 : f32 to vector<1x40xf32>
    %315 = arith.mulf %314, %311 : vector<1x40xf32>
    %316 = arith.select %313, %311, %315 : vector<1x40xi1>, vector<1x40xf32>
    %317 = vector.broadcast %268 : vector<32x1xf32> to vector<32x40xf32>
    %318 = arith.mulf %292, %317 : vector<32x40xf32>
    %cst_124 = arith.constant dense<0.000000e+00> : vector<40xf32>
    %319 = vector.multi_reduction <add>, %318, %cst_124 [0] : vector<32x40xf32> to vector<40xf32>
    %320 = vector.shape_cast %319 : vector<40xf32> to vector<1x40xf32>
    %321 = arith.addf %296, %320 : vector<1x40xf32>
    %cst_125 = arith.constant 0.000000e+00 : f32
    %322 = vector.broadcast %cst_125 : f32 to vector<1x40xf32>
    %323 = arith.cmpf oge, %321, %322 : vector<1x40xf32>
    %324 = vector.broadcast %229 : f32 to vector<1x40xf32>
    %325 = arith.mulf %324, %321 : vector<1x40xf32>
    %326 = arith.select %323, %321, %325 : vector<1x40xi1>, vector<1x40xf32>
    %327 = arith.maximumf %306, %316 : vector<1x40xf32>
    %328 = arith.maximumf %327, %326 : vector<1x40xf32>
    %329 = arith.subf %306, %328 : vector<1x40xf32>
    %330 = math.exp %329 : vector<1x40xf32>
    %331 = arith.subf %316, %328 : vector<1x40xf32>
    %332 = math.exp %331 : vector<1x40xf32>
    %333 = arith.subf %326, %328 : vector<1x40xf32>
    %334 = math.exp %333 : vector<1x40xf32>
    %335 = arith.addf %330, %332 : vector<1x40xf32>
    %336 = arith.addf %335, %334 : vector<1x40xf32>
    %337 = vector.broadcast %330 : vector<1x40xf32> to vector<32x40xf32>
    %338 = arith.mulf %337, %280 : vector<32x40xf32>
    %339 = vector.broadcast %332 : vector<1x40xf32> to vector<32x40xf32>
    %340 = arith.mulf %339, %286 : vector<32x40xf32>
    %341 = arith.addf %338, %340 : vector<32x40xf32>
    %342 = vector.broadcast %334 : vector<1x40xf32> to vector<32x40xf32>
    %343 = arith.mulf %342, %292 : vector<32x40xf32>
    %344 = arith.addf %341, %343 : vector<32x40xf32>
    %345 = vector.broadcast %336 : vector<1x40xf32> to vector<32x40xf32>
    %346 = arith.divf %344, %345 : vector<32x40xf32>
    %cst_126 = arith.constant 0.333333343 : f32
    %347 = vector.broadcast %cst_126 : f32 to vector<32x40xf32>
    %348 = arith.mulf %346, %347 : vector<32x40xf32>
    %349 = arith.addf %348, %271 : vector<32x40xf32>
    %cst_127 = arith.constant 0.999994993 : f32
    %350 = vector.broadcast %cst_127 : f32 to vector<32x40xf32>
    %351 = arith.mulf %349, %350 : vector<32x40xf32>
    %352 = arith.addf %351, %274 : vector<32x40xf32>
    %cst_128 = arith.constant 0.000000e+00 : f32
    %353 = vector.broadcast %cst_128 : f32 to vector<32x40xf32>
    %354 = arith.cmpf oge, %352, %353 : vector<32x40xf32>
    %355 = vector.broadcast %230 : f32 to vector<32x40xf32>
    %356 = arith.mulf %355, %352 : vector<32x40xf32>
    %357 = arith.select %354, %352, %356 : vector<32x40xi1>, vector<32x40xf32>
    %cst_129 = arith.constant dense<0.000000e+00> : vector<32x40xf32>
    %358 = tpu.matmul %258, %227, %cst_129 {dimension_numbers = #tpu.dot_dimension_numbers<[1], [0], [0], [1], [0, 0, 1, 1], [], []>} : vector<32x64xf32>, vector<64x40xf32>, vector<32x40xf32> -> vector<32x40xf32>
    %359 = vector.broadcast %262 : vector<32x1xf32> to vector<32x40xf32>
    %360 = arith.addf %358, %359 : vector<32x40xf32>
    %cst_130 = arith.constant dense<0.000000e+00> : vector<32x40xf32>
    %361 = tpu.matmul %260, %227, %cst_130 {dimension_numbers = #tpu.dot_dimension_numbers<[1], [0], [0], [1], [0, 0, 1, 1], [], []>} : vector<32x64xf32>, vector<64x40xf32>, vector<32x40xf32> -> vector<32x40xf32>
    %362 = vector.broadcast %264 : vector<32x1xf32> to vector<32x40xf32>
    %363 = arith.addf %361, %362 : vector<32x40xf32>
    %cst_131 = arith.constant dense<0.000000e+00> : vector<32x40xf32>
    %364 = tpu.matmul %360, %249, %cst_131 {dimension_numbers = #tpu.dot_dimension_numbers<[1], [0], [0], [1], [0, 0, 1, 1], [], []>} : vector<32x40xf32>, vector<40x40xf32>, vector<32x40xf32> -> vector<32x40xf32>
    %cst_132 = arith.constant 0.000000e+00 : f32
    %365 = vector.broadcast %cst_132 : f32 to vector<32x40xf32>
    %366 = arith.cmpf oge, %364, %365 : vector<32x40xf32>
    %367 = vector.broadcast %228 : f32 to vector<32x40xf32>
    %368 = arith.mulf %367, %364 : vector<32x40xf32>
    %369 = arith.select %366, %364, %368 : vector<32x40xi1>, vector<32x40xf32>
    %cst_133 = arith.constant dense<0.000000e+00> : vector<32x40xf32>
    %370 = tpu.matmul %360, %252, %cst_133 {dimension_numbers = #tpu.dot_dimension_numbers<[1], [0], [0], [1], [0, 0, 1, 1], [], []>} : vector<32x40xf32>, vector<40x40xf32>, vector<32x40xf32> -> vector<32x40xf32>
    %cst_134 = arith.constant 0.000000e+00 : f32
    %371 = vector.broadcast %cst_134 : f32 to vector<32x40xf32>
    %372 = arith.cmpf oge, %370, %371 : vector<32x40xf32>
    %373 = vector.broadcast %228 : f32 to vector<32x40xf32>
    %374 = arith.mulf %373, %370 : vector<32x40xf32>
    %375 = arith.select %372, %370, %374 : vector<32x40xi1>, vector<32x40xf32>
    %cst_135 = arith.constant dense<0.000000e+00> : vector<32x40xf32>
    %376 = tpu.matmul %360, %256, %cst_135 {dimension_numbers = #tpu.dot_dimension_numbers<[1], [0], [0], [1], [0, 0, 1, 1], [], []>} : vector<32x40xf32>, vector<40x40xf32>, vector<32x40xf32> -> vector<32x40xf32>
    %cst_136 = arith.constant 0.000000e+00 : f32
    %377 = vector.broadcast %cst_136 : f32 to vector<32x40xf32>
    %378 = arith.cmpf oge, %376, %377 : vector<32x40xf32>
    %379 = vector.broadcast %228 : f32 to vector<32x40xf32>
    %380 = arith.mulf %379, %376 : vector<32x40xf32>
    %381 = arith.select %378, %376, %380 : vector<32x40xi1>, vector<32x40xf32>
    %382 = vector.broadcast %266 : vector<32x1xf32> to vector<32x40xf32>
    %383 = arith.mulf %360, %382 : vector<32x40xf32>
    %cst_137 = arith.constant dense<0.000000e+00> : vector<40xf32>
    %384 = vector.multi_reduction <add>, %383, %cst_137 [0] : vector<32x40xf32> to vector<40xf32>
    %385 = vector.shape_cast %384 : vector<40xf32> to vector<1x40xf32>
    %386 = vector.broadcast %268 : vector<32x1xf32> to vector<32x40xf32>
    %387 = arith.mulf %369, %386 : vector<32x40xf32>
    %cst_138 = arith.constant dense<0.000000e+00> : vector<40xf32>
    %388 = vector.multi_reduction <add>, %387, %cst_138 [0] : vector<32x40xf32> to vector<40xf32>
    %389 = vector.shape_cast %388 : vector<40xf32> to vector<1x40xf32>
    %390 = arith.addf %385, %389 : vector<1x40xf32>
    %cst_139 = arith.constant 0.000000e+00 : f32
    %391 = vector.broadcast %cst_139 : f32 to vector<1x40xf32>
    %392 = arith.cmpf oge, %390, %391 : vector<1x40xf32>
    %393 = vector.broadcast %229 : f32 to vector<1x40xf32>
    %394 = arith.mulf %393, %390 : vector<1x40xf32>
    %395 = arith.select %392, %390, %394 : vector<1x40xi1>, vector<1x40xf32>
    %396 = vector.broadcast %268 : vector<32x1xf32> to vector<32x40xf32>
    %397 = arith.mulf %375, %396 : vector<32x40xf32>
    %cst_140 = arith.constant dense<0.000000e+00> : vector<40xf32>
    %398 = vector.multi_reduction <add>, %397, %cst_140 [0] : vector<32x40xf32> to vector<40xf32>
    %399 = vector.shape_cast %398 : vector<40xf32> to vector<1x40xf32>
    %400 = arith.addf %385, %399 : vector<1x40xf32>
    %cst_141 = arith.constant 0.000000e+00 : f32
    %401 = vector.broadcast %cst_141 : f32 to vector<1x40xf32>
    %402 = arith.cmpf oge, %400, %401 : vector<1x40xf32>
    %403 = vector.broadcast %229 : f32 to vector<1x40xf32>
    %404 = arith.mulf %403, %400 : vector<1x40xf32>
    %405 = arith.select %402, %400, %404 : vector<1x40xi1>, vector<1x40xf32>
    %406 = vector.broadcast %268 : vector<32x1xf32> to vector<32x40xf32>
    %407 = arith.mulf %381, %406 : vector<32x40xf32>
    %cst_142 = arith.constant dense<0.000000e+00> : vector<40xf32>
    %408 = vector.multi_reduction <add>, %407, %cst_142 [0] : vector<32x40xf32> to vector<40xf32>
    %409 = vector.shape_cast %408 : vector<40xf32> to vector<1x40xf32>
    %410 = arith.addf %385, %409 : vector<1x40xf32>
    %cst_143 = arith.constant 0.000000e+00 : f32
    %411 = vector.broadcast %cst_143 : f32 to vector<1x40xf32>
    %412 = arith.cmpf oge, %410, %411 : vector<1x40xf32>
    %413 = vector.broadcast %229 : f32 to vector<1x40xf32>
    %414 = arith.mulf %413, %410 : vector<1x40xf32>
    %415 = arith.select %412, %410, %414 : vector<1x40xi1>, vector<1x40xf32>
    %416 = arith.maximumf %395, %405 : vector<1x40xf32>
    %417 = arith.maximumf %416, %415 : vector<1x40xf32>
    %418 = arith.subf %395, %417 : vector<1x40xf32>
    %419 = math.exp %418 : vector<1x40xf32>
    %420 = arith.subf %405, %417 : vector<1x40xf32>
    %421 = math.exp %420 : vector<1x40xf32>
    %422 = arith.subf %415, %417 : vector<1x40xf32>
    %423 = math.exp %422 : vector<1x40xf32>
    %424 = arith.addf %419, %421 : vector<1x40xf32>
    %425 = arith.addf %424, %423 : vector<1x40xf32>
    %426 = vector.broadcast %419 : vector<1x40xf32> to vector<32x40xf32>
    %427 = arith.mulf %426, %369 : vector<32x40xf32>
    %428 = vector.broadcast %421 : vector<1x40xf32> to vector<32x40xf32>
    %429 = arith.mulf %428, %375 : vector<32x40xf32>
    %430 = arith.addf %427, %429 : vector<32x40xf32>
    %431 = vector.broadcast %423 : vector<1x40xf32> to vector<32x40xf32>
    %432 = arith.mulf %431, %381 : vector<32x40xf32>
    %433 = arith.addf %430, %432 : vector<32x40xf32>
    %434 = vector.broadcast %425 : vector<1x40xf32> to vector<32x40xf32>
    %435 = arith.divf %433, %434 : vector<32x40xf32>
    %cst_144 = arith.constant 0.333333343 : f32
    %436 = vector.broadcast %cst_144 : f32 to vector<32x40xf32>
    %437 = arith.mulf %435, %436 : vector<32x40xf32>
    %438 = arith.addf %437, %360 : vector<32x40xf32>
    %cst_145 = arith.constant 0.999994993 : f32
    %439 = vector.broadcast %cst_145 : f32 to vector<32x40xf32>
    %440 = arith.mulf %438, %439 : vector<32x40xf32>
    %441 = arith.addf %440, %363 : vector<32x40xf32>
    %cst_146 = arith.constant 0.000000e+00 : f32
    %442 = vector.broadcast %cst_146 : f32 to vector<32x40xf32>
    %443 = arith.cmpf oge, %441, %442 : vector<32x40xf32>
    %444 = vector.broadcast %230 : f32 to vector<32x40xf32>
    %445 = arith.mulf %444, %441 : vector<32x40xf32>
    %446 = arith.select %443, %441, %445 : vector<32x40xi1>, vector<32x40xf32>
    %c6 = arith.constant 6 : index
    %447 = memref.load %arg1[%c6] : memref<14xf32, #tpu.memory_space<smem>>
    %c7 = arith.constant 7 : index
    %448 = memref.load %arg1[%c7] : memref<14xf32, #tpu.memory_space<smem>>
    %c8 = arith.constant 8 : index
    %449 = memref.load %arg1[%c8] : memref<14xf32, #tpu.memory_space<smem>>
    %c2_147 = arith.constant 2 : index
    %c0_148 = arith.constant 0 : index
    %c0_149 = arith.constant 0 : index
    %c0_150 = arith.constant 0 : index
    %450 = vector.load %arg3[%c2_147, %c0_148, %c0_149, %c0_150] : memref<4x2x40x40xf32, #tpu.memory_space<vmem>>, vector<1x1x40x40xf32>
    %451 = vector.shape_cast %450 : vector<1x1x40x40xf32> to vector<40x40xf32>
    %c2_151 = arith.constant 2 : index
    %c1_152 = arith.constant 1 : index
    %c0_153 = arith.constant 0 : index
    %c0_154 = arith.constant 0 : index
    %452 = vector.load %arg3[%c2_151, %c1_152, %c0_153, %c0_154] : memref<4x2x40x40xf32, #tpu.memory_space<vmem>>, vector<1x1x40x40xf32>
    %453 = vector.shape_cast %452 : vector<1x1x40x40xf32> to vector<40x40xf32>
    %454 = arith.maximumf %451, %453 : vector<40x40xf32>
    %cst_155 = arith.constant 0.000000e+00 : f32
    %455 = vector.broadcast %cst_155 : f32 to vector<40x40xf32>
    %456 = arith.maximumf %454, %455 : vector<40x40xf32>
    %457 = arith.mulf %456, %456 : vector<40x40xf32>
    %458 = vector.shape_cast %457 : vector<40x40xf32> to vector<1x40x40xf32>
    %cst_156 = arith.constant dense<0.000000e+00> : vector<1xf32>
    %459 = vector.multi_reduction <add>, %458, %cst_156 [1, 2] : vector<1x40x40xf32> to vector<1xf32>
    %460 = vector.shape_cast %459 : vector<1xf32> to vector<1x1x1xf32>
    %461 = vector.extract %460[0, 0, 0] : f32 from vector<1x1x1xf32>
    %462 = vector.broadcast %461 : f32 to vector<40x40xf32>
    %463 = arith.divf %456, %462 : vector<40x40xf32>
    %464 = arith.addf %4, %463 : vector<40x40xf32>
    %cst_157 = arith.constant 5.000000e-01 : f32
    %465 = vector.broadcast %cst_157 : f32 to vector<40x40xf32>
    %466 = arith.mulf %465, %464 : vector<40x40xf32>
    %cst_158 = arith.constant 0.999994993 : f32
    %467 = vector.broadcast %cst_158 : f32 to vector<40x40xf32>
    %468 = arith.mulf %453, %467 : vector<40x40xf32>
    %469 = arith.subf %4, %466 : vector<40x40xf32>
    %cst_159 = arith.constant 0.999994993 : f32
    %470 = vector.broadcast %cst_159 : f32 to vector<40x40xf32>
    %471 = arith.mulf %469, %470 : vector<40x40xf32>
    %cst_160 = arith.constant dense<0.000000e+00> : vector<40x40xf32>
    %472 = tpu.matmul %466, %466, %cst_160 {dimension_numbers = #tpu.dot_dimension_numbers<[1], [0], [0], [1], [0, 0, 1, 1], [], []>} : vector<40x40xf32>, vector<40x40xf32>, vector<40x40xf32> -> vector<40x40xf32>
    %473 = arith.subf %466, %472 : vector<40x40xf32>
    %cst_161 = arith.constant 0.999994993 : f32
    %474 = vector.broadcast %cst_161 : f32 to vector<40x40xf32>
    %475 = arith.mulf %473, %474 : vector<40x40xf32>
    %c2_162 = arith.constant 2 : index
    %c0_163 = arith.constant 0 : index
    %c0_164 = arith.constant 0 : index
    %c0_165 = arith.constant 0 : index
    %476 = vector.load %arg4[%c2_162, %c0_163, %c0_164, %c0_165] : memref<4x2x64x64xf32, #tpu.memory_space<vmem>>, vector<1x1x64x32xf32>
    %477 = vector.shape_cast %476 : vector<1x1x64x32xf32> to vector<64x32xf32>
    %c2_166 = arith.constant 2 : index
    %c1_167 = arith.constant 1 : index
    %c0_168 = arith.constant 0 : index
    %c0_169 = arith.constant 0 : index
    %478 = vector.load %arg4[%c2_166, %c1_167, %c0_168, %c0_169] : memref<4x2x64x64xf32, #tpu.memory_space<vmem>>, vector<1x1x64x32xf32>
    %479 = vector.shape_cast %478 : vector<1x1x64x32xf32> to vector<64x32xf32>
    %c2_170 = arith.constant 2 : index
    %c0_171 = arith.constant 0 : index
    %c0_172 = arith.constant 0 : index
    %480 = vector.load %arg5[%c2_170, %c0_171, %c0_172] : memref<4x64x4xf32, #tpu.memory_space<vmem>>, vector<1x64x1xf32>
    %481 = vector.shape_cast %480 : vector<1x64x1xf32> to vector<64x1xf32>
    %c2_173 = arith.constant 2 : index
    %c0_174 = arith.constant 0 : index
    %c1_175 = arith.constant 1 : index
    %482 = vector.load %arg5[%c2_173, %c0_174, %c1_175] : memref<4x64x4xf32, #tpu.memory_space<vmem>>, vector<1x64x1xf32>
    %483 = vector.shape_cast %482 : vector<1x64x1xf32> to vector<64x1xf32>
    %c2_176 = arith.constant 2 : index
    %c0_177 = arith.constant 0 : index
    %c2_178 = arith.constant 2 : index
    %484 = vector.load %arg5[%c2_176, %c0_177, %c2_178] : memref<4x64x4xf32, #tpu.memory_space<vmem>>, vector<1x64x1xf32>
    %485 = vector.shape_cast %484 : vector<1x64x1xf32> to vector<64x1xf32>
    %c2_179 = arith.constant 2 : index
    %c0_180 = arith.constant 0 : index
    %c3_181 = arith.constant 3 : index
    %486 = vector.load %arg5[%c2_179, %c0_180, %c3_181] : memref<4x64x4xf32, #tpu.memory_space<vmem>>, vector<1x64x1xf32>
    %487 = vector.shape_cast %486 : vector<1x64x1xf32> to vector<64x1xf32>
    %cst_182 = arith.constant dense<0.000000e+00> : vector<64x40xf32>
    %488 = tpu.matmul %477, %357, %cst_182 {dimension_numbers = #tpu.dot_dimension_numbers<[1], [0], [0], [1], [0, 0, 1, 1], [], []>} : vector<64x32xf32>, vector<32x40xf32>, vector<64x40xf32> -> vector<64x40xf32>
    %489 = vector.broadcast %481 : vector<64x1xf32> to vector<64x40xf32>
    %490 = arith.addf %488, %489 : vector<64x40xf32>
    %cst_183 = arith.constant dense<0.000000e+00> : vector<64x40xf32>
    %491 = tpu.matmul %479, %357, %cst_183 {dimension_numbers = #tpu.dot_dimension_numbers<[1], [0], [0], [1], [0, 0, 1, 1], [], []>} : vector<64x32xf32>, vector<32x40xf32>, vector<64x40xf32> -> vector<64x40xf32>
    %492 = vector.broadcast %483 : vector<64x1xf32> to vector<64x40xf32>
    %493 = arith.addf %491, %492 : vector<64x40xf32>
    %cst_184 = arith.constant dense<0.000000e+00> : vector<64x40xf32>
    %494 = tpu.matmul %490, %468, %cst_184 {dimension_numbers = #tpu.dot_dimension_numbers<[1], [0], [0], [1], [0, 0, 1, 1], [], []>} : vector<64x40xf32>, vector<40x40xf32>, vector<64x40xf32> -> vector<64x40xf32>
    %cst_185 = arith.constant 0.000000e+00 : f32
    %495 = vector.broadcast %cst_185 : f32 to vector<64x40xf32>
    %496 = arith.cmpf oge, %494, %495 : vector<64x40xf32>
    %497 = vector.broadcast %447 : f32 to vector<64x40xf32>
    %498 = arith.mulf %497, %494 : vector<64x40xf32>
    %499 = arith.select %496, %494, %498 : vector<64x40xi1>, vector<64x40xf32>
    %cst_186 = arith.constant dense<0.000000e+00> : vector<64x40xf32>
    %500 = tpu.matmul %490, %471, %cst_186 {dimension_numbers = #tpu.dot_dimension_numbers<[1], [0], [0], [1], [0, 0, 1, 1], [], []>} : vector<64x40xf32>, vector<40x40xf32>, vector<64x40xf32> -> vector<64x40xf32>
    %cst_187 = arith.constant 0.000000e+00 : f32
    %501 = vector.broadcast %cst_187 : f32 to vector<64x40xf32>
    %502 = arith.cmpf oge, %500, %501 : vector<64x40xf32>
    %503 = vector.broadcast %447 : f32 to vector<64x40xf32>
    %504 = arith.mulf %503, %500 : vector<64x40xf32>
    %505 = arith.select %502, %500, %504 : vector<64x40xi1>, vector<64x40xf32>
    %cst_188 = arith.constant dense<0.000000e+00> : vector<64x40xf32>
    %506 = tpu.matmul %490, %475, %cst_188 {dimension_numbers = #tpu.dot_dimension_numbers<[1], [0], [0], [1], [0, 0, 1, 1], [], []>} : vector<64x40xf32>, vector<40x40xf32>, vector<64x40xf32> -> vector<64x40xf32>
    %cst_189 = arith.constant 0.000000e+00 : f32
    %507 = vector.broadcast %cst_189 : f32 to vector<64x40xf32>
    %508 = arith.cmpf oge, %506, %507 : vector<64x40xf32>
    %509 = vector.broadcast %447 : f32 to vector<64x40xf32>
    %510 = arith.mulf %509, %506 : vector<64x40xf32>
    %511 = arith.select %508, %506, %510 : vector<64x40xi1>, vector<64x40xf32>
    %512 = vector.broadcast %485 : vector<64x1xf32> to vector<64x40xf32>
    %513 = arith.mulf %490, %512 : vector<64x40xf32>
    %cst_190 = arith.constant dense<0.000000e+00> : vector<40xf32>
    %514 = vector.multi_reduction <add>, %513, %cst_190 [0] : vector<64x40xf32> to vector<40xf32>
    %515 = vector.shape_cast %514 : vector<40xf32> to vector<1x40xf32>
    %516 = vector.broadcast %487 : vector<64x1xf32> to vector<64x40xf32>
    %517 = arith.mulf %499, %516 : vector<64x40xf32>
    %cst_191 = arith.constant dense<0.000000e+00> : vector<40xf32>
    %518 = vector.multi_reduction <add>, %517, %cst_191 [0] : vector<64x40xf32> to vector<40xf32>
    %519 = vector.shape_cast %518 : vector<40xf32> to vector<1x40xf32>
    %520 = arith.addf %515, %519 : vector<1x40xf32>
    %cst_192 = arith.constant 0.000000e+00 : f32
    %521 = vector.broadcast %cst_192 : f32 to vector<1x40xf32>
    %522 = arith.cmpf oge, %520, %521 : vector<1x40xf32>
    %523 = vector.broadcast %448 : f32 to vector<1x40xf32>
    %524 = arith.mulf %523, %520 : vector<1x40xf32>
    %525 = arith.select %522, %520, %524 : vector<1x40xi1>, vector<1x40xf32>
    %526 = vector.broadcast %487 : vector<64x1xf32> to vector<64x40xf32>
    %527 = arith.mulf %505, %526 : vector<64x40xf32>
    %cst_193 = arith.constant dense<0.000000e+00> : vector<40xf32>
    %528 = vector.multi_reduction <add>, %527, %cst_193 [0] : vector<64x40xf32> to vector<40xf32>
    %529 = vector.shape_cast %528 : vector<40xf32> to vector<1x40xf32>
    %530 = arith.addf %515, %529 : vector<1x40xf32>
    %cst_194 = arith.constant 0.000000e+00 : f32
    %531 = vector.broadcast %cst_194 : f32 to vector<1x40xf32>
    %532 = arith.cmpf oge, %530, %531 : vector<1x40xf32>
    %533 = vector.broadcast %448 : f32 to vector<1x40xf32>
    %534 = arith.mulf %533, %530 : vector<1x40xf32>
    %535 = arith.select %532, %530, %534 : vector<1x40xi1>, vector<1x40xf32>
    %536 = vector.broadcast %487 : vector<64x1xf32> to vector<64x40xf32>
    %537 = arith.mulf %511, %536 : vector<64x40xf32>
    %cst_195 = arith.constant dense<0.000000e+00> : vector<40xf32>
    %538 = vector.multi_reduction <add>, %537, %cst_195 [0] : vector<64x40xf32> to vector<40xf32>
    %539 = vector.shape_cast %538 : vector<40xf32> to vector<1x40xf32>
    %540 = arith.addf %515, %539 : vector<1x40xf32>
    %cst_196 = arith.constant 0.000000e+00 : f32
    %541 = vector.broadcast %cst_196 : f32 to vector<1x40xf32>
    %542 = arith.cmpf oge, %540, %541 : vector<1x40xf32>
    %543 = vector.broadcast %448 : f32 to vector<1x40xf32>
    %544 = arith.mulf %543, %540 : vector<1x40xf32>
    %545 = arith.select %542, %540, %544 : vector<1x40xi1>, vector<1x40xf32>
    %546 = arith.maximumf %525, %535 : vector<1x40xf32>
    %547 = arith.maximumf %546, %545 : vector<1x40xf32>
    %548 = arith.subf %525, %547 : vector<1x40xf32>
    %549 = math.exp %548 : vector<1x40xf32>
    %550 = arith.subf %535, %547 : vector<1x40xf32>
    %551 = math.exp %550 : vector<1x40xf32>
    %552 = arith.subf %545, %547 : vector<1x40xf32>
    %553 = math.exp %552 : vector<1x40xf32>
    %554 = arith.addf %549, %551 : vector<1x40xf32>
    %555 = arith.addf %554, %553 : vector<1x40xf32>
    %556 = vector.broadcast %549 : vector<1x40xf32> to vector<64x40xf32>
    %557 = arith.mulf %556, %499 : vector<64x40xf32>
    %558 = vector.broadcast %551 : vector<1x40xf32> to vector<64x40xf32>
    %559 = arith.mulf %558, %505 : vector<64x40xf32>
    %560 = arith.addf %557, %559 : vector<64x40xf32>
    %561 = vector.broadcast %553 : vector<1x40xf32> to vector<64x40xf32>
    %562 = arith.mulf %561, %511 : vector<64x40xf32>
    %563 = arith.addf %560, %562 : vector<64x40xf32>
    %564 = vector.broadcast %555 : vector<1x40xf32> to vector<64x40xf32>
    %565 = arith.divf %563, %564 : vector<64x40xf32>
    %cst_197 = arith.constant 0.333333343 : f32
    %566 = vector.broadcast %cst_197 : f32 to vector<64x40xf32>
    %567 = arith.mulf %565, %566 : vector<64x40xf32>
    %568 = arith.addf %567, %490 : vector<64x40xf32>
    %cst_198 = arith.constant 0.999994993 : f32
    %569 = vector.broadcast %cst_198 : f32 to vector<64x40xf32>
    %570 = arith.mulf %568, %569 : vector<64x40xf32>
    %571 = arith.addf %570, %493 : vector<64x40xf32>
    %cst_199 = arith.constant 0.000000e+00 : f32
    %572 = vector.broadcast %cst_199 : f32 to vector<64x40xf32>
    %573 = arith.cmpf oge, %571, %572 : vector<64x40xf32>
    %574 = vector.broadcast %449 : f32 to vector<64x40xf32>
    %575 = arith.mulf %574, %571 : vector<64x40xf32>
    %576 = arith.select %573, %571, %575 : vector<64x40xi1>, vector<64x40xf32>
    %cst_200 = arith.constant dense<0.000000e+00> : vector<64x40xf32>
    %577 = tpu.matmul %477, %446, %cst_200 {dimension_numbers = #tpu.dot_dimension_numbers<[1], [0], [0], [1], [0, 0, 1, 1], [], []>} : vector<64x32xf32>, vector<32x40xf32>, vector<64x40xf32> -> vector<64x40xf32>
    %578 = vector.broadcast %481 : vector<64x1xf32> to vector<64x40xf32>
    %579 = arith.addf %577, %578 : vector<64x40xf32>
    %cst_201 = arith.constant dense<0.000000e+00> : vector<64x40xf32>
    %580 = tpu.matmul %479, %446, %cst_201 {dimension_numbers = #tpu.dot_dimension_numbers<[1], [0], [0], [1], [0, 0, 1, 1], [], []>} : vector<64x32xf32>, vector<32x40xf32>, vector<64x40xf32> -> vector<64x40xf32>
    %581 = vector.broadcast %483 : vector<64x1xf32> to vector<64x40xf32>
    %582 = arith.addf %580, %581 : vector<64x40xf32>
    %cst_202 = arith.constant dense<0.000000e+00> : vector<64x40xf32>
    %583 = tpu.matmul %579, %468, %cst_202 {dimension_numbers = #tpu.dot_dimension_numbers<[1], [0], [0], [1], [0, 0, 1, 1], [], []>} : vector<64x40xf32>, vector<40x40xf32>, vector<64x40xf32> -> vector<64x40xf32>
    %cst_203 = arith.constant 0.000000e+00 : f32
    %584 = vector.broadcast %cst_203 : f32 to vector<64x40xf32>
    %585 = arith.cmpf oge, %583, %584 : vector<64x40xf32>
    %586 = vector.broadcast %447 : f32 to vector<64x40xf32>
    %587 = arith.mulf %586, %583 : vector<64x40xf32>
    %588 = arith.select %585, %583, %587 : vector<64x40xi1>, vector<64x40xf32>
    %cst_204 = arith.constant dense<0.000000e+00> : vector<64x40xf32>
    %589 = tpu.matmul %579, %471, %cst_204 {dimension_numbers = #tpu.dot_dimension_numbers<[1], [0], [0], [1], [0, 0, 1, 1], [], []>} : vector<64x40xf32>, vector<40x40xf32>, vector<64x40xf32> -> vector<64x40xf32>
    %cst_205 = arith.constant 0.000000e+00 : f32
    %590 = vector.broadcast %cst_205 : f32 to vector<64x40xf32>
    %591 = arith.cmpf oge, %589, %590 : vector<64x40xf32>
    %592 = vector.broadcast %447 : f32 to vector<64x40xf32>
    %593 = arith.mulf %592, %589 : vector<64x40xf32>
    %594 = arith.select %591, %589, %593 : vector<64x40xi1>, vector<64x40xf32>
    %cst_206 = arith.constant dense<0.000000e+00> : vector<64x40xf32>
    %595 = tpu.matmul %579, %475, %cst_206 {dimension_numbers = #tpu.dot_dimension_numbers<[1], [0], [0], [1], [0, 0, 1, 1], [], []>} : vector<64x40xf32>, vector<40x40xf32>, vector<64x40xf32> -> vector<64x40xf32>
    %cst_207 = arith.constant 0.000000e+00 : f32
    %596 = vector.broadcast %cst_207 : f32 to vector<64x40xf32>
    %597 = arith.cmpf oge, %595, %596 : vector<64x40xf32>
    %598 = vector.broadcast %447 : f32 to vector<64x40xf32>
    %599 = arith.mulf %598, %595 : vector<64x40xf32>
    %600 = arith.select %597, %595, %599 : vector<64x40xi1>, vector<64x40xf32>
    %601 = vector.broadcast %485 : vector<64x1xf32> to vector<64x40xf32>
    %602 = arith.mulf %579, %601 : vector<64x40xf32>
    %cst_208 = arith.constant dense<0.000000e+00> : vector<40xf32>
    %603 = vector.multi_reduction <add>, %602, %cst_208 [0] : vector<64x40xf32> to vector<40xf32>
    %604 = vector.shape_cast %603 : vector<40xf32> to vector<1x40xf32>
    %605 = vector.broadcast %487 : vector<64x1xf32> to vector<64x40xf32>
    %606 = arith.mulf %588, %605 : vector<64x40xf32>
    %cst_209 = arith.constant dense<0.000000e+00> : vector<40xf32>
    %607 = vector.multi_reduction <add>, %606, %cst_209 [0] : vector<64x40xf32> to vector<40xf32>
    %608 = vector.shape_cast %607 : vector<40xf32> to vector<1x40xf32>
    %609 = arith.addf %604, %608 : vector<1x40xf32>
    %cst_210 = arith.constant 0.000000e+00 : f32
    %610 = vector.broadcast %cst_210 : f32 to vector<1x40xf32>
    %611 = arith.cmpf oge, %609, %610 : vector<1x40xf32>
    %612 = vector.broadcast %448 : f32 to vector<1x40xf32>
    %613 = arith.mulf %612, %609 : vector<1x40xf32>
    %614 = arith.select %611, %609, %613 : vector<1x40xi1>, vector<1x40xf32>
    %615 = vector.broadcast %487 : vector<64x1xf32> to vector<64x40xf32>
    %616 = arith.mulf %594, %615 : vector<64x40xf32>
    %cst_211 = arith.constant dense<0.000000e+00> : vector<40xf32>
    %617 = vector.multi_reduction <add>, %616, %cst_211 [0] : vector<64x40xf32> to vector<40xf32>
    %618 = vector.shape_cast %617 : vector<40xf32> to vector<1x40xf32>
    %619 = arith.addf %604, %618 : vector<1x40xf32>
    %cst_212 = arith.constant 0.000000e+00 : f32
    %620 = vector.broadcast %cst_212 : f32 to vector<1x40xf32>
    %621 = arith.cmpf oge, %619, %620 : vector<1x40xf32>
    %622 = vector.broadcast %448 : f32 to vector<1x40xf32>
    %623 = arith.mulf %622, %619 : vector<1x40xf32>
    %624 = arith.select %621, %619, %623 : vector<1x40xi1>, vector<1x40xf32>
    %625 = vector.broadcast %487 : vector<64x1xf32> to vector<64x40xf32>
    %626 = arith.mulf %600, %625 : vector<64x40xf32>
    %cst_213 = arith.constant dense<0.000000e+00> : vector<40xf32>
    %627 = vector.multi_reduction <add>, %626, %cst_213 [0] : vector<64x40xf32> to vector<40xf32>
    %628 = vector.shape_cast %627 : vector<40xf32> to vector<1x40xf32>
    %629 = arith.addf %604, %628 : vector<1x40xf32>
    %cst_214 = arith.constant 0.000000e+00 : f32
    %630 = vector.broadcast %cst_214 : f32 to vector<1x40xf32>
    %631 = arith.cmpf oge, %629, %630 : vector<1x40xf32>
    %632 = vector.broadcast %448 : f32 to vector<1x40xf32>
    %633 = arith.mulf %632, %629 : vector<1x40xf32>
    %634 = arith.select %631, %629, %633 : vector<1x40xi1>, vector<1x40xf32>
    %635 = arith.maximumf %614, %624 : vector<1x40xf32>
    %636 = arith.maximumf %635, %634 : vector<1x40xf32>
    %637 = arith.subf %614, %636 : vector<1x40xf32>
    %638 = math.exp %637 : vector<1x40xf32>
    %639 = arith.subf %624, %636 : vector<1x40xf32>
    %640 = math.exp %639 : vector<1x40xf32>
    %641 = arith.subf %634, %636 : vector<1x40xf32>
    %642 = math.exp %641 : vector<1x40xf32>
    %643 = arith.addf %638, %640 : vector<1x40xf32>
    %644 = arith.addf %643, %642 : vector<1x40xf32>
    %645 = vector.broadcast %638 : vector<1x40xf32> to vector<64x40xf32>
    %646 = arith.mulf %645, %588 : vector<64x40xf32>
    %647 = vector.broadcast %640 : vector<1x40xf32> to vector<64x40xf32>
    %648 = arith.mulf %647, %594 : vector<64x40xf32>
    %649 = arith.addf %646, %648 : vector<64x40xf32>
    %650 = vector.broadcast %642 : vector<1x40xf32> to vector<64x40xf32>
    %651 = arith.mulf %650, %600 : vector<64x40xf32>
    %652 = arith.addf %649, %651 : vector<64x40xf32>
    %653 = vector.broadcast %644 : vector<1x40xf32> to vector<64x40xf32>
    %654 = arith.divf %652, %653 : vector<64x40xf32>
    %cst_215 = arith.constant 0.333333343 : f32
    %655 = vector.broadcast %cst_215 : f32 to vector<64x40xf32>
    %656 = arith.mulf %654, %655 : vector<64x40xf32>
    %657 = arith.addf %656, %579 : vector<64x40xf32>
    %cst_216 = arith.constant 0.999994993 : f32
    %658 = vector.broadcast %cst_216 : f32 to vector<64x40xf32>
    %659 = arith.mulf %657, %658 : vector<64x40xf32>
    %660 = arith.addf %659, %582 : vector<64x40xf32>
    %cst_217 = arith.constant 0.000000e+00 : f32
    %661 = vector.broadcast %cst_217 : f32 to vector<64x40xf32>
    %662 = arith.cmpf oge, %660, %661 : vector<64x40xf32>
    %663 = vector.broadcast %449 : f32 to vector<64x40xf32>
    %664 = arith.mulf %663, %660 : vector<64x40xf32>
    %665 = arith.select %662, %660, %664 : vector<64x40xi1>, vector<64x40xf32>
    %c9 = arith.constant 9 : index
    %666 = memref.load %arg1[%c9] : memref<14xf32, #tpu.memory_space<smem>>
    %c10 = arith.constant 10 : index
    %667 = memref.load %arg1[%c10] : memref<14xf32, #tpu.memory_space<smem>>
    %c11 = arith.constant 11 : index
    %668 = memref.load %arg1[%c11] : memref<14xf32, #tpu.memory_space<smem>>
    %c3_218 = arith.constant 3 : index
    %c0_219 = arith.constant 0 : index
    %c0_220 = arith.constant 0 : index
    %c0_221 = arith.constant 0 : index
    %669 = vector.load %arg3[%c3_218, %c0_219, %c0_220, %c0_221] : memref<4x2x40x40xf32, #tpu.memory_space<vmem>>, vector<1x1x40x40xf32>
    %670 = vector.shape_cast %669 : vector<1x1x40x40xf32> to vector<40x40xf32>
    %c3_222 = arith.constant 3 : index
    %c1_223 = arith.constant 1 : index
    %c0_224 = arith.constant 0 : index
    %c0_225 = arith.constant 0 : index
    %671 = vector.load %arg3[%c3_222, %c1_223, %c0_224, %c0_225] : memref<4x2x40x40xf32, #tpu.memory_space<vmem>>, vector<1x1x40x40xf32>
    %672 = vector.shape_cast %671 : vector<1x1x40x40xf32> to vector<40x40xf32>
    %673 = arith.maximumf %670, %672 : vector<40x40xf32>
    %cst_226 = arith.constant 0.000000e+00 : f32
    %674 = vector.broadcast %cst_226 : f32 to vector<40x40xf32>
    %675 = arith.maximumf %673, %674 : vector<40x40xf32>
    %676 = arith.mulf %675, %675 : vector<40x40xf32>
    %677 = vector.shape_cast %676 : vector<40x40xf32> to vector<1x40x40xf32>
    %cst_227 = arith.constant dense<0.000000e+00> : vector<1xf32>
    %678 = vector.multi_reduction <add>, %677, %cst_227 [1, 2] : vector<1x40x40xf32> to vector<1xf32>
    %679 = vector.shape_cast %678 : vector<1xf32> to vector<1x1x1xf32>
    %680 = vector.extract %679[0, 0, 0] : f32 from vector<1x1x1xf32>
    %681 = vector.broadcast %680 : f32 to vector<40x40xf32>
    %682 = arith.divf %675, %681 : vector<40x40xf32>
    %683 = arith.addf %4, %682 : vector<40x40xf32>
    %cst_228 = arith.constant 5.000000e-01 : f32
    %684 = vector.broadcast %cst_228 : f32 to vector<40x40xf32>
    %685 = arith.mulf %684, %683 : vector<40x40xf32>
    %cst_229 = arith.constant 0.999994993 : f32
    %686 = vector.broadcast %cst_229 : f32 to vector<40x40xf32>
    %687 = arith.mulf %672, %686 : vector<40x40xf32>
    %688 = arith.subf %4, %685 : vector<40x40xf32>
    %cst_230 = arith.constant 0.999994993 : f32
    %689 = vector.broadcast %cst_230 : f32 to vector<40x40xf32>
    %690 = arith.mulf %688, %689 : vector<40x40xf32>
    %cst_231 = arith.constant dense<0.000000e+00> : vector<40x40xf32>
    %691 = tpu.matmul %685, %685, %cst_231 {dimension_numbers = #tpu.dot_dimension_numbers<[1], [0], [0], [1], [0, 0, 1, 1], [], []>} : vector<40x40xf32>, vector<40x40xf32>, vector<40x40xf32> -> vector<40x40xf32>
    %692 = arith.subf %685, %691 : vector<40x40xf32>
    %cst_232 = arith.constant 0.999994993 : f32
    %693 = vector.broadcast %cst_232 : f32 to vector<40x40xf32>
    %694 = arith.mulf %692, %693 : vector<40x40xf32>
    %c3_233 = arith.constant 3 : index
    %c0_234 = arith.constant 0 : index
    %c0_235 = arith.constant 0 : index
    %c0_236 = arith.constant 0 : index
    %695 = vector.load %arg4[%c3_233, %c0_234, %c0_235, %c0_236] : memref<4x2x64x64xf32, #tpu.memory_space<vmem>>, vector<1x1x3x64xf32>
    %696 = vector.shape_cast %695 : vector<1x1x3x64xf32> to vector<3x64xf32>
    %c3_237 = arith.constant 3 : index
    %c1_238 = arith.constant 1 : index
    %c0_239 = arith.constant 0 : index
    %c0_240 = arith.constant 0 : index
    %697 = vector.load %arg4[%c3_237, %c1_238, %c0_239, %c0_240] : memref<4x2x64x64xf32, #tpu.memory_space<vmem>>, vector<1x1x3x64xf32>
    %698 = vector.shape_cast %697 : vector<1x1x3x64xf32> to vector<3x64xf32>
    %c3_241 = arith.constant 3 : index
    %c0_242 = arith.constant 0 : index
    %c0_243 = arith.constant 0 : index
    %699 = vector.load %arg5[%c3_241, %c0_242, %c0_243] : memref<4x64x4xf32, #tpu.memory_space<vmem>>, vector<1x3x1xf32>
    %700 = vector.shape_cast %699 : vector<1x3x1xf32> to vector<3x1xf32>
    %c3_244 = arith.constant 3 : index
    %c0_245 = arith.constant 0 : index
    %c1_246 = arith.constant 1 : index
    %701 = vector.load %arg5[%c3_244, %c0_245, %c1_246] : memref<4x64x4xf32, #tpu.memory_space<vmem>>, vector<1x3x1xf32>
    %702 = vector.shape_cast %701 : vector<1x3x1xf32> to vector<3x1xf32>
    %c3_247 = arith.constant 3 : index
    %c0_248 = arith.constant 0 : index
    %c2_249 = arith.constant 2 : index
    %703 = vector.load %arg5[%c3_247, %c0_248, %c2_249] : memref<4x64x4xf32, #tpu.memory_space<vmem>>, vector<1x3x1xf32>
    %704 = vector.shape_cast %703 : vector<1x3x1xf32> to vector<3x1xf32>
    %c3_250 = arith.constant 3 : index
    %c0_251 = arith.constant 0 : index
    %c3_252 = arith.constant 3 : index
    %705 = vector.load %arg5[%c3_250, %c0_251, %c3_252] : memref<4x64x4xf32, #tpu.memory_space<vmem>>, vector<1x3x1xf32>
    %706 = vector.shape_cast %705 : vector<1x3x1xf32> to vector<3x1xf32>
    %cst_253 = arith.constant dense<0.000000e+00> : vector<3x40xf32>
    %707 = tpu.matmul %696, %576, %cst_253 {dimension_numbers = #tpu.dot_dimension_numbers<[1], [0], [0], [1], [0, 0, 1, 1], [], []>} : vector<3x64xf32>, vector<64x40xf32>, vector<3x40xf32> -> vector<3x40xf32>
    %708 = vector.broadcast %700 : vector<3x1xf32> to vector<3x40xf32>
    %709 = arith.addf %707, %708 : vector<3x40xf32>
    %cst_254 = arith.constant dense<0.000000e+00> : vector<3x40xf32>
    %710 = tpu.matmul %698, %576, %cst_254 {dimension_numbers = #tpu.dot_dimension_numbers<[1], [0], [0], [1], [0, 0, 1, 1], [], []>} : vector<3x64xf32>, vector<64x40xf32>, vector<3x40xf32> -> vector<3x40xf32>
    %711 = vector.broadcast %702 : vector<3x1xf32> to vector<3x40xf32>
    %712 = arith.addf %710, %711 : vector<3x40xf32>
    %cst_255 = arith.constant dense<0.000000e+00> : vector<3x40xf32>
    %713 = tpu.matmul %709, %687, %cst_255 {dimension_numbers = #tpu.dot_dimension_numbers<[1], [0], [0], [1], [0, 0, 1, 1], [], []>} : vector<3x40xf32>, vector<40x40xf32>, vector<3x40xf32> -> vector<3x40xf32>
    %cst_256 = arith.constant 0.000000e+00 : f32
    %714 = vector.broadcast %cst_256 : f32 to vector<3x40xf32>
    %715 = arith.cmpf oge, %713, %714 : vector<3x40xf32>
    %716 = vector.broadcast %666 : f32 to vector<3x40xf32>
    %717 = arith.mulf %716, %713 : vector<3x40xf32>
    %718 = arith.select %715, %713, %717 : vector<3x40xi1>, vector<3x40xf32>
    %cst_257 = arith.constant dense<0.000000e+00> : vector<3x40xf32>
    %719 = tpu.matmul %709, %690, %cst_257 {dimension_numbers = #tpu.dot_dimension_numbers<[1], [0], [0], [1], [0, 0, 1, 1], [], []>} : vector<3x40xf32>, vector<40x40xf32>, vector<3x40xf32> -> vector<3x40xf32>
    %cst_258 = arith.constant 0.000000e+00 : f32
    %720 = vector.broadcast %cst_258 : f32 to vector<3x40xf32>
    %721 = arith.cmpf oge, %719, %720 : vector<3x40xf32>
    %722 = vector.broadcast %666 : f32 to vector<3x40xf32>
    %723 = arith.mulf %722, %719 : vector<3x40xf32>
    %724 = arith.select %721, %719, %723 : vector<3x40xi1>, vector<3x40xf32>
    %cst_259 = arith.constant dense<0.000000e+00> : vector<3x40xf32>
    %725 = tpu.matmul %709, %694, %cst_259 {dimension_numbers = #tpu.dot_dimension_numbers<[1], [0], [0], [1], [0, 0, 1, 1], [], []>} : vector<3x40xf32>, vector<40x40xf32>, vector<3x40xf32> -> vector<3x40xf32>
    %cst_260 = arith.constant 0.000000e+00 : f32
    %726 = vector.broadcast %cst_260 : f32 to vector<3x40xf32>
    %727 = arith.cmpf oge, %725, %726 : vector<3x40xf32>
    %728 = vector.broadcast %666 : f32 to vector<3x40xf32>
    %729 = arith.mulf %728, %725 : vector<3x40xf32>
    %730 = arith.select %727, %725, %729 : vector<3x40xi1>, vector<3x40xf32>
    %731 = vector.broadcast %704 : vector<3x1xf32> to vector<3x40xf32>
    %732 = arith.mulf %709, %731 : vector<3x40xf32>
    %cst_261 = arith.constant dense<0.000000e+00> : vector<40xf32>
    %733 = vector.multi_reduction <add>, %732, %cst_261 [0] : vector<3x40xf32> to vector<40xf32>
    %734 = vector.shape_cast %733 : vector<40xf32> to vector<1x40xf32>
    %735 = vector.broadcast %706 : vector<3x1xf32> to vector<3x40xf32>
    %736 = arith.mulf %718, %735 : vector<3x40xf32>
    %cst_262 = arith.constant dense<0.000000e+00> : vector<40xf32>
    %737 = vector.multi_reduction <add>, %736, %cst_262 [0] : vector<3x40xf32> to vector<40xf32>
    %738 = vector.shape_cast %737 : vector<40xf32> to vector<1x40xf32>
    %739 = arith.addf %734, %738 : vector<1x40xf32>
    %cst_263 = arith.constant 0.000000e+00 : f32
    %740 = vector.broadcast %cst_263 : f32 to vector<1x40xf32>
    %741 = arith.cmpf oge, %739, %740 : vector<1x40xf32>
    %742 = vector.broadcast %667 : f32 to vector<1x40xf32>
    %743 = arith.mulf %742, %739 : vector<1x40xf32>
    %744 = arith.select %741, %739, %743 : vector<1x40xi1>, vector<1x40xf32>
    %745 = vector.broadcast %706 : vector<3x1xf32> to vector<3x40xf32>
    %746 = arith.mulf %724, %745 : vector<3x40xf32>
    %cst_264 = arith.constant dense<0.000000e+00> : vector<40xf32>
    %747 = vector.multi_reduction <add>, %746, %cst_264 [0] : vector<3x40xf32> to vector<40xf32>
    %748 = vector.shape_cast %747 : vector<40xf32> to vector<1x40xf32>
    %749 = arith.addf %734, %748 : vector<1x40xf32>
    %cst_265 = arith.constant 0.000000e+00 : f32
    %750 = vector.broadcast %cst_265 : f32 to vector<1x40xf32>
    %751 = arith.cmpf oge, %749, %750 : vector<1x40xf32>
    %752 = vector.broadcast %667 : f32 to vector<1x40xf32>
    %753 = arith.mulf %752, %749 : vector<1x40xf32>
    %754 = arith.select %751, %749, %753 : vector<1x40xi1>, vector<1x40xf32>
    %755 = vector.broadcast %706 : vector<3x1xf32> to vector<3x40xf32>
    %756 = arith.mulf %730, %755 : vector<3x40xf32>
    %cst_266 = arith.constant dense<0.000000e+00> : vector<40xf32>
    %757 = vector.multi_reduction <add>, %756, %cst_266 [0] : vector<3x40xf32> to vector<40xf32>
    %758 = vector.shape_cast %757 : vector<40xf32> to vector<1x40xf32>
    %759 = arith.addf %734, %758 : vector<1x40xf32>
    %cst_267 = arith.constant 0.000000e+00 : f32
    %760 = vector.broadcast %cst_267 : f32 to vector<1x40xf32>
    %761 = arith.cmpf oge, %759, %760 : vector<1x40xf32>
    %762 = vector.broadcast %667 : f32 to vector<1x40xf32>
    %763 = arith.mulf %762, %759 : vector<1x40xf32>
    %764 = arith.select %761, %759, %763 : vector<1x40xi1>, vector<1x40xf32>
    %765 = arith.maximumf %744, %754 : vector<1x40xf32>
    %766 = arith.maximumf %765, %764 : vector<1x40xf32>
    %767 = arith.subf %744, %766 : vector<1x40xf32>
    %768 = math.exp %767 : vector<1x40xf32>
    %769 = arith.subf %754, %766 : vector<1x40xf32>
    %770 = math.exp %769 : vector<1x40xf32>
    %771 = arith.subf %764, %766 : vector<1x40xf32>
    %772 = math.exp %771 : vector<1x40xf32>
    %773 = arith.addf %768, %770 : vector<1x40xf32>
    %774 = arith.addf %773, %772 : vector<1x40xf32>
    %775 = vector.broadcast %768 : vector<1x40xf32> to vector<3x40xf32>
    %776 = arith.mulf %775, %718 : vector<3x40xf32>
    %777 = vector.broadcast %770 : vector<1x40xf32> to vector<3x40xf32>
    %778 = arith.mulf %777, %724 : vector<3x40xf32>
    %779 = arith.addf %776, %778 : vector<3x40xf32>
    %780 = vector.broadcast %772 : vector<1x40xf32> to vector<3x40xf32>
    %781 = arith.mulf %780, %730 : vector<3x40xf32>
    %782 = arith.addf %779, %781 : vector<3x40xf32>
    %783 = vector.broadcast %774 : vector<1x40xf32> to vector<3x40xf32>
    %784 = arith.divf %782, %783 : vector<3x40xf32>
    %cst_268 = arith.constant 0.333333343 : f32
    %785 = vector.broadcast %cst_268 : f32 to vector<3x40xf32>
    %786 = arith.mulf %784, %785 : vector<3x40xf32>
    %787 = arith.addf %786, %709 : vector<3x40xf32>
    %cst_269 = arith.constant 0.999994993 : f32
    %788 = vector.broadcast %cst_269 : f32 to vector<3x40xf32>
    %789 = arith.mulf %787, %788 : vector<3x40xf32>
    %790 = arith.addf %789, %712 : vector<3x40xf32>
    %cst_270 = arith.constant 0.000000e+00 : f32
    %791 = vector.broadcast %cst_270 : f32 to vector<3x40xf32>
    %792 = arith.cmpf oge, %790, %791 : vector<3x40xf32>
    %793 = vector.broadcast %668 : f32 to vector<3x40xf32>
    %794 = arith.mulf %793, %790 : vector<3x40xf32>
    %795 = arith.select %792, %790, %794 : vector<3x40xi1>, vector<3x40xf32>
    %cst_271 = arith.constant dense<0.000000e+00> : vector<3x40xf32>
    %796 = tpu.matmul %696, %665, %cst_271 {dimension_numbers = #tpu.dot_dimension_numbers<[1], [0], [0], [1], [0, 0, 1, 1], [], []>} : vector<3x64xf32>, vector<64x40xf32>, vector<3x40xf32> -> vector<3x40xf32>
    %797 = vector.broadcast %700 : vector<3x1xf32> to vector<3x40xf32>
    %798 = arith.addf %796, %797 : vector<3x40xf32>
    %cst_272 = arith.constant dense<0.000000e+00> : vector<3x40xf32>
    %799 = tpu.matmul %698, %665, %cst_272 {dimension_numbers = #tpu.dot_dimension_numbers<[1], [0], [0], [1], [0, 0, 1, 1], [], []>} : vector<3x64xf32>, vector<64x40xf32>, vector<3x40xf32> -> vector<3x40xf32>
    %800 = vector.broadcast %702 : vector<3x1xf32> to vector<3x40xf32>
    %801 = arith.addf %799, %800 : vector<3x40xf32>
    %cst_273 = arith.constant dense<0.000000e+00> : vector<3x40xf32>
    %802 = tpu.matmul %798, %687, %cst_273 {dimension_numbers = #tpu.dot_dimension_numbers<[1], [0], [0], [1], [0, 0, 1, 1], [], []>} : vector<3x40xf32>, vector<40x40xf32>, vector<3x40xf32> -> vector<3x40xf32>
    %cst_274 = arith.constant 0.000000e+00 : f32
    %803 = vector.broadcast %cst_274 : f32 to vector<3x40xf32>
    %804 = arith.cmpf oge, %802, %803 : vector<3x40xf32>
    %805 = vector.broadcast %666 : f32 to vector<3x40xf32>
    %806 = arith.mulf %805, %802 : vector<3x40xf32>
    %807 = arith.select %804, %802, %806 : vector<3x40xi1>, vector<3x40xf32>
    %cst_275 = arith.constant dense<0.000000e+00> : vector<3x40xf32>
    %808 = tpu.matmul %798, %690, %cst_275 {dimension_numbers = #tpu.dot_dimension_numbers<[1], [0], [0], [1], [0, 0, 1, 1], [], []>} : vector<3x40xf32>, vector<40x40xf32>, vector<3x40xf32> -> vector<3x40xf32>
    %cst_276 = arith.constant 0.000000e+00 : f32
    %809 = vector.broadcast %cst_276 : f32 to vector<3x40xf32>
    %810 = arith.cmpf oge, %808, %809 : vector<3x40xf32>
    %811 = vector.broadcast %666 : f32 to vector<3x40xf32>
    %812 = arith.mulf %811, %808 : vector<3x40xf32>
    %813 = arith.select %810, %808, %812 : vector<3x40xi1>, vector<3x40xf32>
    %cst_277 = arith.constant dense<0.000000e+00> : vector<3x40xf32>
    %814 = tpu.matmul %798, %694, %cst_277 {dimension_numbers = #tpu.dot_dimension_numbers<[1], [0], [0], [1], [0, 0, 1, 1], [], []>} : vector<3x40xf32>, vector<40x40xf32>, vector<3x40xf32> -> vector<3x40xf32>
    %cst_278 = arith.constant 0.000000e+00 : f32
    %815 = vector.broadcast %cst_278 : f32 to vector<3x40xf32>
    %816 = arith.cmpf oge, %814, %815 : vector<3x40xf32>
    %817 = vector.broadcast %666 : f32 to vector<3x40xf32>
    %818 = arith.mulf %817, %814 : vector<3x40xf32>
    %819 = arith.select %816, %814, %818 : vector<3x40xi1>, vector<3x40xf32>
    %820 = vector.broadcast %704 : vector<3x1xf32> to vector<3x40xf32>
    %821 = arith.mulf %798, %820 : vector<3x40xf32>
    %cst_279 = arith.constant dense<0.000000e+00> : vector<40xf32>
    %822 = vector.multi_reduction <add>, %821, %cst_279 [0] : vector<3x40xf32> to vector<40xf32>
    %823 = vector.shape_cast %822 : vector<40xf32> to vector<1x40xf32>
    %824 = vector.broadcast %706 : vector<3x1xf32> to vector<3x40xf32>
    %825 = arith.mulf %807, %824 : vector<3x40xf32>
    %cst_280 = arith.constant dense<0.000000e+00> : vector<40xf32>
    %826 = vector.multi_reduction <add>, %825, %cst_280 [0] : vector<3x40xf32> to vector<40xf32>
    %827 = vector.shape_cast %826 : vector<40xf32> to vector<1x40xf32>
    %828 = arith.addf %823, %827 : vector<1x40xf32>
    %cst_281 = arith.constant 0.000000e+00 : f32
    %829 = vector.broadcast %cst_281 : f32 to vector<1x40xf32>
    %830 = arith.cmpf oge, %828, %829 : vector<1x40xf32>
    %831 = vector.broadcast %667 : f32 to vector<1x40xf32>
    %832 = arith.mulf %831, %828 : vector<1x40xf32>
    %833 = arith.select %830, %828, %832 : vector<1x40xi1>, vector<1x40xf32>
    %834 = vector.broadcast %706 : vector<3x1xf32> to vector<3x40xf32>
    %835 = arith.mulf %813, %834 : vector<3x40xf32>
    %cst_282 = arith.constant dense<0.000000e+00> : vector<40xf32>
    %836 = vector.multi_reduction <add>, %835, %cst_282 [0] : vector<3x40xf32> to vector<40xf32>
    %837 = vector.shape_cast %836 : vector<40xf32> to vector<1x40xf32>
    %838 = arith.addf %823, %837 : vector<1x40xf32>
    %cst_283 = arith.constant 0.000000e+00 : f32
    %839 = vector.broadcast %cst_283 : f32 to vector<1x40xf32>
    %840 = arith.cmpf oge, %838, %839 : vector<1x40xf32>
    %841 = vector.broadcast %667 : f32 to vector<1x40xf32>
    %842 = arith.mulf %841, %838 : vector<1x40xf32>
    %843 = arith.select %840, %838, %842 : vector<1x40xi1>, vector<1x40xf32>
    %844 = vector.broadcast %706 : vector<3x1xf32> to vector<3x40xf32>
    %845 = arith.mulf %819, %844 : vector<3x40xf32>
    %cst_284 = arith.constant dense<0.000000e+00> : vector<40xf32>
    %846 = vector.multi_reduction <add>, %845, %cst_284 [0] : vector<3x40xf32> to vector<40xf32>
    %847 = vector.shape_cast %846 : vector<40xf32> to vector<1x40xf32>
    %848 = arith.addf %823, %847 : vector<1x40xf32>
    %cst_285 = arith.constant 0.000000e+00 : f32
    %849 = vector.broadcast %cst_285 : f32 to vector<1x40xf32>
    %850 = arith.cmpf oge, %848, %849 : vector<1x40xf32>
    %851 = vector.broadcast %667 : f32 to vector<1x40xf32>
    %852 = arith.mulf %851, %848 : vector<1x40xf32>
    %853 = arith.select %850, %848, %852 : vector<1x40xi1>, vector<1x40xf32>
    %854 = arith.maximumf %833, %843 : vector<1x40xf32>
    %855 = arith.maximumf %854, %853 : vector<1x40xf32>
    %856 = arith.subf %833, %855 : vector<1x40xf32>
    %857 = math.exp %856 : vector<1x40xf32>
    %858 = arith.subf %843, %855 : vector<1x40xf32>
    %859 = math.exp %858 : vector<1x40xf32>
    %860 = arith.subf %853, %855 : vector<1x40xf32>
    %861 = math.exp %860 : vector<1x40xf32>
    %862 = arith.addf %857, %859 : vector<1x40xf32>
    %863 = arith.addf %862, %861 : vector<1x40xf32>
    %864 = vector.broadcast %857 : vector<1x40xf32> to vector<3x40xf32>
    %865 = arith.mulf %864, %807 : vector<3x40xf32>
    %866 = vector.broadcast %859 : vector<1x40xf32> to vector<3x40xf32>
    %867 = arith.mulf %866, %813 : vector<3x40xf32>
    %868 = arith.addf %865, %867 : vector<3x40xf32>
    %869 = vector.broadcast %861 : vector<1x40xf32> to vector<3x40xf32>
    %870 = arith.mulf %869, %819 : vector<3x40xf32>
    %871 = arith.addf %868, %870 : vector<3x40xf32>
    %872 = vector.broadcast %863 : vector<1x40xf32> to vector<3x40xf32>
    %873 = arith.divf %871, %872 : vector<3x40xf32>
    %cst_286 = arith.constant 0.333333343 : f32
    %874 = vector.broadcast %cst_286 : f32 to vector<3x40xf32>
    %875 = arith.mulf %873, %874 : vector<3x40xf32>
    %876 = arith.addf %875, %798 : vector<3x40xf32>
    %cst_287 = arith.constant 0.999994993 : f32
    %877 = vector.broadcast %cst_287 : f32 to vector<3x40xf32>
    %878 = arith.mulf %876, %877 : vector<3x40xf32>
    %879 = arith.addf %878, %801 : vector<3x40xf32>
    %cst_288 = arith.constant 0.000000e+00 : f32
    %880 = vector.broadcast %cst_288 : f32 to vector<3x40xf32>
    %881 = arith.cmpf oge, %879, %880 : vector<3x40xf32>
    %882 = vector.broadcast %668 : f32 to vector<3x40xf32>
    %883 = arith.mulf %882, %879 : vector<3x40xf32>
    %884 = arith.select %881, %879, %883 : vector<3x40xi1>, vector<3x40xf32>
    %c0_289 = arith.constant 0 : index
    %c0_290 = arith.constant 0 : index
    %c0_291 = arith.constant 0 : index
    %885 = vector.load %arg10[%c0_289, %c0_290, %c0_291] : memref<2x3x40xf32, #tpu.memory_space<vmem>>, vector<1x3x40xf32>
    %886 = vector.shape_cast %885 : vector<1x3x40xf32> to vector<3x40xf32>
    %887 = vector.shape_cast %795 : vector<3x40xf32> to vector<1x3x40xf32>
    tpu.vector_store %arg10[%c0_289, %c0_290, %c0_291], %887 {strides = array<i32>} : memref<2x3x40xf32, #tpu.memory_space<vmem>>, vector<1x3x40xf32>,
    %c1_292 = arith.constant 1 : index
    %c0_293 = arith.constant 0 : index
    %c0_294 = arith.constant 0 : index
    %888 = vector.load %arg10[%c1_292, %c0_293, %c0_294] : memref<2x3x40xf32, #tpu.memory_space<vmem>>, vector<1x3x40xf32>
    %889 = vector.shape_cast %888 : vector<1x3x40xf32> to vector<3x40xf32>
    %890 = vector.shape_cast %884 : vector<3x40xf32> to vector<1x3x40xf32>
    tpu.vector_store %arg10[%c1_292, %c0_293, %c0_294], %890 {strides = array<i32>} : memref<2x3x40xf32, #tpu.memory_space<vmem>>, vector<1x3x40xf32>,
    %cst_295 = arith.constant 0.000000e+00 : f32
    %891 = vector.broadcast %cst_295 : f32 to vector<82x8xf32>
    %c0_296 = arith.constant 0 : index
    %c0_297 = arith.constant 0 : index
    %892 = vector.load %arg11[%c0_296, %c0_297] : memref<82x8xf32, #tpu.memory_space<vmem>>, vector<82x8xf32>
    tpu.vector_store %arg11[%c0_296, %c0_297], %891 {strides = array<i32>} : memref<82x8xf32, #tpu.memory_space<vmem>>, vector<82x8xf32>,
    %c0_298 = arith.constant 0 : index
    %c0_299 = arith.constant 0 : index
    %c0_300 = arith.constant 0 : index
    %893 = vector.load %arg10[%c0_298, %c0_299, %c0_300] : memref<2x3x40xf32, #tpu.memory_space<vmem>>, vector<1x3x8xf32>
    %894 = vector.shape_cast %893 : vector<1x3x8xf32> to vector<3x8xf32>
    %c12 = arith.constant 12 : index
    %c0_301 = arith.constant 0 : index
    %895 = vector.load %arg11[%c12, %c0_301] : memref<82x8xf32, #tpu.memory_space<vmem>>, vector<3x8xf32>
    tpu.vector_store %arg11[%c12, %c0_301], %894 {strides = array<i32>} : memref<82x8xf32, #tpu.memory_space<vmem>>, vector<3x8xf32>,
    %c0_302 = arith.constant 0 : index
    %c0_303 = arith.constant 0 : index
    %c8_304 = arith.constant 8 : index
    %896 = vector.load %arg10[%c0_302, %c0_303, %c8_304] : memref<2x3x40xf32, #tpu.memory_space<vmem>>, vector<1x3x8xf32>
    %897 = vector.shape_cast %896 : vector<1x3x8xf32> to vector<3x8xf32>
    %c17 = arith.constant 17 : index
    %c0_305 = arith.constant 0 : index
    %898 = vector.load %arg11[%c17, %c0_305] : memref<82x8xf32, #tpu.memory_space<vmem>>, vector<3x8xf32>
    tpu.vector_store %arg11[%c17, %c0_305], %897 {strides = array<i32>} : memref<82x8xf32, #tpu.memory_space<vmem>>, vector<3x8xf32>,
    %c0_306 = arith.constant 0 : index
    %c0_307 = arith.constant 0 : index
    %c16 = arith.constant 16 : index
    %899 = vector.load %arg10[%c0_306, %c0_307, %c16] : memref<2x3x40xf32, #tpu.memory_space<vmem>>, vector<1x3x8xf32>
    %900 = vector.shape_cast %899 : vector<1x3x8xf32> to vector<3x8xf32>
    %c22 = arith.constant 22 : index
    %c0_308 = arith.constant 0 : index
    %901 = vector.load %arg11[%c22, %c0_308] : memref<82x8xf32, #tpu.memory_space<vmem>>, vector<3x8xf32>
    tpu.vector_store %arg11[%c22, %c0_308], %900 {strides = array<i32>} : memref<82x8xf32, #tpu.memory_space<vmem>>, vector<3x8xf32>,
    %c0_309 = arith.constant 0 : index
    %c0_310 = arith.constant 0 : index
    %c24 = arith.constant 24 : index
    %902 = vector.load %arg10[%c0_309, %c0_310, %c24] : memref<2x3x40xf32, #tpu.memory_space<vmem>>, vector<1x3x8xf32>
    %903 = vector.shape_cast %902 : vector<1x3x8xf32> to vector<3x8xf32>
    %c27 = arith.constant 27 : index
    %c0_311 = arith.constant 0 : index
    %904 = vector.load %arg11[%c27, %c0_311] : memref<82x8xf32, #tpu.memory_space<vmem>>, vector<3x8xf32>
    tpu.vector_store %arg11[%c27, %c0_311], %903 {strides = array<i32>} : memref<82x8xf32, #tpu.memory_space<vmem>>, vector<3x8xf32>,
    %c0_312 = arith.constant 0 : index
    %c0_313 = arith.constant 0 : index
    %c32 = arith.constant 32 : index
    %905 = vector.load %arg10[%c0_312, %c0_313, %c32] : memref<2x3x40xf32, #tpu.memory_space<vmem>>, vector<1x3x8xf32>
    %906 = vector.shape_cast %905 : vector<1x3x8xf32> to vector<3x8xf32>
    %c32_314 = arith.constant 32 : index
    %c0_315 = arith.constant 0 : index
    %907 = vector.load %arg11[%c32_314, %c0_315] : memref<82x8xf32, #tpu.memory_space<vmem>>, vector<3x8xf32>
    tpu.vector_store %arg11[%c32_314, %c0_315], %906 {strides = array<i32>} : memref<82x8xf32, #tpu.memory_space<vmem>>, vector<3x8xf32>,
    %c1_316 = arith.constant 1 : index
    %c0_317 = arith.constant 0 : index
    %c0_318 = arith.constant 0 : index
    %908 = vector.load %arg10[%c1_316, %c0_317, %c0_318] : memref<2x3x40xf32, #tpu.memory_space<vmem>>, vector<1x3x8xf32>
    %909 = vector.shape_cast %908 : vector<1x3x8xf32> to vector<3x8xf32>
    %c47 = arith.constant 47 : index
    %c0_319 = arith.constant 0 : index
    %910 = vector.load %arg11[%c47, %c0_319] : memref<82x8xf32, #tpu.memory_space<vmem>>, vector<3x8xf32>
    tpu.vector_store %arg11[%c47, %c0_319], %909 {strides = array<i32>} : memref<82x8xf32, #tpu.memory_space<vmem>>, vector<3x8xf32>,
    %c1_320 = arith.constant 1 : index
    %c0_321 = arith.constant 0 : index
    %c8_322 = arith.constant 8 : index
    %911 = vector.load %arg10[%c1_320, %c0_321, %c8_322] : memref<2x3x40xf32, #tpu.memory_space<vmem>>, vector<1x3x8xf32>
    %912 = vector.shape_cast %911 : vector<1x3x8xf32> to vector<3x8xf32>
    %c52 = arith.constant 52 : index
    %c0_323 = arith.constant 0 : index
    %913 = vector.load %arg11[%c52, %c0_323] : memref<82x8xf32, #tpu.memory_space<vmem>>, vector<3x8xf32>
    tpu.vector_store %arg11[%c52, %c0_323], %912 {strides = array<i32>} : memref<82x8xf32, #tpu.memory_space<vmem>>, vector<3x8xf32>,
    %c1_324 = arith.constant 1 : index
    %c0_325 = arith.constant 0 : index
    %c16_326 = arith.constant 16 : index
    %914 = vector.load %arg10[%c1_324, %c0_325, %c16_326] : memref<2x3x40xf32, #tpu.memory_space<vmem>>, vector<1x3x8xf32>
    %915 = vector.shape_cast %914 : vector<1x3x8xf32> to vector<3x8xf32>
    %c57 = arith.constant 57 : index
    %c0_327 = arith.constant 0 : index
    %916 = vector.load %arg11[%c57, %c0_327] : memref<82x8xf32, #tpu.memory_space<vmem>>, vector<3x8xf32>
    tpu.vector_store %arg11[%c57, %c0_327], %915 {strides = array<i32>} : memref<82x8xf32, #tpu.memory_space<vmem>>, vector<3x8xf32>,
    %c1_328 = arith.constant 1 : index
    %c0_329 = arith.constant 0 : index
    %c24_330 = arith.constant 24 : index
    %917 = vector.load %arg10[%c1_328, %c0_329, %c24_330] : memref<2x3x40xf32, #tpu.memory_space<vmem>>, vector<1x3x8xf32>
    %918 = vector.shape_cast %917 : vector<1x3x8xf32> to vector<3x8xf32>
    %c62 = arith.constant 62 : index
    %c0_331 = arith.constant 0 : index
    %919 = vector.load %arg11[%c62, %c0_331] : memref<82x8xf32, #tpu.memory_space<vmem>>, vector<3x8xf32>
    tpu.vector_store %arg11[%c62, %c0_331], %918 {strides = array<i32>} : memref<82x8xf32, #tpu.memory_space<vmem>>, vector<3x8xf32>,
    %c1_332 = arith.constant 1 : index
    %c0_333 = arith.constant 0 : index
    %c32_334 = arith.constant 32 : index
    %920 = vector.load %arg10[%c1_332, %c0_333, %c32_334] : memref<2x3x40xf32, #tpu.memory_space<vmem>>, vector<1x3x8xf32>
    %921 = vector.shape_cast %920 : vector<1x3x8xf32> to vector<3x8xf32>
    %c67 = arith.constant 67 : index
    %c0_335 = arith.constant 0 : index
    %922 = vector.load %arg11[%c67, %c0_335] : memref<82x8xf32, #tpu.memory_space<vmem>>, vector<3x8xf32>
    tpu.vector_store %arg11[%c67, %c0_335], %921 {strides = array<i32>} : memref<82x8xf32, #tpu.memory_space<vmem>>, vector<3x8xf32>,
    %c0_336 = arith.constant 0 : index
    %c0_337 = arith.constant 0 : index
    %923 = vector.load %arg8[%c0_336, %c0_337] : memref<70x1xf32, #tpu.memory_space<vmem>>, vector<70x1xf32>
    %cst_338 = arith.constant 0.000000e+00 : f32
    %924 = vector.broadcast %cst_338 : f32 to vector<70x4xf32>
    %c0_339 = arith.constant 0 : index
    %c0_340 = arith.constant 0 : index
    %925 = vector.load %arg11[%c0_339, %c0_340] : memref<82x8xf32, #tpu.memory_space<vmem>>, vector<70x8xf32>
    %c0_341 = arith.constant 0 : index
    %c0_342 = arith.constant 0 : index
    %c0_343 = arith.constant 0 : index
    %c0_344 = arith.constant 0 : index
    %926 = vector.load %arg6[%c0_341, %c0_342, %c0_343, %c0_344] : memref<2x9x8x4xf32, #tpu.memory_space<vmem>>, vector<1x1x8x4xf32>
    %927 = vector.shape_cast %926 : vector<1x1x8x4xf32> to vector<8x4xf32>
    %cst_345 = arith.constant dense<0.000000e+00> : vector<70x4xf32>
    %928 = tpu.matmul %925, %927, %cst_345 {dimension_numbers = #tpu.dot_dimension_numbers<[1], [0], [0], [1], [0, 0, 1, 1], [], []>} : vector<70x8xf32>, vector<8x4xf32>, vector<70x4xf32> -> vector<70x4xf32>
    %929 = arith.addf %924, %928 : vector<70x4xf32>
    %c5_346 = arith.constant 5 : index
    %c0_347 = arith.constant 0 : index
    %930 = vector.load %arg11[%c5_346, %c0_347] : memref<82x8xf32, #tpu.memory_space<vmem>>, vector<70x8xf32>
    %c0_348 = arith.constant 0 : index
    %c1_349 = arith.constant 1 : index
    %c0_350 = arith.constant 0 : index
    %c0_351 = arith.constant 0 : index
    %931 = vector.load %arg6[%c0_348, %c1_349, %c0_350, %c0_351] : memref<2x9x8x4xf32, #tpu.memory_space<vmem>>, vector<1x1x8x4xf32>
    %932 = vector.shape_cast %931 : vector<1x1x8x4xf32> to vector<8x4xf32>
    %cst_352 = arith.constant dense<0.000000e+00> : vector<70x4xf32>
    %933 = tpu.matmul %930, %932, %cst_352 {dimension_numbers = #tpu.dot_dimension_numbers<[1], [0], [0], [1], [0, 0, 1, 1], [], []>} : vector<70x8xf32>, vector<8x4xf32>, vector<70x4xf32> -> vector<70x4xf32>
    %934 = arith.addf %929, %933 : vector<70x4xf32>
    %c10_353 = arith.constant 10 : index
    %c0_354 = arith.constant 0 : index
    %935 = vector.load %arg11[%c10_353, %c0_354] : memref<82x8xf32, #tpu.memory_space<vmem>>, vector<70x8xf32>
    %c0_355 = arith.constant 0 : index
    %c2_356 = arith.constant 2 : index
    %c0_357 = arith.constant 0 : index
    %c0_358 = arith.constant 0 : index
    %936 = vector.load %arg6[%c0_355, %c2_356, %c0_357, %c0_358] : memref<2x9x8x4xf32, #tpu.memory_space<vmem>>, vector<1x1x8x4xf32>
    %937 = vector.shape_cast %936 : vector<1x1x8x4xf32> to vector<8x4xf32>
    %cst_359 = arith.constant dense<0.000000e+00> : vector<70x4xf32>
    %938 = tpu.matmul %935, %937, %cst_359 {dimension_numbers = #tpu.dot_dimension_numbers<[1], [0], [0], [1], [0, 0, 1, 1], [], []>} : vector<70x8xf32>, vector<8x4xf32>, vector<70x4xf32> -> vector<70x4xf32>
    %939 = arith.addf %934, %938 : vector<70x4xf32>
    %c1_360 = arith.constant 1 : index
    %c0_361 = arith.constant 0 : index
    %940 = vector.load %arg11[%c1_360, %c0_361] : memref<82x8xf32, #tpu.memory_space<vmem>>, vector<70x8xf32>
    %c0_362 = arith.constant 0 : index
    %c3_363 = arith.constant 3 : index
    %c0_364 = arith.constant 0 : index
    %c0_365 = arith.constant 0 : index
    %941 = vector.load %arg6[%c0_362, %c3_363, %c0_364, %c0_365] : memref<2x9x8x4xf32, #tpu.memory_space<vmem>>, vector<1x1x8x4xf32>
    %942 = vector.shape_cast %941 : vector<1x1x8x4xf32> to vector<8x4xf32>
    %cst_366 = arith.constant dense<0.000000e+00> : vector<70x4xf32>
    %943 = tpu.matmul %940, %942, %cst_366 {dimension_numbers = #tpu.dot_dimension_numbers<[1], [0], [0], [1], [0, 0, 1, 1], [], []>} : vector<70x8xf32>, vector<8x4xf32>, vector<70x4xf32> -> vector<70x4xf32>
    %944 = arith.addf %939, %943 : vector<70x4xf32>
    %c6_367 = arith.constant 6 : index
    %c0_368 = arith.constant 0 : index
    %945 = vector.load %arg11[%c6_367, %c0_368] : memref<82x8xf32, #tpu.memory_space<vmem>>, vector<70x8xf32>
    %c0_369 = arith.constant 0 : index
    %c4_370 = arith.constant 4 : index
    %c0_371 = arith.constant 0 : index
    %c0_372 = arith.constant 0 : index
    %946 = vector.load %arg6[%c0_369, %c4_370, %c0_371, %c0_372] : memref<2x9x8x4xf32, #tpu.memory_space<vmem>>, vector<1x1x8x4xf32>
    %947 = vector.shape_cast %946 : vector<1x1x8x4xf32> to vector<8x4xf32>
    %cst_373 = arith.constant dense<0.000000e+00> : vector<70x4xf32>
    %948 = tpu.matmul %945, %947, %cst_373 {dimension_numbers = #tpu.dot_dimension_numbers<[1], [0], [0], [1], [0, 0, 1, 1], [], []>} : vector<70x8xf32>, vector<8x4xf32>, vector<70x4xf32> -> vector<70x4xf32>
    %949 = arith.addf %944, %948 : vector<70x4xf32>
    %c11_374 = arith.constant 11 : index
    %c0_375 = arith.constant 0 : index
    %950 = vector.load %arg11[%c11_374, %c0_375] : memref<82x8xf32, #tpu.memory_space<vmem>>, vector<70x8xf32>
    %c0_376 = arith.constant 0 : index
    %c5_377 = arith.constant 5 : index
    %c0_378 = arith.constant 0 : index
    %c0_379 = arith.constant 0 : index
    %951 = vector.load %arg6[%c0_376, %c5_377, %c0_378, %c0_379] : memref<2x9x8x4xf32, #tpu.memory_space<vmem>>, vector<1x1x8x4xf32>
    %952 = vector.shape_cast %951 : vector<1x1x8x4xf32> to vector<8x4xf32>
    %cst_380 = arith.constant dense<0.000000e+00> : vector<70x4xf32>
    %953 = tpu.matmul %950, %952, %cst_380 {dimension_numbers = #tpu.dot_dimension_numbers<[1], [0], [0], [1], [0, 0, 1, 1], [], []>} : vector<70x8xf32>, vector<8x4xf32>, vector<70x4xf32> -> vector<70x4xf32>
    %954 = arith.addf %949, %953 : vector<70x4xf32>
    %c2_381 = arith.constant 2 : index
    %c0_382 = arith.constant 0 : index
    %955 = vector.load %arg11[%c2_381, %c0_382] : memref<82x8xf32, #tpu.memory_space<vmem>>, vector<70x8xf32>
    %c0_383 = arith.constant 0 : index
    %c6_384 = arith.constant 6 : index
    %c0_385 = arith.constant 0 : index
    %c0_386 = arith.constant 0 : index
    %956 = vector.load %arg6[%c0_383, %c6_384, %c0_385, %c0_386] : memref<2x9x8x4xf32, #tpu.memory_space<vmem>>, vector<1x1x8x4xf32>
    %957 = vector.shape_cast %956 : vector<1x1x8x4xf32> to vector<8x4xf32>
    %cst_387 = arith.constant dense<0.000000e+00> : vector<70x4xf32>
    %958 = tpu.matmul %955, %957, %cst_387 {dimension_numbers = #tpu.dot_dimension_numbers<[1], [0], [0], [1], [0, 0, 1, 1], [], []>} : vector<70x8xf32>, vector<8x4xf32>, vector<70x4xf32> -> vector<70x4xf32>
    %959 = arith.addf %954, %958 : vector<70x4xf32>
    %c7_388 = arith.constant 7 : index
    %c0_389 = arith.constant 0 : index
    %960 = vector.load %arg11[%c7_388, %c0_389] : memref<82x8xf32, #tpu.memory_space<vmem>>, vector<70x8xf32>
    %c0_390 = arith.constant 0 : index
    %c7_391 = arith.constant 7 : index
    %c0_392 = arith.constant 0 : index
    %c0_393 = arith.constant 0 : index
    %961 = vector.load %arg6[%c0_390, %c7_391, %c0_392, %c0_393] : memref<2x9x8x4xf32, #tpu.memory_space<vmem>>, vector<1x1x8x4xf32>
    %962 = vector.shape_cast %961 : vector<1x1x8x4xf32> to vector<8x4xf32>
    %cst_394 = arith.constant dense<0.000000e+00> : vector<70x4xf32>
    %963 = tpu.matmul %960, %962, %cst_394 {dimension_numbers = #tpu.dot_dimension_numbers<[1], [0], [0], [1], [0, 0, 1, 1], [], []>} : vector<70x8xf32>, vector<8x4xf32>, vector<70x4xf32> -> vector<70x4xf32>
    %964 = arith.addf %959, %963 : vector<70x4xf32>
    %c12_395 = arith.constant 12 : index
    %c0_396 = arith.constant 0 : index
    %965 = vector.load %arg11[%c12_395, %c0_396] : memref<82x8xf32, #tpu.memory_space<vmem>>, vector<70x8xf32>
    %c0_397 = arith.constant 0 : index
    %c8_398 = arith.constant 8 : index
    %c0_399 = arith.constant 0 : index
    %c0_400 = arith.constant 0 : index
    %966 = vector.load %arg6[%c0_397, %c8_398, %c0_399, %c0_400] : memref<2x9x8x4xf32, #tpu.memory_space<vmem>>, vector<1x1x8x4xf32>
    %967 = vector.shape_cast %966 : vector<1x1x8x4xf32> to vector<8x4xf32>
    %cst_401 = arith.constant dense<0.000000e+00> : vector<70x4xf32>
    %968 = tpu.matmul %965, %967, %cst_401 {dimension_numbers = #tpu.dot_dimension_numbers<[1], [0], [0], [1], [0, 0, 1, 1], [], []>} : vector<70x8xf32>, vector<8x4xf32>, vector<70x4xf32> -> vector<70x4xf32>
    %969 = arith.addf %964, %968 : vector<70x4xf32>
    %c0_402 = arith.constant 0 : index
    %c0_403 = arith.constant 0 : index
    %c0_404 = arith.constant 0 : index
    %970 = vector.load %arg7[%c0_402, %c0_403, %c0_404] : memref<2x1x4xf32, #tpu.memory_space<vmem>>, vector<1x1x4xf32>
    %971 = vector.shape_cast %970 : vector<1x1x4xf32> to vector<1x4xf32>
    %972 = vector.broadcast %971 : vector<1x4xf32> to vector<70x4xf32>
    %973 = arith.addf %969, %972 : vector<70x4xf32>
    %c12_405 = arith.constant 12 : index
    %974 = memref.load %arg1[%c12_405] : memref<14xf32, #tpu.memory_space<smem>>
    %cst_406 = arith.constant 0.000000e+00 : f32
    %975 = vector.broadcast %cst_406 : f32 to vector<70x4xf32>
    %976 = arith.cmpf oge, %973, %975 : vector<70x4xf32>
    %977 = vector.broadcast %974 : f32 to vector<70x4xf32>
    %978 = arith.mulf %977, %973 : vector<70x4xf32>
    %979 = arith.select %976, %973, %978 : vector<70x4xi1>, vector<70x4xf32>
    %980 = vector.broadcast %923 : vector<70x1xf32> to vector<70x4xf32>
    %981 = arith.mulf %979, %980 : vector<70x4xf32>
    %c6_407 = arith.constant 6 : index
    %c0_408 = arith.constant 0 : index
    %982 = vector.load %arg11[%c6_407, %c0_408] : memref<82x8xf32, #tpu.memory_space<vmem>>, vector<70x4xf32>
    tpu.vector_store %arg11[%c6_407, %c0_408], %981 {strides = array<i32>} : memref<82x8xf32, #tpu.memory_space<vmem>>, vector<70x4xf32>,
    %cst_409 = arith.constant 0.000000e+00 : f32
    %983 = vector.broadcast %cst_409 : f32 to vector<70x4xf32>
    %c0_410 = arith.constant 0 : index
    %c0_411 = arith.constant 0 : index
    %984 = vector.load %arg11[%c0_410, %c0_411] : memref<82x8xf32, #tpu.memory_space<vmem>>, vector<70x8xf32>
    %c1_412 = arith.constant 1 : index
    %c0_413 = arith.constant 0 : index
    %c0_414 = arith.constant 0 : index
    %c0_415 = arith.constant 0 : index
    %985 = vector.load %arg6[%c1_412, %c0_413, %c0_414, %c0_415] : memref<2x9x8x4xf32, #tpu.memory_space<vmem>>, vector<1x1x8x4xf32>
    %986 = vector.shape_cast %985 : vector<1x1x8x4xf32> to vector<8x4xf32>
    %cst_416 = arith.constant dense<0.000000e+00> : vector<70x4xf32>
    %987 = tpu.matmul %984, %986, %cst_416 {dimension_numbers = #tpu.dot_dimension_numbers<[1], [0], [0], [1], [0, 0, 1, 1], [], []>} : vector<70x8xf32>, vector<8x4xf32>, vector<70x4xf32> -> vector<70x4xf32>
    %988 = arith.addf %983, %987 : vector<70x4xf32>
    %c5_417 = arith.constant 5 : index
    %c0_418 = arith.constant 0 : index
    %989 = vector.load %arg11[%c5_417, %c0_418] : memref<82x8xf32, #tpu.memory_space<vmem>>, vector<70x8xf32>
    %c1_419 = arith.constant 1 : index
    %c1_420 = arith.constant 1 : index
    %c0_421 = arith.constant 0 : index
    %c0_422 = arith.constant 0 : index
    %990 = vector.load %arg6[%c1_419, %c1_420, %c0_421, %c0_422] : memref<2x9x8x4xf32, #tpu.memory_space<vmem>>, vector<1x1x8x4xf32>
    %991 = vector.shape_cast %990 : vector<1x1x8x4xf32> to vector<8x4xf32>
    %cst_423 = arith.constant dense<0.000000e+00> : vector<70x4xf32>
    %992 = tpu.matmul %989, %991, %cst_423 {dimension_numbers = #tpu.dot_dimension_numbers<[1], [0], [0], [1], [0, 0, 1, 1], [], []>} : vector<70x8xf32>, vector<8x4xf32>, vector<70x4xf32> -> vector<70x4xf32>
    %993 = arith.addf %988, %992 : vector<70x4xf32>
    %c10_424 = arith.constant 10 : index
    %c0_425 = arith.constant 0 : index
    %994 = vector.load %arg11[%c10_424, %c0_425] : memref<82x8xf32, #tpu.memory_space<vmem>>, vector<70x8xf32>
    %c1_426 = arith.constant 1 : index
    %c2_427 = arith.constant 2 : index
    %c0_428 = arith.constant 0 : index
    %c0_429 = arith.constant 0 : index
    %995 = vector.load %arg6[%c1_426, %c2_427, %c0_428, %c0_429] : memref<2x9x8x4xf32, #tpu.memory_space<vmem>>, vector<1x1x8x4xf32>
    %996 = vector.shape_cast %995 : vector<1x1x8x4xf32> to vector<8x4xf32>
    %cst_430 = arith.constant dense<0.000000e+00> : vector<70x4xf32>
    %997 = tpu.matmul %994, %996, %cst_430 {dimension_numbers = #tpu.dot_dimension_numbers<[1], [0], [0], [1], [0, 0, 1, 1], [], []>} : vector<70x8xf32>, vector<8x4xf32>, vector<70x4xf32> -> vector<70x4xf32>
    %998 = arith.addf %993, %997 : vector<70x4xf32>
    %c1_431 = arith.constant 1 : index
    %c0_432 = arith.constant 0 : index
    %999 = vector.load %arg11[%c1_431, %c0_432] : memref<82x8xf32, #tpu.memory_space<vmem>>, vector<70x8xf32>
    %c1_433 = arith.constant 1 : index
    %c3_434 = arith.constant 3 : index
    %c0_435 = arith.constant 0 : index
    %c0_436 = arith.constant 0 : index
    %1000 = vector.load %arg6[%c1_433, %c3_434, %c0_435, %c0_436] : memref<2x9x8x4xf32, #tpu.memory_space<vmem>>, vector<1x1x8x4xf32>
    %1001 = vector.shape_cast %1000 : vector<1x1x8x4xf32> to vector<8x4xf32>
    %cst_437 = arith.constant dense<0.000000e+00> : vector<70x4xf32>
    %1002 = tpu.matmul %999, %1001, %cst_437 {dimension_numbers = #tpu.dot_dimension_numbers<[1], [0], [0], [1], [0, 0, 1, 1], [], []>} : vector<70x8xf32>, vector<8x4xf32>, vector<70x4xf32> -> vector<70x4xf32>
    %1003 = arith.addf %998, %1002 : vector<70x4xf32>
    %c6_438 = arith.constant 6 : index
    %c0_439 = arith.constant 0 : index
    %1004 = vector.load %arg11[%c6_438, %c0_439] : memref<82x8xf32, #tpu.memory_space<vmem>>, vector<70x8xf32>
    %c1_440 = arith.constant 1 : index
    %c4_441 = arith.constant 4 : index
    %c0_442 = arith.constant 0 : index
    %c0_443 = arith.constant 0 : index
    %1005 = vector.load %arg6[%c1_440, %c4_441, %c0_442, %c0_443] : memref<2x9x8x4xf32, #tpu.memory_space<vmem>>, vector<1x1x8x4xf32>
    %1006 = vector.shape_cast %1005 : vector<1x1x8x4xf32> to vector<8x4xf32>
    %cst_444 = arith.constant dense<0.000000e+00> : vector<70x4xf32>
    %1007 = tpu.matmul %1004, %1006, %cst_444 {dimension_numbers = #tpu.dot_dimension_numbers<[1], [0], [0], [1], [0, 0, 1, 1], [], []>} : vector<70x8xf32>, vector<8x4xf32>, vector<70x4xf32> -> vector<70x4xf32>
    %1008 = arith.addf %1003, %1007 : vector<70x4xf32>
    %c11_445 = arith.constant 11 : index
    %c0_446 = arith.constant 0 : index
    %1009 = vector.load %arg11[%c11_445, %c0_446] : memref<82x8xf32, #tpu.memory_space<vmem>>, vector<70x8xf32>
    %c1_447 = arith.constant 1 : index
    %c5_448 = arith.constant 5 : index
    %c0_449 = arith.constant 0 : index
    %c0_450 = arith.constant 0 : index
    %1010 = vector.load %arg6[%c1_447, %c5_448, %c0_449, %c0_450] : memref<2x9x8x4xf32, #tpu.memory_space<vmem>>, vector<1x1x8x4xf32>
    %1011 = vector.shape_cast %1010 : vector<1x1x8x4xf32> to vector<8x4xf32>
    %cst_451 = arith.constant dense<0.000000e+00> : vector<70x4xf32>
    %1012 = tpu.matmul %1009, %1011, %cst_451 {dimension_numbers = #tpu.dot_dimension_numbers<[1], [0], [0], [1], [0, 0, 1, 1], [], []>} : vector<70x8xf32>, vector<8x4xf32>, vector<70x4xf32> -> vector<70x4xf32>
    %1013 = arith.addf %1008, %1012 : vector<70x4xf32>
    %c2_452 = arith.constant 2 : index
    %c0_453 = arith.constant 0 : index
    %1014 = vector.load %arg11[%c2_452, %c0_453] : memref<82x8xf32, #tpu.memory_space<vmem>>, vector<70x8xf32>
    %c1_454 = arith.constant 1 : index
    %c6_455 = arith.constant 6 : index
    %c0_456 = arith.constant 0 : index
    %c0_457 = arith.constant 0 : index
    %1015 = vector.load %arg6[%c1_454, %c6_455, %c0_456, %c0_457] : memref<2x9x8x4xf32, #tpu.memory_space<vmem>>, vector<1x1x8x4xf32>
    %1016 = vector.shape_cast %1015 : vector<1x1x8x4xf32> to vector<8x4xf32>
    %cst_458 = arith.constant dense<0.000000e+00> : vector<70x4xf32>
    %1017 = tpu.matmul %1014, %1016, %cst_458 {dimension_numbers = #tpu.dot_dimension_numbers<[1], [0], [0], [1], [0, 0, 1, 1], [], []>} : vector<70x8xf32>, vector<8x4xf32>, vector<70x4xf32> -> vector<70x4xf32>
    %1018 = arith.addf %1013, %1017 : vector<70x4xf32>
    %c7_459 = arith.constant 7 : index
    %c0_460 = arith.constant 0 : index
    %1019 = vector.load %arg11[%c7_459, %c0_460] : memref<82x8xf32, #tpu.memory_space<vmem>>, vector<70x8xf32>
    %c1_461 = arith.constant 1 : index
    %c7_462 = arith.constant 7 : index
    %c0_463 = arith.constant 0 : index
    %c0_464 = arith.constant 0 : index
    %1020 = vector.load %arg6[%c1_461, %c7_462, %c0_463, %c0_464] : memref<2x9x8x4xf32, #tpu.memory_space<vmem>>, vector<1x1x8x4xf32>
    %1021 = vector.shape_cast %1020 : vector<1x1x8x4xf32> to vector<8x4xf32>
    %cst_465 = arith.constant dense<0.000000e+00> : vector<70x4xf32>
    %1022 = tpu.matmul %1019, %1021, %cst_465 {dimension_numbers = #tpu.dot_dimension_numbers<[1], [0], [0], [1], [0, 0, 1, 1], [], []>} : vector<70x8xf32>, vector<8x4xf32>, vector<70x4xf32> -> vector<70x4xf32>
    %1023 = arith.addf %1018, %1022 : vector<70x4xf32>
    %c12_466 = arith.constant 12 : index
    %c0_467 = arith.constant 0 : index
    %1024 = vector.load %arg11[%c12_466, %c0_467] : memref<82x8xf32, #tpu.memory_space<vmem>>, vector<70x8xf32>
    %c1_468 = arith.constant 1 : index
    %c8_469 = arith.constant 8 : index
    %c0_470 = arith.constant 0 : index
    %c0_471 = arith.constant 0 : index
    %1025 = vector.load %arg6[%c1_468, %c8_469, %c0_470, %c0_471] : memref<2x9x8x4xf32, #tpu.memory_space<vmem>>, vector<1x1x8x4xf32>
    %1026 = vector.shape_cast %1025 : vector<1x1x8x4xf32> to vector<8x4xf32>
    %cst_472 = arith.constant dense<0.000000e+00> : vector<70x4xf32>
    %1027 = tpu.matmul %1024, %1026, %cst_472 {dimension_numbers = #tpu.dot_dimension_numbers<[1], [0], [0], [1], [0, 0, 1, 1], [], []>} : vector<70x8xf32>, vector<8x4xf32>, vector<70x4xf32> -> vector<70x4xf32>
    %1028 = arith.addf %1023, %1027 : vector<70x4xf32>
    %c1_473 = arith.constant 1 : index
    %c0_474 = arith.constant 0 : index
    %c0_475 = arith.constant 0 : index
    %1029 = vector.load %arg7[%c1_473, %c0_474, %c0_475] : memref<2x1x4xf32, #tpu.memory_space<vmem>>, vector<1x1x4xf32>
    %1030 = vector.shape_cast %1029 : vector<1x1x4xf32> to vector<1x4xf32>
    %1031 = vector.broadcast %1030 : vector<1x4xf32> to vector<70x4xf32>
    %1032 = arith.addf %1028, %1031 : vector<70x4xf32>
    %c13 = arith.constant 13 : index
    %1033 = memref.load %arg1[%c13] : memref<14xf32, #tpu.memory_space<smem>>
    %cst_476 = arith.constant 0.000000e+00 : f32
    %1034 = vector.broadcast %cst_476 : f32 to vector<70x4xf32>
    %1035 = arith.cmpf oge, %1032, %1034 : vector<70x4xf32>
    %1036 = vector.broadcast %1033 : f32 to vector<70x4xf32>
    %1037 = arith.mulf %1036, %1032 : vector<70x4xf32>
    %1038 = arith.select %1035, %1032, %1037 : vector<70x4xi1>, vector<70x4xf32>
    %1039 = arith.addf %1038, %981 : vector<70x4xf32>
    %1040 = vector.broadcast %923 : vector<70x1xf32> to vector<70x4xf32>
    %1041 = arith.mulf %1039, %1040 : vector<70x4xf32>
    %c0_477 = arith.constant 0 : index
    %c0_478 = arith.constant 0 : index
    %1042 = vector.load %arg9[%c0_477, %c0_478] : memref<70x4xf32, #tpu.memory_space<vmem>>, vector<70x4xf32>
    tpu.vector_store %arg9[%c0_477, %c0_478], %1041 {strides = array<i32>} : memref<70x4xf32, #tpu.memory_space<vmem>>, vector<70x4xf32>,
    return
  }
  func.func @transform_0(%arg0: i32) -> i32 {
    %c0_i32 = arith.constant 0 : i32
    %c0_i32_0 = arith.constant 0 : i32
    return %c0_i32 : i32
  }
  func.func @transform_1(%arg0: i32) -> (i32, i32, i32) {
    %c0_i32 = arith.constant 0 : i32
    %c0_i32_0 = arith.constant 0 : i32
    %c0_i32_1 = arith.constant 0 : i32
    %c0_i32_2 = arith.constant 0 : i32
    return %c0_i32, %c0_i32_0, %c0_i32_1 : i32, i32, i32
  }
  func.func @transform_2(%arg0: i32) -> (i32, i32, i32, i32) {
    %c0_i32 = arith.constant 0 : i32
    %c0_i32_0 = arith.constant 0 : i32
    %c0_i32_1 = arith.constant 0 : i32
    %c0_i32_2 = arith.constant 0 : i32
    %c0_i32_3 = arith.constant 0 : i32
    return %c0_i32, %c0_i32_0, %c0_i32_1, %c0_i32_2 : i32, i32, i32, i32
  }
  func.func @transform_3(%arg0: i32) -> (i32, i32, i32, i32) {
    %c0_i32 = arith.constant 0 : i32
    %c0_i32_0 = arith.constant 0 : i32
    %c0_i32_1 = arith.constant 0 : i32
    %c0_i32_2 = arith.constant 0 : i32
    %c0_i32_3 = arith.constant 0 : i32
    return %c0_i32, %c0_i32_0, %c0_i32_1, %c0_i32_2 : i32, i32, i32, i32
  }
  func.func @transform_4(%arg0: i32) -> (i32, i32, i32) {
    %c0_i32 = arith.constant 0 : i32
    %c0_i32_0 = arith.constant 0 : i32
    %c0_i32_1 = arith.constant 0 : i32
    %c0_i32_2 = arith.constant 0 : i32
    return %c0_i32, %c0_i32_0, %c0_i32_1 : i32, i32, i32
  }
  func.func @transform_5(%arg0: i32) -> (i32, i32, i32, i32) {
    %c0_i32 = arith.constant 0 : i32
    %c0_i32_0 = arith.constant 0 : i32
    %c0_i32_1 = arith.constant 0 : i32
    %c0_i32_2 = arith.constant 0 : i32
    %c0_i32_3 = arith.constant 0 : i32
    return %c0_i32, %c0_i32_0, %c0_i32_1, %c0_i32_2 : i32, i32, i32, i32
  }
  func.func @transform_6(%arg0: i32) -> (i32, i32, i32) {
    %c0_i32 = arith.constant 0 : i32
    %c0_i32_0 = arith.constant 0 : i32
    %c0_i32_1 = arith.constant 0 : i32
    %c0_i32_2 = arith.constant 0 : i32
    return %c0_i32, %c0_i32_0, %c0_i32_1 : i32, i32, i32
  }
  func.func @transform_7(%arg0: i32) -> (i32, i32) {
    %c0_i32 = arith.constant 0 : i32
    %c0_i32_0 = arith.constant 0 : i32
    %c0_i32_1 = arith.constant 0 : i32
    return %c0_i32, %c0_i32_0 : i32, i32
  }
  func.func @transform_8(%arg0: i32) -> (i32, i32) {
    %c0_i32 = arith.constant 0 : i32
    %c0_i32_0 = arith.constant 0 : i32
    %c0_i32_1 = arith.constant 0 : i32
    return %c0_i32, %c0_i32_0 : i32, i32
  }
}

</mosaic_0001>

<bundles_post_ra>
// kernel: model_forward.1
= control target key start
LH: loop header
LB: loop body
LE: loop exit
PB: predicated region body
PF: predicated region fallthrough
CT: control target
= control target key end

     0   :  { %13 = vsyncpa [#allocation6], 0  ;;  %s17399_s0 = inlined_call_operand.vmem [shape: f32[14], index: 0, kind: input, shape index: {}]   ;;  %s17400_s1 = inlined_call_operand.vmem [shape: f32[2,3,40], index: 1, kind: input, shape index: {}]   ;;  %s17401_s2 = inlined_call_operand.hbm [shape: f32[4,2,40,40], index: 2, kind: input, shape index: {}]   ;;  %s17402_s3 = inlined_call_operand.vmem [shape: f32[4,2,64,64], index: 3, kind: input, shape index: {}]   ;;  %s17403_s4 = inlined_call_operand.vmem [shape: f32[4,64,4], index: 4, kind: input, shape index: {}]   ;;  %s17404_s5 = inlined_call_operand.vmem [shape: f32[2,9,8,4], index: 5, kind: input, shape index: {}]   ;;  %s17405_s6 = inlined_call_operand.vmem [shape: f32[2,1,4], index: 6, kind: input, shape index: {}]   ;;  %s17406_s7 = inlined_call_operand.vmem [shape: f32[70,1], index: 7, kind: input, shape index: {}]   ;;  %s17407_s8 = inlined_call_operand.vmem [shape: f32[70,4], index: 8, kind: output, shape index: {}]  }
   0x1   :  { %s21_s29 = sshll.u32 %s17399_s0, 4  ;;  %s22_s29 = int_to_ptr.vmem [resolvable:$true] %s21_s29 }
   0x2   :  { %14 = vsyncpa [#allocation5], 0  ;;  %s13035_s30 = scalar_lea.vmem %s22_s29, 16  ;;  %p13040_p1 = scmp.lt.s32.totalorder %s22_s29, %s22_s29 }
   0x3   :  { %p13036_p0 = scmp.ne.s32.totalorder %s22_s29, %s13035_s30  ;;  %p13041_p2 = scmp.lt.s32.totalorder %s13035_s30, %s13035_s30 }
   0x5   :  { %p13042_p3 = por %p13041_p2, %p13040_p1 }
   0x7   :  { %p13043_p4 = pnand %p13042_p3, %p13036_p0 }
   0x9   :  { %13046 = shalt.err (!%p13043_p4)
}
   0xa   :  { %s13073_s9 = smov [#allocation4]   ;;  %s13074_s10 = smov [#allocation7]  }
   0xb   :  { %24 = dma.vmem_to_smem %s22_s29, 16, %s13073_s9, [#allocation6]  }
   0xc   :  { %s32_s11 = sshll.u32 %s13074_s10, 4  ;;  %s13047_s14 = scalar_lea.hbm %s17401_s2, 5120  ;;  %s33_s11 = int_to_ptr.vmem [resolvable:$true] %s32_s11 }
   0xd   :  { %p13048_p5 = scmp.ne.s32.totalorder %s17401_s2, %s13047_s14  ;;  %p13051_p6 = scmp.lt.u32.totalorder %s13047_s14, %s17401_s2 }
   0xf   :  { %p13053_p7 = pnand %p13051_p6, %p13048_p5 }
  0x11   :  { %13056 = shalt.err (!%p13053_p7)
}
  0x12   :  { %s13057_s18 = scalar_lea.vmem %s33_s11, 5120  ;;  %p13062_p9 = scmp.lt.s32.totalorder %s33_s11, %s33_s11 }
  0x13   :  { %p13058_p8 = scmp.ne.s32.totalorder %s33_s11, %s13057_s18  ;;  %p13063_p10 = scmp.lt.s32.totalorder %s13057_s18, %s13057_s18 }
  0x15   :  { %p13064_p11 = por %p13063_p10, %p13062_p9 }
  0x17   :  { %p13065_p12 = pnand %p13064_p11, %p13058_p8 }
  0x19   :  { %13068 = shalt.err (!%p13065_p12)
}
  0x1a   :  { %s13075_s19 = smov 128   ;;  %s13076_s20 = smov 8  }
  0x1b   :  { %38 = dma.hbm_to_vmem [thread:$0]  %s17401_s2, 5120, %s33_s11, [#allocation5], %s13075_s19, %s13075_s19, %s13076_s20  }
  0x1c   :  { %13069 = dma.done.wait [#allocation6], 16  }
  0x1d   :  { %13070 = vsyncadd [#allocation6], 4294967280 }
  0x1e   :  { %13071 = dma.done.wait [#allocation5], 5120  }
  0x1f   :  { %13072 = vsyncadd [#allocation5], 4294962176 }
  0x20   :  { %55 = sfence }
  0x21   :  { %v85_v0 = vld [vmem:[#allocation7] sm:$0xff]  ;;  %v86_v1 = vld [vmem:[#allocation7 + $0x8] sm:$0xff]  ;;  %v87_v2 = vld [vmem:[#allocation7 + $0x10] sm:$0xff]  ;;  %vm367_vm0 = vcmask 1042432   ;;  %vm342_vm1 = vcmask 23552   ;;  %v17412_v10 = vmov 0  }
  0x22   :  { %v88_v3 = vld [vmem:[#allocation7 + $0x18] sm:$0xff]  ;;  %v89_v4 = vld [vmem:[#allocation7 + $0x20] sm:$0xff]  ;;  %v13148_v5 = vld [vmem:[#allocation7 + $0x28] sm:$0xff]  ;;  %12917 = vset.pattern.permute.xlu1 %v17412_v10  ;;  %12916 = vset.pattern.permute.xlu0 %v17412_v10  ;;  %vm111_vm2 = vcmask 326656   ;;  %v17414_v54 = vmov 0.0|0.0   ;;  %vm13079_vm3 = vmmov 0  }
  0x23   :  { %v13150_v6 = vld [vmem:[#allocation7 + $0x30] sm:$0xff]  ;;  %v13152_v7 = vld [vmem:[#allocation7 + $0x38] sm:$0xff]  ;;  %v13154_v8 = vld [vmem:[#allocation7 + $0x40] sm:$0xff]  ;;  %v96_v9 = vmax.f32 %v85_v0, %v13148_v5  ;;  %12545 = vmatprep.subr.bf16.mxu0 %v17414_v54  ;;  %v17418_v59 = vmov 0.0   ;;  %s10075_s28 = sld [smem:[#allocation4 + $0x1]]  ;;  %s14237_s18 = sld [smem:[#allocation4 + $0x2]] }
  0x24   :  { %v13159_v11 = vld [vmem:[#allocation7 + $0x48] sm:$0xff]  ;;  %v97_v12 = vmax.f32 %v86_v1, %v13150_v6  ;;  %v98_v13 = vmax.f32 %v87_v2, %v13152_v7  ;;  %v99_v14 = vmax.f32 %v88_v3, %v13154_v8  ;;  %v79_v15 = vld [vmem:[%s17400_s1] sm:$0x7]  ;;  %v13186_v20 = vld [vmem:[%s17402_s3 + $0x10] sm:$0xff]  ;;  %11195 = vmatprep.mubr.msk.f32.mxu0 %vm13079_vm3, %v17418_v59  ;;  %s10174_s15 = sld [smem:[#allocation4 + $0x3]]  ;;  %s14972_s30 = sld [smem:[#allocation4 + $0x4]] }
  0x25   :  { %v13170_v16 = vld [vmem:[%s17402_s3] sm:$0xff]  ;;  %v100_v17 = vmax.f32 %v89_v4, %v13159_v11  ;;  %v13173_v18 = vmax.f32 %v96_v9, 0.0  ;;  %11210 = vmatprep.subr.msk.mxu1 %vm367_vm0, %v79_v15  ;;  %v13181_v19 = vld [vmem:[%s17402_s3 + $0x8] sm:$0xff]  ;;  %v13218_v30 = vld [vmem:[%s17402_s3 + $0x18] sm:$0xff]  ;;  %s10176_s11 = sld [smem:[#allocation4 + $0x5]]  ;;  %s10234_s17 = sld [smem:[#allocation4 + $0x6]] }
  0x26   :  { %11212 = vmatprep.mubr.msk.f32.mxu1 %vm342_vm1, %v13170_v16  ;;  %v13188_v21 = vmax.f32 %v97_v12, 0.0  ;;  %v13190_v22 = vmax.f32 %v98_v13, 0.0  ;;  %v13192_v23 = vmax.f32 %v99_v14, 0.0  ;;  %11211 = vmatpush3.msk.msra.mxu1 %vm367_vm0, %v79_v15  ;;  %v13204_v26 = vld [vmem:[%s17403_s4 + $0x8] sm:$0xff]  ;;  %v13225_v32 = vld [vmem:[%s17402_s3 + $0x20] sm:$0xff]  ;;  %v13230_v33 = vld [vmem:[%s17403_s4 + $0x10] sm:$0xff] }
  0x27   :  { %v13195_v24 = vmax.f32 %v100_v17, 0.0  ;;  %v106_v25 = vmul.f32 %v13173_v18, %v13173_v18  ;;  %11213 = vmatmul.mubr.msk.f32.vlgmr.msra.gmra.mrb[0].mxu1 %vm342_vm1, %v13181_v19  ;;  %11224 = vmatprep.subr.msk.mxu1 %vm367_vm0, %v79_v15  ;;  %v13245_v39 = vld [vmem:[%s17402_s3 + $0x28] sm:$0xff]  ;;  %v13251_v41 = vld [vmem:[%s17402_s3 + $0x30] sm:$0xff]  ;;  %v13256_v42 = vld [vmem:[%s17403_s4 + $0x18] sm:$0xff]  ;;  %s10236_s20 = sld [smem:[#allocation4 + $0x8]]  ;;  %s13084_s29 = smov 112  }
  0x28   :  { %v107_v27 = vmul.f32 %v13188_v21, %v13188_v21  ;;  %v108_v28 = vmul.f32 %v13190_v22, %v13190_v22  ;;  %v109_v29 = vmul.f32 %v13192_v23, %v13192_v23  ;;  %11215 = vmatprep.mubr.msk.f32.mxu1 %vm342_vm1, %v13186_v20  ;;  %309 = vperm.xlu1 %12917, %v13204_v26   ;;  %v13266_v45 = vld [vmem:[%s17402_s3 + $0x38] sm:$0xff]  ;;  %v13272_v47 = vld [vmem:[%s17403_s4 + $0x20] sm:$0xff]  ;;  %v13280_v48 = vld [vmem:[%s17403_s4 + $0x28] sm:$0xff]  ;;  %s13086_s9 = smov 104   ;;  %s13087_s10 = smov 96  }
  0x29   :  { %v112_v31 = vsel %vm111_vm2, %v106_v25, 0.0  ;;  %11225 = vmatpush3.msk.msra.mxu1 %vm367_vm0, %v79_v15  ;;  %v110_v34 = vmul.f32 %v13195_v24, %v13195_v24  ;;  %v13286_v49 = vld [vmem:[%s17403_s4 + $0x30] sm:$0xff]  ;;  %v13292_v50 = vld [vmem:[%s17403_s4 + $0x38] sm:$0xff]  ;;  %v13298_v51 = vld [vmem:[%s17403_s4] sm:$0xff] }
  0x2a   :  { %v113_v35 = vsel %vm111_vm2, %v107_v27, 0.0  ;;  %v115_v36 = vsel %vm111_vm2, %v108_v28, 0.0  ;;  %v117_v38 = vsel %vm111_vm2, %v109_v29, 0.0  ;;  %v13304_v52 = vld [vmem:[%s17402_s3 + $0x40] sm:$0xff]  ;;  %v13309_v53 = vld [vmem:[%s17402_s3 + $0x48] sm:$0xff]  ;;  %v13319_v55 = vld [vmem:[%s17402_s3 + $0x50] sm:$0xff] }
  0x2b   :  { %v114_v37 = vadd.f32 %v113_v35, %v112_v31  ;;  %11216 = vmatmul.mubr.msk.f32.gmra.mrb[2].mxu1 %vm342_vm1, %v13218_v30  ;;  %v119_v43 = vsel %vm111_vm2, %v110_v34, 0.0  ;;  %v13324_v56 = vld [vmem:[%s17402_s3 + $0x58] sm:$0xff]  ;;  %v13333_v57 = vld [vmem:[%s17402_s3 + $0x60] sm:$0xff]  ;;  %v13340_v58 = vld [vmem:[%s17402_s3 + $0x68] sm:$0xff] }
  0x2c   :  { %11218 = vmatprep.mubr.msk.f32.mxu1 %vm342_vm1, %v13225_v32  ;;  %314 = vperm.xlu1 %12917, %v13230_v33   ;;  %17596 = vst [vmem:[#allocation10_spill] sm:$0xff] %v13333_v57  ;;  %17597 = vst [vmem:[#allocation11_spill] sm:$0xff] %v13340_v58  ;;  %v13349_v60 = vld [vmem:[%s17402_s3 + $0x70] sm:$0xff]  ;;  %v13354_v61 = vld [vmem:[%s17402_s3 + $0x78] sm:$0xff] }
  0x2d   :  { %v116_v40 = vadd.f32 %v115_v36, %v114_v37  ;;  %17598 = vst [vmem:[#allocation12_spill] sm:$0xff] %v13349_v60  ;;  %17599 = vst [vmem:[#allocation13_spill] sm:$0xff] %v13354_v61  ;;  %v2235_v62 = vld [vmem:[#allocation7 + $0x50] sm:$0xff]  ;;  %v2236_v63 = vld [vmem:[#allocation7 + $0x58] sm:$0xff] }
  0x2e   :  { %v2241_v0 = vld [vmem:[#allocation7 + $0x78] sm:$0xff]  ;;  %v2242_v1 = vld [vmem:[#allocation7 + $0x80] sm:$0xff]  ;;  %v2243_v4 = vld [vmem:[#allocation7 + $0x88] sm:$0xff] }
  0x2f   :  { %v118_v44 = vadd.f32 %v117_v38, %v116_v40  ;;  %11219 = vmatmul.mubr.msk.f32.gmra.mrb[4].mxu1 %vm342_vm1, %v13245_v39  ;;  %v2246_v2 = vmax.f32 %v2235_v62, %v2241_v0  ;;  %v2237_v3 = vld [vmem:[#allocation7 + $0x60] sm:$0xff]  ;;  %v2247_v9 = vmax.f32 %v2236_v63, %v2242_v1  ;;  %v2238_v14 = vld [vmem:[#allocation7 + $0x68] sm:$0xff]  ;;  %v2244_v15 = vld [vmem:[#allocation7 + $0x90] sm:$0xff] }
  0x30   :  { %11221 = vmatprep.mubr.msk.f32.mxu1 %vm342_vm1, %v13251_v41  ;;  %319 = vperm.xlu1 %12917, %v13256_v42   ;;  %v2248_v12 = vmax.f32 %v2237_v3, %v2243_v4  ;;  %v2249_v25 = vmax.f32 %v2238_v14, %v2244_v15  ;;  %v2239_v29 = vld [vmem:[#allocation7 + $0x70] sm:$0xff]  ;;  %v2245_v31 = vld [vmem:[#allocation7 + $0x98] sm:$0xff]  ;;  %v17408_v4 = vmov 3  }
  0x31   :  { %v120_v46 = vadd.f32 %v119_v43, %v118_v44  ;;  %v13360_v13 = vmax.f32 %v2246_v2, 0.0  ;;  %v13362_v17 = vmax.f32 %v2247_v9, 0.0  ;;  %v2250_v35 = vmax.f32 %v2239_v29, %v2245_v31 }
  0x32   :  { %v13364_v27 = vmax.f32 %v2248_v12, 0.0  ;;  %v13370_v36 = vmax.f32 %v2249_v25, 0.0  ;;  %v17410_v9 = vmov 2  }
  0x33   :  { %121 = vadd.xlane.f32.xlu0 %v120_v46  ;;  %11222 = vmatmul.mubr.msk.f32.gmra.mrb[6].mxu1 %vm342_vm1, %v13266_v45  ;;  %v2256_v28 = vmul.f32 %v13360_v13, %v13360_v13  ;;  %v2257_v34 = vmul.f32 %v13362_v17, %v13362_v17  ;;  %v13376_v43 = vmax.f32 %v2250_v35, 0.0 }
  0x34   :  { %324 = vperm.xlu1 %12917, %v13272_v47   ;;  %11226 = vmatprep.mubr.msk.f32.mxu1 %vm342_vm1, %v13304_v52  ;;  %17600 = vst [vmem:[#allocation14_spill] sm:$0xff] %v13370_v36  ;;  %v2258_v37 = vmul.f32 %v13364_v27, %v13364_v27  ;;  %v2259_v44 = vmul.f32 %v13370_v36, %v13370_v36 }
  0x35   :  { %v2261_v38 = vsel %vm111_vm2, %v2256_v28, 0.0  ;;  %v2262_v40 = vsel %vm111_vm2, %v2257_v34, 0.0  ;;  %17601 = vst [vmem:[#allocation15_spill] sm:$0xff] %v13376_v43  ;;  %v2260_v63 = vmul.f32 %v13376_v43, %v13376_v43 }
  0x36   :  { %v2263_v46 = vadd.f32 %v2262_v40, %v2261_v38  ;;  %v2264_v62 = vsel %vm111_vm2, %v2258_v37, 0.0  ;;  %v2266_v1 = vsel %vm111_vm2, %v2259_v44, 0.0  ;;  %v56_v38 = vlaneseq }
  0x37   :  { %11227 = vmatmul.mubr.msk.f32.vlgmr.msra.gmra.mrb[8].mxu1 %vm342_vm1, %v13309_v53  ;;  %v2268_v3 = vsel %vm111_vm2, %v2260_v63, 0.0 }
  0x38   :  { %329 = vperm.xlu1 %12917, %v13280_v48   ;;  %11229 = vmatprep.mubr.msk.f32.mxu1 %vm342_vm1, %v13319_v55  ;;  %v2265_v0 = vadd.f32 %v2264_v62, %v2263_v46  ;;  %v57_v63 = vshrl.u32 %v56_v38, 7 }
  0x3a   :  { %v2267_v2 = vadd.f32 %v2266_v1, %v2265_v0 }
  0x3b   :  { %11230 = vmatmul.mubr.msk.f32.gmra.mrb[10].mxu1 %vm342_vm1, %v13324_v56 }
  0x3c   :  { %334 = vperm.xlu1 %12917, %v13286_v49   ;;  %11232 = vmatprep.mubr.msk.f32.mxu1 %vm342_vm1, %v13333_v57  ;;  %v2269_v14 = vadd.f32 %v2268_v3, %v2267_v2  ;;  %v63_v2 = vand.u32 127, %v56_v38 }
  0x3e   :  { %vm64_vm4 = vcmp.eq.s32.totalorder %v57_v63, %v63_v2 }
  0x3f   :  { %11233 = vmatmul.mubr.msk.f32.gmra.mrb[12].mxu1 %vm342_vm1, %v13340_v58  ;;  %v13431_v38 = vsel %vm64_vm4, 1.0, %v17418_v59 }
  0x40   :  { %339 = vperm.xlu1 %12917, %v13292_v50   ;;  %11235 = vmatprep.mubr.msk.f32.mxu1 %vm342_vm1, %v13349_v60  ;;  %17603 = vst [vmem:[#allocation17_spill] sm:$0xff] %v13431_v38 }
  0x43   :  { %11236 = vmatmul.mubr.msk.f32.gmra.mrb[14].mxu1 %vm342_vm1, %v13354_v61 }
  0x44   :  { %12919 = vset.pattern.permute.xlu1 %v17408_v4 }
  0x49   :  { %304 = vperm.xlu0 %12916, %v13298_v51  }
  0x4d   :  { %12918 = vset.pattern.permute.xlu0 %v17410_v9 }
  0x4e   :  { %1050 = vperm.xlu0 %12918, %v13298_v51  }
  0x52   :  { %1054 = vperm.xlu0 %12918, %v13204_v26  }
  0x56   :  { %1058 = vperm.xlu0 %12918, %v13230_v33  }
  0x5a   :  { %12920 = vset.pattern.permute.xlu0 %v17408_v4 }
  0x5b   :  { %1111 = vperm.xlu0 %12920, %v13298_v51  }
  0x5f   :  { %1119 = vperm.xlu0 %12920, %v13230_v33  }
  0x63   :  { %1123 = vperm.xlu0 %12920, %v13256_v42  }
  0x64   :  { %2270 = vadd.xlane.f32.xlu1 %v2269_v14  ;;  %v59_v14 = vadd.s32 16, %v57_v63 }
  0x66   :  { %vm66_vm6 = vcmp.eq.s32.totalorder %v59_v14, %v63_v2 }
  0x67   :  { %1127 = vperm.xlu0 %12920, %v13272_v47   ;;  %v13437_v4 = vsel %vm66_vm6, 1.0, %v17418_v59 }
  0x68   :  { %17605 = vst [vmem:[#allocation19_spill] sm:$0xff] %v13437_v4 }
  0x6b   :  { %1131 = vperm.xlu0 %12920, %v13280_v48  }
  0x6f   :  { %1135 = vperm.xlu0 %12920, %v13286_v49  }
  0x73   :  { %1139 = vperm.xlu0 %12920, %v13292_v50  }
  0x75   :  { %1115 = vperm.xlu1 %12919, %v13204_v26  }
  0x79   :  { %12921 = vset.pattern.permute.xlu1 %v17410_v9 }
  0x7a   :  { %1062 = vperm.xlu1 %12921, %v13256_v42  }
  0x7e   :  { %1066 = vperm.xlu1 %12921, %v13272_v47  }
  0x82   :  { %1070 = vperm.xlu1 %12921, %v13280_v48  }
  0x86   :  { %1074 = vperm.xlu1 %12921, %v13286_v49  }
  0x8a   :  { %1078 = vperm.xlu1 %12921, %v13292_v50  }
  0xa7   :  { %v13418_v1 = vpop.permute.xlu1 %309 }
  0xc0   :  { %v122_v12 = vpop.xlane.xlu0 %121 }
  0xc1   :  { %v123_v15 = vrot.slane %v122_v12, 4 }
  0xc3   :  { %v124_v25 = vadd.f32 %v123_v15, %v122_v12  ;;  %v58_v12 = vadd.s32 8, %v57_v63  ;;  %v60_v15 = vadd.s32 24, %v57_v63 }
  0xc5   :  { %v125_v28 = vrot.slane %v124_v25, 2  ;;  %vm65_vm5 = vcmp.eq.s32.totalorder %v58_v12, %v63_v2  ;;  %vm67_vm7 = vcmp.eq.s32.totalorder %v60_v15, %v63_v2 }
  0xc7   :  { %v126_v29 = vadd.f32 %v125_v28, %v124_v25  ;;  %v61_v25 = vadd.s32 32, %v57_v63  ;;  %v13440_v63 = vsel %vm67_vm7, 1.0, %v17418_v59 }
  0xc8   :  { %v13405_v35 = vpop.permute.xlu0 %304  ;;  %17606 = vst [vmem:[#allocation20_spill] sm:$0xff] %v13440_v63 }
  0xc9   :  { %v127_v31 = vrot.slane %v126_v29, 1  ;;  %vm68_vm8 = vcmp.eq.s32.totalorder %v61_v25, %v63_v2 }
  0xca   :  { %v13443_v12 = vsel %vm68_vm8, 1.0, %v17418_v59 }
  0xcb   :  { %v128_v34 = vadd.f32 %v127_v31, %v126_v29  ;;  %17607 = vst [vmem:[#allocation21_spill] sm:$0xff] %v13443_v12 }
  0xcd   :  { %12893 = vpush %v128_v34  ;;  %v13428_v34 = vpop.permute.xlu1 %314 }
  0xfa   :  { %v13407_v37 = vpop.f32.mrb[0].mxu1 }
  0xfb   :  { %v437_v40 = vpop.f32.mrb[1].mxu1 }
  0xfc   :  { %v13410_v44 = vadd.f32 %v437_v40, %v13405_v35 }
  0xfe   :  { %17602 = vst [vmem:[#allocation16_spill] sm:$0xff] %v13410_v44  ;;  %s12894_s24 = spop %12893  ;;  %v13412_v46 = vpop.f32.mrb[2].mxu1  ;;  %11270 = vmatprep.mubr.msk.f32.mxu1 %vm111_vm2, %v13410_v44 }
  0xff   :  { %v130_v62 = vstv %s12894_s24  ;;  %v13416_v0 = vpop.f32.mrb[3].mxu1  ;;  %s10347_s24 = sld [smem:[#allocation4 + $0xa]] }
 0x100   :  { %12944 = vrcp.f32 %v130_v62  ;;  %v13434_v62 = vsel %vm65_vm5, 1.0, %v17418_v59  ;;  %v13454_v59 = vpop.permute.xlu1 %319 }
 0x101   :  { %17604 = vst [vmem:[#allocation18_spill] sm:$0xff] %v13434_v62 }
 0x102   :  { %v13420_v3 = vpop.f32.mrb[4].mxu1 }
 0x103   :  { %v13422_v28 = vpop.f32.mrb[5].mxu1 }
 0x104   :  { %v13478_v58 = vpop.permute.xlu1 %324 }
 0x106   :  { %v13424_v29 = vpop.f32.mrb[6].mxu1 }
 0x107   :  { %v13426_v31 = vpop.f32.mrb[7].mxu1 }
 0x10a   :  { %v12945_v40 = vpop.eup %12944 }
 0x10b   :  { %v132_v2 = vmul.f32 %v12945_v40, %v13173_v18  ;;  %v133_v14 = vmul.f32 %v12945_v40, %v13188_v21  ;;  %v134_v15 = vmul.f32 %v12945_v40, %v13190_v22  ;;  %v135_v25 = vmul.f32 %v12945_v40, %v13192_v23 }
 0x10c   :  { %v136_v9 = vmul.f32 %v12945_v40, %v13195_v24 }
 0x10d   :  { %v137_v10 = vadd.f32 %v13431_v38, %v132_v2  ;;  %v138_v54 = vadd.f32 %v13434_v62, %v133_v14  ;;  %v139_v43 = vadd.f32 %v13437_v4, %v134_v15  ;;  %v140_v61 = vadd.f32 %v13440_v63, %v135_v25 }
 0x10e   :  { %v141_v18 = vadd.f32 %v13443_v12, %v136_v9  ;;  %v17608_v14 = vmov 0.0|0.0  }
 0x10f   :  { %v13457_v60 = vmul.f32 0.5, %v137_v10  ;;  %v13459_v21 = vmul.f32 0.5, %v138_v54  ;;  %v13461_v22 = vmul.f32 0.5, %v139_v43  ;;  %v13463_v23 = vmul.f32 0.5, %v140_v61 }
 0x110   :  { %v13475_v61 = vmul.f32 0.5, %v141_v18 }
 0x111   :  { %v12546_v24 = vpack.c.bf16 %v13459_v21, %v13457_v60  ;;  %v152_v40 = vsub.f32 %v13431_v38, %v13457_v60  ;;  %v153_v2 = vsub.f32 %v13434_v62, %v13459_v21  ;;  %v154_v9 = vsub.f32 %v13437_v4, %v13461_v22 }
 0x112   :  { %v155_v10 = vsub.f32 %v13440_v63, %v13463_v23  ;;  %v12549_v57 = vpack.c.bf16 %v13463_v23, %v13461_v22  ;;  %v147_v4 = vmul.f32 0.999995, %v13148_v5  ;;  %v148_v63 = vmul.f32 0.999995, %v13150_v6 }
 0x113   :  { %12547 = vmatpush3.bf16.msra.mxu0 %v12546_v24  ;;  %v157_v54 = vmul.f32 0.999995, %v152_v40  ;;  %v158_v43 = vmul.f32 0.999995, %v153_v2  ;;  %v159_v15 = vmul.f32 0.999995, %v154_v9  ;;  %v156_v24 = vsub.f32 %v13443_v12, %v13475_v61  ;;  %v13494_v2 = vpop.permute.xlu1 %329 }
 0x114   :  { %12548 = vmatprep.subr.bf16.mxu0 %v17608_v14  ;;  %v160_v25 = vmul.f32 0.999995, %v155_v10  ;;  %v17609_v40 = vmov 0.0   ;;  %v12551_v9 = vpack.c.bf16 %v148_v63, %v147_v4  ;;  %v149_v5 = vmul.f32 0.999995, %v13152_v7 }
 0x115   :  { %v13482_v36 = vpack.c.bf16 %v158_v43, %v157_v54  ;;  %v150_v6 = vmul.f32 0.999995, %v13154_v8  ;;  %v13506_v10 = vadd.f32 %v13407_v37, %v13418_v1  ;;  %v13513_v7 = vadd.f32 %v13416_v0, %v13428_v34  ;;  %v13524_v63 = vld [vmem:[%s17400_s1 + $0x4] sm:$0x7]  ;;  %s82_s1 = sld [smem:[#allocation4]] }
 0x116   :  { %v13487_v18 = vpack.c.bf16 %v160_v25, %v159_v15  ;;  %v151_v37 = vmul.f32 0.999995, %v13159_v11  ;;  %v13528_v0 = vadd.f32 %v13412_v46, %v13454_v59  ;;  %v13538_v11 = vadd.f32 %v13422_v28, %v13478_v58 }
 0x117   :  { %12550 = vmatpush3.bf16.msra.mxu0 %v12549_v57  ;;  %12560 = vmatprep.subr.bf16.mxu1 %v13482_v36  ;;  %v13499_v57 = vmul.f32 0.999995, %v156_v24  ;;  %17610 = vst [vmem:[#allocation22_spill] sm:$0xff] %v13506_v10  ;;  %17611 = vst [vmem:[#allocation23_spill] sm:$0xff] %v13513_v7  ;;  %v12555_v8 = vpack.c.bf16 %v150_v6, %v149_v5  ;;  %v13518_v4 = vpop.permute.xlu1 %334  ;;  %v13546_v46 = vadd.f32 %v13420_v3, %v13494_v2  ;;  %v17428_v5 = vmov 1  }
 0x118   :  { %12562 = vmatpush3.bf16.msra.mxu1 %v13482_v36  ;;  %11193 = vmatprep.subr.mxu0 %v17609_v40  ;;  %17612 = vst [vmem:[#allocation24_spill] sm:$0xff] %v13528_v0  ;;  %17613 = vst [vmem:[#allocation25_spill] sm:$0xff] %v13538_v11  ;;  %v13556_v28 = vadd.f32 %v13426_v31, %v13518_v4  ;;  %v17625_v6 = vmov 0  }
 0x119   :  { %12564 = vmatprep.subr.bf16.mxu1 %v13487_v18  ;;  %17614 = vst [vmem:[#allocation26_spill] sm:$0xff] %v13546_v46  ;;  %12922 = vset.pattern.permute.xlu1 %v17428_v5 }
 0x11a   :  { %17615 = vst [vmem:[#allocation27_spill] sm:$0xff] %v13556_v28  ;;  %12923 = vset.pattern.permute.xlu0 %v17428_v5  ;;  %477 = vperm.xlu1 %12922, %v13298_v51  }
 0x11b   :  { %11194 = vmatpush3.msra.mxu0 %v13475_v61  ;;  %v13558_v54 = vpop.permute.xlu1 %339  ;;  %481 = vperm.xlu0 %12923, %v13204_v26  }
 0x11c   :  { %11196 = vmatmul.mubr.msk.f32.vlgmr.msra.gmra.mrb[0].mxu0 %vm111_vm2, %v13457_v60  ;;  %12566 = vmatpush3.bf16.msra.mxu1 %v13487_v18  ;;  %v13568_v3 = vadd.f32 %v13424_v29, %v13558_v54 }
 0x11d   :  { %11268 = vmatprep.subr.mxu1 %v13499_v57  ;;  %11198 = vmatprep.mubr.msk.f32.mxu0 %vm13079_vm3, %v17609_v40 }
 0x11e   :  { %12552 = vmatprep.subr.bf16.mxu0 %v12551_v9  ;;  %17616 = vst [vmem:[#allocation28_spill] sm:$0xff] %v13568_v3  ;;  %485 = vperm.xlu1 %12922, %v13230_v33  }
 0x11f   :  { %12554 = vmatpush3.bf16.msra.mxu0 %v12551_v9  ;;  %493 = vperm.xlu0 %12923, %v13272_v47  }
 0x120   :  { %11199 = vmatmul.mubr.msk.f32.gmra.mrb[2].mxu0 %vm111_vm2, %v13459_v21  ;;  %11269 = vmatpush3.msra.mxu1 %v13499_v57 }
 0x121   :  { %11271 = vmatmul.mubr.msk.f32.vlgmr.msra.gmra.mrb[16].mxu1 %vm111_vm2, %v13506_v10  ;;  %11201 = vmatprep.mubr.msk.f32.mxu0 %vm13079_vm3, %v17609_v40 }
 0x122   :  { %11273 = vmatprep.mubr.msk.f32.mxu1 %vm111_vm2, %v13513_v7  ;;  %12556 = vmatprep.subr.bf16.mxu0 %v12555_v8 }
 0x123   :  { %12558 = vmatpush3.bf16.msra.mxu0 %v12555_v8  ;;  %11304 = vmatprep.subr.msk.mxu1 %vm367_vm0, %v13524_v63 }
 0x124   :  { %11202 = vmatmul.mubr.msk.f32.gmra.mrb[4].mxu0 %vm111_vm2, %v13461_v22  ;;  %11246 = vmatprep.subr.mxu0 %v151_v37 }
 0x125   :  { %11274 = vmatmul.mubr.msk.f32.gmra.mrb[18].mxu1 %vm111_vm2, %v13528_v0  ;;  %11204 = vmatprep.mubr.msk.f32.mxu0 %vm13079_vm3, %v17609_v40 }
 0x126   :  { %11276 = vmatprep.mubr.msk.f32.mxu1 %vm111_vm2, %v13538_v11  ;;  %11305 = vmatpush3.msk.msra.mxu1 %vm367_vm0, %v13524_v63 }
 0x127   :  { %11247 = vmatpush3.msra.mxu0 %v151_v37  ;;  %12576 = vmatprep.subr.bf16.mxu1 %v12551_v9 }
 0x128   :  { %11205 = vmatmul.mubr.msk.f32.gmra.mrb[6].mxu0 %vm111_vm2, %v13463_v23  ;;  %489 = vperm.xlu1 %12922, %v13256_v42  }
 0x129   :  { %11277 = vmatmul.mubr.msk.f32.gmra.mrb[20].mxu1 %vm111_vm2, %v13546_v46  ;;  %11207 = vmatprep.mubr.msk.f32.mxu0 %vm13079_vm3, %v17609_v40 }
 0x12a   :  { %11279 = vmatprep.mubr.msk.f32.mxu1 %vm111_vm2, %v13556_v28  ;;  %501 = vperm.xlu0 %12923, %v13286_v49  }
 0x12c   :  { %11208 = vmatmul.mubr.msk.f32.gmra.mrb[8].mxu0 %vm111_vm2, %v13475_v61  ;;  %497 = vperm.xlu1 %12922, %v13280_v48  }
 0x12d   :  { %11280 = vmatmul.mubr.msk.f32.gmra.mrb[22].mxu1 %vm111_vm2, %v13568_v3  ;;  %11248 = vmatprep.mubr.msk.f32.mxu0 %vm111_vm2, %v13410_v44 }
 0x12e   :  { %11306 = vmatprep.mubr.msk.f32.mxu1 %vm342_vm1, %v13170_v16  ;;  %v2271_v16 = vpop.xlane.xlu1 %2270  ;;  %12924 = vset.pattern.permute.xlu0 %v17625_v6 }
 0x130   :  { %11249 = vmatmul.mubr.msk.f32.vlgmr.msra.gmra.mrb[10].mxu0 %vm111_vm2, %v13506_v10  ;;  %505 = vperm.xlu1 %12922, %v13292_v50  }
 0x131   :  { %11307 = vmatmul.mubr.msk.f32.vlgmr.msra.gmra.mrb[24].mxu1 %vm342_vm1, %v13181_v19  ;;  %11251 = vmatprep.mubr.msk.f32.mxu0 %vm111_vm2, %v13513_v7  ;;  %v2272_v19 = vrot.slane %v2271_v16, 4 }
 0x132   :  { %11309 = vmatprep.mubr.msk.f32.mxu1 %vm342_vm1, %v13186_v20  ;;  %12578 = vmatpush3.bf16.msra.mxu1 %v12551_v9  ;;  %v13650_v42 = vpop.permute.xlu1 %1115 }
 0x133   :  { %12580 = vmatprep.subr.bf16.mxu1 %v12555_v8  ;;  %v2273_v20 = vadd.f32 %v2272_v19, %v2271_v16 }
 0x134   :  { %11252 = vmatmul.mubr.msk.f32.gmra.mrb[12].mxu0 %vm111_vm2, %v13528_v0  ;;  %12925 = vset.pattern.permute.xlu1 %v17625_v6 }
 0x135   :  { %11310 = vmatmul.mubr.msk.f32.gmra.mrb[26].mxu1 %vm342_vm1, %v13218_v30  ;;  %11254 = vmatprep.mubr.msk.f32.mxu0 %vm111_vm2, %v13538_v11  ;;  %v2274_v30 = vrot.slane %v2273_v20, 2 }
 0x136   :  { %11312 = vmatprep.mubr.msk.f32.mxu1 %vm342_vm1, %v13225_v32  ;;  %12582 = vmatpush3.bf16.msra.mxu1 %v12555_v8  ;;  %v13612_v32 = vpop.f32.mrb[8].mxu1  ;;  %v13638_v8 = vpop.permute.xlu0 %1050 }
 0x137   :  { %11340 = vmatprep.subr.mxu1 %v151_v37  ;;  %17617 = vst [vmem:[#allocation29_spill] sm:$0xff] %v13612_v32  ;;  %17626 = vst [vmem:[#allocation37_spill] sm:$0xff] %v13638_v8  ;;  %v1081_v48 = vmul.f32 %v13638_v8, %v13410_v44  ;;  %v13658_v50 = vpop.permute.xlu1 %1062 }
 0x138   :  { %11255 = vmatmul.mubr.msk.f32.gmra.mrb[14].mxu0 %vm111_vm2, %v13546_v46  ;;  %17629 = vst [vmem:[#allocation40_spill] sm:$0xff] %v13658_v50 }
 0x139   :  { %11313 = vmatmul.mubr.msk.f32.gmra.mrb[28].mxu1 %vm342_vm1, %v13245_v39  ;;  %11257 = vmatprep.mubr.msk.f32.mxu0 %vm111_vm2, %v13556_v28  ;;  %v2275_v39 = vadd.f32 %v2274_v30, %v2273_v20  ;;  %v1089_v16 = vsel %vm111_vm2, %v1081_v48, 0.0  ;;  %v13672_v48 = vstv %s82_s1 }
 0x13a   :  { %11315 = vmatprep.mubr.msk.f32.mxu1 %vm342_vm1, %v13251_v41  ;;  %11341 = vmatpush3.msra.mxu1 %v151_v37  ;;  %v13614_v41 = vpop.f32.mrb[9].mxu1  ;;  %v13641_v37 = vpop.permute.xlu0 %1054 }
 0x13b   :  { %v2276_v29 = vrot.slane %v2275_v39, 1  ;;  %17618 = vst [vmem:[#allocation30_spill] sm:$0xff] %v13614_v41  ;;  %v13616_v43 = vpop.f32.mrb[10].mxu1  ;;  %17627 = vst [vmem:[#allocation38_spill] sm:$0xff] %v13641_v37  ;;  %v1082_v49 = vmul.f32 %v13641_v37, %v13506_v10  ;;  %v13669_v6 = vpop.permute.xlu1 %1066 }
 0x13c   :  { %11258 = vmatmul.mubr.msk.f32.gmra.mrb[16].mxu0 %vm111_vm2, %v13568_v3  ;;  %17619 = vst [vmem:[#allocation31_spill] sm:$0xff] %v13616_v43  ;;  %v13618_v15 = vpop.f32.mrb[11].mxu1  ;;  %17630 = vst [vmem:[#allocation41_spill] sm:$0xff] %v13669_v6 }
 0x13d   :  { %11316 = vmatmul.mubr.msk.f32.gmra.mrb[30].mxu1 %vm342_vm1, %v13266_v45  ;;  %11292 = vmatprep.mubr.msk.f32.mxu0 %vm111_vm2, %v13410_v44  ;;  %v2277_v31 = vadd.f32 %v2276_v29, %v2275_v39  ;;  %17620 = vst [vmem:[#allocation32_spill] sm:$0xff] %v13618_v15  ;;  %v13620_v45 = vpop.f32.mrb[12].mxu1  ;;  %v1090_v19 = vsel %vm111_vm2, %v1082_v49, 0.0 }
 0x13e   :  { %17621 = vst [vmem:[#allocation33_spill] sm:$0xff] %v13620_v45  ;;  %v13622_v25 = vpop.f32.mrb[13].mxu1  ;;  %v13644_v26 = vpop.permute.xlu0 %1058  ;;  %v1091_v30 = vadd.f32 %v1090_v19, %v1089_v16  ;;  %v1085_v16 = vmul.f32 %v13669_v6, %v13538_v11 }
 0x13f   :  { %12895 = vpush %v2277_v31  ;;  %17622 = vst [vmem:[#allocation34_spill] sm:$0xff] %v13622_v25  ;;  %v13624_v24 = vpop.f32.mrb[14].mxu1  ;;  %v1083_v20 = vmul.f32 %v13644_v26, %v13513_v7  ;;  %v1084_v31 = vmul.f32 %v13658_v50, %v13528_v0 }
 0x140   :  { %17623 = vst [vmem:[#allocation35_spill] sm:$0xff] %v13624_v24  ;;  %v13626_v9 = vpop.f32.mrb[15].mxu1  ;;  %17628 = vst [vmem:[#allocation39_spill] sm:$0xff] %v13644_v26 }
 0x141   :  { %17624 = vst [vmem:[#allocation36_spill] sm:$0xff] %v13626_v9  ;;  %v1092_v5 = vsel %vm111_vm2, %v1083_v20, 0.0  ;;  %v1094_v9 = vsel %vm111_vm2, %v1084_v31, 0.0  ;;  %v13682_v31 = vpop.permute.xlu1 %1070 }
 0x142   :  { %v13646_v33 = vpop.permute.xlu0 %1111  ;;  %v1093_v49 = vadd.f32 %v1092_v5, %v1091_v30  ;;  %17631 = vst [vmem:[#allocation42_spill] sm:$0xff] %v13682_v31  ;;  %v1086_v50 = vmul.f32 %v13682_v31, %v13546_v46 }
 0x144   :  { %v1095_v30 = vadd.f32 %v1094_v9, %v1093_v49 }
 0x146   :  { %v13648_v47 = vpop.permute.xlu0 %1119 }
 0x14a   :  { %v13656_v51 = vpop.permute.xlu0 %1123 }
 0x14e   :  { %v13664_v29 = vpop.permute.xlu0 %1127 }
 0x152   :  { %v13679_v32 = vpop.permute.xlu0 %1131 }
 0x170   :  { %s13772_s27 = spop %12895 }
 0x1ef   :  { %v243_v39 = vpop.f32.mrb[0].mxu0 }
 0x1f0   :  { %v11197_v44 = vpop.f32.mrb[1].mxu0  ;;  %v267_v24 = vsub.f32 %v13457_v60, %v243_v39 }
 0x1f2   :  { %v272_v60 = vmul.f32 0.999995, %v267_v24 }
 0x1f3   :  { %v248_v45 = vpop.f32.mrb[2].mxu0 }
 0x1f4   :  { %v268_v19 = vsub.f32 %v13459_v21, %v248_v45  ;;  %v11200_v43 = vpop.f32.mrb[3].mxu0  ;;  %v11272_v25 = vpop.f32.mrb[16].mxu1  ;;  %v1096_v21 = vsel %vm111_vm2, %v1085_v16, 0.0 }
 0x1f5   :  { %vm897_vm9 = vcmp.ge.f32.partialorder %v11272_v25, 0.0  ;;  %v905_v44 = vmul.f32 %v11272_v25, %v13672_v48  ;;  %v857_v20 = vpop.f32.mrb[17].mxu1 }
 0x1f6   :  { %v273_v39 = vmul.f32 0.999995, %v268_v19  ;;  %vm896_vm10 = vcmp.ge.f32.partialorder %v857_v20, 0.0  ;;  %v904_v5 = vmul.f32 %v857_v20, %v13672_v48 }
 0x1f7   :  { %v13684_v15 = vsel %vm897_vm9, %v11272_v25, %v905_v44  ;;  %v253_v41 = vpop.f32.mrb[4].mxu0 }
 0x1f8   :  { %17632 = vst [vmem:[#allocation43_spill] sm:$0xff] %v13684_v15  ;;  %v13687_v43 = vpack.c.bf16 %v273_v39, %v272_v60  ;;  %v1177_v45 = vmul.f32 %v13650_v42, %v13684_v15  ;;  %v13691_v6 = vsel %vm896_vm10, %v857_v20, %v904_v5  ;;  %v11203_v24 = vpop.f32.mrb[5].mxu0  ;;  %v11275_v19 = vpop.f32.mrb[18].mxu1  ;;  %v269_v44 = vsub.f32 %v13461_v22, %v253_v41 }
 0x1f9   :  { %17633 = vst [vmem:[#allocation44_spill] sm:$0xff] %v13691_v6  ;;  %v1176_v9 = vmul.f32 %v13646_v33, %v13691_v6  ;;  %vm899_vm11 = vcmp.ge.f32.partialorder %v11275_v19, 0.0  ;;  %v907_v25 = vmul.f32 %v11275_v19, %v13672_v48  ;;  %v867_v49 = vpop.f32.mrb[19].mxu1  ;;  %v1097_v60 = vadd.f32 %v1096_v21, %v1095_v30  ;;  %v13707_v15 = vpop.permute.xlu0 %1135 }
 0x1fa   :  { %v1185_v16 = vsel %vm111_vm2, %v1177_v45, 0.0  ;;  %vm898_vm12 = vcmp.ge.f32.partialorder %v867_v49, 0.0  ;;  %v906_v20 = vmul.f32 %v867_v49, %v13672_v48  ;;  %12568 = vmatprep.subr.bf16.mxu0 %v13687_v43  ;;  %12592 = vmatprep.subr.bf16.mxu1 %v13687_v43  ;;  %v1098_v30 = vsel %vm111_vm2, %v1086_v50, 0.0  ;;  %v13715_v21 = vpop.permute.xlu1 %1074 }
 0x1fb   :  { %v1184_v39 = vsel %vm111_vm2, %v1176_v9, 0.0  ;;  %v13704_v5 = vsel %vm899_vm11, %v11275_v19, %v907_v25  ;;  %v258_v24 = vpop.f32.mrb[6].mxu0  ;;  %12570 = vmatpush3.bf16.msra.mxu0 %v13687_v43  ;;  %17636 = vst [vmem:[#allocation47_spill] sm:$0xff] %v13715_v21 }
 0x1fc   :  { %17634 = vst [vmem:[#allocation45_spill] sm:$0xff] %v13704_v5  ;;  %v1186_v45 = vadd.f32 %v1185_v16, %v1184_v39  ;;  %v1179_v22 = vmul.f32 %v13656_v51, %v13704_v5  ;;  %v13711_v41 = vsel %vm898_vm12, %v867_v49, %v906_v20  ;;  %v270_v6 = vsub.f32 %v13463_v23, %v258_v24  ;;  %v11206_v31 = vpop.f32.mrb[7].mxu0  ;;  %v11278_v26 = vpop.f32.mrb[20].mxu1 }
 0x1fd   :  { %17635 = vst [vmem:[#allocation46_spill] sm:$0xff] %v13711_v41  ;;  %v1178_v19 = vmul.f32 %v13648_v47, %v13711_v41  ;;  %vm901_vm13 = vcmp.ge.f32.partialorder %v11278_v26, 0.0  ;;  %v909_v9 = vmul.f32 %v11278_v26, %v13672_v48  ;;  %v877_v25 = vpop.f32.mrb[21].mxu1  ;;  %v274_v16 = vmul.f32 0.999995, %v269_v44 }
 0x1fe   :  { %v275_v39 = vmul.f32 0.999995, %v270_v6  ;;  %vm900_vm14 = vcmp.ge.f32.partialorder %v877_v25, 0.0  ;;  %v908_v49 = vmul.f32 %v877_v25, %v13672_v48  ;;  %v1087_v23 = vmul.f32 %v13715_v21, %v13556_v28 }
 0x1ff   :  { %v1189_v31 = vsel %vm111_vm2, %v1179_v22, 0.0  ;;  %v1187_v50 = vsel %vm111_vm2, %v1178_v19, 0.0  ;;  %v13725_v20 = vsel %vm901_vm13, %v11278_v26, %v909_v9  ;;  %v263_v24 = vpop.f32.mrb[8].mxu0  ;;  %v1099_v9 = vadd.f32 %v1098_v30, %v1097_v60 }
 0x200   :  { %17637 = vst [vmem:[#allocation48_spill] sm:$0xff] %v13725_v20  ;;  %v1188_v5 = vadd.f32 %v1187_v50, %v1186_v45  ;;  %v13727_v41 = vpack.c.bf16 %v275_v39, %v274_v16  ;;  %v13729_v8 = vsel %vm900_vm14, %v877_v25, %v908_v49  ;;  %v1181_v6 = vmul.f32 %v13679_v32, %v13725_v20  ;;  %v11209_v44 = vpop.f32.mrb[9].mxu0  ;;  %v11281_v37 = vpop.f32.mrb[22].mxu1 }
 0x201   :  { %17638 = vst [vmem:[#allocation49_spill] sm:$0xff] %v13729_v8  ;;  %v1180_v21 = vmul.f32 %v13664_v29, %v13729_v8  ;;  %v271_v22 = vsub.f32 %v13475_v61, %v263_v24  ;;  %vm903_vm15 = vcmp.ge.f32.partialorder %v11281_v37, 0.0  ;;  %v911_v26 = vmul.f32 %v11281_v37, %v13672_v48  ;;  %v887_v19 = vpop.f32.mrb[23].mxu1  ;;  %v13739_v16 = vpop.permute.xlu0 %1139 }
 0x202   :  { %v1190_v45 = vadd.f32 %v1189_v31, %v1188_v5  ;;  %vm902_vm4 = vcmp.ge.f32.partialorder %v887_v19, 0.0  ;;  %v910_v25 = vmul.f32 %v887_v19, %v13672_v48  ;;  %12572 = vmatprep.subr.bf16.mxu0 %v13727_v41  ;;  %v13741_v39 = vpop.permute.xlu1 %1078  ;;  %v1193_v50 = vsel %vm111_vm2, %v1181_v6, 0.0 }
 0x203   :  { %v1191_v49 = vsel %vm111_vm2, %v1180_v21, 0.0  ;;  %v13745_v61 = vmul.f32 0.999995, %v271_v22  ;;  %v13747_v24 = vsel %vm903_vm15, %v11281_v37, %v911_v26  ;;  %12574 = vmatpush3.bf16.msra.mxu0 %v13727_v41  ;;  %v11250_v60 = vpop.f32.mrb[10].mxu0  ;;  %v1100_v8 = vsel %vm111_vm2, %v1087_v23, 0.0 }
 0x204   :  { %17639 = vst [vmem:[#allocation50_spill] sm:$0xff] %v13747_v24  ;;  %v1192_v5 = vadd.f32 %v1191_v49, %v1190_v45  ;;  %v13750_v30 = vsel %vm902_vm4, %v887_v19, %v910_v25  ;;  %v11308_v31 = vpop.f32.mrb[24].mxu1  ;;  %vm767_vm5 = vcmp.ge.f32.partialorder %v11250_v60, 0.0  ;;  %v776_v44 = vmul.f32 %v11250_v60, %v13672_v48  ;;  %v727_v20 = vpop.f32.mrb[11].mxu0 }
 0x205   :  { %17640 = vst [vmem:[#allocation51_spill] sm:$0xff] %v13750_v30  ;;  %v1182_v21 = vmul.f32 %v13707_v15, %v13750_v30  ;;  %11290 = vmatprep.subr.mxu0 %v13745_v61  ;;  %v1430_v37 = vpop.f32.mrb[25].mxu1  ;;  %v1183_v6 = vmul.f32 %v13739_v16, %v13747_v24  ;;  %vm766_vm6 = vcmp.ge.f32.partialorder %v727_v20, 0.0  ;;  %v775_v45 = vmul.f32 %v13672_v48, %v727_v20 }
 0x206   :  { %v1194_v22 = vadd.f32 %v1193_v50, %v1192_v5  ;;  %v13759_v26 = vsel %vm767_vm5, %v11250_v60, %v776_v44  ;;  %v13762_v19 = vadd.f32 %v1430_v37, %v13405_v35  ;;  %v1088_v23 = vmul.f32 %v13741_v39, %v13568_v3 }
 0x207   :  { %v1195_v25 = vsel %vm111_vm2, %v1182_v21, 0.0  ;;  %v1143_v49 = vmul.f32 %v13650_v42, %v13759_v26  ;;  %v1197_v30 = vsel %vm111_vm2, %v1183_v6, 0.0  ;;  %v11253_v24 = vpop.f32.mrb[12].mxu0  ;;  %11291 = vmatpush3.msra.mxu0 %v13745_v61  ;;  %v13775_v35 = vadd.f32 %v11308_v31, %v13418_v1 }
 0x208   :  { %17641 = vst [vmem:[#allocation52_spill] sm:$0xff] %v13762_v19  ;;  %v1196_v50 = vadd.f32 %v1195_v25, %v1194_v22  ;;  %v13777_v60 = vsel %vm766_vm6, %v727_v20, %v775_v45  ;;  %vm769_vm7 = vcmp.ge.f32.partialorder %v11253_v24, 0.0  ;;  %v737_v5 = vpop.f32.mrb[13].mxu0  ;;  %11293 = vmatmul.mubr.msk.f32.vlgmr.msra.gmra.mrb[18].mxu0 %vm111_vm2, %v13506_v10  ;;  %v11311_v44 = vpop.f32.mrb[26].mxu1  ;;  %11318 = vmatprep.subr.msk.mxu0 %vm367_vm0, %v13524_v63  ;;  %vm2461_vm13 = vcmask 523264  }
 0x209   :  { %17642 = vst [vmem:[#allocation53_spill] sm:$0xff] %v13775_v35  ;;  %v1101_v21 = vadd.f32 %v1100_v8, %v1099_v9  ;;  %v1151_v37 = vsel %vm111_vm2, %v1143_v49, 0.0  ;;  %v1142_v6 = vmul.f32 %v13646_v33, %v13777_v60  ;;  %v778_v1 = vmul.f32 %v11253_v24, %v13672_v48  ;;  %11342 = vmatprep.mubr.msk.f32.mxu1 %vm111_vm2, %v13762_v19  ;;  %v1440_v20 = vpop.f32.mrb[27].mxu1 }
 0x20a   :  { %11295 = vmatprep.mubr.msk.f32.mxu0 %vm111_vm2, %v13513_v7  ;;  %v1198_v31 = vadd.f32 %v1197_v30, %v1196_v50  ;;  %vm768_vm8 = vcmp.ge.f32.partialorder %v737_v5, 0.0  ;;  %v777_v22 = vmul.f32 %v13672_v48, %v737_v5  ;;  %11319 = vmatpush3.msk.msra.mxu0 %vm367_vm0, %v13524_v63  ;;  %v2279_v8 = vstv %s13772_s27 }
 0x20b   :  { %11343 = vmatmul.mubr.msk.f32.vlgmr.msra.gmra.mrb[32].mxu1 %vm111_vm2, %v13775_v35  ;;  %v1102_v9 = vsel %vm111_vm2, %v1088_v23, 0.0  ;;  %v1150_v45 = vsel %vm111_vm2, %v1142_v6, 0.0  ;;  %v13800_v25 = vsel %vm769_vm7, %v11253_v24, %v778_v1  ;;  %12584 = vmatprep.subr.bf16.mxu0 %v13482_v36  ;;  %v11256_v30 = vpop.f32.mrb[14].mxu0  ;;  %12946 = vrcp.f32 %v2279_v8 }
 0x20c   :  { %12594 = vmatpush3.bf16.msra.mxu1 %v13687_v43  ;;  %v1152_v49 = vadd.f32 %v1151_v37, %v1150_v45  ;;  %v1145_v63 = vmul.f32 %v13656_v51, %v13800_v25  ;;  %v13806_v50 = vsel %vm768_vm8, %v737_v5, %v777_v22  ;;  %v747_v7 = vpop.f32.mrb[15].mxu0  ;;  %11296 = vmatmul.mubr.msk.f32.gmra.mrb[20].mxu0 %vm111_vm2, %v13528_v0  ;;  %v11314_v23 = vpop.f32.mrb[28].mxu1  ;;  %vm771_vm0 = vcmp.ge.f32.partialorder %v11256_v30, 0.0 }
 0x20d   :  { %12596 = vmatprep.subr.bf16.mxu1 %v13727_v41  ;;  %v1144_v24 = vmul.f32 %v13648_v47, %v13806_v50  ;;  %v13814_v43 = vadd.f32 %v1440_v20, %v13428_v34  ;;  %11298 = vmatprep.mubr.msk.f32.mxu0 %vm111_vm2, %v13538_v11  ;;  %v1450_v37 = vpop.f32.mrb[29].mxu1  ;;  %v1103_v5 = vadd.f32 %v1102_v9, %v1101_v21  ;;  %vm770_vm9 = vcmp.ge.f32.partialorder %v747_v7, 0.0 }
 0x20e   :  { %v13819_v6 = vadd.f32 %v11311_v44, %v13454_v59  ;;  %v780_v1 = vmul.f32 %v11256_v30, %v13672_v48  ;;  %v1155_v22 = vsel %vm111_vm2, %v1145_v63, 0.0  ;;  %v779_v34 = vmul.f32 %v13672_v48, %v747_v7 }
 0x20f   :  { %17643 = vst [vmem:[#allocation54_spill] sm:$0xff] %v13814_v43  ;;  %v1153_v45 = vsel %vm111_vm2, %v1144_v24, 0.0  ;;  %11345 = vmatprep.mubr.msk.f32.mxu1 %vm111_vm2, %v13814_v43  ;;  %v11259_v20 = vpop.f32.mrb[16].mxu0  ;;  %v1199_v8 = vrot.slane %v1198_v31, 4  ;;  %v13846_v11 = vadd.f32 %v11314_v23, %v13494_v2 }
 0x210   :  { %17644 = vst [vmem:[#allocation55_spill] sm:$0xff] %v13819_v6  ;;  %12598 = vmatpush3.bf16.msra.mxu1 %v13727_v41  ;;  %v1154_v21 = vadd.f32 %v1153_v45, %v1152_v49  ;;  %v13829_v59 = vsel %vm771_vm0, %v11256_v30, %v780_v1  ;;  %v757_v44 = vpop.f32.mrb[17].mxu0  ;;  %v11317_v9 = vpop.f32.mrb[30].mxu1  ;;  %v13836_v24 = vsel %vm770_vm9, %v747_v7, %v779_v34  ;;  %v1104_v49 = vrot.slane %v1103_v5, 4 }
 0x211   :  { %11346 = vmatmul.mubr.msk.f32.gmra.mrb[34].mxu1 %vm111_vm2, %v13819_v6  ;;  %11384 = vmatprep.subr.mxu1 %v13745_v61  ;;  %v1147_v63 = vmul.f32 %v13679_v32, %v13829_v59  ;;  %v13839_v41 = vadd.f32 %v1450_v37, %v13478_v58  ;;  %v1460_v30 = vpop.f32.mrb[31].mxu1  ;;  %v1146_v1 = vmul.f32 %v13664_v29, %v13836_v24  ;;  %vm773_vm10 = vcmp.ge.f32.partialorder %v11259_v20, 0.0 }
 0x212   :  { %11299 = vmatmul.mubr.msk.f32.gmra.mrb[22].mxu0 %vm111_vm2, %v13546_v46  ;;  %v1156_v45 = vadd.f32 %v1155_v22, %v1154_v21  ;;  %17646 = vst [vmem:[#allocation57_spill] sm:$0xff] %v13846_v11  ;;  %v1200_v58 = vadd.f32 %v1199_v8, %v1198_v31  ;;  %v782_v34 = vmul.f32 %v11259_v20, %v13672_v48  ;;  %vm772_vm11 = vcmp.ge.f32.partialorder %v757_v44, 0.0 }
 0x213   :  { %17645 = vst [vmem:[#allocation56_spill] sm:$0xff] %v13839_v41  ;;  %11301 = vmatprep.mubr.msk.f32.mxu0 %vm111_vm2, %v13556_v28  ;;  %11348 = vmatprep.mubr.msk.f32.mxu1 %vm111_vm2, %v13839_v41  ;;  %v1159_v7 = vsel %vm111_vm2, %v1147_v63, 0.0  ;;  %v1157_v37 = vsel %vm111_vm2, %v1146_v1, 0.0  ;;  %v1105_v23 = vadd.f32 %v1104_v49, %v1103_v5  ;;  %v13868_v63 = vadd.f32 %v1460_v30, %v13518_v4 }
 0x214   :  { %11385 = vmatpush3.msra.mxu1 %v13745_v61  ;;  %v1158_v2 = vadd.f32 %v1157_v37, %v1156_v45  ;;  %v13860_v22 = vsel %vm773_vm10, %v11259_v20, %v782_v34  ;;  %v781_v61 = vmul.f32 %v13672_v48, %v757_v44  ;;  %v1201_v1 = vrot.slane %v1200_v58, 2  ;;  %v17650_v34 = vld [vmem:[#allocation10_spill] sm:$0xff] }
 0x215   :  { %11349 = vmatmul.mubr.msk.f32.gmra.mrb[36].mxu1 %vm111_vm2, %v13846_v11  ;;  %v12947_v31 = vpop.eup %12946  ;;  %v1149_v8 = vmul.f32 %v13739_v16, %v13860_v22  ;;  %17647 = vst [vmem:[#allocation58_spill] sm:$0xff] %v13868_v63  ;;  %v13873_v5 = vadd.f32 %v11317_v9, %v13558_v54 }
 0x216   :  { %11302 = vmatmul.mubr.msk.f32.gmra.mrb[24].mxu0 %vm111_vm2, %v13568_v3  ;;  %v1160_v21 = vadd.f32 %v1159_v7, %v1158_v2  ;;  %v13870_v45 = vsel %vm772_vm11, %v757_v44, %v781_v61  ;;  %11351 = vmatprep.mubr.msk.f32.mxu1 %vm111_vm2, %v13868_v63  ;;  %v2281_v4 = vmul.f32 %v12947_v31, %v13360_v13 }
 0x217   :  { %11320 = vmatprep.mubr.msk.f32.mxu0 %vm342_vm1, %v13304_v52  ;;  %17648 = vst [vmem:[#allocation59_spill] sm:$0xff] %v13873_v5  ;;  %v1148_v20 = vmul.f32 %v13707_v15, %v13870_v45  ;;  %v1106_v52 = vrot.slane %v1105_v23, 2  ;;  %v1163_v54 = vsel %vm111_vm2, %v1149_v8, 0.0  ;;  %v2282_v9 = vmul.f32 %v12947_v31, %v13362_v17 }
 0x218   :  { %v2286_v49 = vadd.f32 %v13431_v38, %v2281_v4 }
 0x219   :  { %11352 = vmatmul.mubr.msk.f32.gmra.mrb[38].mxu1 %vm111_vm2, %v13873_v5  ;;  %v1161_v44 = vsel %vm111_vm2, %v1148_v20, 0.0  ;;  %v1107_v13 = vadd.f32 %v1106_v52, %v1105_v23  ;;  %v2287_v17 = vadd.f32 %v13434_v62, %v2282_v9  ;;  %v17654_v20 = vld [vmem:[#allocation20_spill] sm:$0xff] }
 0x21a   :  { %11321 = vmatmul.mubr.msk.f32.vlgmr.msra.gmra.mrb[26].mxu0 %vm342_vm1, %v13309_v53  ;;  %11386 = vmatprep.mubr.msk.f32.mxu1 %vm111_vm2, %v13762_v19  ;;  %v1202_v53 = vadd.f32 %v1201_v1, %v1200_v58  ;;  %v1162_v30 = vadd.f32 %v1161_v44, %v1160_v21  ;;  %v17649_v58 = vld [vmem:[#allocation14_spill] sm:$0xff]  ;;  %v13916_v61 = vmul.f32 0.5, %v2286_v49  ;;  %v17653_v21 = vld [vmem:[#allocation19_spill] sm:$0xff]  ;;  %v17655_v44 = vld [vmem:[#allocation13_spill] sm:$0xff] }
 0x21b   :  { %12586 = vmatpush3.bf16.msra.mxu0 %v13482_v36  ;;  %11323 = vmatprep.mubr.msk.f32.mxu0 %vm342_vm1, %v13319_v55  ;;  %v2283_v55 = vmul.f32 %v12947_v31, %v13364_v27  ;;  %v1108_v2 = vrot.slane %v1107_v13, 1  ;;  %v17652_v27 = vld [vmem:[#allocation12_spill] sm:$0xff]  ;;  %v13918_v8 = vmul.f32 0.5, %v2287_v17  ;;  %v17658_v49 = vld [vmem:[#allocation15_spill] sm:$0xff] }
 0x21c   :  { %12588 = vmatprep.subr.bf16.mxu0 %v13487_v18  ;;  %v1164_v36 = vadd.f32 %v1163_v54, %v1162_v30  ;;  %v1203_v7 = vrot.slane %v1202_v53, 1 }
 0x21d   :  { %11387 = vmatmul.mubr.msk.f32.vlgmr.msra.gmra.mrb[40].mxu1 %vm111_vm2, %v13775_v35  ;;  %v2288_v1 = vadd.f32 %v17653_v21, %v2283_v55 }
 0x21e   :  { %11324 = vmatmul.mubr.msk.f32.gmra.mrb[28].mxu0 %vm342_vm1, %v13324_v56  ;;  %11389 = vmatprep.mubr.msk.f32.mxu1 %vm111_vm2, %v13814_v43  ;;  %v2284_v56 = vmul.f32 %v12947_v31, %v17649_v58  ;;  %v1165_v37 = vrot.slane %v1164_v36, 4  ;;  %v1204_v4 = vadd.f32 %v1203_v7, %v1202_v53  ;;  %v12600_v53 = vpack.c.bf16 %v13918_v8, %v13916_v61 }
 0x21f   :  { %12590 = vmatpush3.bf16.msra.mxu0 %v13487_v18  ;;  %11326 = vmatprep.mubr.msk.f32.mxu0 %vm342_vm1, %v17650_v34  ;;  %v17651_v18 = vld [vmem:[#allocation11_spill] sm:$0xff]  ;;  %v13935_v30 = vmul.f32 0.5, %v2288_v1  ;;  %v13941_v58 = vstv %s10075_s28  ;;  %s16503_s28 = sld [smem:[#allocation4 + $0xb]] }
 0x220   :  { %11362 = vmatprep.subr.mxu0 %v13499_v57  ;;  %v1166_v23 = vadd.f32 %v1165_v37, %v1164_v36  ;;  %v2289_v52 = vadd.f32 %v17654_v20, %v2284_v56 }
 0x221   :  { %11390 = vmatmul.mubr.msk.f32.gmra.mrb[42].mxu1 %vm111_vm2, %v13819_v6  ;;  %17656 = vst [vmem:[#allocation14_spill] sm:$0xff] %v13935_v30 }
 0x222   :  { %11327 = vmatmul.mubr.msk.f32.gmra.mrb[30].mxu0 %vm342_vm1, %v17651_v18  ;;  %11392 = vmatprep.mubr.msk.f32.mxu1 %vm111_vm2, %v13839_v41  ;;  %v1167_v54 = vrot.slane %v1166_v23, 2  ;;  %v13937_v36 = vmul.f32 0.5, %v2289_v52  ;;  %v17660_v52 = vld [vmem:[#allocation38_spill] sm:$0xff] }
 0x223   :  { %11363 = vmatpush3.msra.mxu0 %v13499_v57  ;;  %11329 = vmatprep.mubr.msk.f32.mxu0 %vm342_vm1, %v17652_v27  ;;  %v13925_v57 = vadd.f32 %v1108_v2, %v1107_v13  ;;  %v2285_v13 = vmul.f32 %v12947_v31, %v17658_v49 }
 0x224   :  { %12599 = vmatprep.subr.bf16.mxu0 %v17608_v14  ;;  %v1168_v9 = vadd.f32 %v1167_v54, %v1166_v23  ;;  %17657 = vst [vmem:[#allocation10_spill] sm:$0xff] %v13937_v36  ;;  %v12603_v7 = vpack.c.bf16 %v13937_v36, %v13935_v30  ;;  %v17661_v54 = vld [vmem:[#allocation37_spill] sm:$0xff] }
 0x225   :  { %11393 = vmatmul.mubr.msk.f32.gmra.mrb[44].mxu1 %vm111_vm2, %v13846_v11  ;;  %v1205_v17 = vadd.f32 %v1204_v4, %v13925_v57  ;;  %v2290_v31 = vadd.f32 %v13443_v12, %v2285_v13  ;;  %v1986_v4 = vmul.f32 %v13775_v35, %v17660_v52 }
 0x226   :  { %11330 = vmatmul.mubr.msk.f32.gmra.mrb[32].mxu0 %vm342_vm1, %v17655_v44  ;;  %11395 = vmatprep.mubr.msk.f32.mxu1 %vm111_vm2, %v13868_v63  ;;  %v1169_v55 = vrot.slane %v1168_v9, 1  ;;  %v1985_v44 = vmul.f32 %v13762_v19, %v17661_v54 }
 0x227   :  { %11364 = vmatprep.mubr.msk.f32.mxu0 %vm111_vm2, %v13762_v19  ;;  %v1207_v37 = vmul.f32 %v1205_v17, %v13941_v58  ;;  %vm1206_vm1 = vcmp.ge.f32.partialorder %v1205_v17, 0.0  ;;  %v13960_v2 = vmul.f32 0.5, %v2290_v31  ;;  %v1994_v49 = vsel %vm111_vm2, %v1986_v4, 0.0 }
 0x228   :  { %v1170_v56 = vadd.f32 %v1169_v55, %v1168_v9  ;;  %v17662_v9 = vld [vmem:[#allocation39_spill] sm:$0xff]  ;;  %v1993_v13 = vsel %vm111_vm2, %v1985_v44, 0.0 }
 0x229   :  { %11396 = vmatmul.mubr.msk.f32.gmra.mrb[46].mxu1 %vm111_vm2, %v13873_v5  ;;  %17659 = vst [vmem:[#allocation11_spill] sm:$0xff] %v13960_v2  ;;  %v13962_v23 = vsel %vm1206_vm1, %v1205_v17, %v1207_v37  ;;  %v1995_v55 = vadd.f32 %v1994_v49, %v1993_v13  ;;  %v17664_v37 = vld [vmem:[#allocation41_spill] sm:$0xff]  ;;  %v17666_v44 = vld [vmem:[#allocation47_spill] sm:$0xff] }
 0x22a   :  { %11365 = vmatmul.mubr.msk.f32.vlgmr.msra.gmra.mrb[34].mxu0 %vm111_vm2, %v13775_v35  ;;  %v1171_v34 = vadd.f32 %v1170_v56, %v13925_v57  ;;  %v17663_v56 = vld [vmem:[#allocation40_spill] sm:$0xff] }
 0x22b   :  { %11367 = vmatprep.mubr.msk.f32.mxu0 %vm111_vm2, %v13814_v43  ;;  %12601 = vmatpush3.bf16.msra.mxu0 %v12600_v53  ;;  %v1987_v53 = vmul.f32 %v13814_v43, %v17662_v9  ;;  %v17665_v9 = vld [vmem:[#allocation42_spill] sm:$0xff] }
 0x22c   :  { %12602 = vmatprep.subr.bf16.mxu0 %v17608_v14  ;;  %vm1172_vm12 = vcmp.ge.f32.partialorder %v1171_v34, 0.0  ;;  %v1174_v18 = vmul.f32 %v13941_v58, %v1171_v34  ;;  %v1990_v4 = vmul.f32 %v13846_v11, %v17665_v9  ;;  %v14020_v9 = vpop.permute.xlu1 %477 }
 0x22d   :  { %v1996_v17 = vsel %vm111_vm2, %v1987_v53, 0.0  ;;  %v1991_v53 = vmul.f32 %v13868_v63, %v17666_v44  ;;  %17667 = vst [vmem:[#allocation12_spill] sm:$0xff] %v14020_v9 }
 0x22e   :  { %11368 = vmatmul.mubr.msk.f32.gmra.mrb[36].mxu0 %vm111_vm2, %v13819_v6  ;;  %v13964_v27 = vsel %vm1172_vm12, %v1171_v34, %v1174_v18  ;;  %v1997_v31 = vadd.f32 %v1996_v17, %v1995_v55  ;;  %v1989_v34 = vmul.f32 %v13839_v41, %v17664_v37  ;;  %v2002_v49 = vsel %vm111_vm2, %v1990_v4, 0.0 }
 0x22f   :  { %11370 = vmatprep.mubr.msk.f32.mxu0 %vm111_vm2, %v13839_v41  ;;  %12604 = vmatpush3.bf16.msra.mxu0 %v12603_v7  ;;  %v1988_v7 = vmul.f32 %v13819_v6, %v17663_v56  ;;  %v2004_v17 = vsel %vm111_vm2, %v1991_v53, 0.0  ;;  %v1992_v55 = vmul.f32 %v13873_v5, %v13741_v39  ;;  %v10186_v39 = vld [vmem:[%s17402_s3 + $0xc0] sm:$0xff]  ;;  %v14079_v41 = vld [vmem:[%s17403_s4 + $0x48] sm:$0xff] }
 0x230   :  { %11406 = vmatprep.subr.mxu0 %v17609_v40  ;;  %v2000_v54 = vsel %vm111_vm2, %v1989_v34, 0.0  ;;  %v14032_v44 = vpop.permute.xlu1 %485  ;;  %2448 = vperm.xlu1 %12925, %v14079_v41  }
 0x231   :  { %v1998_v18 = vsel %vm111_vm2, %v1988_v7, 0.0  ;;  %v2006_v7 = vsel %vm111_vm2, %v1992_v55, 0.0  ;;  %17669 = vst [vmem:[#allocation15_spill] sm:$0xff] %v14032_v44 }
 0x232   :  { %11371 = vmatmul.mubr.msk.f32.gmra.mrb[38].mxu0 %vm111_vm2, %v13846_v11  ;;  %v1999_v52 = vadd.f32 %v1998_v18, %v1997_v31 }
 0x233   :  { %11373 = vmatprep.mubr.msk.f32.mxu0 %vm111_vm2, %v13868_v63  ;;  %11407 = vmatpush3.msra.mxu0 %v13960_v2 }
 0x234   :  { %v2001_v1 = vadd.f32 %v2000_v54, %v1999_v52  ;;  %v10182_v54 = vld [vmem:[%s17402_s3 + $0x80] sm:$0xff]  ;;  %v14064_v21 = vpop.permute.xlu1 %489 }
 0x235   :  { %11439 = vmatprep.mubr.msk.f32.mxu1 %vm2461_vm13, %v10182_v54  ;;  %17679 = vst [vmem:[#allocation42_spill] sm:$0xff] %v14064_v21 }
 0x236   :  { %11374 = vmatmul.mubr.msk.f32.gmra.mrb[40].mxu0 %vm111_vm2, %v13873_v5  ;;  %v2003_v13 = vadd.f32 %v2002_v49, %v2001_v1  ;;  %v14029_v1 = vpop.permute.xlu0 %481 }
 0x237   :  { %11408 = vmatprep.mubr.msk.f32.mxu0 %vm13079_vm3, %v17609_v40  ;;  %17668 = vst [vmem:[#allocation13_spill] sm:$0xff] %v14029_v1 }
 0x238   :  { %v2005_v56 = vadd.f32 %v2004_v17, %v2003_v13  ;;  %v17671_v13 = vld [vmem:[#allocation30_spill] sm:$0xff] }
 0x239   :  { %v14038_v17 = vadd.f32 %v17671_v13, %v14020_v9  ;;  %v17677_v13 = vld [vmem:[#allocation34_spill] sm:$0xff] }
 0x23a   :  { %11409 = vmatmul.mubr.msk.f32.vlgmr.msra.gmra.mrb[42].mxu0 %vm111_vm2, %v13916_v61  ;;  %v2007_v31 = vadd.f32 %v2006_v7, %v2005_v56  ;;  %v14034_v53 = vpop.permute.xlu0 %493  ;;  %v14110_v9 = vld [vmem:[%s17403_s4 + $0x40] sm:$0xff] }
 0x23b   :  { %11411 = vmatprep.mubr.msk.f32.mxu0 %vm13079_vm3, %v17609_v40  ;;  %17670 = vst [vmem:[#allocation38_spill] sm:$0xff] %v14034_v53  ;;  %17672 = vst [vmem:[#allocation37_spill] sm:$0xff] %v14038_v17  ;;  %2443 = vperm.xlu0 %12924, %v14110_v9  }
 0x23c   :  { %v2008_v37 = vrot.slane %v2007_v31, 4 }
 0x23e   :  { %11412 = vmatmul.mubr.msk.f32.gmra.mrb[44].mxu0 %vm111_vm2, %v13918_v8  ;;  %v2009_v34 = vadd.f32 %v2008_v37, %v2007_v31  ;;  %v17673_v31 = vld [vmem:[#allocation32_spill] sm:$0xff] }
 0x23f   :  { %11414 = vmatprep.mubr.msk.f32.mxu0 %vm13079_vm3, %v17609_v40  ;;  %v14045_v37 = vadd.f32 %v17673_v31, %v14032_v44 }
 0x240   :  { %v2010_v18 = vrot.slane %v2009_v34, 2 }
 0x241   :  { %17674 = vst [vmem:[#allocation39_spill] sm:$0xff] %v14045_v37 }
 0x242   :  { %11415 = vmatmul.mubr.msk.f32.gmra.mrb[46].mxu0 %vm111_vm2, %v13935_v30  ;;  %v2011_v52 = vadd.f32 %v2010_v18, %v2009_v34  ;;  %v17675_v34 = vld [vmem:[#allocation29_spill] sm:$0xff] }
 0x243   :  { %11417 = vmatprep.mubr.msk.f32.mxu0 %vm13079_vm3, %v17609_v40  ;;  %v14049_v18 = vadd.f32 %v17675_v34, %v14029_v1  ;;  %v14127_v1 = vld [vmem:[%s17403_s4 + $0x58] sm:$0xff] }
 0x244   :  { %v2012_v4 = vrot.slane %v2011_v52, 1  ;;  %2458 = vperm.xlu0 %12924, %v14127_v1  }
 0x245   :  { %17676 = vst [vmem:[#allocation40_spill] sm:$0xff] %v14049_v18  ;;  %v14155_v18 = vpop.permute.xlu1 %497 }
 0x246   :  { %11418 = vmatmul.mubr.msk.f32.gmra.mrb[48].mxu0 %vm111_vm2, %v13937_v36  ;;  %v14041_v7 = vadd.f32 %v2012_v4, %v2011_v52  ;;  %17691 = vst [vmem:[#allocation61_spill] sm:$0xff] %v14155_v18 }
 0x247   :  { %11420 = vmatprep.mubr.msk.f32.mxu0 %vm13079_vm3, %v17609_v40  ;;  %v14054_v40 = vadd.f32 %v17677_v13, %v14034_v53 }
 0x249   :  { %17678 = vst [vmem:[#allocation41_spill] sm:$0xff] %v14054_v40 }
 0x24a   :  { %11421 = vmatmul.mubr.msk.f32.gmra.mrb[50].mxu0 %vm111_vm2, %v13960_v2 }
 0x24b   :  { %11461 = vmatprep.mubr.msk.f32.mxu0 %vm2461_vm13, %v10186_v39 }
 0x2db   :  { %v11294_v49 = vpop.f32.mrb[18].mxu0 }
 0x2dc   :  { %vm1026_vm14 = vcmp.ge.f32.partialorder %v11294_v49, 0.0  ;;  %v1034_v55 = vmul.f32 %v11294_v49, %v13672_v48  ;;  %v986_v56 = vpop.f32.mrb[19].mxu0 }
 0x2dd   :  { %vm1025_vm15 = vcmp.ge.f32.partialorder %v986_v56, 0.0  ;;  %v1033_v54 = vmul.f32 %v986_v56, %v13672_v48 }
 0x2de   :  { %v11344_v39 = vpop.f32.mrb[32].mxu1  ;;  %v14056_v14 = vsel %vm1026_vm14, %v11294_v49, %v1034_v55 }
 0x2df   :  { %vm1704_vm4 = vcmp.ge.f32.partialorder %v11344_v39, 0.0  ;;  %v1712_v52 = vmul.f32 %v11344_v39, %v13672_v48  ;;  %v1664_v4 = vpop.f32.mrb[33].mxu1  ;;  %v1210_v31 = vmul.f32 %v13650_v42, %v14056_v14  ;;  %v14061_v12 = vsel %vm1025_vm15, %v986_v56, %v1033_v54  ;;  %v11297_v20 = vpop.f32.mrb[20].mxu0 }
 0x2e0   :  { %vm1703_vm5 = vcmp.ge.f32.partialorder %v1664_v4, 0.0  ;;  %v1711_v34 = vmul.f32 %v1664_v4, %v13672_v48  ;;  %v1209_v13 = vmul.f32 %v13646_v33, %v14061_v12  ;;  %vm1028_vm6 = vcmp.ge.f32.partialorder %v11297_v20, 0.0  ;;  %v996_v5 = vpop.f32.mrb[21].mxu0 }
 0x2e1   :  { %v14068_v49 = vsel %vm1704_vm4, %v11344_v39, %v1712_v52  ;;  %v1036_v55 = vmul.f32 %v11297_v20, %v13672_v48  ;;  %v1218_v11 = vsel %vm111_vm2, %v1210_v31, 0.0  ;;  %vm1027_vm7 = vcmp.ge.f32.partialorder %v996_v5, 0.0 }
 0x2e2   :  { %17680 = vst [vmem:[#allocation47_spill] sm:$0xff] %v14068_v49  ;;  %v2015_v56 = vmul.f32 %v14068_v49, %v13650_v42  ;;  %v14074_v54 = vsel %vm1703_vm5, %v1664_v4, %v1711_v34  ;;  %v1217_v39 = vsel %vm111_vm2, %v1209_v13, 0.0  ;;  %v1035_v31 = vmul.f32 %v996_v5, %v13672_v48  ;;  %v17682_v4 = vld [vmem:[#allocation31_spill] sm:$0xff] }
 0x2e3   :  { %17681 = vst [vmem:[#allocation30_spill] sm:$0xff] %v14074_v54  ;;  %v2014_v52 = vmul.f32 %v14074_v54, %v13646_v33  ;;  %v14084_v6 = vsel %vm1028_vm6, %v11297_v20, %v1036_v55  ;;  %v14090_v34 = vadd.f32 %v17682_v4, %v14064_v21  ;;  %v1219_v43 = vadd.f32 %v1218_v11, %v1217_v39  ;;  %v14098_v20 = vld [vmem:[%s17403_s4 + $0x50] sm:$0xff] }
 0x2e4   :  { %v2023_v35 = vsel %vm111_vm2, %v2015_v56, 0.0  ;;  %v1212_v19 = vmul.f32 %v13656_v51, %v14084_v6  ;;  %v11347_v13 = vpop.f32.mrb[34].mxu1  ;;  %v14101_v63 = vsel %vm1027_vm7, %v996_v5, %v1035_v31  ;;  %2453 = vperm.xlu1 %12925, %v14098_v20  }
 0x2e5   :  { %17683 = vst [vmem:[#allocation32_spill] sm:$0xff] %v14090_v34  ;;  %v2022_v55 = vsel %vm111_vm2, %v2014_v52, 0.0  ;;  %vm1706_vm8 = vcmp.ge.f32.partialorder %v11347_v13, 0.0  ;;  %v1714_v4 = vmul.f32 %v11347_v13, %v13672_v48  ;;  %v1674_v53 = vpop.f32.mrb[35].mxu1  ;;  %v11300_v11 = vpop.f32.mrb[22].mxu0  ;;  %v1211_v44 = vmul.f32 %v13648_v47, %v14101_v63 }
 0x2e6   :  { %v2024_v39 = vadd.f32 %v2023_v35, %v2022_v55  ;;  %v1222_v56 = vsel %vm111_vm2, %v1212_v19, 0.0  ;;  %vm1705_vm0 = vcmp.ge.f32.partialorder %v1674_v53, 0.0  ;;  %v1006_v21 = vpop.f32.mrb[23].mxu0  ;;  %v1713_v52 = vmul.f32 %v1674_v53, %v13672_v48  ;;  %v14118_v19 = vpop.permute.xlu0 %501 }
 0x2e7   :  { %v14112_v5 = vsel %vm1706_vm8, %v11347_v13, %v1714_v4  ;;  %vm1030_vm9 = vcmp.ge.f32.partialorder %v11300_v11, 0.0  ;;  %v1038_v31 = vmul.f32 %v11300_v11, %v13672_v48  ;;  %17685 = vst [vmem:[#allocation34_spill] sm:$0xff] %v14118_v19  ;;  %v1220_v35 = vsel %vm111_vm2, %v1211_v44, 0.0 }
 0x2e8   :  { %17684 = vst [vmem:[#allocation29_spill] sm:$0xff] %v14112_v5  ;;  %v2017_v55 = vmul.f32 %v14112_v5, %v13656_v51  ;;  %vm1029_vm10 = vcmp.ge.f32.partialorder %v1006_v21, 0.0  ;;  %v1037_v13 = vmul.f32 %v1006_v21, %v13672_v48  ;;  %v11350_v4 = vpop.f32.mrb[36].mxu1  ;;  %v1221_v49 = vadd.f32 %v1220_v35, %v1219_v43 }
 0x2e9   :  { %v14130_v54 = vsel %vm1705_vm0, %v1674_v53, %v1713_v52  ;;  %v14132_v2 = vsel %vm1030_vm9, %v11300_v11, %v1038_v31  ;;  %vm1708_vm11 = vcmp.ge.f32.partialorder %v11350_v4, 0.0  ;;  %v1684_v44 = vpop.f32.mrb[37].mxu1  ;;  %v11303_v3 = vpop.f32.mrb[24].mxu0  ;;  %v1716_v34 = vmul.f32 %v11350_v4, %v13672_v48  ;;  %v17688_v31 = vld [vmem:[#allocation36_spill] sm:$0xff] }
 0x2ea   :  { %17686 = vst [vmem:[#allocation31_spill] sm:$0xff] %v14130_v54  ;;  %v2016_v5 = vmul.f32 %v14130_v54, %v13648_v47  ;;  %v1214_v28 = vmul.f32 %v13679_v32, %v14132_v2  ;;  %v14138_v40 = vsel %vm1029_vm10, %v1006_v21, %v1037_v13  ;;  %v1016_v37 = vpop.f32.mrb[25].mxu0  ;;  %v1223_v53 = vadd.f32 %v1222_v56, %v1221_v49 }
 0x2eb   :  { %v1213_v43 = vmul.f32 %v13664_v29, %v14138_v40  ;;  %vm1707_vm1 = vcmp.ge.f32.partialorder %v1684_v44, 0.0  ;;  %v1715_v11 = vmul.f32 %v1684_v44, %v13672_v48  ;;  %v17687_v52 = vmov 2  }
 0x2ec   :  { %12928 = vset.pattern.permute.xlu1 %v17687_v52  ;;  %v14148_v35 = vadd.f32 %v17688_v31, %v14118_v19  ;;  %v2025_v21 = vsel %vm111_vm2, %v2016_v5, 0.0  ;;  %v14152_v13 = vsel %vm1708_vm11, %v11350_v4, %v1716_v34  ;;  %v2027_v54 = vsel %vm111_vm2, %v2017_v55, 0.0  ;;  %v11353_v55 = vpop.f32.mrb[38].mxu1  ;;  %12926 = vset.pattern.permute.xlu0 %v17687_v52 }
 0x2ed   :  { %17690 = vst [vmem:[#allocation60_spill] sm:$0xff] %v14152_v13  ;;  %v1224_v49 = vsel %vm111_vm2, %v1213_v43, 0.0  ;;  %v2019_v56 = vmul.f32 %v14152_v13, %v13679_v32  ;;  %v14160_v17 = vsel %vm1707_vm1, %v1684_v44, %v1715_v11  ;;  %v2026_v46 = vadd.f32 %v2025_v21, %v2024_v39  ;;  %v14162_v0 = vpop.f32.mrb[26].mxu0  ;;  %v1694_v11 = vpop.f32.mrb[39].mxu1  ;;  %2977 = vperm.xlu0 %12926, %v14110_v9  }
 0x2ee   :  { %17689 = vst [vmem:[#allocation36_spill] sm:$0xff] %v14148_v35  ;;  %17692 = vst [vmem:[#allocation62_spill] sm:$0xff] %v14160_v17  ;;  %v1225_v31 = vadd.f32 %v1224_v49, %v1223_v53  ;;  %v2018_v5 = vmul.f32 %v14160_v17, %v13664_v29  ;;  %vm1032_vm12 = vcmp.ge.f32.partialorder %v11303_v3, 0.0  ;;  %v1040_v34 = vmul.f32 %v11303_v3, %v13672_v48  ;;  %v14167_v4 = vpop.f32.mrb[27].mxu0 }
 0x2ef   :  { %17693 = vst [vmem:[#allocation63_spill] sm:$0xff] %v14162_v0  ;;  %17694 = vst [vmem:[#allocation64_spill] sm:$0xff] %v14167_v4  ;;  %v1226_v43 = vsel %vm111_vm2, %v1214_v28, 0.0  ;;  %v2028_v19 = vadd.f32 %v2027_v54, %v2026_v46  ;;  %vm1031_vm14 = vcmp.ge.f32.partialorder %v1016_v37, 0.0  ;;  %v1039_v44 = vmul.f32 %v1016_v37, %v13672_v48 }
 0x2f0   :  { %v2029_v39 = vsel %vm111_vm2, %v2018_v5, 0.0  ;;  %v14173_v53 = vsel %vm1032_vm12, %v11303_v3, %v1040_v34  ;;  %v1227_v21 = vadd.f32 %v1226_v43, %v1225_v31  ;;  %vm1710_vm15 = vcmp.ge.f32.partialorder %v11353_v55, 0.0  ;;  %v11388_v5 = vpop.f32.mrb[40].mxu1 }
 0x2f1   :  { %17695 = vst [vmem:[#allocation65_spill] sm:$0xff] %v14173_v53  ;;  %v2031_v49 = vsel %vm111_vm2, %v2019_v56, 0.0  ;;  %v2030_v4 = vadd.f32 %v2029_v39, %v2028_v19  ;;  %v14177_v0 = vsel %vm1031_vm14, %v1016_v37, %v1039_v44  ;;  %v1718_v46 = vmul.f32 %v11353_v55, %v13672_v48  ;;  %v14180_v28 = vpop.f32.mrb[28].mxu0  ;;  %v17698_v19 = vld [vmem:[#allocation33_spill] sm:$0xff]  ;;  %v14193_v56 = vpop.permute.xlu1 %505  ;;  %2981 = vperm.xlu0 %12926, %v14079_v41  }
 0x2f2   :  { %17696 = vst [vmem:[#allocation66_spill] sm:$0xff] %v14180_v28  ;;  %v1216_v54 = vmul.f32 %v13739_v16, %v14173_v53  ;;  %v1215_v3 = vmul.f32 %v13707_v15, %v14177_v0  ;;  %vm1709_vm4 = vcmp.ge.f32.partialorder %v1694_v11, 0.0  ;;  %v1717_v31 = vmul.f32 %v1694_v11, %v13672_v48  ;;  %v14187_v34 = vpop.f32.mrb[29].mxu0  ;;  %17700 = vst [vmem:[#allocation68_spill] sm:$0xff] %v14193_v56  ;;  %v1922_v39 = vpop.f32.mrb[41].mxu1 }
 0x2f3   :  { %17697 = vst [vmem:[#allocation67_spill] sm:$0xff] %v14187_v34  ;;  %v14191_v37 = vadd.f32 %v17698_v19, %v14155_v18  ;;  %v14195_v43 = vsel %vm1710_vm15, %v11353_v55, %v1718_v46  ;;  %v2032_v44 = vadd.f32 %v2031_v49, %v2030_v4  ;;  %vm1962_vm5 = vcmp.ge.f32.partialorder %v11388_v5, 0.0  ;;  %v17704_v49 = vld [vmem:[#allocation35_spill] sm:$0xff] }
 0x2f4   :  { %17701 = vst [vmem:[#allocation69_spill] sm:$0xff] %v14195_v43  ;;  %v1228_v52 = vsel %vm111_vm2, %v1215_v3, 0.0  ;;  %v2021_v28 = vmul.f32 %v14195_v43, %v13739_v16  ;;  %v14200_v13 = vsel %vm1709_vm4, %v1694_v11, %v1717_v31  ;;  %v1970_v34 = vmul.f32 %v11388_v5, %v13672_v48  ;;  %v11391_v43 = vpop.f32.mrb[42].mxu1 }
 0x2f5   :  { %17699 = vst [vmem:[#allocation33_spill] sm:$0xff] %v14191_v37  ;;  %17702 = vst [vmem:[#allocation70_spill] sm:$0xff] %v14200_v13  ;;  %v1229_v19 = vadd.f32 %v1228_v52, %v1227_v21  ;;  %v2020_v18 = vmul.f32 %v14200_v13, %v13707_v15  ;;  %vm1961_vm6 = vcmp.ge.f32.partialorder %v1922_v39, 0.0  ;;  %v1969_v55 = vmul.f32 %v1922_v39, %v13672_v48  ;;  %v14207_v4 = vpop.f32.mrb[30].mxu0  ;;  %v1932_v35 = vpop.f32.mrb[43].mxu1 }
 0x2f6   :  { %17703 = vst [vmem:[#allocation71_spill] sm:$0xff] %v14207_v4  ;;  %v14211_v46 = vadd.f32 %v17704_v49, %v14193_v56  ;;  %v1230_v11 = vsel %vm111_vm2, %v1216_v54, 0.0  ;;  %v2035_v3 = vsel %vm111_vm2, %v2021_v28, 0.0  ;;  %v14215_v31 = vsel %vm1962_vm5, %v11388_v5, %v1970_v34  ;;  %v14217_v52 = vpop.f32.mrb[31].mxu0  ;;  %2985 = vperm.xlu0 %12926, %v14098_v20  }
 0x2f7   :  { %17706 = vst [vmem:[#allocation72_spill] sm:$0xff] %v14215_v31  ;;  %17707 = vst [vmem:[#allocation73_spill] sm:$0xff] %v14217_v52  ;;  %v1231_v21 = vadd.f32 %v1230_v11, %v1229_v19  ;;  %v2033_v17 = vsel %vm111_vm2, %v2020_v18, 0.0  ;;  %v2081_v13 = vmul.f32 %v14215_v31, %v13650_v42  ;;  %v14222_v4 = vsel %vm1961_vm6, %v1922_v39, %v1969_v55 }
 0x2f8   :  { %17705 = vst [vmem:[#allocation35_spill] sm:$0xff] %v14211_v46  ;;  %17708 = vst [vmem:[#allocation74_spill] sm:$0xff] %v14222_v4  ;;  %v2034_v49 = vadd.f32 %v2033_v17, %v2032_v44  ;;  %v2080_v54 = vmul.f32 %v14222_v4, %v13646_v33  ;;  %vm1964_vm7 = vcmp.ge.f32.partialorder %v11391_v43, 0.0  ;;  %v1972_v28 = vmul.f32 %v11391_v43, %v13672_v48  ;;  %v11394_v44 = vpop.f32.mrb[44].mxu1 }
 0x2f9   :  { %v1232_v5 = vrot.slane %v1231_v21, 4  ;;  %v2089_v34 = vsel %vm111_vm2, %v2081_v13, 0.0  ;;  %vm1963_vm8 = vcmp.ge.f32.partialorder %v1932_v35, 0.0  ;;  %v1971_v18 = vmul.f32 %v1932_v35, %v13672_v48  ;;  %v14230_v19 = vpop.f32.mrb[32].mxu0 }
 0x2fa   :  { %17709 = vst [vmem:[#allocation75_spill] sm:$0xff] %v14230_v19  ;;  %v2036_v39 = vadd.f32 %v2035_v3, %v2034_v49  ;;  %v2088_v55 = vsel %vm111_vm2, %v2080_v54, 0.0  ;;  %v14233_v17 = vsel %vm1964_vm7, %v11391_v43, %v1972_v28  ;;  %v14235_v11 = vpop.f32.mrb[33].mxu0  ;;  %v1942_v3 = vpop.f32.mrb[45].mxu1  ;;  %vm1966_vm0 = vcmp.ge.f32.partialorder %v11394_v44, 0.0 }
 0x2fb   :  { %17710 = vst [vmem:[#allocation76_spill] sm:$0xff] %v14233_v17  ;;  %17711 = vst [vmem:[#allocation77_spill] sm:$0xff] %v14235_v11  ;;  %v1233_v52 = vadd.f32 %v1232_v5, %v1231_v21  ;;  %v2090_v13 = vadd.f32 %v2089_v34, %v2088_v55  ;;  %v2083_v31 = vmul.f32 %v14233_v17, %v13656_v51  ;;  %v17713_v28 = vmov 3   ;;  %v13016_v34 = vld [vmem:[#allocation7 + $0x78] sm:$0xff]  ;;  %v13017_v17 = vld [vmem:[#allocation7 + $0x80] sm:$0xff] }
 0x2fc   :  { %v14243_v4 = vsel %vm1963_vm8, %v1932_v35, %v1971_v18  ;;  %v2037_v49 = vrot.slane %v2036_v39, 4  ;;  %v1974_v54 = vmul.f32 %v11394_v44, %v13672_v48  ;;  %12927 = vset.pattern.permute.xlu0 %v17713_v28  ;;  %vm1965_vm9 = vcmp.ge.f32.partialorder %v1942_v3, 0.0  ;;  %v11397_v11 = vpop.f32.mrb[46].mxu1 }
 0x2fd   :  { %17712 = vst [vmem:[#allocation78_spill] sm:$0xff] %v14243_v4  ;;  %v2082_v43 = vmul.f32 %v14243_v4, %v13648_v47  ;;  %v1234_v19 = vrot.slane %v1233_v52, 2  ;;  %v1973_v21 = vmul.f32 %v1942_v3, %v13672_v48  ;;  %v11366_v5 = vpop.f32.mrb[34].mxu0  ;;  %v2296_v55 = vmul.f32 0.999995, %v13016_v34  ;;  %3010 = vperm.xlu0 %12927, %v14110_v9   ;;  %v1952_v34 = vpop.f32.mrb[47].mxu1 }
 0x2fe   :  { %v2038_v35 = vadd.f32 %v2037_v49, %v2036_v39  ;;  %v14252_v56 = vsel %vm1966_vm0, %v11394_v44, %v1974_v54  ;;  %v1793_v38 = vpop.f32.mrb[35].mxu0  ;;  %v2297_v4 = vmul.f32 0.999995, %v13017_v17  ;;  %v2093_v28 = vsel %vm111_vm2, %v2083_v31, 0.0 }
 0x2ff   :  { %v2091_v18 = vsel %vm111_vm2, %v2082_v43, 0.0  ;;  %17714 = vst [vmem:[#allocation79_spill] sm:$0xff] %v14252_v56  ;;  %v1235_v46 = vadd.f32 %v1234_v19, %v1233_v52  ;;  %v14256_v10 = vsel %vm1965_vm9, %v1942_v3, %v1973_v21  ;;  %v2085_v39 = vmul.f32 %v14252_v56, %v13679_v32 }
 0x300   :  { %v2092_v37 = vadd.f32 %v2091_v18, %v2090_v13  ;;  %17715 = vst [vmem:[#allocation80_spill] sm:$0xff] %v14256_v10  ;;  %v2039_v53 = vrot.slane %v2038_v35, 2  ;;  %v2084_v44 = vmul.f32 %v14256_v10, %v13664_v29  ;;  %vm1968_vm10 = vcmp.ge.f32.partialorder %v11397_v11, 0.0 }
 0x301   :  { %v1236_v49 = vrot.slane %v1235_v46, 1  ;;  %v1976_v52 = vmul.f32 %v11397_v11, %v13672_v48  ;;  %v11369_v19 = vpop.f32.mrb[36].mxu0  ;;  %3014 = vperm.xlu0 %12927, %v14079_v41   ;;  %vm1967_vm11 = vcmp.ge.f32.partialorder %v1952_v34, 0.0  ;;  %v14268_v54 = vstv %s14237_s18  ;;  %s10457_s18 = sld [smem:[#allocation4 + $0xc]] }
 0x302   :  { %v2094_v43 = vadd.f32 %v2093_v28, %v2092_v37  ;;  %v2040_v17 = vadd.f32 %v2039_v53, %v2038_v35  ;;  %v2095_v13 = vsel %vm111_vm2, %v2084_v44, 0.0  ;;  %v1803_v3 = vpop.f32.mrb[37].mxu0  ;;  %v1975_v37 = vmul.f32 %v1952_v34, %v13672_v48 }
 0x303   :  { %v1237_v21 = vadd.f32 %v1236_v49, %v1235_v46  ;;  %v14270_v56 = vsel %vm1968_vm10, %v11397_v11, %v1976_v52  ;;  %v2097_v10 = vsel %vm111_vm2, %v2085_v39, 0.0  ;;  %vm1833_vm1 = vcmp.ge.f32.partialorder %v11366_v5, 0.0 }
 0x304   :  { %v2096_v18 = vadd.f32 %v2095_v13, %v2094_v43  ;;  %17716 = vst [vmem:[#allocation81_spill] sm:$0xff] %v14270_v56  ;;  %v2041_v28 = vrot.slane %v2040_v17, 1  ;;  %v14274_v31 = vpack.c.bf16 %v2297_v4, %v2296_v55  ;;  %v14277_v53 = vsel %vm1967_vm11, %v1952_v34, %v1975_v37  ;;  %v13018_v43 = vld [vmem:[#allocation7 + $0x88] sm:$0xff] }
 0x305   :  { %v1238_v41 = vadd.f32 %v1237_v21, %v13925_v57  ;;  %v1841_v44 = vmul.f32 %v11366_v5, %v13672_v48  ;;  %v14280_v62 = vpop.f32.mrb[38].mxu0  ;;  %3018 = vperm.xlu0 %12927, %v14098_v20   ;;  %v2087_v11 = vmul.f32 %v14270_v56, %v13739_v16  ;;  %v2086_v39 = vmul.f32 %v14277_v53, %v13707_v15 }
 0x306   :  { %v2098_v35 = vadd.f32 %v2097_v10, %v2096_v18  ;;  %v2042_v46 = vadd.f32 %v2041_v28, %v2040_v17  ;;  %vm1832_vm12 = vcmp.ge.f32.partialorder %v1793_v38, 0.0  ;;  %v14287_v4 = vpop.f32.mrb[39].mxu0  ;;  %v1840_v55 = vmul.f32 %v1793_v38, %v13672_v48 }
 0x307   :  { %vm1239_vm14 = vcmp.ge.f32.partialorder %v1238_v41, 0.0  ;;  %v1240_v57 = vmul.f32 %v1238_v41, %v13941_v58  ;;  %v14290_v10 = vsel %vm1833_vm1, %v11366_v5, %v1841_v44  ;;  %v2099_v49 = vsel %vm111_vm2, %v2086_v39, 0.0 }
 0x308   :  { %v14294_v34 = vadd.f32 %v2042_v46, %v14041_v7  ;;  %vm1835_vm15 = vcmp.ge.f32.partialorder %v11369_v19, 0.0  ;;  %v14297_v52 = vmul.f32 0.999995, %v13018_v43  ;;  %v2100_v13 = vadd.f32 %v2099_v49, %v2098_v35 }
 0x309   :  { %v1241_v17 = vsel %vm1239_vm14, %v1238_v41, %v1240_v57  ;;  %v14299_v21 = vsel %vm1832_vm12, %v1793_v38, %v1840_v55  ;;  %v1843_v18 = vmul.f32 %v11369_v19, %v13672_v48  ;;  %v11375_v37 = vpop.f32.mrb[40].mxu0  ;;  %3022 = vperm.xlu0 %12927, %v14127_v1   ;;  %v17717_v5 = vmax.f32 %v13964_v27, %v13962_v23 }
 0x30a   :  { %v2101_v44 = vsel %vm111_vm2, %v2087_v11, 0.0  ;;  %v2048_v46 = vmul.f32 %v14290_v10, %v13650_v42  ;;  %v2047_v41 = vmul.f32 %v14299_v21, %v13646_v33  ;;  %v1823_v35 = vpop.f32.mrb[41].mxu0  ;;  %vm1834_vm4 = vcmp.ge.f32.partialorder %v1803_v3, 0.0 }
 0x30b   :  { %v1243_v28 = vmax.f32 %v17717_v5, %v1241_v17  ;;  %v2102_v38 = vadd.f32 %v2101_v44, %v2100_v13  ;;  %v14311_v39 = vsel %vm1835_vm15, %v11369_v19, %v1843_v18  ;;  %v1842_v57 = vmul.f32 %v1803_v3, %v13672_v48 }
 0x30c   :  { %v2045_v11 = vmul.f32 %v14294_v34, %v13941_v58  ;;  %v2050_v42 = vmul.f32 %v14311_v39, %v13656_v51  ;;  %v2055_v19 = vsel %vm111_vm2, %v2047_v41, 0.0  ;;  %v17718_v18 = vmov 1  }
 0x30d   :  { %v1244_v1 = vsub.f32 %v13964_v27, %v1243_v28  ;;  %v1247_v55 = vsub.f32 %v13962_v23, %v1243_v28  ;;  %v1250_v49 = vsub.f32 %v1241_v17, %v1243_v28  ;;  %v2103_v43 = vrot.slane %v2102_v38, 4  ;;  %v2392_v13 = vpop.f32.mrb[42].mxu0  ;;  %12929 = vset.pattern.permute.xlu0 %v17718_v18  ;;  %v17722_v18 = vld [vmem:[#allocation43_spill] sm:$0xff] }
 0x30e   :  { %v14320_v33 = vsel %vm1834_vm4, %v1803_v3, %v1842_v57  ;;  %2560 = vperm.xlu0 %12929, %v14110_v9   ;;  %v2060_v28 = vsel %vm111_vm2, %v2050_v42, 0.0  ;;  %v2056_v51 = vsel %vm111_vm2, %v2048_v46, 0.0  ;;  %vm1837_vm5 = vcmp.ge.f32.partialorder %v14280_v62, 0.0  ;;  %v11410_v3 = vpop.f32.mrb[43].mxu0 }
 0x30f   :  { %v1245_v5 = vmul.f32 1.442695, %v1244_v1  ;;  %v1248_v44 = vmul.f32 1.442695, %v1247_v55  ;;  %v1251_v27 = vmul.f32 1.442695, %v1250_v49  ;;  %v2049_v23 = vmul.f32 %v14320_v33, %v13648_v47 }
 0x310   :  { %v2104_v17 = vadd.f32 %v2103_v43, %v2102_v38  ;;  %v2057_v41 = vadd.f32 %v2056_v51, %v2055_v19  ;;  %v1845_v1 = vmul.f32 %v14280_v62, %v13672_v48  ;;  %vm1836_vm6 = vcmp.ge.f32.partialorder %v14287_v4, 0.0 }
 0x311   :  { %12948 = vpow2.f32 %v1245_v5  ;;  %v2058_v57 = vsel %vm111_vm2, %v2049_v23, 0.0  ;;  %v1844_v47 = vmul.f32 %v14287_v4, %v13672_v48  ;;  %v2397_v9 = vpop.f32.mrb[44].mxu0  ;;  %vm1839_vm7 = vcmp.ge.f32.partialorder %v11375_v37, 0.0 }
 0x312   :  { %12950 = vpow2.f32 %v1248_v44  ;;  %v2105_v55 = vrot.slane %v2104_v17, 2  ;;  %v2059_v46 = vadd.f32 %v2058_v57, %v2057_v41  ;;  %v14337_v38 = vsel %vm1837_vm5, %v14280_v62, %v1845_v1  ;;  %v11413_v49 = vpop.f32.mrb[45].mxu0  ;;  %2568 = vperm.xlu0 %12929, %v14098_v20  }
 0x313   :  { %12952 = vpow2.f32 %v1251_v27  ;;  %v2052_v42 = vmul.f32 %v14337_v38, %v13679_v32  ;;  %v14343_v19 = vsel %vm1836_vm6, %v14287_v4, %v1844_v47  ;;  %v1847_v5 = vmul.f32 %v11375_v37, %v13672_v48  ;;  %v14375_v49 = vld [vmem:[#allocation7 + $0xd0] sm:$0xff] }
 0x314   :  { %v2106_v43 = vadd.f32 %v2105_v55, %v2104_v17  ;;  %v2051_v44 = vmul.f32 %v14343_v19, %v13664_v29  ;;  %v2061_v27 = vadd.f32 %v2060_v28, %v2059_v46  ;;  %vm1838_vm8 = vcmp.ge.f32.partialorder %v1823_v35, 0.0  ;;  %v14364_v55 = vld [vmem:[#allocation7 + $0xc8] sm:$0xff] }
 0x315   :  { %v1846_v62 = vmul.f32 %v1823_v35, %v13672_v48  ;;  %vm2044_vm0 = vcmp.ge.f32.partialorder %v14294_v34, 0.0  ;;  %v14350_v20 = vsel %vm1839_vm7, %v11375_v37, %v1847_v5  ;;  %v2416_v17 = vsub.f32 %v13916_v61, %v2392_v13  ;;  %v2402_v32 = vpop.f32.mrb[46].mxu0  ;;  %v14362_v13 = vld [vmem:[#allocation7 + $0xa0] sm:$0xff]  ;;  %v14373_v46 = vld [vmem:[#allocation7 + $0xa8] sm:$0xff] }
 0x316   :  { %v2107_v23 = vrot.slane %v2106_v43, 1  ;;  %v2062_v4 = vsel %vm111_vm2, %v2051_v44, 0.0  ;;  %v2054_v51 = vmul.f32 %v14350_v20, %v13739_v16  ;;  %v2417_v29 = vsub.f32 %v13918_v8, %v2397_v9  ;;  %v11416_v28 = vpop.f32.mrb[47].mxu0 }
 0x317   :  { %v14356_v3 = vsel %vm1838_vm8, %v1823_v35, %v1846_v62  ;;  %v17719_v41 = vmov 0   ;;  %v2063_v57 = vadd.f32 %v2062_v4, %v2061_v27  ;;  %v2421_v1 = vmul.f32 0.999995, %v2416_v17  ;;  %v14390_v28 = vld [vmem:[#allocation7 + $0xb0] sm:$0xff] }
 0x318   :  { %12931 = vset.pattern.permute.xlu0 %v17719_v41  ;;  %v2108_v48 = vadd.f32 %v2107_v23, %v2106_v43  ;;  %v2053_v37 = vmul.f32 %v14356_v3, %v13707_v15  ;;  %v14369_v16 = vsel %vm2044_vm0, %v14294_v34, %v2045_v11  ;;  %v2064_v35 = vsel %vm111_vm2, %v2052_v42, 0.0  ;;  %v17721_v41 = vld [vmem:[#allocation44_spill] sm:$0xff] }
 0x319   :  { %v2422_v47 = vmul.f32 0.999995, %v2417_v29  ;;  %v2418_v9 = vsub.f32 %v13935_v30, %v2402_v32  ;;  %v2068_v43 = vsel %vm111_vm2, %v2054_v51, 0.0  ;;  %v2065_v5 = vadd.f32 %v2064_v35, %v2063_v57  ;;  %v2407_v27 = vpop.f32.mrb[48].mxu0  ;;  %v17720_v35 = vld [vmem:[#allocation51_spill] sm:$0xff] }
 0x31a   :  { %v2109_v15 = vadd.f32 %v2108_v48, %v14041_v7  ;;  %v2066_v44 = vsel %vm111_vm2, %v2053_v37, 0.0  ;;  %v2419_v42 = vsub.f32 %v13937_v36, %v2407_v27  ;;  %v11419_v23 = vpop.f32.mrb[49].mxu0  ;;  %v14392_v48 = vld [vmem:[#allocation7 + $0xd8] sm:$0xff] }
 0x31b   :  { %v14380_v62 = vpop.eup %12948  ;;  %v14382_v34 = vpack.c.bf16 %v2422_v47, %v2421_v1  ;;  %v2423_v11 = vmul.f32 0.999995, %v2418_v9  ;;  %v2067_v29 = vadd.f32 %v2066_v44, %v2065_v5 }
 0x31c   :  { %v12951_v32 = vpop.eup %12950  ;;  %v1261_v4 = vmul.f32 %v14380_v62, %v13870_v45  ;;  %v2111_v51 = vmul.f32 %v2109_v15, %v13941_v58  ;;  %v2424_v9 = vmul.f32 0.999995, %v2419_v42  ;;  %v1255_v27 = vmul.f32 %v14380_v62, %v13777_v60 }
 0x31d   :  { %v12953_v37 = vpop.eup %12952  ;;  %v1253_v1 = vadd.f32 %v12951_v32, %v14380_v62  ;;  %v1269_v47 = vmul.f32 %v12951_v32, %v17720_v35  ;;  %vm2110_vm9 = vcmp.ge.f32.partialorder %v2109_v15, 0.0  ;;  %v2069_v5 = vadd.f32 %v2068_v43, %v2067_v29  ;;  %v14401_v44 = vpop.f32.mrb[50].mxu0 }
 0x31e   :  { %v1285_v45 = vmul.f32 %v12953_v37, %v14177_v0  ;;  %v1256_v23 = vmul.f32 %v14380_v62, %v13759_v26  ;;  %v14405_v36 = vpack.c.bf16 %v2424_v9, %v2423_v11  ;;  %v3792_v35 = vmax.f32 %v14390_v28, %v14392_v48  ;;  %v11422_v42 = vpop.f32.mrb[51].mxu0 }
 0x31f   :  { %v1254_v17 = vadd.f32 %v12953_v37, %v1253_v1  ;;  %v1277_v57 = vadd.f32 %v1269_v47, %v1261_v4  ;;  %v2070_v30 = vrot.slane %v2069_v5, 4  ;;  %v1263_v60 = vmul.f32 %v12951_v32, %v17721_v41  ;;  %v17723_v41 = vld [vmem:[#allocation46_spill] sm:$0xff]  ;;  %v17726_v42 = vld [vmem:[#allocation48_spill] sm:$0xff] }
 0x320   :  { %v1264_v0 = vmul.f32 %v12951_v32, %v17722_v18  ;;  %v1279_v43 = vmul.f32 %v12953_v37, %v14061_v12  ;;  %v14412_v56 = vsel %vm2110_vm9, %v2109_v15, %v2111_v51  ;;  %v1280_v26 = vmul.f32 %v12953_v37, %v14056_v14  ;;  %v17724_v18 = vld [vmem:[#allocation45_spill] sm:$0xff] }
 0x321   :  { %v1293_v29 = vadd.f32 %v1285_v45, %v1277_v57  ;;  %12954 = vrcp.f32 %v1254_v17  ;;  %v2071_v4 = vadd.f32 %v2070_v30, %v2069_v5  ;;  %v1271_v11 = vadd.f32 %v1263_v60, %v1255_v27  ;;  %v17725_v5 = vld [vmem:[#allocation49_spill] sm:$0xff] }
 0x322   :  { %v1272_v1 = vadd.f32 %v1264_v0, %v1256_v23  ;;  %v1257_v28 = vmul.f32 %v14380_v62, %v13806_v50  ;;  %v1258_v48 = vmul.f32 %v14380_v62, %v13800_v25  ;;  %v1265_v47 = vmul.f32 %v12951_v32, %v17723_v41  ;;  %v3782_v25 = vld [vmem:[#allocation7 + $0xb8] sm:$0xff]  ;;  %v3783_v0 = vld [vmem:[#allocation7 + $0xc0] sm:$0xff] }
 0x323   :  { %v1266_v9 = vmul.f32 %v12951_v32, %v17724_v18  ;;  %v1281_v12 = vmul.f32 %v12953_v37, %v14101_v63  ;;  %v2072_v17 = vrot.slane %v2071_v4, 2  ;;  %v1287_v15 = vadd.f32 %v1279_v43, %v1271_v11  ;;  %v3788_v43 = vld [vmem:[#allocation7 + $0xe0] sm:$0xff] }
 0x324   :  { %v1288_v51 = vadd.f32 %v1280_v26, %v1272_v1  ;;  %v1282_v14 = vmul.f32 %v12953_v37, %v14084_v6  ;;  %v1273_v30 = vadd.f32 %v1265_v47, %v1257_v28  ;;  %v1259_v27 = vmul.f32 %v14380_v62, %v13836_v24  ;;  %v3789_v26 = vld [vmem:[#allocation7 + $0xe8] sm:$0xff]  ;;  %v17728_v47 = vld [vmem:[#allocation65_spill] sm:$0xff] }
 0x325   :  { %v1274_v57 = vadd.f32 %v1266_v9, %v1258_v48  ;;  %v1260_v50 = vmul.f32 %v14380_v62, %v13829_v59  ;;  %v2073_v45 = vadd.f32 %v2072_v17, %v2071_v4  ;;  %v1267_v23 = vmul.f32 %v12951_v32, %v17725_v5  ;;  %v17727_v4 = vld [vmem:[#allocation50_spill] sm:$0xff] }
 0x326   :  { %v1268_v60 = vmul.f32 %v12951_v32, %v17726_v42  ;;  %v1283_v63 = vmul.f32 %v12953_v37, %v14138_v40  ;;  %v1289_v6 = vadd.f32 %v1281_v12, %v1273_v30  ;;  %v1284_v1 = vmul.f32 %v12953_v37, %v14132_v2 }
 0x327   :  { %v1290_v11 = vadd.f32 %v1282_v14, %v1274_v57  ;;  %v1262_v24 = vmul.f32 %v14380_v62, %v13860_v22  ;;  %v2074_v28 = vrot.slane %v2073_v45, 1  ;;  %v1275_v59 = vadd.f32 %v1267_v23, %v1259_v27 }
 0x328   :  { %v1276_v48 = vadd.f32 %v1268_v60, %v1260_v50  ;;  %v1270_v41 = vmul.f32 %v12951_v32, %v17727_v4  ;;  %v1286_v18 = vmul.f32 %v12953_v37, %v17728_v47  ;;  %v3793_v9 = vmax.f32 %v3782_v25, %v3788_v43 }
 0x329   :  { %v3794_v17 = vmax.f32 %v3783_v0, %v3789_v26  ;;  %v17729_v40 = vmax.f32 %v14362_v13, %v14364_v55  ;;  %v2075_v12 = vadd.f32 %v2074_v28, %v2073_v45  ;;  %v1291_v14 = vadd.f32 %v1283_v63, %v1275_v59 }
 0x32a   :  { %v1292_v2 = vadd.f32 %v1284_v1, %v1276_v48  ;;  %v1278_v30 = vadd.f32 %v1270_v41, %v1262_v24  ;;  %v17730_v22 = vmax.f32 %v14373_v46, %v14375_v49  ;;  %v14445_v32 = vmax.f32 %v3792_v35, 0.0  ;;  %v17731_v24 = vld [vmem:[#allocation16_spill] sm:$0xff] }
 0x32b   :  { %v14438_v5 = vmax.f32 %v17729_v40, 0.0  ;;  %v12955_v57 = vpop.eup %12954  ;;  %v14447_v37 = vmax.f32 %v3793_v9, 0.0  ;;  %v14449_v27 = vmax.f32 %v3794_v17, 0.0  ;;  %v2076_v13 = vadd.f32 %v2075_v12, %v14041_v7  ;;  %v17734_v48 = vld [vmem:[#allocation24_spill] sm:$0xff]  ;;  %v17736_v9 = vld [vmem:[#allocation26_spill] sm:$0xff] }
 0x32c   :  { %v14443_v62 = vmax.f32 %v17730_v22, 0.0  ;;  %v1302_v50 = vmul.f32 %v12955_v57, %v1293_v29  ;;  %v1296_v55 = vmul.f32 %v12955_v57, %v1287_v15  ;;  %v1297_v25 = vmul.f32 %v12955_v57, %v1288_v51  ;;  %v17732_v51 = vld [vmem:[#allocation22_spill] sm:$0xff] }
 0x32d   :  { %v1298_v45 = vmul.f32 %v12955_v57, %v1289_v6  ;;  %v1299_v23 = vmul.f32 %v12955_v57, %v1290_v11  ;;  %v1300_v42 = vmul.f32 %v12955_v57, %v1291_v14  ;;  %v1301_v60 = vmul.f32 %v12955_v57, %v1292_v2  ;;  %v17733_v11 = vld [vmem:[#allocation23_spill] sm:$0xff] }
 0x32e   :  { %v1310_v63 = vmul.f32 0.33333334, %v1302_v50  ;;  %vm2077_vm10 = vcmp.ge.f32.partialorder %v2076_v13, 0.0  ;;  %v2078_v46 = vmul.f32 %v2076_v13, %v13941_v58  ;;  %v1304_v49 = vmul.f32 0.33333334, %v1296_v55  ;;  %v17735_v58 = vld [vmem:[#allocation25_spill] sm:$0xff] }
 0x32f   :  { %v1305_v35 = vmul.f32 0.33333334, %v1297_v25  ;;  %v1306_v0 = vmul.f32 0.33333334, %v1298_v45  ;;  %v1307_v43 = vmul.f32 0.33333334, %v1299_v23  ;;  %v1294_v26 = vadd.f32 %v1286_v18, %v1278_v30 }
 0x330   :  { %v2079_v1 = vsel %vm2077_vm10, %v2076_v13, %v2078_v46  ;;  %v1312_v29 = vadd.f32 %v1304_v49, %v17731_v24  ;;  %v1308_v28 = vmul.f32 0.33333334, %v1300_v42  ;;  %v1309_v7 = vmul.f32 0.33333334, %v1301_v60  ;;  %v17737_v30 = vld [vmem:[#allocation37_spill] sm:$0xff]  ;;  %v17738_v42 = vld [vmem:[#allocation40_spill] sm:$0xff] }
 0x331   :  { %v2113_v15 = vmax.f32 %v14369_v16, %v2079_v1  ;;  %v1313_v6 = vadd.f32 %v1305_v35, %v17732_v51  ;;  %v1314_v59 = vadd.f32 %v1306_v0, %v17733_v11  ;;  %v1315_v4 = vadd.f32 %v1307_v43, %v17734_v48  ;;  %v17739_v46 = vld [vmem:[#allocation39_spill] sm:$0xff]  ;;  %v17740_v35 = vld [vmem:[#allocation32_spill] sm:$0xff] }
 0x332   :  { %v1320_v41 = vmul.f32 0.999995, %v1312_v29  ;;  %v1316_v47 = vadd.f32 %v1308_v28, %v17735_v58  ;;  %v1317_v17 = vadd.f32 %v1309_v7, %v17736_v9  ;;  %v1303_v40 = vmul.f32 %v12955_v57, %v1294_v26 }
 0x333   :  { %v2114_v18 = vmax.f32 %v2113_v15, %v14412_v56  ;;  %v1321_v12 = vmul.f32 0.999995, %v1313_v6  ;;  %v1322_v14 = vmul.f32 0.999995, %v1314_v59  ;;  %v1323_v2 = vmul.f32 0.999995, %v1315_v4 }
 0x334   :  { %v1328_v22 = vadd.f32 %v1320_v41, %v17737_v30  ;;  %v1324_v50 = vmul.f32 0.999995, %v1316_v47  ;;  %v1325_v13 = vmul.f32 0.999995, %v1317_v17  ;;  %v1311_v55 = vmul.f32 0.33333334, %v1303_v40 }
 0x335   :  { %v2115_v25 = vsub.f32 %v14369_v16, %v2114_v18  ;;  %v2118_v45 = vsub.f32 %v2079_v1, %v2114_v18  ;;  %v2121_v23 = vsub.f32 %v14412_v56, %v2114_v18  ;;  %v1329_v60 = vadd.f32 %v1321_v12, %v17738_v42  ;;  %v17741_v15 = vld [vmem:[#allocation41_spill] sm:$0xff]  ;;  %v17743_v4 = vld [vmem:[#allocation27_spill] sm:$0xff]  ;;  %v17744_v17 = vld [vmem:[#allocation28_spill] sm:$0xff] }
 0x336   :  { %vm1336_vm11 = vcmp.ge.f32.partialorder %v1328_v22, 0.0  ;;  %v1345_v57 = vmul.f32 %v14268_v54, %v1328_v22  ;;  %v1330_v49 = vadd.f32 %v1322_v14, %v17739_v46  ;;  %v1331_v0 = vadd.f32 %v1323_v2, %v17740_v35  ;;  %v17742_v6 = vld [vmem:[#allocation33_spill] sm:$0xff]  ;;  %v13019_v14 = vld [vmem:[#allocation7 + $0x90] sm:$0xff]  ;;  %v17746_v46 = vld [vmem:[#allocation35_spill] sm:$0xff] }
 0x337   :  { %v2116_v43 = vmul.f32 1.442695, %v2115_v25  ;;  %v2119_v26 = vmul.f32 1.442695, %v2118_v45  ;;  %v2122_v24 = vmul.f32 1.442695, %v2121_v23  ;;  %v1346_v29 = vmul.f32 %v14268_v54, %v1329_v60 }
 0x338   :  { %vm1337_vm1 = vcmp.ge.f32.partialorder %v1329_v60, 0.0  ;;  %v1353_v28 = vsel %vm1336_vm11, %v1328_v22, %v1345_v57  ;;  %vm1338_vm12 = vcmp.ge.f32.partialorder %v1330_v49, 0.0  ;;  %vm1339_vm14 = vcmp.ge.f32.partialorder %v1331_v0, 0.0  ;;  %v17745_v25 = vld [vmem:[#allocation36_spill] sm:$0xff] }
 0x339   :  { %12956 = vpow2.f32 %v2116_v43  ;;  %v1354_v56 = vsel %vm1337_vm1, %v1329_v60, %v1346_v29  ;;  %v1347_v16 = vmul.f32 %v14268_v54, %v1330_v49  ;;  %v1348_v1 = vmul.f32 %v14268_v54, %v1331_v0  ;;  %v17747_v43 = vld [vmem:[#allocation11_spill] sm:$0xff] }
 0x33a   :  { %12958 = vpow2.f32 %v2119_v26  ;;  %v12605_v7 = vpack.c.bf16 %v1354_v56, %v1353_v28  ;;  %v1332_v51 = vadd.f32 %v1324_v50, %v17741_v15  ;;  %v1333_v11 = vadd.f32 %v1325_v13, %v17742_v6 }
 0x33b   :  { %12960 = vpow2.f32 %v2122_v24  ;;  %v1355_v59 = vsel %vm1338_vm12, %v1330_v49, %v1347_v16  ;;  %v1356_v48 = vsel %vm1339_vm14, %v1331_v0, %v1348_v1  ;;  %v1318_v41 = vadd.f32 %v1310_v63, %v17743_v4  ;;  %v17751_v4 = vld [vmem:[#allocation31_spill] sm:$0xff] }
 0x33c   :  { %12606 = vmatprep.subr.bf16.mxu1 %v12605_v7  ;;  %12622 = vmatprep.subr.bf16.mxu0 %v12605_v7  ;;  %v12609_v58 = vpack.c.bf16 %v1356_v48, %v1355_v59  ;;  %vm1340_vm15 = vcmp.ge.f32.partialorder %v1332_v51, 0.0  ;;  %vm1341_vm4 = vcmp.ge.f32.partialorder %v1333_v11, 0.0  ;;  %v1349_v47 = vmul.f32 %v14268_v54, %v1332_v51  ;;  %v17750_v59 = vld [vmem:[#allocation47_spill] sm:$0xff] }
 0x33d   :  { %12608 = vmatpush3.bf16.msra.mxu1 %v12605_v7  ;;  %12624 = vmatpush3.bf16.msra.mxu0 %v12605_v7  ;;  %v1350_v9 = vmul.f32 %v14268_v54, %v1333_v11  ;;  %v1319_v40 = vadd.f32 %v1311_v55, %v17744_v17  ;;  %v1326_v18 = vmul.f32 0.999995, %v1318_v41  ;;  %v3800_v12 = vmul.f32 %v14438_v5, %v14438_v5 }
 0x33e   :  { %12610 = vmatprep.subr.bf16.mxu1 %v12609_v58  ;;  %12626 = vmatprep.subr.bf16.mxu0 %v12609_v58  ;;  %v1357_v63 = vsel %vm1340_vm15, %v1332_v51, %v1349_v47  ;;  %v2299_v2 = vmul.f32 0.999995, %v13019_v14  ;;  %v3801_v30 = vmul.f32 %v14443_v62, %v14443_v62  ;;  %v3802_v22 = vmul.f32 %v14445_v32, %v14445_v32  ;;  %v17748_v51 = vld [vmem:[#allocation70_spill] sm:$0xff] }
 0x33f   :  { %v1358_v50 = vsel %vm1341_vm4, %v1333_v11, %v1350_v9  ;;  %v1327_v13 = vmul.f32 0.999995, %v1319_v40  ;;  %v1334_v45 = vadd.f32 %v1326_v18, %v17745_v25  ;;  %v3803_v55 = vmul.f32 %v14447_v37, %v14447_v37  ;;  %v17749_v11 = vld [vmem:[#allocation30_spill] sm:$0xff] }
 0x340   :  { %v12613_v23 = vpack.c.bf16 %v1358_v50, %v1357_v63  ;;  %v3804_v42 = vmul.f32 %v14449_v27, %v14449_v27  ;;  %v3805_v60 = vsel %vm111_vm2, %v3800_v12, 0.0  ;;  %v3806_v57 = vsel %vm111_vm2, %v3801_v30, 0.0  ;;  %v17753_v50 = vld [vmem:[#allocation72_spill] sm:$0xff] }
 0x341   :  { %12612 = vmatpush3.bf16.msra.mxu1 %v12609_v58  ;;  %12628 = vmatpush3.bf16.msra.mxu0 %v12609_v58  ;;  %v1335_v49 = vadd.f32 %v1327_v13, %v17746_v46  ;;  %vm1342_vm5 = vcmp.ge.f32.partialorder %v1334_v45, 0.0  ;;  %v1351_v35 = vmul.f32 %v14268_v54, %v1334_v45  ;;  %v3807_v0 = vadd.f32 %v3806_v57, %v3805_v60 }
 0x342   :  { %v2420_v26 = vsub.f32 %v17747_v43, %v14401_v44  ;;  %12614 = vmatprep.subr.bf16.mxu1 %v12613_v23  ;;  %12630 = vmatprep.subr.bf16.mxu0 %v12613_v23  ;;  %v14495_v24 = vpack.c.bf16 %v2299_v2, %v14297_v52  ;;  %v3808_v29 = vsel %vm111_vm2, %v3802_v22, 0.0  ;;  %v3810_v28 = vsel %vm111_vm2, %v3803_v55, 0.0  ;;  %v17752_v22 = vld [vmem:[#allocation74_spill] sm:$0xff]  ;;  %v17768_v44 = vld [vmem:[#allocation12_spill] sm:$0xff] }
 0x343   :  { %v14499_v56 = vpop.eup %12956  ;;  %vm1343_vm6 = vcmp.ge.f32.partialorder %v1335_v49, 0.0  ;;  %v1352_v16 = vmul.f32 %v14268_v54, %v1335_v49  ;;  %v1359_v1 = vsel %vm1342_vm5, %v1334_v45, %v1351_v35  ;;  %v3809_v7 = vadd.f32 %v3808_v29, %v3807_v0  ;;  %v14549_v35 = vld [vmem:[%s17402_s3 + $0x90] sm:$0xff] }
 0x344   :  { %v14502_v15 = vpop.eup %12958  ;;  %v2132_v6 = vmul.f32 %v14499_v56, %v17748_v51  ;;  %v2126_v52 = vmul.f32 %v14499_v56, %v17749_v11  ;;  %v2127_v48 = vmul.f32 %v14499_v56, %v17750_v59  ;;  %v2128_v41 = vmul.f32 %v14499_v56, %v17751_v4  ;;  %v17759_v11 = vld [vmem:[#allocation62_spill] sm:$0xff]  ;;  %v14575_v4 = vld [vmem:[%s17402_s3 + $0x98] sm:$0xff] }
 0x345   :  { %v14512_v58 = vpop.eup %12960  ;;  %v2124_v47 = vadd.f32 %v14502_v15, %v14499_v56  ;;  %v2140_v9 = vmul.f32 %v14502_v15, %v14356_v3  ;;  %12616 = vmatpush3.bf16.msra.mxu1 %v12613_v23  ;;  %12632 = vmatpush3.bf16.msra.mxu0 %v12613_v23  ;;  %v1360_v17 = vsel %vm1343_vm6, %v1335_v49, %v1352_v16  ;;  %v3812_v40 = vsel %vm111_vm2, %v3804_v42, 0.0  ;;  %v17754_v23 = vld [vmem:[#allocation29_spill] sm:$0xff] }
 0x346   :  { %v2156_v18 = vmul.f32 %v14512_v58, %v14277_v53  ;;  %v12617_v12 = vpack.c.bf16 %v1360_v17, %v1359_v1  ;;  %v2134_v63 = vmul.f32 %v14502_v15, %v14299_v21  ;;  %v2135_v14 = vmul.f32 %v14502_v15, %v14290_v10  ;;  %v14533_v10 = vld [vmem:[%s17402_s3 + $0x88] sm:$0xff] }
 0x347   :  { %v2125_v2 = vadd.f32 %v14512_v58, %v2124_v47  ;;  %v2148_v30 = vadd.f32 %v2140_v9, %v2132_v6  ;;  %v2150_v3 = vmul.f32 %v14512_v58, %v17752_v22  ;;  %v2151_v13 = vmul.f32 %v14512_v58, %v17753_v50  ;;  %v14538_v21 = vld [vmem:[%s17402_s3 + $0xc8] sm:$0xff]  ;;  %v17765_v22 = vld [vmem:[#allocation69_spill] sm:$0xff] }
 0x348   :  { %12618 = vmatprep.subr.bf16.mxu1 %v12617_v12  ;;  %12634 = vmatprep.subr.bf16.mxu0 %v12617_v12  ;;  %v2142_v25 = vadd.f32 %v2134_v63, %v2126_v52  ;;  %v2143_v53 = vadd.f32 %v2135_v14, %v2127_v48  ;;  %v3811_v45 = vadd.f32 %v3810_v28, %v3809_v7  ;;  %v17755_v28 = vld [vmem:[#allocation78_spill] sm:$0xff]  ;;  %v17757_v7 = vld [vmem:[#allocation17_spill] sm:$0xff]  ;;  %v17760_v52 = vld [vmem:[#allocation60_spill] sm:$0xff]  ;;  %v14597_v50 = vmul.f32 0.999995, %v2420_v26 }
 0x349   :  { %v2164_v55 = vadd.f32 %v2156_v18, %v2148_v30  ;;  %12962 = vrcp.f32 %v2125_v2  ;;  %12620 = vmatpush3.bf16.msra.mxu1 %v12617_v12  ;;  %12636 = vmatpush3.bf16.msra.mxu0 %v12617_v12  ;;  %v2129_v42 = vmul.f32 %v14499_v56, %v17754_v23  ;;  %v2136_v60 = vmul.f32 %v14502_v15, %v14320_v33  ;;  %v17756_v33 = vld [vmem:[#allocation76_spill] sm:$0xff]  ;;  %v17764_v2 = vld [vmem:[#allocation79_spill] sm:$0xff] }
 0x34a   :  { %12654 = vmatprep.subr.bf16.mxu0 %v14382_v34  ;;  %12638 = vmatprep.subr.bf16.mxu1 %v14274_v31  ;;  %v2158_v57 = vadd.f32 %v2150_v3, %v2142_v25  ;;  %v2159_v46 = vadd.f32 %v2151_v13, %v2143_v53  ;;  %v3813_v49 = vadd.f32 %v3812_v40, %v3811_v45  ;;  %v17763_v63 = vld [vmem:[#allocation80_spill] sm:$0xff]  ;;  %v17767_v23 = vld [vmem:[#allocation63_spill] sm:$0xff] }
 0x34b   :  { %v2137_v0 = vmul.f32 %v14502_v15, %v14311_v39  ;;  %v2144_v29 = vadd.f32 %v2136_v60, %v2128_v41  ;;  %v2152_v16 = vmul.f32 %v14512_v58, %v17755_v28  ;;  %v2153_v1 = vmul.f32 %v14512_v58, %v17756_v33  ;;  %v17769_v26 = vld [vmem:[#allocation64_spill] sm:$0xff]  ;;  %v17772_v28 = vld [vmem:[#allocation15_spill] sm:$0xff] }
 0x34c   :  { %11440 = vmatmul.mubr.msk.f32.vlgmr.msra.gmra.mrb[48].mxu1 %vm2461_vm13, %v14533_v10  ;;  %11462 = vmatmul.mubr.msk.f32.vlgmr.msra.gmra.mrb[52].mxu0 %vm2461_vm13, %v14538_v21  ;;  %v17758_v51 = vsub.f32 %v17757_v7, %v13916_v61  ;;  %v2130_v39 = vmul.f32 %v14499_v56, %v17759_v11  ;;  %v2131_v59 = vmul.f32 %v14499_v56, %v17760_v52  ;;  %v17761_v61 = vld [vmem:[#allocation18_spill] sm:$0xff]  ;;  %v17776_v11 = vld [vmem:[#allocation81_spill] sm:$0xff] }
 0x34d   :  { %v2138_v48 = vmul.f32 %v14502_v15, %v14343_v19  ;;  %12640 = vmatpush3.bf16.msra.mxu1 %v14274_v31  ;;  %12656 = vmatpush3.bf16.msra.mxu0 %v14382_v34  ;;  %v17762_v41 = vsub.f32 %v17761_v61, %v13918_v8  ;;  %v2145_v9 = vadd.f32 %v2137_v0, %v2129_v42  ;;  %v13020_v19 = vld [vmem:[#allocation7 + $0x98] sm:$0xff] }
 0x34e   :  { %v2306_v6 = vmul.f32 0.999995, %v17758_v51  ;;  %v2160_v17 = vadd.f32 %v2152_v16, %v2144_v29  ;;  %v2139_v40 = vmul.f32 %v14502_v15, %v14337_v38  ;;  %12658 = vmatprep.subr.bf16.mxu0 %v14405_v36  ;;  %11442 = vmatprep.mubr.msk.f32.mxu1 %vm2461_vm13, %v14549_v35  ;;  %v14585_v18 = vmul.f32 0.999995, %v13020_v19  ;;  %v17773_v16 = vld [vmem:[#allocation67_spill] sm:$0xff] }
 0x34f   :  { %v2307_v47 = vmul.f32 0.999995, %v17762_v41  ;;  %v2146_v12 = vadd.f32 %v2138_v48, %v2130_v39  ;;  %v2154_v14 = vmul.f32 %v14512_v58, %v17763_v63  ;;  %v2155_v8 = vmul.f32 %v14512_v58, %v17764_v2  ;;  %12642 = vmatprep.subr.bf16.mxu1 %v14495_v24  ;;  %3814 = vadd.xlane.f32.xlu1 %v3813_v49  ;;  %v17775_v51 = vld [vmem:[#allocation71_spill] sm:$0xff]  ;;  %v17777_v2 = vld [vmem:[#allocation38_spill] sm:$0xff] }
 0x350   :  { %v2161_v30 = vadd.f32 %v2153_v1, %v2145_v9  ;;  %v2147_v38 = vadd.f32 %v2139_v40, %v2131_v59  ;;  %v2133_v3 = vmul.f32 %v14499_v56, %v17765_v22  ;;  %11443 = vmatmul.mubr.msk.f32.gmra.mrb[50].mxu1 %vm2461_vm13, %v14575_v4  ;;  %v2141_v25 = vmul.f32 %v14502_v15, %v14350_v20  ;;  %v17766_v56 = vld [vmem:[#allocation13_spill] sm:$0xff]  ;;  %v17770_v20 = vld [vmem:[#allocation42_spill] sm:$0xff]  ;;  %v17780_v22 = vld [vmem:[#allocation52_spill] sm:$0xff] }
 0x351   :  { %v2162_v13 = vadd.f32 %v2154_v14, %v2146_v12  ;;  %12644 = vmatpush3.bf16.msra.mxu1 %v14495_v24  ;;  %12660 = vmatpush3.bf16.msra.mxu0 %v14405_v36  ;;  %v14605_v53 = vpack.c.bf16 %v2307_v47, %v2306_v6  ;;  %v1541_v42 = vadd.f32 %v17767_v23, %v17766_v56  ;;  %v17771_v15 = vld [vmem:[#allocation66_spill] sm:$0xff]  ;;  %v17774_v1 = vld [vmem:[#allocation61_spill] sm:$0xff]  ;;  %v17783_v23 = vld [vmem:[#allocation55_spill] sm:$0xff] }
 0x352   :  { %v2163_v45 = vadd.f32 %v2155_v8, %v2147_v38  ;;  %v1536_v60 = vadd.f32 %v17769_v26, %v17768_v44  ;;  %11507 = vmatprep.subr.mxu0 %v14597_v50  ;;  %11475 = vmatprep.subr.mxu1 %v14585_v18  ;;  %v2149_v49 = vadd.f32 %v2141_v25, %v2133_v3  ;;  %v17778_v8 = vld [vmem:[#allocation73_spill] sm:$0xff]  ;;  %v17784_v26 = vld [vmem:[#allocation56_spill] sm:$0xff] }
 0x353   :  { %v12963_v0 = vpop.eup %12962  ;;  %v1551_v29 = vadd.f32 %v17771_v15, %v17770_v20  ;;  %v1546_v33 = vadd.f32 %v17773_v16, %v17772_v28  ;;  %v1561_v6 = vadd.f32 %v17775_v51, %v17774_v1  ;;  %v2157_v39 = vmul.f32 %v14512_v58, %v17776_v11  ;;  %v17781_v25 = vld [vmem:[#allocation53_spill] sm:$0xff]  ;;  %v17786_v11 = vld [vmem:[#allocation34_spill] sm:$0xff] }
 0x354   :  { %v2173_v52 = vmul.f32 %v12963_v0, %v2164_v55  ;;  %v2167_v59 = vmul.f32 %v12963_v0, %v2158_v57  ;;  %v2168_v48 = vmul.f32 %v12963_v0, %v2159_v46  ;;  %v2169_v41 = vmul.f32 %v12963_v0, %v2160_v17  ;;  %v17779_v17 = vld [vmem:[#allocation58_spill] sm:$0xff]  ;;  %v17785_v1 = vld [vmem:[#allocation57_spill] sm:$0xff] }
 0x355   :  { %11476 = vmatpush3.msra.mxu1 %v14585_v18  ;;  %11508 = vmatpush3.msra.mxu0 %v14597_v50  ;;  %v2170_v47 = vmul.f32 %v12963_v0, %v2161_v30  ;;  %v2171_v9 = vmul.f32 %v12963_v0, %v2162_v13  ;;  %v2172_v40 = vmul.f32 %v12963_v0, %v2163_v45  ;;  %v17782_v45 = vld [vmem:[#allocation54_spill] sm:$0xff] }
 0x356   :  { %v2181_v19 = vmul.f32 0.33333334, %v2173_v52  ;;  %12646 = vmatprep.subr.bf16.mxu1 %v14605_v53  ;;  %v2175_v12 = vmul.f32 0.33333334, %v2167_v59  ;;  %v2176_v63 = vmul.f32 0.33333334, %v2168_v48  ;;  %v2165_v14 = vadd.f32 %v2157_v39, %v2149_v49 }
 0x357   :  { %v1556_v58 = vadd.f32 %v17778_v8, %v17777_v2  ;;  %v2177_v55 = vmul.f32 0.33333334, %v2169_v41  ;;  %v2178_v57 = vmul.f32 0.33333334, %v2170_v47  ;;  %v2179_v46 = vmul.f32 0.33333334, %v2171_v9 }
 0x358   :  { %v2189_v38 = vadd.f32 %v2181_v19, %v17779_v17  ;;  %v2183_v3 = vadd.f32 %v2175_v12, %v17780_v22  ;;  %v2184_v30 = vadd.f32 %v2176_v63, %v17781_v25  ;;  %v2180_v13 = vmul.f32 0.33333334, %v2172_v40  ;;  %v17787_v39 = vld [vmem:[#allocation77_spill] sm:$0xff]  ;;  %v17788_v25 = vld [vmem:[#allocation59_spill] sm:$0xff] }
 0x359   :  { %v2185_v56 = vadd.f32 %v2177_v55, %v17782_v45  ;;  %v2186_v44 = vadd.f32 %v2178_v57, %v17783_v23  ;;  %v2187_v20 = vadd.f32 %v2179_v46, %v17784_v26  ;;  %v2174_v49 = vmul.f32 %v12963_v0, %v2165_v14  ;;  %v17789_v45 = vld [vmem:[#allocation68_spill] sm:$0xff] }
 0x35a   :  { %v2197_v15 = vmul.f32 0.999995, %v2189_v38  ;;  %v2191_v28 = vmul.f32 0.999995, %v2183_v3  ;;  %v2192_v16 = vmul.f32 0.999995, %v2184_v30  ;;  %v2188_v51 = vadd.f32 %v2180_v13, %v17785_v1 }
 0x35b   :  { %v1566_v52 = vadd.f32 %v17787_v39, %v17786_v11  ;;  %v2193_v59 = vmul.f32 0.999995, %v2185_v56  ;;  %v2194_v48 = vmul.f32 0.999995, %v2186_v44  ;;  %v2195_v41 = vmul.f32 0.999995, %v2187_v20 }
 0x35c   :  { %v2199_v47 = vadd.f32 %v2191_v28, %v1536_v60  ;;  %v2200_v9 = vadd.f32 %v2192_v16, %v1541_v42  ;;  %v2196_v40 = vmul.f32 0.999995, %v2188_v51  ;;  %v2182_v19 = vmul.f32 0.33333334, %v2174_v49  ;;  %v17790_v56 = vld [vmem:[#allocation75_spill] sm:$0xff] }
 0x35d   :  { %v2201_v12 = vadd.f32 %v2193_v59, %v1546_v33  ;;  %v2202_v63 = vadd.f32 %v2194_v48, %v1551_v29  ;;  %v2203_v2 = vadd.f32 %v2195_v41, %v1556_v58  ;;  %v2205_v8 = vadd.f32 %v2197_v15, %v1566_v52  ;;  %v13021_v29 = vld [vmem:[%s17403_s4 + $0x58] sm:$0xff]  ;;  %v13022_v28 = vld [vmem:[%s17403_s4 + $0x48] sm:$0xff]  ;;  %v14666_v52 = vld [vmem:[%s17402_s3 + $0xd0] sm:$0xff] }
 0x35e   :  { %vm2207_vm7 = vcmp.ge.f32.partialorder %v2199_v47, 0.0  ;;  %vm2208_vm8 = vcmp.ge.f32.partialorder %v2200_v9, 0.0  ;;  %v2215_v0 = vmul.f32 %v2199_v47, %v14268_v54  ;;  %v2216_v14 = vmul.f32 %v2200_v9, %v14268_v54  ;;  %11464 = vmatprep.mubr.msk.f32.mxu0 %vm2461_vm13, %v14666_v52  ;;  %v14673_v59 = vld [vmem:[%s17402_s3 + $0xd8] sm:$0xff] }
 0x35f   :  { %vm2209_vm0 = vcmp.ge.f32.partialorder %v2201_v12, 0.0  ;;  %vm2210_vm9 = vcmp.ge.f32.partialorder %v2202_v63, 0.0  ;;  %v2217_v55 = vmul.f32 %v2201_v12, %v14268_v54  ;;  %v2218_v57 = vmul.f32 %v2202_v63, %v14268_v54  ;;  %11465 = vmatmul.mubr.msk.f32.gmra.mrb[54].mxu0 %vm2461_vm13, %v14673_v59 }
 0x360   :  { %v2223_v60 = vsel %vm2207_vm7, %v2199_v47, %v2215_v0  ;;  %v2224_v42 = vsel %vm2208_vm8, %v2200_v9, %v2216_v14  ;;  %2989 = vperm.xlu1 %12928, %v13021_v29   ;;  %v2204_v33 = vadd.f32 %v2196_v40, %v1561_v6  ;;  %vm2211_vm10 = vcmp.ge.f32.partialorder %v2203_v2, 0.0  ;;  %v17795_v14 = vld [vmem:[#allocation10_spill] sm:$0xff] }
 0x361   :  { %v14642_v58 = vpack.c.bf16 %v2224_v42, %v2223_v60  ;;  %v2225_v46 = vsel %vm2209_vm0, %v2201_v12, %v2217_v55  ;;  %v2226_v17 = vsel %vm2210_vm9, %v2202_v63, %v2218_v57  ;;  %v2219_v38 = vmul.f32 %v2203_v2, %v14268_v54  ;;  %v17796_v55 = vld [vmem:[#allocation20_spill] sm:$0xff]  ;;  %v14685_v60 = vpop.permute.xlu0 %2443 }
 0x362   :  { %v14645_v22 = vpack.c.bf16 %v2226_v17, %v2225_v46  ;;  %vm2212_vm11 = vcmp.ge.f32.partialorder %v2204_v33, 0.0  ;;  %v2220_v3 = vmul.f32 %v2204_v33, %v14268_v54  ;;  %v2190_v30 = vadd.f32 %v2182_v19, %v17788_v25 }
 0x363   :  { %12678 = vmatprep.subr.bf16.mxu0 %v14642_v58  ;;  %v2227_v13 = vsel %vm2211_vm10, %v2203_v2, %v2219_v38  ;;  %vm2213_vm1 = vcmp.ge.f32.partialorder %v2205_v8, 0.0  ;;  %v2221_v6 = vmul.f32 %v2205_v8, %v14268_v54  ;;  %v1571_v23 = vadd.f32 %v17790_v56, %v17789_v45  ;;  %v17793_v2 = vld [vmem:[#allocation14_spill] sm:$0xff]  ;;  %v17801_v45 = vld [vmem:[#allocation21_spill] sm:$0xff] }
 0x364   :  { %v2228_v44 = vsel %vm2212_vm11, %v2204_v33, %v2220_v3  ;;  %v2198_v26 = vmul.f32 0.999995, %v2190_v30  ;;  %v17791_v20 = vmov 1   ;;  %v17792_v39 = vmov 0  }
 0x365   :  { %12930 = vset.pattern.permute.xlu1 %v17791_v20  ;;  %v14654_v49 = vpack.c.bf16 %v2228_v44, %v2227_v13  ;;  %v2229_v15 = vsel %vm2213_vm1, %v2205_v8, %v2221_v6  ;;  %v17794_v8 = vld [vmem:[#allocation19_spill] sm:$0xff]  ;;  %v2304_v57 = vsub.f32 %v17796_v55, %v17795_v14  ;;  %v2305_v56 = vsub.f32 %v17801_v45, %v17747_v43 }
 0x366   :  { %2564 = vperm.xlu1 %12930, %v13022_v28   ;;  %v2206_v16 = vadd.f32 %v2198_v26, %v1571_v23  ;;  %v2303_v0 = vsub.f32 %v17794_v8, %v17793_v2  ;;  %v14707_v23 = vpop.permute.xlu0 %2458  ;;  %v13024_v28 = vld [vmem:[%s17402_s3 + $0x80] sm:$0xff] }
 0x367   :  { %v2309_v17 = vmul.f32 0.999995, %v2304_v57  ;;  %v2310_v43 = vmul.f32 0.999995, %v2305_v56 }
 0x368   :  { %vm2214_vm12 = vcmp.ge.f32.partialorder %v2206_v16, 0.0  ;;  %v2222_v1 = vmul.f32 %v2206_v16, %v14268_v54  ;;  %v14677_v54 = vpop.permute.xlu1 %2448  ;;  %v2308_v46 = vmul.f32 0.999995, %v2303_v0  ;;  %v14818_v0 = vld [vmem:[%s17403_s4 + $0x88] sm:$0xff] }
 0x36a   :  { %2572 = vperm.xlu1 %12930, %v13021_v29   ;;  %v2230_v51 = vsel %vm2214_vm12, %v2206_v16, %v2222_v1  ;;  %v12649_v6 = vpack.c.bf16 %v2309_v17, %v2308_v46  ;;  %v14825_v46 = vld [vmem:[%s17403_s4 + $0x98] sm:$0xff] }
 0x36b   :  { %v14660_v11 = vpack.c.bf16 %v2230_v51, %v2229_v15  ;;  %v13023_v15 = vld [vmem:[%s17402_s3 + $0xc0] sm:$0xff] }
 0x36c   :  { %v14679_v48 = vpop.permute.xlu1 %2453 }
 0x36e   :  { %12932 = vset.pattern.permute.xlu1 %v17792_v39 }
 0x36f   :  { %4004 = vperm.xlu1 %12932, %v14818_v0  }
 0x3dc   :  { %v3815_v41 = vpop.xlane.xlu1 %3814 }
 0x3dd   :  { %v3816_v47 = vrot.slane %v3815_v41, 4 }
 0x3df   :  { %v3817_v9 = vadd.f32 %v3816_v47, %v3815_v41 }
 0x3e0   :  { %v14797_v1 = vpop.permute.xlu1 %2989 }
 0x3e1   :  { %v3818_v40 = vrot.slane %v3817_v9, 2  ;;  %17811 = vst [vmem:[#allocation24_spill] sm:$0xff] %v14797_v1 }
 0x3e3   :  { %v3819_v19 = vadd.f32 %v3818_v40, %v3817_v9  ;;  %v14805_v40 = vstv %s10174_s15 }
 0x3e5   :  { %v3820_v12 = vrot.slane %v3819_v19, 1 }
 0x3e7   :  { %v3821_v63 = vadd.f32 %v3820_v12, %v3819_v19  ;;  %v14812_v12 = vld [vmem:[%s17403_s4 + $0x80] sm:$0xff] }
 0x3e8   :  { %3999 = vperm.xlu0 %12931, %v14812_v12  }
 0x3e9   :  { %12897 = vpush %v3821_v63 }
 0x3ec   :  { %4014 = vperm.xlu0 %12931, %v14825_v46  }
 0x41a   :  { %s12898_s0 = spop %12897 }
 0x41b   :  { %v3823_v47 = vstv %s12898_s0 }
 0x41c   :  { %12964 = vrcp.f32 %v3823_v47 }
 0x41f   :  { %v11441_v42 = vpop.f32.mrb[48].mxu1  ;;  %v14687_v29 = vpop.f32.mrb[52].mxu0 }
 0x420   :  { %17797 = vst [vmem:[#allocation51_spill] sm:$0xff] %v14687_v29  ;;  %v2540_v33 = vpop.f32.mrb[49].mxu1  ;;  %v14689_v38 = vpop.f32.mrb[53].mxu0  ;;  %v14695_v25 = vadd.f32 %v11441_v42, %v14677_v54 }
 0x421   :  { %17798 = vst [vmem:[#allocation44_spill] sm:$0xff] %v14689_v38  ;;  %v14692_v3 = vadd.f32 %v2540_v33, %v14685_v60 }
 0x422   :  { %17800 = vst [vmem:[#allocation46_spill] sm:$0xff] %v14695_v25 }
 0x423   :  { %17799 = vst [vmem:[#allocation43_spill] sm:$0xff] %v14692_v3  ;;  %v11444_v30 = vpop.f32.mrb[50].mxu1  ;;  %11477 = vmatprep.mubr.msk.f32.mxu1 %vm111_vm2, %v14692_v3  ;;  %11509 = vmatprep.mubr.msk.f32.mxu0 %vm111_vm2, %v14692_v3 }
 0x424   :  { %v2550_v13 = vpop.f32.mrb[51].mxu1  ;;  %11478 = vmatmul.mubr.msk.f32.vlgmr.msra.gmra.mrb[52].mxu1 %vm111_vm2, %v14695_v25  ;;  %11510 = vmatmul.mubr.msk.f32.vlgmr.msra.gmra.mrb[56].mxu0 %vm111_vm2, %v14695_v25  ;;  %v14715_v26 = vadd.f32 %v11444_v30, %v14707_v23 }
 0x425   :  { %v14710_v44 = vadd.f32 %v2550_v13, %v14679_v48  ;;  %12648 = vmatpush3.bf16.msra.mxu1 %v14605_v53  ;;  %12680 = vmatpush3.bf16.msra.mxu0 %v14642_v58 }
 0x426   :  { %17803 = vst [vmem:[#allocation49_spill] sm:$0xff] %v14715_v26  ;;  %12650 = vmatprep.subr.bf16.mxu1 %v12649_v6  ;;  %12682 = vmatprep.subr.bf16.mxu0 %v14645_v22 }
 0x427   :  { %17802 = vst [vmem:[#allocation45_spill] sm:$0xff] %v14710_v44  ;;  %11480 = vmatprep.mubr.msk.f32.mxu1 %vm111_vm2, %v14710_v44  ;;  %11512 = vmatprep.mubr.msk.f32.mxu0 %vm111_vm2, %v14710_v44 }
 0x428   :  { %11481 = vmatmul.mubr.msk.f32.gmra.mrb[54].mxu1 %vm111_vm2, %v14715_v26  ;;  %11513 = vmatmul.mubr.msk.f32.gmra.mrb[58].mxu0 %vm111_vm2, %v14715_v26 }
 0x429   :  { %12652 = vmatpush3.bf16.msra.mxu1 %v12649_v6  ;;  %12684 = vmatpush3.bf16.msra.mxu0 %v14645_v22 }
 0x42a   :  { %11491 = vmatprep.subr.mxu1 %v2310_v43  ;;  %11493 = vmatprep.mubr.msk.f32.mxu1 %vm111_vm2, %v14692_v3 }
 0x42b   :  { %12686 = vmatprep.subr.bf16.mxu0 %v14654_v49  ;;  %11553 = vmatprep.mubr.msk.f32.mxu0 %vm2461_vm13, %v13023_v15 }
 0x42d   :  { %11492 = vmatpush3.msra.mxu1 %v2310_v43  ;;  %12688 = vmatpush3.bf16.msra.mxu0 %v14654_v49 }
 0x42e   :  { %11494 = vmatmul.mubr.msk.f32.vlgmr.msra.gmra.mrb[56].mxu1 %vm111_vm2, %v14695_v25  ;;  %12662 = vmatprep.subr.bf16.mxu1 %v14642_v58 }
 0x42f   :  { %12690 = vmatprep.subr.bf16.mxu0 %v14660_v11  ;;  %11496 = vmatprep.mubr.msk.f32.mxu1 %vm111_vm2, %v14710_v44 }
 0x430   :  { %12664 = vmatpush3.bf16.msra.mxu1 %v14642_v58 }
 0x431   :  { %12666 = vmatprep.subr.bf16.mxu1 %v14645_v22  ;;  %12692 = vmatpush3.bf16.msra.mxu0 %v14660_v11 }
 0x432   :  { %11497 = vmatmul.mubr.msk.f32.gmra.mrb[58].mxu1 %vm111_vm2, %v14715_v26  ;;  %12702 = vmatprep.subr.bf16.mxu0 %v14605_v53 }
 0x433   :  { %11531 = vmatprep.mubr.msk.f32.mxu1 %vm2461_vm13, %v13024_v28 }
 0x434   :  { %12668 = vmatpush3.bf16.msra.mxu1 %v14645_v22  ;;  %11554 = vmatmul.mubr.msk.f32.vlgmr.msra.gmra.mrb[60].mxu0 %vm2461_vm13, %v14538_v21  ;;  %v17804_v21 = vmov 0.0|0.0  }
 0x435   :  { %12670 = vmatprep.subr.bf16.mxu1 %v14654_v49  ;;  %12704 = vmatpush3.bf16.msra.mxu0 %v14605_v53  ;;  %v14777_v53 = vpop.f32.mrb[54].mxu0 }
 0x436   :  { %12706 = vmatprep.subr.bf16.mxu0 %v12649_v6  ;;  %11556 = vmatprep.mubr.msk.f32.mxu0 %vm2461_vm13, %v14666_v52  ;;  %17805 = vst [vmem:[#allocation48_spill] sm:$0xff] %v14777_v53  ;;  %v2995_v52 = vmul.f32 %v14797_v1, %v14715_v26 }
 0x438   :  { %12672 = vmatpush3.bf16.msra.mxu1 %v14654_v49  ;;  %11557 = vmatmul.mubr.msk.f32.gmra.mrb[62].mxu0 %vm2461_vm13, %v14673_v59  ;;  %v3001_v9 = vsel %vm111_vm2, %v2995_v52, 0.0 }
 0x439   :  { %12674 = vmatprep.subr.bf16.mxu1 %v14660_v11  ;;  %12708 = vmatpush3.bf16.msra.mxu0 %v12649_v6  ;;  %v14835_v6 = vld [vmem:[%s17403_s4 + $0x90] sm:$0xff] }
 0x43a   :  { %11583 = vmatprep.subr.mxu0 %v2310_v43  ;;  %4009 = vperm.xlu1 %12932, %v14835_v6  }
 0x43c   :  { %12676 = vmatpush3.bf16.msra.mxu1 %v14660_v11 }
 0x43d   :  { %11584 = vmatpush3.msra.mxu0 %v2310_v43  ;;  %12694 = vmatprep.subr.bf16.mxu1 %v14274_v31 }
 0x43e   :  { %12717 = vmatprep.subr.bf16.mxu0 %v17804_v21 }
 0x43f   :  { %11532 = vmatmul.mubr.msk.f32.vlgmr.msra.gmra.mrb[60].mxu1 %vm2461_vm13, %v14533_v10  ;;  %v14779_v10 = vpop.f32.mrb[55].mxu0 }
 0x440   :  { %12696 = vmatpush3.bf16.msra.mxu1 %v14274_v31  ;;  %11534 = vmatprep.mubr.msk.f32.mxu1 %vm2461_vm13, %v14549_v35  ;;  %17806 = vst [vmem:[#allocation50_spill] sm:$0xff] %v14779_v10  ;;  %v14781_v31 = vpop.permute.xlu0 %2977 }
 0x441   :  { %12698 = vmatprep.subr.bf16.mxu1 %v14495_v24  ;;  %17807 = vst [vmem:[#allocation65_spill] sm:$0xff] %v14781_v31 }
 0x443   :  { %11535 = vmatmul.mubr.msk.f32.gmra.mrb[62].mxu1 %vm2461_vm13, %v14575_v4  ;;  %v2992_v4 = vmul.f32 %v14781_v31, %v14692_v3 }
 0x444   :  { %12700 = vmatpush3.bf16.msra.mxu1 %v14495_v24  ;;  %v14783_v35 = vpop.permute.xlu0 %2981 }
 0x445   :  { %11567 = vmatprep.subr.mxu1 %v14585_v18  ;;  %17808 = vst [vmem:[#allocation16_spill] sm:$0xff] %v14783_v35  ;;  %v2993_v24 = vmul.f32 %v14783_v35, %v14695_v25  ;;  %v2996_v22 = vsel %vm111_vm2, %v2992_v4, 0.0 }
 0x447   :  { %v2997_v49 = vsel %vm111_vm2, %v2993_v24, 0.0 }
 0x448   :  { %11568 = vmatpush3.msra.mxu1 %v14585_v18  ;;  %v14785_v58 = vpop.permute.xlu0 %2985  ;;  %v2998_v11 = vadd.f32 %v2997_v49, %v2996_v22 }
 0x449   :  { %12710 = vmatprep.subr.bf16.mxu1 %v14382_v34  ;;  %17809 = vst [vmem:[#allocation22_spill] sm:$0xff] %v14785_v58  ;;  %v2994_v18 = vmul.f32 %v14785_v58, %v14710_v44 }
 0x44b   :  { %v2999_v51 = vsel %vm111_vm2, %v2994_v18, 0.0 }
 0x44c   :  { %v14795_v16 = vpop.permute.xlu0 %3010  ;;  %v3000_v59 = vadd.f32 %v2999_v51, %v2998_v11 }
 0x44d   :  { %17810 = vst [vmem:[#allocation23_spill] sm:$0xff] %v14795_v16 }
 0x44e   :  { %v14807_v19 = vadd.f32 %v3001_v9, %v3000_v59  ;;  %v14859_v9 = vld [vmem:[%s17403_s4 + $0xa8] sm:$0xff] }
 0x44f   :  { %4024 = vperm.xlu0 %12931, %v14859_v9  }
 0x450   :  { %v14802_v41 = vpop.permute.xlu0 %3014  ;;  %v3003_v56 = vrot.slane %v14807_v19, 4 }
 0x454   :  { %v14830_v13 = vpop.permute.xlu0 %3018 }
 0x455   :  { %17812 = vst [vmem:[#allocation25_spill] sm:$0xff] %v14830_v13 }
 0x458   :  { %v14877_v58 = vpop.permute.xlu0 %3022 }
 0x4f7   :  { %v11479_v63 = vpop.f32.mrb[52].mxu1  ;;  %v11511_v2 = vpop.f32.mrb[56].mxu0 }
 0x4f8   :  { %vm2770_vm14 = vcmp.ge.f32.partialorder %v11479_v63, 0.0  ;;  %v2775_v14 = vmul.f32 %v11479_v63, %v14805_v40  ;;  %vm2965_vm15 = vcmp.ge.f32.partialorder %v11511_v2, 0.0  ;;  %v2969_v57 = vmul.f32 %v11511_v2, %v14805_v40  ;;  %v2750_v42 = vpop.f32.mrb[53].mxu1  ;;  %v2945_v33 = vpop.f32.mrb[57].mxu0 }
 0x4f9   :  { %vm2769_vm4 = vcmp.ge.f32.partialorder %v2750_v42, 0.0  ;;  %v2774_v17 = vmul.f32 %v14805_v40, %v2750_v42  ;;  %vm2964_vm5 = vcmp.ge.f32.partialorder %v2945_v33, 0.0  ;;  %v2968_v30 = vmul.f32 %v2945_v33, %v14805_v40 }
 0x4fa   :  { %v14838_v43 = vsel %vm2770_vm14, %v11479_v63, %v2775_v14  ;;  %v14840_v15 = vsel %vm2965_vm15, %v11511_v2, %v2969_v57  ;;  %v14868_v57 = vld [vmem:[%s17403_s4 + $0xa0] sm:$0xff] }
 0x4fb   :  { %v3026_v28 = vmul.f32 %v14802_v41, %v14838_v43  ;;  %v3069_v4 = vmul.f32 %v14802_v41, %v14840_v15  ;;  %v14846_v24 = vsel %vm2769_vm4, %v2750_v42, %v2774_v17  ;;  %v14848_v18 = vsel %vm2964_vm5, %v2945_v33, %v2968_v30  ;;  %v11482_v22 = vpop.f32.mrb[54].mxu1  ;;  %v11514_v49 = vpop.f32.mrb[58].mxu0  ;;  %4019 = vperm.xlu1 %12932, %v14868_v57  }
 0x4fc   :  { %v3025_v51 = vmul.f32 %v14795_v16, %v14846_v24  ;;  %v3068_v11 = vmul.f32 %v14795_v16, %v14848_v18  ;;  %vm2772_vm6 = vcmp.ge.f32.partialorder %v11482_v22, 0.0  ;;  %v2777_v52 = vmul.f32 %v11482_v22, %v14805_v40  ;;  %v2760_v59 = vpop.f32.mrb[55].mxu1  ;;  %v2955_v47 = vpop.f32.mrb[59].mxu0 }
 0x4fd   :  { %v3030_v63 = vsel %vm111_vm2, %v3026_v28, 0.0  ;;  %v3073_v2 = vsel %vm111_vm2, %v3069_v4, 0.0  ;;  %vm2967_vm7 = vcmp.ge.f32.partialorder %v11514_v49, 0.0  ;;  %v2971_v14 = vmul.f32 %v11514_v49, %v14805_v40 }
 0x4fe   :  { %v3029_v42 = vsel %vm111_vm2, %v3025_v51, 0.0  ;;  %v3072_v33 = vsel %vm111_vm2, %v3068_v11, 0.0  ;;  %v14872_v17 = vsel %vm2772_vm6, %v11482_v22, %v2777_v52  ;;  %vm2771_vm8 = vcmp.ge.f32.partialorder %v2760_v59, 0.0  ;;  %v14886_v22 = vld [vmem:[%s17403_s4 + $0xb8] sm:$0xff] }
 0x4ff   :  { %v3031_v30 = vadd.f32 %v3030_v63, %v3029_v42  ;;  %v3074_v1 = vadd.f32 %v3073_v2, %v3072_v33  ;;  %v14874_v28 = vsel %vm2967_vm7, %v11514_v49, %v2971_v14  ;;  %v2776_v4 = vmul.f32 %v14805_v40, %v2760_v59  ;;  %v14889_v49 = vpop.eup %12964  ;;  %v14898_v2 = vld [vmem:[%s17403_s4 + $0xb0] sm:$0xff]  ;;  %4034 = vperm.xlu0 %12931, %v14886_v22  }
 0x500   :  { %vm2966_vm0 = vcmp.ge.f32.partialorder %v2955_v47, 0.0  ;;  %v2970_v31 = vmul.f32 %v2955_v47, %v14805_v40  ;;  %v3028_v51 = vmul.f32 %v14877_v58, %v14872_v17  ;;  %v3071_v52 = vmul.f32 %v14877_v58, %v14874_v28  ;;  %4029 = vperm.xlu1 %12932, %v14898_v2  }
 0x501   :  { %v14891_v11 = vsel %vm2771_vm8, %v2760_v59, %v2776_v4  ;;  %v11495_v63 = vpop.f32.mrb[56].mxu1  ;;  %v3004_v14 = vadd.f32 %v3003_v56, %v14807_v19  ;;  %vm4037_vm4 = vcmask 261120  }
 0x502   :  { %v3027_v42 = vmul.f32 %v14830_v13, %v14891_v11  ;;  %v14903_v33 = vsel %vm2966_vm0, %v2955_v47, %v2970_v31  ;;  %v2848_v35 = vpop.f32.mrb[57].mxu1  ;;  %vm2868_vm9 = vcmp.ge.f32.partialorder %v11495_v63, 0.0  ;;  %v2872_v4 = vmul.f32 %v11495_v63, %v14805_v40 }
 0x503   :  { %v3070_v59 = vmul.f32 %v14830_v13, %v14903_v33  ;;  %vm2867_vm10 = vcmp.ge.f32.partialorder %v2848_v35, 0.0  ;;  %v3034_v53 = vsel %vm111_vm2, %v3028_v51, 0.0  ;;  %v2871_v19 = vmul.f32 %v2848_v35, %v14805_v40 }
 0x504   :  { %v3032_v10 = vsel %vm111_vm2, %v3027_v42, 0.0  ;;  %v3825_v31 = vmul.f32 %v14889_v49, %v14438_v5  ;;  %v3077_v44 = vsel %vm111_vm2, %v3071_v52, 0.0  ;;  %v14917_v38 = vsel %vm2868_vm9, %v11495_v63, %v2872_v4 }
 0x505   :  { %v3033_v56 = vadd.f32 %v3032_v10, %v3031_v30  ;;  %v3075_v47 = vsel %vm111_vm2, %v3070_v59, 0.0  ;;  %v11498_v29 = vpop.f32.mrb[58].mxu1  ;;  %v3048_v42 = vmul.f32 %v14802_v41, %v14917_v38  ;;  %v14921_v51 = vsel %vm2867_vm10, %v2848_v35, %v2871_v19 }
 0x506   :  { %v3076_v26 = vadd.f32 %v3075_v47, %v3074_v1  ;;  %vm2870_vm11 = vcmp.ge.f32.partialorder %v11498_v29, 0.0  ;;  %v2858_v3 = vpop.f32.mrb[59].mxu1  ;;  %v3047_v5 = vmul.f32 %v14795_v16, %v14921_v51  ;;  %v2874_v10 = vmul.f32 %v11498_v29, %v14805_v40 }
 0x507   :  { %v3035_v25 = vadd.f32 %v3034_v53, %v3033_v56  ;;  %vm2869_vm1 = vcmp.ge.f32.partialorder %v2858_v3, 0.0  ;;  %v14926_v30 = vpop.f32.mrb[60].mxu0  ;;  %v17814_v52 = vmov 2   ;;  %v3052_v1 = vsel %vm111_vm2, %v3048_v42, 0.0 }
 0x508   :  { %17813 = vst [vmem:[#allocation26_spill] sm:$0xff] %v14926_v30  ;;  %12934 = vset.pattern.permute.xlu0 %v17814_v52  ;;  %v3078_v63 = vadd.f32 %v3077_v44, %v3076_v26  ;;  %v2873_v59 = vmul.f32 %v2858_v3, %v14805_v40  ;;  %v3826_v35 = vmul.f32 %v14889_v49, %v14443_v62  ;;  %v14933_v4 = vpop.f32.mrb[61].mxu0  ;;  %v3051_v19 = vsel %vm111_vm2, %v3047_v5, 0.0 }
 0x509   :  { %17815 = vst [vmem:[#allocation37_spill] sm:$0xff] %v14933_v4  ;;  %4745 = vperm.xlu0 %12934, %v14818_v0   ;;  %12933 = vset.pattern.permute.xlu1 %v17814_v52  ;;  %v3036_v53 = vrot.slane %v3035_v25, 4  ;;  %v14939_v56 = vsel %vm2870_vm11, %v11498_v29, %v2874_v10  ;;  %v3053_v26 = vadd.f32 %v3052_v1, %v3051_v19  ;;  %v3005_v62 = vrot.slane %v3004_v14, 2 }
 0x50a   :  { %4741 = vperm.xlu1 %12933, %v14812_v12   ;;  %v3079_v44 = vrot.slane %v3078_v63, 4  ;;  %v14943_v47 = vsel %vm2869_vm1, %v2858_v3, %v2873_v59  ;;  %v3050_v30 = vmul.f32 %v14877_v58, %v14939_v56  ;;  %v3830_v29 = vadd.f32 %v17757_v7, %v3825_v31 }
 0x50b   :  { %v3037_v42 = vadd.f32 %v3036_v53, %v3035_v25  ;;  %v3049_v52 = vmul.f32 %v14830_v13, %v14943_v47  ;;  %v14949_v4 = vpop.f32.mrb[62].mxu0  ;;  %v3831_v10 = vadd.f32 %v17761_v61, %v3826_v35  ;;  %v3827_v1 = vmul.f32 %v14889_v49, %v14445_v32 }
 0x50c   :  { %17816 = vst [vmem:[#allocation40_spill] sm:$0xff] %v14949_v4  ;;  %v3080_v5 = vadd.f32 %v3079_v44, %v3078_v63  ;;  %v14953_v16 = vpop.f32.mrb[63].mxu0  ;;  %v3828_v59 = vmul.f32 %v14889_v49, %v14447_v37  ;;  %v17818_v53 = vmov 3   ;;  %v3006_v31 = vadd.f32 %v3005_v62, %v3004_v14 }
 0x50d   :  { %17817 = vst [vmem:[#allocation39_spill] sm:$0xff] %v14953_v16  ;;  %4749 = vperm.xlu0 %12934, %v14835_v6   ;;  %v3038_v3 = vrot.slane %v3037_v42, 2  ;;  %v3054_v25 = vsel %vm111_vm2, %v3049_v52, 0.0  ;;  %v3056_v44 = vsel %vm111_vm2, %v3050_v30, 0.0  ;;  %v14964_v13 = vmul.f32 0.5, %v3830_v29 }
 0x50e   :  { %12935 = vset.pattern.permute.xlu1 %v17818_v53  ;;  %v3081_v63 = vrot.slane %v3080_v5, 2  ;;  %v3055_v19 = vadd.f32 %v3054_v25, %v3053_v26  ;;  %v14966_v52 = vmul.f32 0.5, %v3831_v10  ;;  %v3832_v32 = vadd.f32 %v17794_v8, %v3827_v1 }
 0x50f   :  { %4802 = vperm.xlu1 %12935, %v14812_v12   ;;  %v3039_v35 = vadd.f32 %v3038_v3, %v3037_v42  ;;  %v3833_v37 = vadd.f32 %v17796_v55, %v3828_v59  ;;  %v3007_v14 = vrot.slane %v3006_v31, 1  ;;  %v3829_v59 = vmul.f32 %v14889_v49, %v14449_v27 }
 0x510   :  { %v3082_v4 = vadd.f32 %v3081_v63, %v3080_v5  ;;  %v3057_v16 = vadd.f32 %v3056_v44, %v3055_v19  ;;  %v12718_v29 = vpack.c.bf16 %v14966_v52, %v14964_v13  ;;  %v14983_v3 = vmul.f32 0.5, %v3832_v32 }
 0x511   :  { %4753 = vperm.xlu0 %12934, %v14825_v46   ;;  %v3040_v53 = vrot.slane %v3039_v35, 1  ;;  %v14985_v1 = vmul.f32 0.5, %v3833_v37 }
 0x512   :  { %v3058_v26 = vrot.slane %v3057_v16, 4  ;;  %v11533_v25 = vpop.f32.mrb[60].mxu1  ;;  %v3083_v62 = vrot.slane %v3082_v4, 1 }
 0x513   :  { %4806 = vperm.xlu1 %12935, %v14818_v0   ;;  %v3222_v30 = vpop.f32.mrb[61].mxu1  ;;  %v14981_v10 = vadd.f32 %v11533_v25, %v14677_v54  ;;  %v3041_v63 = vadd.f32 %v3040_v53, %v3039_v35  ;;  %v3008_v54 = vadd.f32 %v3007_v14, %v3006_v31  ;;  %v12721_v53 = vpack.c.bf16 %v14985_v1, %v14983_v3 }
 0x514   :  { %v3059_v42 = vadd.f32 %v3058_v26, %v3057_v16  ;;  %v14975_v5 = vadd.f32 %v3222_v30, %v14685_v60  ;;  %v3084_v44 = vadd.f32 %v3083_v62, %v3082_v4  ;;  %v3834_v35 = vadd.f32 %v17801_v45, %v3829_v59 }
 0x515   :  { %4757 = vperm.xlu0 %12934, %v14868_v57   ;;  %v3042_v32 = vadd.f32 %v3041_v63, %v3008_v54  ;;  %v17819_v14 = vmov 0.0  }
 0x516   :  { %v3060_v16 = vrot.slane %v3059_v42, 2  ;;  %v11536_v19 = vpop.f32.mrb[62].mxu1  ;;  %11569 = vmatprep.mubr.msk.f32.mxu1 %vm111_vm2, %v14975_v5  ;;  %11585 = vmatprep.mubr.msk.f32.mxu0 %vm111_vm2, %v14975_v5 }
 0x517   :  { %v3232_v60 = vpop.f32.mrb[63].mxu1  ;;  %11570 = vmatmul.mubr.msk.f32.vlgmr.msra.gmra.mrb[64].mxu1 %vm111_vm2, %v14981_v10  ;;  %11586 = vmatmul.mubr.msk.f32.vlgmr.msra.gmra.mrb[64].mxu0 %vm111_vm2, %v14981_v10  ;;  %v15006_v26 = vadd.f32 %v11536_v19, %v14707_v23  ;;  %v15022_v23 = vmul.f32 0.5, %v3834_v35  ;;  %vm3043_vm12 = vcmp.ge.f32.partialorder %v3042_v32, 0.0 }
 0x518   :  { %v3061_v27 = vadd.f32 %v3060_v16, %v3059_v42  ;;  %12712 = vmatpush3.bf16.msra.mxu1 %v14382_v34  ;;  %12719 = vmatpush3.bf16.msra.mxu0 %v12718_v29  ;;  %v14999_v49 = vadd.f32 %v3232_v60, %v14679_v48  ;;  %v15011_v34 = vstv %s14972_s30  ;;  %v3085_v48 = vadd.f32 %v3084_v44, %v3008_v54  ;;  %s13085_s30 = smov 120  }
 0x519   :  { %12714 = vmatprep.subr.bf16.mxu1 %v14405_v36  ;;  %12720 = vmatprep.subr.bf16.mxu0 %v17804_v21  ;;  %v3045_v31 = vmul.f32 %v15011_v34, %v3042_v32 }
 0x51a   :  { %v3062_v37 = vrot.slane %v3061_v27, 1  ;;  %4761 = vperm.xlu0 %12934, %v14859_v9   ;;  %11572 = vmatprep.mubr.msk.f32.mxu1 %vm111_vm2, %v14999_v49  ;;  %v3087_v30 = vmul.f32 %v3085_v48, %v15011_v34  ;;  %vm3086_vm15 = vcmp.ge.f32.partialorder %v3085_v48, 0.0 }
 0x51b   :  { %11588 = vmatprep.mubr.msk.f32.mxu0 %vm111_vm2, %v14999_v49  ;;  %11573 = vmatmul.mubr.msk.f32.gmra.mrb[66].mxu1 %vm111_vm2, %v15006_v26  ;;  %v3046_v62 = vsel %vm3043_vm12, %v3042_v32, %v3045_v31 }
 0x51c   :  { %v3063_v4 = vadd.f32 %v3062_v37, %v3061_v27  ;;  %11589 = vmatmul.mubr.msk.f32.gmra.mrb[66].mxu0 %vm111_vm2, %v15006_v26  ;;  %12716 = vmatpush3.bf16.msra.mxu1 %v14405_v36  ;;  %v3088_v59 = vsel %vm3086_vm15, %v3085_v48, %v3087_v30 }
 0x51d   :  { %12722 = vmatpush3.bf16.msra.mxu0 %v12721_v53  ;;  %11599 = vmatprep.subr.mxu1 %v14597_v50 }
 0x51e   :  { %v3064_v25 = vadd.f32 %v3063_v4, %v3008_v54  ;;  %11601 = vmatprep.mubr.msk.f32.mxu1 %vm111_vm2, %v14975_v5  ;;  %11615 = vmatprep.subr.mxu0 %v17819_v14 }
 0x51f   :  { %11617 = vmatprep.mubr.msk.f32.mxu0 %vm13079_vm3, %v17819_v14  ;;  %4765 = vperm.xlu0 %12934, %v14898_v2  }
 0x520   :  { %vm3065_vm14 = vcmp.ge.f32.partialorder %v3064_v25, 0.0  ;;  %v3066_v36 = vmul.f32 %v3064_v25, %v15011_v34  ;;  %4810 = vperm.xlu1 %12935, %v14835_v6   ;;  %11600 = vmatpush3.msra.mxu1 %v14597_v50  ;;  %v15048_v50 = vld [vmem:[%s17402_s3 + $0x100] sm:$0xff] }
 0x521   :  { %11616 = vmatpush3.msra.mxu0 %v15022_v23  ;;  %11602 = vmatmul.mubr.msk.f32.vlgmr.msra.gmra.mrb[68].mxu1 %vm111_vm2, %v14981_v10 }
 0x522   :  { %v3067_v42 = vsel %vm3065_vm14, %v3064_v25, %v3066_v36  ;;  %11618 = vmatmul.mubr.msk.f32.vlgmr.msra.gmra.mrb[68].mxu0 %vm111_vm2, %v14964_v13  ;;  %11604 = vmatprep.mubr.msk.f32.mxu1 %vm111_vm2, %v14999_v49 }
 0x523   :  { %v3089_v29 = vmax.f32 %v3046_v62, %v3067_v42  ;;  %11620 = vmatprep.mubr.msk.f32.mxu0 %vm13079_vm3, %v17819_v14  ;;  %4769 = vperm.xlu0 %12934, %v14886_v22  }
 0x524   :  { %4814 = vperm.xlu1 %12935, %v14825_v46  }
 0x525   :  { %v3090_v63 = vmax.f32 %v3089_v29, %v3088_v59  ;;  %11605 = vmatmul.mubr.msk.f32.gmra.mrb[70].mxu1 %vm111_vm2, %v15006_v26 }
 0x526   :  { %11621 = vmatmul.mubr.msk.f32.gmra.mrb[70].mxu0 %vm111_vm2, %v14966_v52  ;;  %11640 = vmatprep.mubr.msk.f32.mxu1 %vm4037_vm4, %v15048_v50 }
 0x527   :  { %v3091_v16 = vsub.f32 %v3046_v62, %v3090_v63  ;;  %v3094_v19 = vsub.f32 %v3067_v42, %v3090_v63  ;;  %v3097_v60 = vsub.f32 %v3088_v59, %v3090_v63  ;;  %11623 = vmatprep.mubr.msk.f32.mxu0 %vm13079_vm3, %v17819_v14  ;;  %12936 = vset.pattern.permute.xlu0 %v17791_v20  ;;  %v15098_v42 = vpop.permute.xlu0 %2560 }
 0x528   :  { %4818 = vperm.xlu1 %12935, %v14868_v57   ;;  %4168 = vperm.xlu0 %12936, %v14812_v12  }
 0x529   :  { %v3092_v54 = vmul.f32 1.442695, %v3091_v16  ;;  %v3095_v44 = vmul.f32 1.442695, %v3094_v19  ;;  %v3098_v27 = vmul.f32 1.442695, %v3097_v60 }
 0x52a   :  { %11624 = vmatmul.mubr.msk.f32.gmra.mrb[72].mxu0 %vm111_vm2, %v14983_v3 }
 0x52b   :  { %12966 = vpow2.f32 %v3092_v54  ;;  %11626 = vmatprep.mubr.msk.f32.mxu0 %vm13079_vm3, %v17819_v14 }
 0x52c   :  { %12968 = vpow2.f32 %v3095_v44  ;;  %4822 = vperm.xlu1 %12935, %v14859_v9   ;;  %4180 = vperm.xlu0 %12936, %v14825_v46  }
 0x52d   :  { %12970 = vpow2.f32 %v3098_v27  ;;  %v17821_v27 = vld [vmem:[#allocation43_spill] sm:$0xff] }
 0x52e   :  { %11627 = vmatmul.mubr.msk.f32.gmra.mrb[74].mxu0 %vm111_vm2, %v14985_v1 }
 0x52f   :  { %11629 = vmatprep.mubr.msk.f32.mxu0 %vm13079_vm3, %v17819_v14  ;;  %v5926_v14 = vld [vmem:[#allocation7 + $0x108] sm:$0xff] }
 0x530   :  { %4826 = vperm.xlu1 %12935, %v14898_v2   ;;  %4188 = vperm.xlu0 %12936, %v14859_v9  }
 0x532   :  { %11630 = vmatmul.mubr.msk.f32.gmra.mrb[76].mxu0 %vm111_vm2, %v15022_v23 }
 0x534   :  { %4830 = vperm.xlu1 %12935, %v14886_v22   ;;  %4196 = vperm.xlu0 %12936, %v14886_v22  }
 0x535   :  { %v12967_v12 = vpop.eup %12966 }
 0x536   :  { %v12969_v53 = vpop.eup %12968  ;;  %v3104_v46 = vmul.f32 %v12967_v12, %v14891_v11  ;;  %v3103_v35 = vmul.f32 %v12967_v12, %v14838_v43  ;;  %v3102_v32 = vmul.f32 %v12967_v12, %v14846_v24  ;;  %v3105_v37 = vmul.f32 %v12967_v12, %v14872_v17 }
 0x537   :  { %v12971_v48 = vpop.eup %12970  ;;  %v3108_v9 = vmul.f32 %v12969_v53, %v14943_v47  ;;  %v3100_v4 = vadd.f32 %v12969_v53, %v12967_v12  ;;  %v3107_v31 = vmul.f32 %v12969_v53, %v14917_v38  ;;  %v3106_v25 = vmul.f32 %v12969_v53, %v14921_v51 }
 0x538   :  { %v3116_v30 = vmul.f32 %v12971_v48, %v14903_v33  ;;  %v3115_v22 = vmul.f32 %v12971_v48, %v14840_v15  ;;  %v3114_v11 = vmul.f32 %v12971_v48, %v14848_v18  ;;  %v3109_v43 = vmul.f32 %v12969_v53, %v14939_v56  ;;  %12937 = vset.pattern.permute.xlu1 %v17791_v20  ;;  %v15096_v56 = vpop.permute.xlu1 %2564  ;;  %v17822_v53 = vld [vmem:[#allocation49_spill] sm:$0xff]  ;;  %v5931_v20 = vld [vmem:[#allocation7 + $0x128] sm:$0xff] }
 0x539   :  { %v3112_v24 = vadd.f32 %v3108_v9, %v3104_v46  ;;  %v3101_v17 = vadd.f32 %v12971_v48, %v3100_v4  ;;  %v3111_v36 = vadd.f32 %v3107_v31, %v3103_v35  ;;  %v3110_v62 = vadd.f32 %v3106_v25, %v3102_v32  ;;  %4172 = vperm.xlu1 %12937, %v14818_v0   ;;  %v15107_v35 = vpop.permute.xlu0 %2568  ;;  %v17825_v9 = vld [vmem:[#allocation45_spill] sm:$0xff] }
 0x53a   :  { %v3113_v47 = vadd.f32 %v3109_v43, %v3105_v37  ;;  %v3117_v38 = vmul.f32 %v12971_v48, %v14874_v28  ;;  %12938 = vset.pattern.permute.xlu0 %v17792_v39  ;;  %v17824_v37 = vld [vmem:[#allocation44_spill] sm:$0xff]  ;;  %v15116_v43 = vstv %s10176_s11 }
 0x53b   :  { %v3120_v33 = vadd.f32 %v3116_v30, %v3112_v24  ;;  %v3119_v51 = vadd.f32 %v3115_v22, %v3111_v36  ;;  %12972 = vrcp.f32 %v3101_v17  ;;  %v3118_v15 = vadd.f32 %v3114_v11, %v3110_v62  ;;  %v17826_v30 = vld [vmem:[#allocation48_spill] sm:$0xff]  ;;  %v17827_v24 = vld [vmem:[#allocation50_spill] sm:$0xff] }
 0x53c   :  { %v3121_v18 = vadd.f32 %v3117_v38, %v3113_v47  ;;  %v15101_v54 = vpop.permute.xlu1 %2572  ;;  %v2654_v48 = vadd.f32 %v17824_v37, %v15098_v42  ;;  %v2664_v17 = vadd.f32 %v17827_v24, %v15107_v35  ;;  %v15167_v37 = vld [vmem:[%s17402_s3 + $0x130] sm:$0xff]  ;;  %v3849_v24 = vsub.f32 %v17801_v45, %v15022_v23 }
 0x53d   :  { %4176 = vperm.xlu1 %12937, %v14835_v6   ;;  %v2669_v22 = vadd.f32 %v17826_v30, %v15101_v54  ;;  %17828 = vst [vmem:[#allocation32_spill] sm:$0xff] %v15167_v37  ;;  %v5927_v45 = vld [vmem:[#allocation7 + $0x110] sm:$0xff] }
 0x541   :  { %4184 = vperm.xlu1 %12937, %v14868_v57   ;;  %v17820_v57 = vld [vmem:[#allocation46_spill] sm:$0xff] }
 0x545   :  { %v12973_v29 = vpop.eup %12972  ;;  %4192 = vperm.xlu1 %12937, %v14898_v2   ;;  %v17823_v2 = vld [vmem:[#allocation51_spill] sm:$0xff] }
 0x546   :  { %v3124_v0 = vmul.f32 %v12973_v29, %v3119_v51  ;;  %v3123_v28 = vmul.f32 %v12973_v29, %v3118_v15  ;;  %v3126_v59 = vmul.f32 %v12973_v29, %v3121_v18  ;;  %v3125_v63 = vmul.f32 %v12973_v29, %v3120_v33 }
 0x547   :  { %v2659_v32 = vadd.f32 %v17823_v2, %v15096_v56 }
 0x548   :  { %v3128_v16 = vmul.f32 0.33333334, %v3124_v0  ;;  %v3127_v19 = vmul.f32 0.33333334, %v3123_v28  ;;  %v3130_v60 = vmul.f32 0.33333334, %v3126_v59 }
 0x549   :  { %v3129_v6 = vmul.f32 0.33333334, %v3125_v63  ;;  %12942 = vset.pattern.permute.xlu1 %v17792_v39  ;;  %v5930_v39 = vld [vmem:[#allocation7 + $0x120] sm:$0xff] }
 0x54a   :  { %v3132_v44 = vadd.f32 %v3128_v16, %v17820_v57  ;;  %v3131_v12 = vadd.f32 %v3127_v19, %v17821_v27  ;;  %v3134_v46 = vadd.f32 %v3130_v60, %v17822_v53  ;;  %v3845_v60 = vsub.f32 %v17757_v7, %v14964_v13  ;;  %v15131_v57 = vld [vmem:[%s17402_s3 + $0x108] sm:$0xff]  ;;  %v15145_v53 = vld [vmem:[%s17402_s3 + $0x118] sm:$0xff] }
 0x54b   :  { %v3133_v4 = vadd.f32 %v3129_v6, %v17825_v9  ;;  %v3846_v6 = vsub.f32 %v17761_v61, %v14966_v52  ;;  %v3848_v9 = vsub.f32 %v17796_v55, %v14985_v1 }
 0x54c   :  { %v3136_v31 = vmul.f32 0.999995, %v3132_v44  ;;  %v3135_v25 = vmul.f32 0.999995, %v3131_v12  ;;  %v3138_v11 = vmul.f32 0.999995, %v3134_v46 }
 0x54d   :  { %v3137_v36 = vmul.f32 0.999995, %v3133_v4  ;;  %v15136_v44 = vld [vmem:[%s17402_s3 + $0x110] sm:$0xff]  ;;  %v3850_v27 = vmul.f32 0.999995, %v3845_v60  ;;  %v15150_v46 = vld [vmem:[%s17402_s3 + $0x120] sm:$0xff] }
 0x54e   :  { %v3140_v62 = vadd.f32 %v3136_v31, %v2659_v32  ;;  %v3139_v47 = vadd.f32 %v3135_v25, %v2654_v48  ;;  %v3142_v38 = vadd.f32 %v3138_v11, %v2669_v22  ;;  %v3851_v12 = vmul.f32 0.999995, %v3846_v6  ;;  %v15161_v32 = vld [vmem:[%s17402_s3 + $0x128] sm:$0xff]  ;;  %v15180_v4 = vld [vmem:[%s17402_s3 + $0x138] sm:$0xff]  ;;  %v15185_v31 = vld [vmem:[%s17402_s3 + $0x140] sm:$0xff] }
 0x54f   :  { %v3141_v33 = vadd.f32 %v3137_v36, %v2664_v17  ;;  %v3847_v48 = vsub.f32 %v17794_v8, %v14983_v3  ;;  %17829 = vst [vmem:[#allocation41_spill] sm:$0xff] %v15180_v4  ;;  %v3853_v30 = vmul.f32 0.999995, %v3848_v9  ;;  %v15194_v22 = vld [vmem:[%s17402_s3 + $0x148] sm:$0xff]  ;;  %v15204_v17 = vmul.f32 0.999995, %v3849_v24 }
 0x550   :  { %vm3144_vm5 = vcmp.ge.f32.partialorder %v3140_v62, 0.0  ;;  %v3149_v51 = vmul.f32 %v15116_v43, %v3140_v62  ;;  %vm3143_vm6 = vcmp.ge.f32.partialorder %v3139_v47, 0.0  ;;  %v3148_v15 = vmul.f32 %v15116_v43, %v3139_v47  ;;  %v13025_v36 = vld [vmem:[#allocation7 + $0xc8] sm:$0xff]  ;;  %v15252_v6 = vld [vmem:[%s17402_s3 + $0x170] sm:$0xff]  ;;  %v17839_v9 = vld [vmem:[#allocation65_spill] sm:$0xff] }
 0x551   :  { %vm3146_vm7 = vcmp.ge.f32.partialorder %v3142_v38, 0.0  ;;  %v3151_v18 = vmul.f32 %v15116_v43, %v3142_v38  ;;  %vm3145_vm8 = vcmp.ge.f32.partialorder %v3141_v33, 0.0  ;;  %v3150_v29 = vmul.f32 %v15116_v43, %v3141_v33  ;;  %17831 = vst [vmem:[#allocation27_spill] sm:$0xff] %v15204_v17  ;;  %v15245_v60 = vld [vmem:[%s17402_s3 + $0x168] sm:$0xff]  ;;  %17836 = vst [vmem:[#allocation70_spill] sm:$0xff] %v15252_v6 }
 0x552   :  { %v3153_v0 = vsel %vm3144_vm5, %v3140_v62, %v3149_v51  ;;  %v3152_v28 = vsel %vm3143_vm6, %v3139_v47, %v3148_v15  ;;  %v15154_v2 = vpack.c.bf16 %v3851_v12, %v3850_v27  ;;  %v3852_v25 = vmul.f32 0.999995, %v3847_v48  ;;  %v13026_v47 = vld [vmem:[#allocation7 + $0xd0] sm:$0xff]  ;;  %v13027_v51 = vld [vmem:[#allocation7 + $0xd8] sm:$0xff]  ;;  %17835 = vst [vmem:[#allocation11_spill] sm:$0xff] %v15245_v60 }
 0x553   :  { %v3155_v59 = vsel %vm3146_vm7, %v3142_v38, %v3151_v18  ;;  %v3154_v63 = vsel %vm3145_vm8, %v3141_v33, %v3150_v29  ;;  %v12723_v16 = vpack.c.bf16 %v3153_v0, %v3152_v28  ;;  %v3840_v62 = vmul.f32 0.999995, %v13025_v36  ;;  %v13028_v18 = vld [vmem:[#allocation7 + $0xe0] sm:$0xff]  ;;  %v13029_v28 = vld [vmem:[#allocation7 + $0xe8] sm:$0xff]  ;;  %v15257_v27 = vld [vmem:[%s17402_s3 + $0x178] sm:$0xff] }
 0x554   :  { %v12727_v19 = vpack.c.bf16 %v3155_v59, %v3154_v63  ;;  %v15198_v11 = vpack.c.bf16 %v3853_v30, %v3852_v25  ;;  %v3841_v38 = vmul.f32 0.999995, %v13026_v47  ;;  %v3842_v15 = vmul.f32 0.999995, %v13027_v51  ;;  %v15224_v63 = vld [vmem:[%s17402_s3 + $0x150] sm:$0xff]  ;;  %17837 = vst [vmem:[#allocation30_spill] sm:$0xff] %v15257_v27 }
 0x555   :  { %12724 = vmatprep.subr.bf16.mxu1 %v12723_v16  ;;  %v3843_v29 = vmul.f32 0.999995, %v13028_v18  ;;  %v15217_v59 = vmul.f32 0.999995, %v13029_v28  ;;  %17832 = vst [vmem:[#allocation28_spill] sm:$0xff] %v15224_v63  ;;  %v17838_v12 = vld [vmem:[#allocation16_spill] sm:$0xff]  ;;  %v3629_v25 = vmul.f32 %v14975_v5, %v17839_v9 }
 0x556   :  { %12726 = vmatpush3.bf16.msra.mxu1 %v12723_v16  ;;  %17830 = vst [vmem:[#allocation33_spill] sm:$0xff] %v15198_v11  ;;  %v15209_v33 = vpack.c.bf16 %v3841_v38, %v3840_v62  ;;  %v3630_v48 = vmul.f32 %v14981_v10, %v17838_v12  ;;  %v17840_v30 = vld [vmem:[#allocation22_spill] sm:$0xff]  ;;  %v17841_v51 = vld [vmem:[#allocation24_spill] sm:$0xff]  ;;  %v5929_v9 = vld [vmem:[#allocation7 + $0x118] sm:$0xff] }
 0x557   :  { %12728 = vmatprep.subr.bf16.mxu1 %v12727_v19  ;;  %v15213_v0 = vpack.c.bf16 %v3843_v29, %v3842_v15  ;;  %v3631_v24 = vmul.f32 %v14999_v49, %v17840_v30  ;;  %v3633_v62 = vsel %vm111_vm2, %v3629_v25, 0.0  ;;  %v3632_v15 = vmul.f32 %v15006_v26, %v17841_v51  ;;  %v5923_v18 = vld [vmem:[#allocation7 + $0xf0] sm:$0xff]  ;;  %v5924_v29 = vld [vmem:[#allocation7 + $0xf8] sm:$0xff]  ;;  %v5925_v28 = vld [vmem:[#allocation7 + $0x100] sm:$0xff] }
 0x558   :  { %12740 = vmatprep.subr.bf16.mxu0 %v15209_v33  ;;  %v3634_v36 = vsel %vm111_vm2, %v3630_v48, 0.0  ;;  %v5932_v30 = vld [vmem:[#allocation7 + $0x130] sm:$0xff]  ;;  %v5934_v55 = vmax.f32 %v5923_v18, %v5929_v9  ;;  %v5933_v48 = vld [vmem:[#allocation7 + $0x138] sm:$0xff]  ;;  %v5935_v8 = vmax.f32 %v5924_v29, %v5930_v39  ;;  %v5936_v25 = vmax.f32 %v5925_v28, %v5931_v20 }
 0x559   :  { %12742 = vmatpush3.bf16.msra.mxu0 %v15209_v33  ;;  %v3636_v47 = vsel %vm111_vm2, %v3631_v24, 0.0  ;;  %v3635_v38 = vadd.f32 %v3634_v36, %v3633_v62  ;;  %v5937_v61 = vmax.f32 %v5926_v14, %v5932_v30  ;;  %v3638_v24 = vsel %vm111_vm2, %v3632_v15, 0.0 }
 0x55a   :  { %12730 = vmatpush3.bf16.msra.mxu1 %v12727_v19  ;;  %12744 = vmatprep.subr.bf16.mxu0 %v15213_v0  ;;  %v5938_v36 = vmax.f32 %v5927_v45, %v5933_v48  ;;  %v15275_v62 = vmax.f32 %v5934_v55, 0.0  ;;  %v15277_v7 = vmax.f32 %v5935_v8, 0.0 }
 0x55b   :  { %12732 = vmatprep.subr.bf16.mxu1 %v12723_v16  ;;  %v3637_v12 = vadd.f32 %v3636_v47, %v3635_v38  ;;  %v15279_v47 = vmax.f32 %v5936_v25, 0.0  ;;  %v15281_v38 = vmax.f32 %v5937_v61, 0.0 }
 0x55c   :  { %17842 = vst [vmem:[#allocation47_spill] sm:$0xff] %v15275_v62  ;;  %17843 = vst [vmem:[#allocation31_spill] sm:$0xff] %v15277_v7  ;;  %v5944_v18 = vmul.f32 %v15275_v62, %v15275_v62  ;;  %v5945_v20 = vmul.f32 %v15277_v7, %v15277_v7  ;;  %v17847_v7 = vld [vmem:[#allocation23_spill] sm:$0xff] }
 0x55d   :  { %11641 = vmatmul.mubr.msk.f32.vlgmr.msra.gmra.mrb[72].mxu1 %vm4037_vm4, %v15131_v57  ;;  %12746 = vmatpush3.bf16.msra.mxu0 %v15213_v0  ;;  %v3639_v51 = vadd.f32 %v3638_v24, %v3637_v12  ;;  %17844 = vst [vmem:[#allocation74_spill] sm:$0xff] %v15279_v47  ;;  %17845 = vst [vmem:[#allocation72_spill] sm:$0xff] %v15281_v38  ;;  %v5946_v39 = vmul.f32 %v15279_v47, %v15279_v47 }
 0x55e   :  { %12734 = vmatpush3.bf16.msra.mxu1 %v12723_v16  ;;  %11643 = vmatprep.mubr.msk.f32.mxu1 %vm4037_vm4, %v15136_v44  ;;  %v15231_v16 = vld [vmem:[%s17402_s3 + $0x158] sm:$0xff]  ;;  %v5947_v55 = vmul.f32 %v15281_v38, %v15281_v38  ;;  %v5949_v8 = vsel %vm111_vm2, %v5944_v18, 0.0  ;;  %v5950_v61 = vsel %vm111_vm2, %v5945_v20, 0.0 }
 0x55f   :  { %12736 = vmatprep.subr.bf16.mxu1 %v12727_v19  ;;  %11680 = vmatprep.subr.mxu0 %v15217_v59  ;;  %17833 = vst [vmem:[#allocation36_spill] sm:$0xff] %v15231_v16  ;;  %v3640_v45 = vrot.slane %v3639_v51, 4  ;;  %v5951_v28 = vadd.f32 %v5950_v61, %v5949_v8  ;;  %v5952_v12 = vsel %vm111_vm2, %v5946_v39, 0.0 }
 0x560   :  { %v5954_v9 = vsel %vm111_vm2, %v5947_v55, 0.0 }
 0x561   :  { %11644 = vmatmul.mubr.msk.f32.gmra.mrb[74].mxu1 %vm4037_vm4, %v15145_v53  ;;  %11681 = vmatpush3.msra.mxu0 %v15217_v59  ;;  %v15303_v20 = vadd.f32 %v3640_v45, %v3639_v51  ;;  %v5953_v55 = vadd.f32 %v5952_v12, %v5951_v28 }
 0x562   :  { %12738 = vmatpush3.bf16.msra.mxu1 %v12727_v19  ;;  %11646 = vmatprep.mubr.msk.f32.mxu1 %vm4037_vm4, %v15150_v46  ;;  %v15238_v19 = vld [vmem:[%s17402_s3 + $0x160] sm:$0xff] }
 0x563   :  { %12748 = vmatprep.subr.bf16.mxu1 %v15154_v2  ;;  %17834 = vst [vmem:[#allocation35_spill] sm:$0xff] %v15238_v19 }
 0x565   :  { %11647 = vmatmul.mubr.msk.f32.gmra.mrb[76].mxu1 %vm4037_vm4, %v15161_v32 }
 0x566   :  { %11649 = vmatprep.mubr.msk.f32.mxu1 %vm4037_vm4, %v15167_v37 }
 0x569   :  { %11650 = vmatmul.mubr.msk.f32.gmra.mrb[78].mxu1 %vm4037_vm4, %v15180_v4 }
 0x56a   :  { %11660 = vmatprep.mubr.msk.f32.mxu1 %vm4037_vm4, %v15185_v31 }
 0x56d   :  { %11661 = vmatmul.mubr.msk.f32.vlgmr.msra.gmra.mrb[80].mxu1 %vm4037_vm4, %v15194_v22 }
 0x56e   :  { %12750 = vmatpush3.bf16.msra.mxu1 %v15154_v2  ;;  %11663 = vmatprep.mubr.msk.f32.mxu1 %vm4037_vm4, %v15224_v63 }
 0x56f   :  { %12752 = vmatprep.subr.bf16.mxu1 %v15198_v11 }
 0x571   :  { %11664 = vmatmul.mubr.msk.f32.gmra.mrb[82].mxu1 %vm4037_vm4, %v15231_v16 }
 0x572   :  { %12754 = vmatpush3.bf16.msra.mxu1 %v15198_v11  ;;  %11666 = vmatprep.mubr.msk.f32.mxu1 %vm4037_vm4, %v15238_v19 }
 0x573   :  { %11702 = vmatprep.subr.mxu1 %v15204_v17 }
 0x575   :  { %11667 = vmatmul.mubr.msk.f32.gmra.mrb[84].mxu1 %vm4037_vm4, %v15245_v60 }
 0x576   :  { %11703 = vmatpush3.msra.mxu1 %v15204_v17  ;;  %11669 = vmatprep.mubr.msk.f32.mxu1 %vm4037_vm4, %v15252_v6 }
 0x579   :  { %11670 = vmatmul.mubr.msk.f32.gmra.mrb[86].mxu1 %vm4037_vm4, %v15257_v27  ;;  %v15283_v27 = vmax.f32 %v5938_v36, 0.0 }
 0x57b   :  { %17846 = vst [vmem:[#allocation29_spill] sm:$0xff] %v15283_v27  ;;  %v5948_v29 = vmul.f32 %v15283_v27, %v15283_v27 }
 0x57d   :  { %v5956_v28 = vsel %vm111_vm2, %v5948_v29, 0.0 }
 0x5ea   :  { %v11571_v14 = vpop.f32.mrb[64].mxu1  ;;  %v11587_v15 = vpop.f32.mrb[64].mxu0 }
 0x5eb   :  { %vm3424_vm0 = vcmp.ge.f32.partialorder %v11571_v14, 0.0  ;;  %v3428_v30 = vmul.f32 %v11571_v14, %v14805_v40  ;;  %vm3521_vm9 = vcmp.ge.f32.partialorder %v11587_v15, 0.0  ;;  %v3525_v48 = vmul.f32 %v11587_v15, %v14805_v40  ;;  %v3404_v25 = vpop.f32.mrb[65].mxu1  ;;  %v3501_v24 = vpop.f32.mrb[65].mxu0 }
 0x5ec   :  { %vm3423_vm10 = vcmp.ge.f32.partialorder %v3404_v25, 0.0  ;;  %v3427_v36 = vmul.f32 %v3404_v25, %v14805_v40  ;;  %vm3520_vm11 = vcmp.ge.f32.partialorder %v3501_v24, 0.0  ;;  %v3524_v18 = vmul.f32 %v3501_v24, %v14805_v40 }
 0x5ed   :  { %v15305_v8 = vsel %vm3424_vm0, %v11571_v14, %v3428_v30  ;;  %v15307_v39 = vsel %vm3521_vm9, %v11587_v15, %v3525_v48  ;;  %v5955_v15 = vadd.f32 %v5954_v9, %v5953_v55 }
 0x5ee   :  { %v3647_v61 = vmul.f32 %v15305_v8, %v14802_v41  ;;  %v3668_v27 = vmul.f32 %v15307_v39, %v14802_v41  ;;  %v15313_v38 = vsel %vm3423_vm10, %v3404_v25, %v3427_v36  ;;  %v15315_v47 = vsel %vm3520_vm11, %v3501_v24, %v3524_v18  ;;  %v11574_v45 = vpop.f32.mrb[66].mxu1 }
 0x5ef   :  { %v3646_v62 = vmul.f32 %v15313_v38, %v17847_v7  ;;  %v3667_v51 = vmul.f32 %v15315_v47, %v17847_v7  ;;  %v11590_v14 = vpop.f32.mrb[66].mxu0  ;;  %vm3426_vm1 = vcmp.ge.f32.partialorder %v11574_v45, 0.0  ;;  %v3430_v48 = vmul.f32 %v11574_v45, %v14805_v40  ;;  %v3414_v25 = vpop.f32.mrb[67].mxu1 }
 0x5f0   :  { %v3651_v12 = vsel %vm111_vm2, %v3647_v61, 0.0  ;;  %v3672_v30 = vsel %vm111_vm2, %v3668_v27, 0.0  ;;  %v3511_v24 = vpop.f32.mrb[67].mxu0  ;;  %vm3523_vm12 = vcmp.ge.f32.partialorder %v11590_v14, 0.0  ;;  %v3527_v6 = vmul.f32 %v11590_v14, %v14805_v40 }
 0x5f1   :  { %v3650_v36 = vsel %vm111_vm2, %v3646_v62, 0.0  ;;  %v3671_v18 = vsel %vm111_vm2, %v3667_v51, 0.0  ;;  %v15328_v55 = vsel %vm3426_vm1, %v11574_v45, %v3430_v48  ;;  %vm3425_vm14 = vcmp.ge.f32.partialorder %v3414_v25, 0.0 }
 0x5f2   :  { %v3652_v21 = vadd.f32 %v3651_v12, %v3650_v36  ;;  %v3673_v9 = vadd.f32 %v3672_v30, %v3671_v18  ;;  %v15330_v29 = vsel %vm3523_vm12, %v11590_v14, %v3527_v6  ;;  %v3429_v27 = vmul.f32 %v3414_v25, %v14805_v40  ;;  %v17848_v6 = vld [vmem:[#allocation25_spill] sm:$0xff] }
 0x5f3   :  { %vm3522_vm15 = vcmp.ge.f32.partialorder %v3511_v24, 0.0  ;;  %v3649_v61 = vmul.f32 %v15328_v55, %v14877_v58  ;;  %v3670_v62 = vmul.f32 %v15330_v29, %v14877_v58  ;;  %v3526_v51 = vmul.f32 %v3511_v24, %v14805_v40 }
 0x5f4   :  { %v5957_v60 = vadd.f32 %v5956_v28, %v5955_v15  ;;  %v15338_v19 = vsel %vm3425_vm14, %v3414_v25, %v3429_v27  ;;  %v11603_v12 = vpop.f32.mrb[68].mxu1  ;;  %v3642_v30 = vrot.slane %v15303_v20, 2 }
 0x5f5   :  { %v3936_v45 = vpop.f32.mrb[68].mxu0  ;;  %v3648_v14 = vmul.f32 %v15338_v19, %v17848_v6  ;;  %v15343_v48 = vsel %vm3522_vm15, %v3511_v24, %v3526_v51  ;;  %vm3618_vm5 = vcmp.ge.f32.partialorder %v11603_v12, 0.0  ;;  %v3598_v36 = vpop.f32.mrb[69].mxu1  ;;  %v3622_v15 = vmul.f32 %v11603_v12, %v14805_v40 }
 0x5f6   :  { %v11619_v18 = vpop.f32.mrb[69].mxu0  ;;  %5958 = vadd.xlane.f32.xlu1 %v5957_v60  ;;  %v3669_v16 = vmul.f32 %v15343_v48, %v17848_v6  ;;  %v3960_v28 = vsub.f32 %v14964_v13, %v3936_v45  ;;  %vm3617_vm6 = vcmp.ge.f32.partialorder %v3598_v36, 0.0  ;;  %v3655_v25 = vsel %vm111_vm2, %v3649_v61, 0.0 }
 0x5f7   :  { %v3676_v27 = vsel %vm111_vm2, %v3670_v62, 0.0  ;;  %v3653_v17 = vsel %vm111_vm2, %v3648_v14, 0.0  ;;  %v3621_v24 = vmul.f32 %v3598_v36, %v14805_v40  ;;  %v15354_v60 = vsel %vm3618_vm5, %v11603_v12, %v3622_v15 }
 0x5f8   :  { %v3654_v51 = vadd.f32 %v3653_v17, %v3652_v21  ;;  %v3674_v18 = vsel %vm111_vm2, %v3669_v16, 0.0  ;;  %v3965_v4 = vmul.f32 0.999995, %v3960_v28  ;;  %v11606_v63 = vpop.f32.mrb[70].mxu1  ;;  %v3689_v13 = vmul.f32 %v15354_v60, %v14802_v41 }
 0x5f9   :  { %v3941_v37 = vpop.f32.mrb[70].mxu0  ;;  %v3675_v11 = vadd.f32 %v3674_v18, %v3673_v9  ;;  %v15358_v45 = vsel %vm3617_vm6, %v3598_v36, %v3621_v24  ;;  %vm3620_vm7 = vcmp.ge.f32.partialorder %v11606_v63, 0.0  ;;  %v3608_v61 = vpop.f32.mrb[71].mxu1  ;;  %v3624_v17 = vmul.f32 %v11606_v63, %v14805_v40 }
 0x5fa   :  { %v11622_v62 = vpop.f32.mrb[71].mxu0  ;;  %v3656_v14 = vadd.f32 %v3655_v25, %v3654_v51  ;;  %v3688_v21 = vmul.f32 %v15358_v45, %v17847_v7  ;;  %v3961_v16 = vsub.f32 %v14966_v52, %v3941_v37  ;;  %v3693_v15 = vsel %vm111_vm2, %v3689_v13, 0.0 }
 0x5fb   :  { %v3677_v12 = vadd.f32 %v3676_v27, %v3675_v11  ;;  %vm3619_vm8 = vcmp.ge.f32.partialorder %v3608_v61, 0.0  ;;  %v3623_v9 = vmul.f32 %v3608_v61, %v14805_v40  ;;  %v15367_v28 = vsel %vm3620_vm7, %v11606_v63, %v3624_v17 }
 0x5fc   :  { %v3657_v41 = vrot.slane %v3656_v14, 4  ;;  %v3692_v36 = vsel %vm111_vm2, %v3688_v21, 0.0  ;;  %v3966_v24 = vmul.f32 0.999995, %v3961_v16  ;;  %v3643_v51 = vadd.f32 %v3642_v30, %v15303_v20 }
 0x5fd   :  { %v3946_v25 = vpop.f32.mrb[72].mxu0  ;;  %v3678_v7 = vrot.slane %v3677_v12, 4  ;;  %v3694_v18 = vadd.f32 %v3693_v15, %v3692_v36  ;;  %v15370_v62 = vsel %vm3619_vm8, %v3608_v61, %v3623_v9  ;;  %v3691_v11 = vmul.f32 %v15367_v28, %v14877_v58 }
 0x5fe   :  { %v11625_v52 = vpop.f32.mrb[73].mxu0  ;;  %v3658_v37 = vadd.f32 %v3657_v41, %v3656_v14  ;;  %v15374_v27 = vpack.c.bf16 %v3966_v24, %v3965_v4  ;;  %v3690_v40 = vmul.f32 %v15370_v62, %v17848_v6  ;;  %v3962_v13 = vsub.f32 %v14983_v3, %v3946_v25 }
 0x5ff   :  { %v3679_v63 = vadd.f32 %v3678_v7, %v3677_v12  ;;  %v3644_v58 = vrot.slane %v3643_v51, 1  ;;  %v3697_v15 = vsel %vm111_vm2, %v3691_v11, 0.0 }
 0x600   :  { %v3659_v21 = vrot.slane %v3658_v37, 2  ;;  %v3695_v20 = vsel %vm111_vm2, %v3690_v40, 0.0  ;;  %12756 = vmatprep.subr.bf16.mxu0 %v15374_v27  ;;  %v3967_v12 = vmul.f32 0.999995, %v3962_v13 }
 0x601   :  { %v3951_v30 = vpop.f32.mrb[74].mxu0  ;;  %v3680_v61 = vrot.slane %v3679_v63, 2  ;;  %v3696_v17 = vadd.f32 %v3695_v20, %v3694_v18  ;;  %v3645_v18 = vadd.f32 %v3644_v58, %v3643_v51 }
 0x602   :  { %v3963_v14 = vsub.f32 %v14985_v1, %v3951_v30  ;;  %v11628_v16 = vpop.f32.mrb[75].mxu0  ;;  %v3660_v4 = vadd.f32 %v3659_v21, %v3658_v37 }
 0x603   :  { %v3681_v9 = vadd.f32 %v3680_v61, %v3679_v63  ;;  %v3698_v6 = vadd.f32 %v3697_v15, %v3696_v17 }
 0x604   :  { %v3968_v41 = vmul.f32 0.999995, %v3963_v14  ;;  %v3661_v3 = vrot.slane %v3660_v4, 1 }
 0x605   :  { %v15383_v36 = vpop.f32.mrb[76].mxu0  ;;  %v3682_v24 = vrot.slane %v3681_v9, 1  ;;  %v3699_v25 = vrot.slane %v3698_v6, 4 }
 0x606   :  { %v15385_v7 = vpack.c.bf16 %v3968_v41, %v3967_v12  ;;  %v11631_v52 = vpop.f32.mrb[77].mxu0  ;;  %v3662_v40 = vadd.f32 %v3661_v3, %v3660_v4 }
 0x607   :  { %v3683_v1 = vadd.f32 %v3682_v24, %v3681_v9  ;;  %v3700_v20 = vadd.f32 %v3699_v25, %v3698_v6  ;;  %v15390_v52 = vpop.permute.xlu1 %4004 }
 0x608   :  { %v3663_v30 = vadd.f32 %v3662_v40, %v3645_v18 }
 0x609   :  { %v3684_v37 = vadd.f32 %v3683_v1, %v3645_v18  ;;  %v3701_v21 = vrot.slane %v3700_v20, 2 }
 0x60a   :  { %vm3664_vm0 = vcmp.ge.f32.partialorder %v3663_v30, 0.0  ;;  %v3665_v11 = vmul.f32 %v3663_v30, %v15011_v34 }
 0x60b   :  { %vm3685_vm9 = vcmp.ge.f32.partialorder %v3684_v37, 0.0  ;;  %v3686_v63 = vmul.f32 %v3684_v37, %v15011_v34  ;;  %v3702_v13 = vadd.f32 %v3701_v21, %v3700_v20  ;;  %v15392_v40 = vpop.permute.xlu1 %4009 }
 0x60c   :  { %v3666_v61 = vsel %vm3664_vm0, %v3663_v30, %v3665_v11 }
 0x60d   :  { %v3687_v17 = vsel %vm3685_vm9, %v3684_v37, %v3686_v63  ;;  %v3703_v14 = vrot.slane %v3702_v13, 1 }
 0x60e   :  { %v3709_v16 = vmax.f32 %v3666_v61, %v3687_v17 }
 0x60f   :  { %v3704_v15 = vadd.f32 %v3703_v14, %v3702_v13 }
 0x611   :  { %v3705_v12 = vadd.f32 %v3704_v15, %v3645_v18  ;;  %v15405_v15 = vpop.permute.xlu1 %4019 }
 0x613   :  { %vm3706_vm10 = vcmp.ge.f32.partialorder %v3705_v12, 0.0  ;;  %v3707_v51 = vmul.f32 %v3705_v12, %v15011_v34 }
 0x615   :  { %v3708_v58 = vsel %vm3706_vm10, %v3705_v12, %v3707_v51  ;;  %v15407_v51 = vpop.permute.xlu0 %3999 }
 0x616   :  { %v3710_v4 = vmax.f32 %v3709_v16, %v3708_v58 }
 0x618   :  { %v3711_v9 = vsub.f32 %v3666_v61, %v3710_v4  ;;  %v3714_v6 = vsub.f32 %v3687_v17, %v3710_v4  ;;  %v3717_v41 = vsub.f32 %v3708_v58, %v3710_v4 }
 0x61a   :  { %v3712_v3 = vmul.f32 1.442695, %v3711_v9  ;;  %v3715_v24 = vmul.f32 1.442695, %v3714_v6  ;;  %v3718_v25 = vmul.f32 1.442695, %v3717_v41  ;;  %v15415_v6 = vpop.permute.xlu0 %4014 }
 0x61c   :  { %12974 = vpow2.f32 %v3712_v3 }
 0x61d   :  { %12976 = vpow2.f32 %v3715_v24 }
 0x61e   :  { %12978 = vpow2.f32 %v3718_v25 }
 0x626   :  { %v12975_v1 = vpop.eup %12974 }
 0x627   :  { %v12977_v18 = vpop.eup %12976  ;;  %v3724_v20 = vmul.f32 %v12975_v1, %v15338_v19  ;;  %v3722_v34 = vmul.f32 %v12975_v1, %v15313_v38  ;;  %v3723_v30 = vmul.f32 %v12975_v1, %v15305_v8  ;;  %v3725_v37 = vmul.f32 %v12975_v1, %v15328_v55 }
 0x628   :  { %v12979_v21 = vpop.eup %12978  ;;  %v3720_v11 = vadd.f32 %v12977_v18, %v12975_v1  ;;  %v3728_v63 = vmul.f32 %v12977_v18, %v15343_v48  ;;  %v3726_v13 = vmul.f32 %v12977_v18, %v15315_v47  ;;  %v3727_v61 = vmul.f32 %v12977_v18, %v15307_v39 }
 0x629   :  { %v3736_v17 = vmul.f32 %v12979_v21, %v15370_v62  ;;  %v3734_v14 = vmul.f32 %v12979_v21, %v15358_v45  ;;  %v3735_v19 = vmul.f32 %v12979_v21, %v15354_v60  ;;  %v3729_v38 = vmul.f32 %v12977_v18, %v15330_v29  ;;  %v15413_v29 = vpop.permute.xlu1 %4029 }
 0x62a   :  { %v3721_v16 = vadd.f32 %v12979_v21, %v3720_v11  ;;  %v3732_v8 = vadd.f32 %v3728_v63, %v3724_v20  ;;  %v3730_v55 = vadd.f32 %v3726_v13, %v3722_v34  ;;  %v3731_v12 = vadd.f32 %v3727_v61, %v3723_v30 }
 0x62b   :  { %v3733_v48 = vadd.f32 %v3729_v38, %v3725_v37  ;;  %v3737_v47 = vmul.f32 %v12979_v21, %v15367_v28  ;;  %v3964_v28 = vsub.f32 %v15022_v23, %v15383_v36  ;;  %v15440_v36 = vpop.permute.xlu0 %4024 }
 0x62c   :  { %v3740_v39 = vadd.f32 %v3736_v17, %v3732_v8  ;;  %12980 = vrcp.f32 %v3721_v16  ;;  %v3738_v62 = vadd.f32 %v3734_v14, %v3730_v55  ;;  %v3739_v58 = vadd.f32 %v3735_v19, %v3731_v12 }
 0x62d   :  { %v3741_v45 = vadd.f32 %v3737_v47, %v3733_v48  ;;  %v15437_v20 = vpop.permute.xlu1 %4741  ;;  %v15446_v37 = vmul.f32 0.999995, %v3964_v28  ;;  %v17857_v48 = vld [vmem:[#allocation37_spill] sm:$0xff] }
 0x62e   :  { %17853 = vst [vmem:[#allocation80_spill] sm:$0xff] %v15437_v20  ;;  %v3308_v47 = vadd.f32 %v17857_v48, %v15098_v42 }
 0x630   :  { %v11642_v4 = vpop.f32.mrb[72].mxu1 }
 0x631   :  { %v15411_v60 = vadd.f32 %v11642_v4, %v15390_v52  ;;  %v4128_v9 = vpop.f32.mrb[73].mxu1  ;;  %v15460_v16 = vpop.permute.xlu1 %4802 }
 0x632   :  { %v15418_v41 = vadd.f32 %v4128_v9, %v15407_v51  ;;  %17856 = vst [vmem:[#allocation13_spill] sm:$0xff] %v15460_v16  ;;  %v15477_v4 = vpop.permute.xlu0 %4034  ;;  %v17860_v9 = vld [vmem:[#allocation26_spill] sm:$0xff] }
 0x633   :  { %17849 = vst [vmem:[#allocation78_spill] sm:$0xff] %v15411_v60 }
 0x634   :  { %17850 = vst [vmem:[#allocation76_spill] sm:$0xff] %v15418_v41  ;;  %v11645_v3 = vpop.f32.mrb[74].mxu1  ;;  %11682 = vmatprep.mubr.msk.f32.mxu0 %vm111_vm2, %v15418_v41  ;;  %11704 = vmatprep.mubr.msk.f32.mxu1 %vm111_vm2, %v15418_v41 }
 0x635   :  { %v15427_v24 = vadd.f32 %v11645_v3, %v15415_v6  ;;  %v4138_v25 = vpop.f32.mrb[75].mxu1  ;;  %11683 = vmatmul.mubr.msk.f32.vlgmr.msra.gmra.mrb[78].mxu0 %vm111_vm2, %v15411_v60  ;;  %11705 = vmatmul.mubr.msk.f32.vlgmr.msra.gmra.mrb[88].mxu1 %vm111_vm2, %v15411_v60  ;;  %v3313_v3 = vadd.f32 %v17860_v9, %v15096_v56 }
 0x636   :  { %v15434_v1 = vadd.f32 %v4138_v25, %v15392_v40  ;;  %12758 = vmatpush3.bf16.msra.mxu0 %v15374_v27  ;;  %v12981_v18 = vpop.eup %12980 }
 0x637   :  { %17851 = vst [vmem:[#allocation62_spill] sm:$0xff] %v15427_v24  ;;  %12760 = vmatprep.subr.bf16.mxu0 %v15385_v7  ;;  %v3745_v23 = vmul.f32 %v12981_v18, %v3740_v39  ;;  %v3743_v30 = vmul.f32 %v12981_v18, %v3738_v62  ;;  %v3744_v11 = vmul.f32 %v12981_v18, %v3739_v58  ;;  %v17858_v62 = vld [vmem:[#allocation39_spill] sm:$0xff] }
 0x638   :  { %17852 = vst [vmem:[#allocation60_spill] sm:$0xff] %v15434_v1  ;;  %v11648_v34 = vpop.f32.mrb[76].mxu1  ;;  %11685 = vmatprep.mubr.msk.f32.mxu0 %vm111_vm2, %v15434_v1  ;;  %11707 = vmatprep.mubr.msk.f32.mxu1 %vm111_vm2, %v15434_v1  ;;  %v3746_v63 = vmul.f32 %v12981_v18, %v3741_v45  ;;  %v3318_v58 = vadd.f32 %v17858_v62, %v15107_v35  ;;  %v17880_v62 = vld [vmem:[#allocation30_spill] sm:$0xff] }
 0x639   :  { %v4148_v21 = vpop.f32.mrb[77].mxu1  ;;  %11686 = vmatmul.mubr.msk.f32.gmra.mrb[80].mxu0 %vm111_vm2, %v15427_v24  ;;  %11708 = vmatmul.mubr.msk.f32.gmra.mrb[90].mxu1 %vm111_vm2, %v15427_v24  ;;  %v3749_v13 = vmul.f32 0.33333334, %v3745_v23  ;;  %v3747_v17 = vmul.f32 0.33333334, %v3743_v30  ;;  %v15457_v14 = vadd.f32 %v11648_v34, %v15440_v36  ;;  %v17863_v34 = vld [vmem:[#allocation40_spill] sm:$0xff] }
 0x63a   :  { %v15453_v61 = vadd.f32 %v4148_v21, %v15405_v15  ;;  %12762 = vmatpush3.bf16.msra.mxu0 %v15385_v7  ;;  %v3748_v19 = vmul.f32 0.33333334, %v3744_v11  ;;  %v3750_v38 = vmul.f32 0.33333334, %v3746_v63  ;;  %v3323_v30 = vadd.f32 %v17863_v34, %v15101_v54  ;;  %v15501_v21 = vpop.permute.xlu1 %4806 }
 0x63b   :  { %17855 = vst [vmem:[#allocation69_spill] sm:$0xff] %v15457_v14  ;;  %11724 = vmatprep.subr.mxu0 %v15446_v37  ;;  %v3753_v8 = vadd.f32 %v3749_v13, %v14999_v49  ;;  %v3751_v12 = vadd.f32 %v3747_v17, %v14975_v5  ;;  %17864 = vst [vmem:[#allocation42_spill] sm:$0xff] %v15501_v21 }
 0x63c   :  { %17854 = vst [vmem:[#allocation79_spill] sm:$0xff] %v15453_v61  ;;  %v11651_v55 = vpop.f32.mrb[78].mxu1  ;;  %11688 = vmatprep.mubr.msk.f32.mxu0 %vm111_vm2, %v15453_v61  ;;  %11710 = vmatprep.mubr.msk.f32.mxu1 %vm111_vm2, %v15453_v61  ;;  %v3752_v49 = vadd.f32 %v3748_v19, %v14981_v10  ;;  %v3754_v10 = vadd.f32 %v3750_v38, %v15006_v26 }
 0x63d   :  { %v4158_v39 = vpop.f32.mrb[79].mxu1  ;;  %11689 = vmatmul.mubr.msk.f32.gmra.mrb[82].mxu0 %vm111_vm2, %v15457_v14  ;;  %11711 = vmatmul.mubr.msk.f32.gmra.mrb[92].mxu1 %vm111_vm2, %v15457_v14  ;;  %v3757_v45 = vmul.f32 0.999995, %v3753_v8  ;;  %v3755_v42 = vmul.f32 0.999995, %v3751_v12  ;;  %v15486_v28 = vadd.f32 %v11651_v55, %v15477_v4 }
 0x63e   :  { %v15480_v5 = vadd.f32 %v4158_v39, %v15413_v29  ;;  %11725 = vmatpush3.msra.mxu0 %v15446_v37  ;;  %v3756_v25 = vmul.f32 0.999995, %v3752_v49  ;;  %v3758_v56 = vmul.f32 0.999995, %v3754_v10  ;;  %v15517_v48 = vpop.permute.xlu1 %4810  ;;  %v17879_v49 = vld [vmem:[#allocation70_spill] sm:$0xff] }
 0x63f   :  { %17861 = vst [vmem:[#allocation12_spill] sm:$0xff] %v15486_v28  ;;  %v3759_v35 = vadd.f32 %v3755_v42, %v3308_v47  ;;  %v3761_v18 = vadd.f32 %v3757_v45, %v3318_v58  ;;  %17866 = vst [vmem:[#allocation15_spill] sm:$0xff] %v15517_v48 }
 0x640   :  { %17859 = vst [vmem:[#allocation63_spill] sm:$0xff] %v15480_v5  ;;  %11691 = vmatprep.mubr.msk.f32.mxu0 %vm111_vm2, %v15480_v5  ;;  %11713 = vmatprep.mubr.msk.f32.mxu1 %vm111_vm2, %v15480_v5  ;;  %v15493_v23 = vpop.f32.mrb[80].mxu1  ;;  %v3760_v26 = vadd.f32 %v3756_v25, %v3313_v3  ;;  %v3762_v13 = vadd.f32 %v3758_v56, %v3323_v30 }
 0x641   :  { %17862 = vst [vmem:[#allocation64_spill] sm:$0xff] %v15493_v23  ;;  %11692 = vmatmul.mubr.msk.f32.gmra.mrb[84].mxu0 %vm111_vm2, %v15486_v28  ;;  %11714 = vmatmul.mubr.msk.f32.gmra.mrb[94].mxu1 %vm111_vm2, %v15486_v28  ;;  %v15503_v11 = vpop.f32.mrb[81].mxu1  ;;  %vm3763_vm11 = vcmp.ge.f32.partialorder %v3759_v35, 0.0  ;;  %v3767_v63 = vmul.f32 %v3759_v35, %v15116_v43  ;;  %vm3765_vm12 = vcmp.ge.f32.partialorder %v3761_v18, 0.0  ;;  %v3769_v19 = vmul.f32 %v3761_v18, %v15116_v43 }
 0x642   :  { %17865 = vst [vmem:[#allocation66_spill] sm:$0xff] %v15503_v11  ;;  %11726 = vmatprep.mubr.msk.f32.mxu0 %vm111_vm2, %v15418_v41  ;;  %11746 = vmatprep.mubr.msk.f32.mxu1 %vm4037_vm4, %v15048_v50  ;;  %vm3764_vm1 = vcmp.ge.f32.partialorder %v3760_v26, 0.0  ;;  %v3768_v54 = vmul.f32 %v3760_v26, %v15116_v43  ;;  %vm3766_vm14 = vcmp.ge.f32.partialorder %v3762_v13, 0.0  ;;  %v3770_v8 = vmul.f32 %v3762_v13, %v15116_v43  ;;  %v15523_v43 = vpop.permute.xlu1 %4814 }
 0x643   :  { %v3771_v17 = vsel %vm3763_vm11, %v3759_v35, %v3767_v63  ;;  %v3773_v50 = vsel %vm3765_vm12, %v3761_v18, %v3769_v19  ;;  %17867 = vst [vmem:[#allocation67_spill] sm:$0xff] %v15523_v43 }
 0x644   :  { %v3772_v38 = vsel %vm3764_vm1, %v3760_v26, %v3768_v54  ;;  %v3774_v12 = vsel %vm3766_vm14, %v3762_v13, %v3770_v8  ;;  %v15591_v30 = vpop.f32.mrb[82].mxu1 }
 0x645   :  { %11727 = vmatmul.mubr.msk.f32.vlgmr.msra.gmra.mrb[86].mxu0 %vm111_vm2, %v15411_v60  ;;  %v12763_v55 = vpack.c.bf16 %v3772_v38, %v3771_v17  ;;  %v12767_v47 = vpack.c.bf16 %v3774_v12, %v3773_v50  ;;  %17885 = vst [vmem:[#allocation52_spill] sm:$0xff] %v15591_v30  ;;  %v15593_v56 = vpop.f32.mrb[83].mxu1  ;;  %v15603_v38 = vpop.permute.xlu0 %4745  ;;  %v4772_v50 = vmul.f32 %v15437_v20, %v15418_v41 }
 0x646   :  { %11729 = vmatprep.mubr.msk.f32.mxu0 %vm111_vm2, %v15434_v1  ;;  %v15539_v39 = vpop.permute.xlu1 %4818  ;;  %17886 = vst [vmem:[#allocation53_spill] sm:$0xff] %v15593_v56  ;;  %17891 = vst [vmem:[#allocation34_spill] sm:$0xff] %v15603_v38  ;;  %v4773_v12 = vmul.f32 %v15603_v38, %v15411_v60  ;;  %v15677_v38 = vld [vmem:[%s17403_s4 + $0xc0] sm:$0x7]  ;;  %s15793_s4 = sld [smem:[#allocation4 + $0x7]] }
 0x647   :  { %12764 = vmatprep.subr.bf16.mxu1 %v12763_v55  ;;  %12772 = vmatprep.subr.bf16.mxu0 %v12763_v55  ;;  %17868 = vst [vmem:[#allocation61_spill] sm:$0xff] %v15539_v39 }
 0x648   :  { %12766 = vmatpush3.bf16.msra.mxu1 %v12763_v55  ;;  %12774 = vmatpush3.bf16.msra.mxu0 %v12763_v55  ;;  %v15595_v54 = vpop.f32.mrb[84].mxu1 }
 0x649   :  { %12768 = vmatprep.subr.bf16.mxu1 %v12767_v47  ;;  %12776 = vmatprep.subr.bf16.mxu0 %v12767_v47  ;;  %17887 = vst [vmem:[#allocation54_spill] sm:$0xff] %v15595_v54  ;;  %v15597_v13 = vpop.f32.mrb[85].mxu1  ;;  %v15605_v8 = vpop.permute.xlu0 %4749 }
 0x64a   :  { %11730 = vmatmul.mubr.msk.f32.gmra.mrb[88].mxu0 %vm111_vm2, %v15427_v24  ;;  %17888 = vst [vmem:[#allocation55_spill] sm:$0xff] %v15597_v13  ;;  %17892 = vst [vmem:[#allocation77_spill] sm:$0xff] %v15605_v8  ;;  %6122 = vperm.xlu0 %12938, %v15677_v38  }
 0x64b   :  { %11732 = vmatprep.mubr.msk.f32.mxu0 %vm111_vm2, %v15453_v61 }
 0x64c   :  { %12770 = vmatpush3.bf16.msra.mxu1 %v12767_v47  ;;  %12778 = vmatpush3.bf16.msra.mxu0 %v12767_v47  ;;  %v15599_v17 = vpop.f32.mrb[86].mxu1  ;;  %v4780_v47 = vsel %vm111_vm2, %v4772_v50, 0.0 }
 0x64d   :  { %12788 = vmatprep.subr.bf16.mxu0 %v15154_v2  ;;  %12780 = vmatprep.subr.bf16.mxu1 %v15209_v33  ;;  %17889 = vst [vmem:[#allocation56_spill] sm:$0xff] %v15599_v17  ;;  %v15601_v19 = vpop.f32.mrb[87].mxu1  ;;  %v15607_v55 = vpop.permute.xlu0 %4753 }
 0x64e   :  { %11733 = vmatmul.mubr.msk.f32.gmra.mrb[90].mxu0 %vm111_vm2, %v15457_v14  ;;  %17890 = vst [vmem:[#allocation57_spill] sm:$0xff] %v15601_v19  ;;  %17893 = vst [vmem:[#allocation59_spill] sm:$0xff] %v15607_v55 }
 0x64f   :  { %11747 = vmatmul.mubr.msk.f32.vlgmr.msra.gmra.mrb[96].mxu1 %vm4037_vm4, %v15131_v57  ;;  %11735 = vmatprep.mubr.msk.f32.mxu0 %vm111_vm2, %v15480_v5  ;;  %v17869_v57 = vld [vmem:[#allocation33_spill] sm:$0xff] }
 0x650   :  { %12782 = vmatpush3.bf16.msra.mxu1 %v15209_v33  ;;  %11749 = vmatprep.mubr.msk.f32.mxu1 %vm4037_vm4, %v15136_v44  ;;  %v15556_v44 = vpop.permute.xlu1 %4822 }
 0x651   :  { %12784 = vmatprep.subr.bf16.mxu1 %v15213_v0  ;;  %17870 = vst [vmem:[#allocation71_spill] sm:$0xff] %v15556_v44 }
 0x652   :  { %11736 = vmatmul.mubr.msk.f32.gmra.mrb[92].mxu0 %vm111_vm2, %v15486_v28 }
 0x653   :  { %11750 = vmatmul.mubr.msk.f32.gmra.mrb[98].mxu1 %vm4037_vm4, %v15145_v53  ;;  %11766 = vmatprep.mubr.msk.f32.mxu0 %vm4037_vm4, %v15185_v31  ;;  %v17871_v53 = vld [vmem:[#allocation32_spill] sm:$0xff]  ;;  %v17873_v31 = vld [vmem:[#allocation41_spill] sm:$0xff] }
 0x654   :  { %12786 = vmatpush3.bf16.msra.mxu1 %v15213_v0  ;;  %11752 = vmatprep.mubr.msk.f32.mxu1 %vm4037_vm4, %v15150_v46  ;;  %v17872_v46 = vld [vmem:[#allocation28_spill] sm:$0xff]  ;;  %v15571_v33 = vpop.permute.xlu1 %4826  ;;  %v17877_v0 = vld [vmem:[#allocation11_spill] sm:$0xff] }
 0x655   :  { %11786 = vmatprep.subr.mxu1 %v15217_v59 }
 0x656   :  { %11767 = vmatmul.mubr.msk.f32.vlgmr.msra.gmra.mrb[94].mxu0 %vm4037_vm4, %v15194_v22  ;;  %v17876_v22 = vld [vmem:[#allocation35_spill] sm:$0xff] }
 0x657   :  { %11753 = vmatmul.mubr.msk.f32.gmra.mrb[100].mxu1 %vm4037_vm4, %v15161_v32  ;;  %12790 = vmatpush3.bf16.msra.mxu0 %v15154_v2  ;;  %v17874_v2 = vld [vmem:[#allocation27_spill] sm:$0xff]  ;;  %v17875_v32 = vld [vmem:[#allocation36_spill] sm:$0xff] }
 0x658   :  { %11787 = vmatpush3.msra.mxu1 %v15217_v59  ;;  %12792 = vmatprep.subr.bf16.mxu0 %v17869_v57  ;;  %v17878_v59 = vmov 0.0|0.0   ;;  %v15581_v58 = vpop.permute.xlu1 %4830 }
 0x659   :  { %12796 = vmatprep.subr.bf16.mxu1 %v15374_v27  ;;  %11755 = vmatprep.mubr.msk.f32.mxu1 %vm4037_vm4, %v17871_v53  ;;  %v4774_v53 = vmul.f32 %v15605_v8, %v15434_v1  ;;  %v17905_v8 = vld [vmem:[#allocation20_spill] sm:$0xff] }
 0x65a   :  { %11769 = vmatprep.mubr.msk.f32.mxu0 %vm4037_vm4, %v17872_v46  ;;  %v15617_v46 = vpop.permute.xlu0 %4757 }
 0x65b   :  { %11756 = vmatmul.mubr.msk.f32.gmra.mrb[102].mxu1 %vm4037_vm4, %v17873_v31  ;;  %12794 = vmatpush3.bf16.msra.mxu0 %v17869_v57  ;;  %v4781_v57 = vsel %vm111_vm2, %v4773_v12, 0.0  ;;  %17894 = vst [vmem:[#allocation68_spill] sm:$0xff] %v15617_v46 }
 0x65c   :  { %11808 = vmatprep.subr.mxu0 %v17874_v2  ;;  %11770 = vmatmul.mubr.msk.f32.gmra.mrb[96].mxu0 %vm4037_vm4, %v17875_v32  ;;  %v15583_v45 = vpop.permute.xlu1 %4172  ;;  %v4782_v31 = vadd.f32 %v4781_v57, %v4780_v47  ;;  %v4783_v32 = vsel %vm111_vm2, %v4774_v53, 0.0 }
 0x65d   :  { %11772 = vmatprep.mubr.msk.f32.mxu0 %vm4037_vm4, %v17876_v22  ;;  %17881 = vst [vmem:[#allocation81_spill] sm:$0xff] %v15583_v45 }
 0x65e   :  { %v15622_v22 = vpop.permute.xlu0 %4761 }
 0x65f   :  { %11809 = vmatpush3.msra.mxu0 %v17874_v2  ;;  %v4775_v2 = vmul.f32 %v15607_v55, %v15427_v24  ;;  %17895 = vst [vmem:[#allocation75_spill] sm:$0xff] %v15622_v22 }
 0x660   :  { %11773 = vmatmul.mubr.msk.f32.gmra.mrb[98].mxu0 %vm4037_vm4, %v17877_v0  ;;  %12803 = vmatprep.subr.bf16.mxu0 %v17878_v59  ;;  %v15585_v42 = vpop.permute.xlu1 %4176  ;;  %v4784_v0 = vadd.f32 %v4783_v32, %v4782_v31 }
 0x661   :  { %11775 = vmatprep.mubr.msk.f32.mxu0 %vm4037_vm4, %v17879_v49  ;;  %17882 = vst [vmem:[#allocation38_spill] sm:$0xff] %v15585_v42  ;;  %v4776_v49 = vmul.f32 %v15617_v46, %v15453_v61 }
 0x664   :  { %11776 = vmatmul.mubr.msk.f32.gmra.mrb[100].mxu0 %vm4037_vm4, %v17880_v62  ;;  %v15587_v9 = vpop.permute.xlu1 %4184  ;;  %v4785_v62 = vsel %vm111_vm2, %v4775_v2, 0.0 }
 0x665   :  { %17883 = vst [vmem:[#allocation73_spill] sm:$0xff] %v15587_v9 }
 0x668   :  { %v15589_v3 = vpop.permute.xlu1 %4192 }
 0x669   :  { %17884 = vst [vmem:[#allocation58_spill] sm:$0xff] %v15589_v3  ;;  %v17908_v3 = vmov 3  }
 0x683   :  { %v5959_v25 = vpop.xlane.xlu1 %5958 }
 0x684   :  { %v5960_v10 = vrot.slane %v5959_v25, 4 }
 0x686   :  { %v5961_v35 = vadd.f32 %v5960_v10, %v5959_v25  ;;  %v4786_v25 = vadd.f32 %v4785_v62, %v4784_v0  ;;  %v4787_v10 = vsel %vm111_vm2, %v4776_v49, 0.0 }
 0x688   :  { %v5962_v18 = vrot.slane %v5961_v35, 2 }
 0x68a   :  { %v5963_v34 = vadd.f32 %v5962_v18, %v5961_v35  ;;  %v15628_v35 = vpop.permute.xlu0 %4765  ;;  %v4777_v18 = vmul.f32 %v15622_v22, %v15457_v14 }
 0x68b   :  { %17896 = vst [vmem:[#allocation14_spill] sm:$0xff] %v15628_v35 }
 0x68c   :  { %v5964_v26 = vrot.slane %v5963_v34, 1 }
 0x68e   :  { %v5965_v63 = vadd.f32 %v5964_v26, %v5963_v34  ;;  %v4788_v34 = vadd.f32 %v4787_v10, %v4786_v25  ;;  %v4778_v26 = vmul.f32 %v15628_v35, %v15480_v5  ;;  %v15635_v50 = vpop.permute.xlu0 %4769  ;;  %v17898_v10 = vld [vmem:[#allocation47_spill] sm:$0xff] }
 0x68f   :  { %17897 = vst [vmem:[#allocation10_spill] sm:$0xff] %v15635_v50  ;;  %v4779_v57 = vmul.f32 %v15635_v50, %v15486_v28 }
 0x690   :  { %12899 = vpush %v5965_v63  ;;  %v4789_v63 = vsel %vm111_vm2, %v4777_v18, 0.0  ;;  %v4791_v47 = vsel %vm111_vm2, %v4778_v26, 0.0  ;;  %v17899_v26 = vld [vmem:[#allocation31_spill] sm:$0xff] }
 0x691   :  { %v4790_v12 = vadd.f32 %v4789_v63, %v4788_v34  ;;  %v4793_v31 = vsel %vm111_vm2, %v4779_v57, 0.0  ;;  %v15651_v57 = vstv %s10234_s17 }
 0x693   :  { %v4792_v53 = vadd.f32 %v4791_v47, %v4790_v12  ;;  %v17900_v12 = vld [vmem:[#allocation74_spill] sm:$0xff] }
 0x695   :  { %v4794_v32 = vadd.f32 %v4793_v31, %v4792_v53  ;;  %v17901_v53 = vld [vmem:[#allocation17_spill] sm:$0xff] }
 0x697   :  { %v4795_v0 = vrot.slane %v4794_v32, 4 }
 0x699   :  { %v4796_v49 = vadd.f32 %v4795_v0, %v4794_v32 }
 0x69b   :  { %v4797_v25 = vrot.slane %v4796_v49, 2 }
 0x69d   :  { %v15645_v34 = vadd.f32 %v4797_v25, %v4796_v49  ;;  %v17904_v25 = vld [vmem:[#allocation19_spill] sm:$0xff] }
 0x6c1   :  { %s12900_s16 = spop %12899 }
 0x6c2   :  { %v5967_v2 = vstv %s12900_s16 }
 0x6c3   :  { %12982 = vrcp.f32 %v5967_v2  ;;  %v17902_v2 = vld [vmem:[#allocation72_spill] sm:$0xff] }
 0x6cd   :  { %v15641_v62 = vpop.eup %12982 }
 0x6ce   :  { %v5969_v18 = vmul.f32 %v15641_v62, %v17898_v10  ;;  %v5970_v63 = vmul.f32 %v15641_v62, %v17899_v26  ;;  %v5971_v47 = vmul.f32 %v15641_v62, %v17900_v12  ;;  %v5972_v32 = vmul.f32 %v15641_v62, %v17902_v2  ;;  %v17903_v10 = vld [vmem:[#allocation18_spill] sm:$0xff] }
 0x6d0   :  { %v5974_v31 = vadd.f32 %v17901_v53, %v5969_v18  ;;  %v5975_v49 = vadd.f32 %v17903_v10, %v5970_v63  ;;  %v15659_v22 = vadd.f32 %v17904_v25, %v5971_v47  ;;  %v15672_v20 = vadd.f32 %v17905_v8, %v5972_v32 }
 0x6d2   :  { %v15669_v47 = vmul.f32 0.5, %v5974_v31 }
 0x708   :  { %v11684_v50 = vpop.f32.mrb[78].mxu0  ;;  %v11706_v35 = vpop.f32.mrb[88].mxu1 }
 0x709   :  { %vm4458_vm4 = vcmp.ge.f32.partialorder %v11684_v50, 0.0  ;;  %v4467_v26 = vmul.f32 %v11684_v50, %v15651_v57  ;;  %vm4588_vm15 = vcmp.ge.f32.partialorder %v11706_v35, 0.0  ;;  %v4596_v12 = vmul.f32 %v11706_v35, %v15651_v57  ;;  %v4418_v46 = vpop.f32.mrb[79].mxu0  ;;  %v4548_v18 = vpop.f32.mrb[89].mxu1 }
 0x70a   :  { %vm4457_vm5 = vcmp.ge.f32.partialorder %v4418_v46, 0.0  ;;  %v4466_v2 = vmul.f32 %v15651_v57, %v4418_v46  ;;  %vm4587_vm6 = vcmp.ge.f32.partialorder %v4548_v18, 0.0  ;;  %v4595_v0 = vmul.f32 %v4548_v18, %v15651_v57 }
 0x70b   :  { %v15665_v55 = vsel %vm4458_vm4, %v11684_v50, %v4467_v26  ;;  %v15667_v63 = vsel %vm4588_vm15, %v11706_v35, %v4596_v12 }
 0x70c   :  { %v4834_v25 = vmul.f32 %v15501_v21, %v15665_v55  ;;  %v4868_v10 = vmul.f32 %v15501_v21, %v15667_v63  ;;  %v15683_v50 = vsel %vm4457_vm5, %v4418_v46, %v4466_v2  ;;  %v15685_v35 = vsel %vm4587_vm6, %v4548_v18, %v4595_v0  ;;  %v11687_v31 = vpop.f32.mrb[80].mxu0  ;;  %v11709_v26 = vpop.f32.mrb[90].mxu1 }
 0x70d   :  { %v4833_v32 = vmul.f32 %v15460_v16, %v15683_v50  ;;  %v4867_v12 = vmul.f32 %v15460_v16, %v15685_v35  ;;  %vm4460_vm7 = vcmp.ge.f32.partialorder %v11687_v31, 0.0  ;;  %v4469_v8 = vmul.f32 %v11687_v31, %v15651_v57  ;;  %v4428_v53 = vpop.f32.mrb[81].mxu0  ;;  %v4558_v28 = vpop.f32.mrb[91].mxu1 }
 0x70e   :  { %v4842_v46 = vsel %vm111_vm2, %v4834_v25, 0.0  ;;  %v4876_v0 = vsel %vm111_vm2, %v4868_v10, 0.0  ;;  %vm4590_vm8 = vcmp.ge.f32.partialorder %v11709_v26, 0.0  ;;  %v4598_v18 = vmul.f32 %v11709_v26, %v15651_v57 }
 0x70f   :  { %v4841_v2 = vsel %vm111_vm2, %v4833_v32, 0.0  ;;  %v4875_v14 = vsel %vm111_vm2, %v4867_v12, 0.0  ;;  %v15698_v61 = vsel %vm4460_vm7, %v11687_v31, %v4469_v8  ;;  %vm4459_vm0 = vcmp.ge.f32.partialorder %v4428_v53, 0.0 }
 0x710   :  { %v4843_v24 = vadd.f32 %v4842_v46, %v4841_v2  ;;  %v4877_v1 = vadd.f32 %v4876_v0, %v4875_v14  ;;  %v4836_v60 = vmul.f32 %v15523_v43, %v15698_v61  ;;  %v15702_v41 = vsel %vm4590_vm8, %v11709_v26, %v4598_v18  ;;  %v11690_v25 = vpop.f32.mrb[82].mxu0  ;;  %v11712_v5 = vpop.f32.mrb[92].mxu1 }
 0x711   :  { %v17906_v10 = vmov 2   ;;  %v4468_v17 = vmul.f32 %v15651_v57, %v4428_v53  ;;  %vm4589_vm9 = vcmp.ge.f32.partialorder %v4558_v28, 0.0  ;;  %v4597_v32 = vmul.f32 %v4558_v28, %v15651_v57  ;;  %v4438_v12 = vpop.f32.mrb[83].mxu0  ;;  %v4568_v8 = vpop.f32.mrb[93].mxu1 }
 0x712   :  { %12939 = vset.pattern.permute.xlu0 %v17906_v10  ;;  %v15707_v31 = vmul.f32 0.5, %v5975_v49  ;;  %v4870_v14 = vmul.f32 %v15523_v43, %v15702_v41  ;;  %vm4462_vm10 = vcmp.ge.f32.partialorder %v11690_v25, 0.0  ;;  %v4471_v26 = vmul.f32 %v11690_v25, %v15651_v57 }
 0x713   :  { %6499 = vperm.xlu0 %12939, %v15677_v38   ;;  %vm4592_vm11 = vcmp.ge.f32.partialorder %v11712_v5, 0.0  ;;  %v4846_v46 = vsel %vm111_vm2, %v4836_v60, 0.0  ;;  %v15715_v0 = vsel %vm4459_vm0, %v4428_v53, %v4468_v17  ;;  %v15717_v18 = vsel %vm4589_vm9, %v4558_v28, %v4597_v32 }
 0x714   :  { %v4600_v2 = vmul.f32 %v11712_v5, %v15651_v57  ;;  %v4835_v49 = vmul.f32 %v15517_v48, %v15715_v0  ;;  %v4869_v10 = vmul.f32 %v15517_v48, %v15717_v18  ;;  %v15724_v54 = vsel %vm4462_vm10, %v11690_v25, %v4471_v26  ;;  %v11693_v30 = vpop.f32.mrb[84].mxu0  ;;  %v11715_v19 = vpop.f32.mrb[94].mxu1 }
 0x715   :  { %vm4461_vm1 = vcmp.ge.f32.partialorder %v4438_v12, 0.0  ;;  %v4838_v60 = vmul.f32 %v15556_v44, %v15724_v54  ;;  %v4470_v28 = vmul.f32 %v15651_v57, %v4438_v12  ;;  %vm4591_vm12 = vcmp.ge.f32.partialorder %v4568_v8, 0.0  ;;  %v4448_v53 = vpop.f32.mrb[85].mxu0  ;;  %v4578_v32 = vpop.f32.mrb[95].mxu1 }
 0x716   :  { %v15728_v17 = vsel %vm4592_vm11, %v11712_v5, %v4600_v2  ;;  %v4880_v13 = vsel %vm111_vm2, %v4870_v14, 0.0  ;;  %v4844_v25 = vsel %vm111_vm2, %v4835_v49, 0.0  ;;  %v4878_v26 = vsel %vm111_vm2, %v4869_v10, 0.0 }
 0x717   :  { %17907 = vst [vmem:[#allocation46_spill] sm:$0xff] %v15728_v17  ;;  %12940 = vset.pattern.permute.xlu0 %v17908_v3  ;;  %v4599_v9 = vmul.f32 %v4568_v8, %v15651_v57  ;;  %v4845_v11 = vadd.f32 %v4844_v25, %v4843_v24  ;;  %v4879_v5 = vadd.f32 %v4878_v26, %v4877_v1  ;;  %v4850_v3 = vsel %vm111_vm2, %v4838_v60, 0.0 }
 0x718   :  { %6512 = vperm.xlu0 %12940, %v15677_v38   ;;  %v4872_v2 = vmul.f32 %v15556_v44, %v15728_v17  ;;  %v15740_v56 = vsel %vm4461_vm1, %v4438_v12, %v4470_v28  ;;  %vm4464_vm14 = vcmp.ge.f32.partialorder %v11693_v30, 0.0  ;;  %v11728_v10 = vpop.f32.mrb[86].mxu0  ;;  %v4473_v25 = vmul.f32 %v11693_v30, %v15651_v57 }
 0x719   :  { %v4837_v14 = vmul.f32 %v15539_v39, %v15740_v56  ;;  %v15745_v49 = vsel %vm4591_vm12, %v4568_v8, %v4599_v9  ;;  %v4847_v42 = vadd.f32 %v4846_v46, %v4845_v11  ;;  %v4881_v1 = vadd.f32 %v4880_v13, %v4879_v5  ;;  %v4677_v26 = vpop.f32.mrb[87].mxu0 }
 0x71a   :  { %v4871_v24 = vmul.f32 %v15539_v39, %v15745_v49  ;;  %vm4594_vm4 = vcmp.ge.f32.partialorder %v11715_v19, 0.0  ;;  %v4602_v60 = vmul.f32 %v11715_v19, %v15651_v57  ;;  %vm4463_vm15 = vcmp.ge.f32.partialorder %v4448_v53, 0.0 }
 0x71b   :  { %v4848_v12 = vsel %vm111_vm2, %v4837_v14, 0.0  ;;  %v17909_v28 = vmov 1   ;;  %v15754_v23 = vsel %vm4464_vm14, %v11693_v30, %v4473_v25  ;;  %v4472_v11 = vmul.f32 %v15651_v57, %v4448_v53 }
 0x71c   :  { %12941 = vset.pattern.permute.xlu0 %v17909_v28  ;;  %v4849_v9 = vadd.f32 %v4848_v12, %v4847_v42  ;;  %v4882_v8 = vsel %vm111_vm2, %v4871_v24, 0.0  ;;  %17910 = vst [vmem:[#allocation43_spill] sm:$0xff] %v15754_v23  ;;  %v4840_v46 = vmul.f32 %v15581_v58, %v15754_v23  ;;  %v15760_v5 = vsel %vm4594_vm4, %v11715_v19, %v4602_v60 }
 0x71d   :  { %6199 = vperm.xlu0 %12941, %v15677_v38   ;;  %v4883_v13 = vadd.f32 %v4882_v8, %v4881_v1  ;;  %17911 = vst [vmem:[#allocation49_spill] sm:$0xff] %v15760_v5  ;;  %vm4593_vm5 = vcmp.ge.f32.partialorder %v4578_v32, 0.0  ;;  %v4884_v14 = vsel %vm111_vm2, %v4872_v2, 0.0  ;;  %v15763_v45 = vsel %vm4463_vm15, %v4448_v53, %v4472_v11  ;;  %v11731_v25 = vpop.f32.mrb[88].mxu0 }
 0x71e   :  { %v4851_v42 = vadd.f32 %v4850_v3, %v4849_v9  ;;  %v4601_v24 = vmul.f32 %v4578_v32, %v15651_v57  ;;  %v4874_v30 = vmul.f32 %v15581_v58, %v15760_v5  ;;  %v4839_v38 = vmul.f32 %v15571_v33, %v15763_v45  ;;  %v4687_v53 = vpop.f32.mrb[89].mxu0 }
 0x71f   :  { %v4885_v1 = vadd.f32 %v4884_v14, %v4883_v13  ;;  %vm4717_vm6 = vcmp.ge.f32.partialorder %v11728_v10, 0.0  ;;  %v4854_v19 = vsel %vm111_vm2, %v4840_v46, 0.0  ;;  %v4725_v2 = vmul.f32 %v11728_v10, %v15651_v57 }
 0x720   :  { %v15771_v12 = vsel %vm4593_vm5, %v4578_v32, %v4601_v24  ;;  %vm4716_vm7 = vcmp.ge.f32.partialorder %v4677_v26, 0.0  ;;  %v17912_v3 = vmov 0   ;;  %v4852_v60 = vsel %vm111_vm2, %v4839_v38, 0.0 }
 0x721   :  { %12943 = vset.pattern.permute.xlu0 %v17912_v3  ;;  %v4873_v28 = vmul.f32 %v15571_v33, %v15771_v12  ;;  %v4724_v9 = vmul.f32 %v4677_v26, %v15651_v57  ;;  %vm4719_vm8 = vcmp.ge.f32.partialorder %v11731_v25, 0.0  ;;  %v4853_v8 = vadd.f32 %v4852_v60, %v4851_v42  ;;  %v11734_v38 = vpop.f32.mrb[90].mxu0 }
 0x722   :  { %v15779_v11 = vsel %vm4717_vm6, %v11728_v10, %v4725_v2  ;;  %v4727_v32 = vmul.f32 %v11731_v25, %v15651_v57  ;;  %vm4718_vm0 = vcmp.ge.f32.partialorder %v4687_v53, 0.0  ;;  %v4726_v24 = vmul.f32 %v4687_v53, %v15651_v57  ;;  %v11748_v2 = vpop.f32.mrb[96].mxu1  ;;  %v4697_v60 = vpop.f32.mrb[91].mxu0 }
 0x723   :  { %v4886_v13 = vsel %vm111_vm2, %v4873_v28, 0.0  ;;  %v4901_v46 = vmul.f32 %v15501_v21, %v15779_v11  ;;  %v15785_v14 = vsel %vm4716_vm7, %v4677_v26, %v4724_v9  ;;  %v4855_v3 = vadd.f32 %v4854_v19, %v4853_v8 }
 0x724   :  { %v4887_v5 = vadd.f32 %v4886_v13, %v4885_v1  ;;  %v4900_v42 = vmul.f32 %v15460_v16, %v15785_v14  ;;  %v15790_v10 = vsel %vm4719_vm8, %v11731_v25, %v4727_v32  ;;  %v4888_v23 = vsel %vm111_vm2, %v4874_v30, 0.0  ;;  %v5118_v1 = vpop.f32.mrb[97].mxu1 }
 0x725   :  { %v4909_v28 = vsel %vm111_vm2, %v4901_v46, 0.0  ;;  %v4903_v26 = vmul.f32 %v15523_v43, %v15790_v10  ;;  %v15799_v9 = vsel %vm4718_vm0, %v4687_v53, %v4726_v24  ;;  %v4856_v19 = vrot.slane %v4855_v3, 4  ;;  %v11737_v46 = vpop.f32.mrb[92].mxu0 }
 0x726   :  { %v4889_v8 = vadd.f32 %v4888_v23, %v4887_v5  ;;  %v4908_v25 = vsel %vm111_vm2, %v4900_v42, 0.0  ;;  %v4902_v32 = vmul.f32 %v15517_v48, %v15799_v9  ;;  %v15805_v30 = vadd.f32 %v11748_v2, %v15390_v52  ;;  %v11751_v5 = vpop.f32.mrb[98].mxu1  ;;  %v4707_v42 = vpop.f32.mrb[93].mxu0 }
 0x727   :  { %v4910_v13 = vadd.f32 %v4909_v28, %v4908_v25  ;;  %vm4721_vm9 = vcmp.ge.f32.partialorder %v11734_v38, 0.0  ;;  %v12804_v43 = vpack.c.bf16 %v15707_v31, %v15669_v47  ;;  %v4857_v16 = vadd.f32 %v4856_v19, %v4855_v3  ;;  %v5128_v52 = vpop.f32.mrb[99].mxu1 }
 0x728   :  { %17913 = vst [vmem:[#allocation51_spill] sm:$0xff] %v15805_v30  ;;  %v4890_v53 = vrot.slane %v4889_v8, 4  ;;  %v4911_v24 = vsel %vm111_vm2, %v4902_v32, 0.0  ;;  %v4729_v23 = vmul.f32 %v11734_v38, %v15651_v57  ;;  %v4913_v21 = vsel %vm111_vm2, %v4903_v26, 0.0 }
 0x729   :  { %v4912_v48 = vadd.f32 %v4911_v24, %v4910_v13  ;;  %v15813_v28 = vadd.f32 %v5118_v1, %v15407_v51  ;;  %vm4720_vm10 = vcmp.ge.f32.partialorder %v4697_v60, 0.0  ;;  %v4858_v2 = vrot.slane %v4857_v16, 2  ;;  %v17915_v1 = vld [vmem:[#allocation29_spill] sm:$0xff] }
 0x72a   :  { %v4891_v25 = vadd.f32 %v4890_v53, %v4889_v8  ;;  %v15816_v17 = vsel %vm4721_vm9, %v11734_v38, %v4729_v23  ;;  %v4728_v3 = vmul.f32 %v4697_v60, %v15651_v57  ;;  %v15822_v26 = vmul.f32 0.5, %v15659_v22  ;;  %v15829_v8 = vpop.f32.mrb[94].mxu0 }
 0x72b   :  { %17914 = vst [vmem:[#allocation44_spill] sm:$0xff] %v15813_v28  ;;  %v4914_v19 = vadd.f32 %v4913_v21, %v4912_v48  ;;  %11788 = vmatprep.mubr.msk.f32.mxu1 %vm111_vm2, %v15813_v28  ;;  %v15825_v51 = vmul.f32 0.5, %v15672_v20  ;;  %v5973_v32 = vmul.f32 %v15641_v62, %v17915_v1  ;;  %17916 = vst [vmem:[#allocation45_spill] sm:$0xff] %v15829_v8  ;;  %11810 = vmatprep.mubr.msk.f32.mxu0 %vm111_vm2, %v15813_v28  ;;  %v11754_v21 = vpop.f32.mrb[100].mxu1  ;;  %v15837_v48 = vpop.f32.mrb[95].mxu0 }
 0x72c   :  { %v4859_v38 = vadd.f32 %v4858_v2, %v4857_v16  ;;  %v4892_v13 = vrot.slane %v4891_v25, 2  ;;  %v15831_v53 = vsel %vm4720_vm10, %v4697_v60, %v4728_v3  ;;  %11789 = vmatmul.mubr.msk.f32.vlgmr.msra.gmra.mrb[104].mxu1 %vm111_vm2, %v15805_v30  ;;  %17917 = vst [vmem:[#allocation48_spill] sm:$0xff] %v15837_v48  ;;  %v17918_v20 = vrot.slane %v15645_v34, 1  ;;  %11811 = vmatmul.mubr.msk.f32.vlgmr.msra.gmra.mrb[102].mxu0 %vm111_vm2, %v15805_v30  ;;  %v5138_v24 = vpop.f32.mrb[101].mxu1 }
 0x72d   :  { %v15845_v62 = vstv %s15793_s4  ;;  %v4905_v16 = vmul.f32 %v15556_v44, %v15816_v17  ;;  %v4904_v60 = vmul.f32 %v15539_v39, %v15831_v53  ;;  %12798 = vmatpush3.bf16.msra.mxu1 %v15374_v27  ;;  %vm4723_vm11 = vcmp.ge.f32.partialorder %v11737_v46, 0.0  ;;  %12805 = vmatpush3.bf16.msra.mxu0 %v12804_v43  ;;  %v17920_v27 = vld [vmem:[#allocation21_spill] sm:$0xff] }
 0x72e   :  { %v15842_v22 = vadd.f32 %v17918_v20, %v15645_v34  ;;  %v4860_v23 = vrot.slane %v4859_v38, 1  ;;  %v4893_v2 = vadd.f32 %v4892_v13, %v4891_v25  ;;  %v4731_v34 = vmul.f32 %v11737_v46, %v15651_v57  ;;  %12800 = vmatprep.subr.bf16.mxu1 %v15385_v7  ;;  %12806 = vmatprep.subr.bf16.mxu0 %v17878_v59  ;;  %v11757_v39 = vpop.f32.mrb[102].mxu1 }
 0x72f   :  { %v4915_v3 = vsel %vm111_vm2, %v4904_v60, 0.0  ;;  %v15858_v1 = vadd.f32 %v5128_v52, %v15392_v40  ;;  %v12807_v20 = vpack.c.bf16 %v15825_v51, %v15822_v26  ;;  %v5978_v48 = vadd.f32 %v17920_v27, %v5973_v32  ;;  %v5148_v60 = vpop.f32.mrb[103].mxu1  ;;  %v15874_v32 = vpop.f32.mrb[96].mxu0 }
 0x730   :  { %v4861_v8 = vadd.f32 %v4860_v23, %v4859_v38  ;;  %v4894_v25 = vrot.slane %v4893_v2, 1  ;;  %v4916_v13 = vadd.f32 %v4915_v3, %v4914_v19  ;;  %vm4722_vm1 = vcmp.ge.f32.partialorder %v4707_v42, 0.0 }
 0x731   :  { %17919 = vst [vmem:[#allocation50_spill] sm:$0xff] %v15858_v1  ;;  %v4917_v44 = vsel %vm111_vm2, %v4905_v16, 0.0  ;;  %v15866_v43 = vadd.f32 %v11751_v5, %v15415_v6  ;;  %v15869_v40 = vsel %vm4723_vm11, %v11737_v46, %v4731_v34  ;;  %v4730_v52 = vmul.f32 %v4707_v42, %v15651_v57  ;;  %11791 = vmatprep.mubr.msk.f32.mxu1 %vm111_vm2, %v15858_v1  ;;  %v15882_v46 = vpop.f32.mrb[97].mxu0 }
 0x732   :  { %v4862_v19 = vadd.f32 %v4861_v8, %v15842_v22  ;;  %v4895_v38 = vadd.f32 %v4894_v25, %v4893_v2  ;;  %v4918_v23 = vadd.f32 %v4917_v44, %v4916_v13  ;;  %11813 = vmatprep.mubr.msk.f32.mxu0 %vm111_vm2, %v15858_v1  ;;  %v15880_v6 = vadd.f32 %v5138_v24, %v15405_v15 }
 0x733   :  { %17921 = vst [vmem:[#allocation16_spill] sm:$0xff] %v15866_v43  ;;  %17923 = vst [vmem:[#allocation22_spill] sm:$0xff] %v15882_v46  ;;  %v15884_v5 = vsel %vm4722_vm1, %v4707_v42, %v4730_v52  ;;  %11792 = vmatmul.mubr.msk.f32.gmra.mrb[106].mxu1 %vm111_vm2, %v15866_v43  ;;  %11814 = vmatmul.mubr.msk.f32.gmra.mrb[104].mxu0 %vm111_vm2, %v15866_v43  ;;  %v4907_v15 = vmul.f32 %v15581_v58, %v15869_v40  ;;  %v15905_v24 = vpop.f32.mrb[98].mxu0  ;;  %v15908_v34 = vmul.f32 0.5, %v5978_v48 }
 0x734   :  { %17922 = vst [vmem:[#allocation65_spill] sm:$0xff] %v15880_v6  ;;  %vm4863_vm12 = vcmp.ge.f32.partialorder %v4862_v19, 0.0  ;;  %v4865_v8 = vmul.f32 %v15845_v62, %v4862_v19  ;;  %v4896_v44 = vadd.f32 %v4895_v38, %v15842_v22  ;;  %12802 = vmatpush3.bf16.msra.mxu1 %v15385_v7  ;;  %11794 = vmatprep.mubr.msk.f32.mxu1 %vm111_vm2, %v15880_v6  ;;  %17925 = vst [vmem:[#allocation23_spill] sm:$0xff] %v15905_v24  ;;  %v15910_v3 = vpop.f32.mrb[99].mxu0 }
 0x735   :  { %v4906_v42 = vmul.f32 %v15571_v33, %v15884_v5  ;;  %v15900_v16 = vadd.f32 %v11754_v21, %v15440_v36  ;;  %11830 = vmatprep.subr.mxu1 %v15446_v37  ;;  %11816 = vmatprep.mubr.msk.f32.mxu0 %vm111_vm2, %v15880_v6  ;;  %17926 = vst [vmem:[#allocation25_spill] sm:$0xff] %v15908_v34  ;;  %17927 = vst [vmem:[#allocation37_spill] sm:$0xff] %v15910_v3  ;;  %v4921_v52 = vsel %vm111_vm2, %v4907_v15, 0.0 }
 0x736   :  { %v4866_v7 = vsel %vm4863_vm12, %v4862_v19, %v4865_v8  ;;  %vm4897_vm14 = vcmp.ge.f32.partialorder %v4896_v44, 0.0  ;;  %v4898_v2 = vmul.f32 %v4896_v44, %v15845_v62  ;;  %12808 = vmatpush3.bf16.msra.mxu0 %v12807_v20  ;;  %v15914_v36 = vadd.f32 %v5148_v60, %v15413_v29 }
 0x737   :  { %17924 = vst [vmem:[#allocation24_spill] sm:$0xff] %v15900_v16  ;;  %v4919_v25 = vsel %vm111_vm2, %v4906_v42, 0.0  ;;  %11795 = vmatmul.mubr.msk.f32.gmra.mrb[108].mxu1 %vm111_vm2, %v15900_v16  ;;  %11817 = vmatmul.mubr.msk.f32.gmra.mrb[106].mxu0 %vm111_vm2, %v15900_v16  ;;  %v17929_v20 = vmov 0.0   ;;  %v15924_v19 = vadd.f32 %v11757_v39, %v15477_v4  ;;  %v15930_v29 = vpop.f32.mrb[100].mxu0 }
 0x738   :  { %17928 = vst [vmem:[#allocation39_spill] sm:$0xff] %v15914_v36  ;;  %v4899_v21 = vsel %vm4897_vm14, %v4896_v44, %v4898_v2  ;;  %v4920_v13 = vadd.f32 %v4919_v25, %v4918_v23  ;;  %11831 = vmatpush3.msra.mxu1 %v15446_v37  ;;  %11852 = vmatprep.subr.mxu0 %v17929_v20  ;;  %17931 = vst [vmem:[#allocation40_spill] sm:$0xff] %v15930_v29  ;;  %v15934_v37 = vpop.f32.mrb[101].mxu0 }
 0x739   :  { %v4933_v48 = vmax.f32 %v4866_v7, %v4899_v21  ;;  %17930 = vst [vmem:[#allocation26_spill] sm:$0xff] %v15924_v19  ;;  %11797 = vmatprep.mubr.msk.f32.mxu1 %vm111_vm2, %v15914_v36  ;;  %11819 = vmatprep.mubr.msk.f32.mxu0 %vm111_vm2, %v15914_v36  ;;  %17932 = vst [vmem:[#allocation33_spill] sm:$0xff] %v15934_v37 }
 0x73a   :  { %v4922_v60 = vadd.f32 %v4921_v52, %v4920_v13  ;;  %11853 = vmatpush3.msra.mxu0 %v15908_v34  ;;  %12809 = vmatprep.subr.bf16.mxu1 %v17878_v59 }
 0x73b   :  { %11798 = vmatmul.mubr.msk.f32.gmra.mrb[110].mxu1 %vm111_vm2, %v15924_v19  ;;  %11820 = vmatmul.mubr.msk.f32.gmra.mrb[108].mxu0 %vm111_vm2, %v15924_v19 }
 0x73c   :  { %v4923_v4 = vrot.slane %v4922_v60, 4  ;;  %11832 = vmatprep.mubr.msk.f32.mxu1 %vm111_vm2, %v15813_v28  ;;  %11854 = vmatprep.mubr.msk.f32.mxu0 %vm13079_vm3, %v17929_v20 }
 0x73d   :  { %12821 = vmatprep.subr.bf16.mxu0 %v17878_v59 }
 0x73e   :  { %v4924_v39 = vadd.f32 %v4923_v4, %v4922_v60 }
 0x73f   :  { %11833 = vmatmul.mubr.msk.f32.vlgmr.msra.gmra.mrb[112].mxu1 %vm111_vm2, %v15805_v30  ;;  %11855 = vmatmul.mubr.msk.f32.vlgmr.msra.gmra.mrb[110].mxu0 %vm111_vm2, %v15669_v47 }
 0x740   :  { %v4925_v38 = vrot.slane %v4924_v39, 2  ;;  %11835 = vmatprep.mubr.msk.f32.mxu1 %vm111_vm2, %v15858_v1  ;;  %11857 = vmatprep.mubr.msk.f32.mxu0 %vm13079_vm3, %v17929_v20 }
 0x742   :  { %v4926_v23 = vadd.f32 %v4925_v38, %v4924_v39  ;;  %v15983_v38 = vpop.permute.xlu0 %4168 }
 0x743   :  { %11836 = vmatmul.mubr.msk.f32.gmra.mrb[114].mxu1 %vm111_vm2, %v15866_v43  ;;  %11858 = vmatmul.mubr.msk.f32.gmra.mrb[112].mxu0 %vm111_vm2, %v15707_v31 }
 0x744   :  { %v4927_v8 = vrot.slane %v4926_v23, 1  ;;  %11838 = vmatprep.mubr.msk.f32.mxu1 %vm111_vm2, %v15880_v6  ;;  %11860 = vmatprep.mubr.msk.f32.mxu0 %vm13079_vm3, %v17929_v20 }
 0x746   :  { %v4928_v44 = vadd.f32 %v4927_v8, %v4926_v23 }
 0x747   :  { %11839 = vmatmul.mubr.msk.f32.gmra.mrb[116].mxu1 %vm111_vm2, %v15900_v16  ;;  %11861 = vmatmul.mubr.msk.f32.gmra.mrb[114].mxu0 %vm111_vm2, %v15822_v26 }
 0x748   :  { %v4929_v15 = vadd.f32 %v4928_v44, %v15842_v22  ;;  %11841 = vmatprep.mubr.msk.f32.mxu1 %vm111_vm2, %v15914_v36  ;;  %11863 = vmatprep.mubr.msk.f32.mxu0 %vm13079_vm3, %v17929_v20 }
 0x74a   :  { %vm4930_vm4 = vcmp.ge.f32.partialorder %v4929_v15, 0.0  ;;  %v4931_v42 = vmul.f32 %v4929_v15, %v15845_v62 }
 0x74b   :  { %11842 = vmatmul.mubr.msk.f32.gmra.mrb[118].mxu1 %vm111_vm2, %v15924_v19  ;;  %11864 = vmatmul.mubr.msk.f32.gmra.mrb[116].mxu0 %vm111_vm2, %v15825_v51 }
 0x74c   :  { %v4932_v2 = vsel %vm4930_vm4, %v4929_v15, %v4931_v42  ;;  %11866 = vmatprep.mubr.msk.f32.mxu0 %vm13079_vm3, %v17929_v20  ;;  %11885 = vmatprep.mubr.msk.f32.mxu1 %vm13079_vm3, %v17929_v20 }
 0x74d   :  { %v4934_v22 = vmax.f32 %v4933_v48, %v4932_v2 }
 0x74f   :  { %v4935_v25 = vsub.f32 %v4866_v7, %v4934_v22  ;;  %v4938_v13 = vsub.f32 %v4899_v21, %v4934_v22  ;;  %v4941_v52 = vsub.f32 %v4932_v2, %v4934_v22  ;;  %11867 = vmatmul.mubr.msk.f32.gmra.mrb[118].mxu0 %vm111_vm2, %v15908_v34 }
 0x750   :  { %11904 = vmatprep.mubr.msk.f32.mxu0 %vm13079_vm3, %v17929_v20 }
 0x751   :  { %v4936_v60 = vmul.f32 1.442695, %v4935_v25  ;;  %v4939_v4 = vmul.f32 1.442695, %v4938_v13  ;;  %v4942_v39 = vmul.f32 1.442695, %v4941_v52 }
 0x753   :  { %12984 = vpow2.f32 %v4936_v60  ;;  %v15996_v60 = vpop.permute.xlu0 %4180 }
 0x754   :  { %12986 = vpow2.f32 %v4939_v4 }
 0x755   :  { %12988 = vpow2.f32 %v4942_v39 }
 0x75d   :  { %v12985_v23 = vpop.eup %12984 }
 0x75e   :  { %v12987_v8 = vpop.eup %12986  ;;  %v4952_v7 = vmul.f32 %v12985_v23, %v15763_v45  ;;  %v4946_v21 = vmul.f32 %v12985_v23, %v15683_v50  ;;  %v4947_v48 = vmul.f32 %v12985_v23, %v15665_v55  ;;  %v4948_v44 = vmul.f32 %v12985_v23, %v15715_v0 }
 0x75f   :  { %v12989_v15 = vpop.eup %12988  ;;  %v4944_v42 = vadd.f32 %v12987_v8, %v12985_v23  ;;  %v4960_v2 = vmul.f32 %v12987_v8, %v15771_v12  ;;  %v4954_v22 = vmul.f32 %v12987_v8, %v15685_v35  ;;  %v4955_v25 = vmul.f32 %v12987_v8, %v15667_v63 }
 0x760   :  { %v4976_v13 = vmul.f32 %v12989_v15, %v15884_v5  ;;  %v4970_v52 = vmul.f32 %v12989_v15, %v15785_v14  ;;  %v4971_v45 = vmul.f32 %v12989_v15, %v15779_v11  ;;  %v4949_v50 = vmul.f32 %v12985_v23, %v15698_v61 }
 0x761   :  { %v4945_v55 = vadd.f32 %v12989_v15, %v4944_v42  ;;  %v4968_v0 = vadd.f32 %v4960_v2, %v4952_v7  ;;  %v4962_v4 = vadd.f32 %v4954_v22, %v4946_v21  ;;  %v4963_v39 = vadd.f32 %v4955_v25, %v4947_v48  ;;  %v17933_v48 = vld [vmem:[#allocation46_spill] sm:$0xff]  ;;  %v17934_v2 = vld [vmem:[#allocation43_spill] sm:$0xff]  ;;  %v17935_v25 = vld [vmem:[#allocation49_spill] sm:$0xff] }
 0x762   :  { %v4956_v12 = vmul.f32 %v12987_v8, %v15717_v18  ;;  %v4957_v35 = vmul.f32 %v12987_v8, %v15702_v41  ;;  %v4972_v63 = vmul.f32 %v12989_v15, %v15799_v9  ;;  %v4973_v5 = vmul.f32 %v12989_v15, %v15790_v10 }
 0x763   :  { %v4984_v29 = vadd.f32 %v4976_v13, %v4968_v0  ;;  %12990 = vrcp.f32 %v4945_v55  ;;  %v4978_v14 = vadd.f32 %v4970_v52, %v4962_v4  ;;  %v4979_v11 = vadd.f32 %v4971_v45, %v4963_v39  ;;  %v17938_v0 = vld [vmem:[#allocation64_spill] sm:$0xff]  ;;  %v17940_v4 = vld [vmem:[#allocation53_spill] sm:$0xff] }
 0x764   :  { %v4964_v37 = vadd.f32 %v4956_v12, %v4948_v44  ;;  %v4965_v61 = vadd.f32 %v4957_v35, %v4949_v50  ;;  %v4950_v3 = vmul.f32 %v12985_v23, %v15740_v56  ;;  %v4951_v7 = vmul.f32 %v12985_v23, %v15724_v54  ;;  %v16010_v44 = vpop.permute.xlu0 %4188  ;;  %v17942_v35 = vld [vmem:[#allocation73_spill] sm:$0xff] }
 0x765   :  { %v4958_v21 = vmul.f32 %v12987_v8, %v15745_v49  ;;  %v4959_v18 = vmul.f32 %v12987_v8, %v17933_v48  ;;  %v4974_v41 = vmul.f32 %v12989_v15, %v15831_v53  ;;  %v4975_v9 = vmul.f32 %v12989_v15, %v15816_v17  ;;  %17936 = vst [vmem:[#allocation32_spill] sm:$0xff] %v16010_v44  ;;  %v17937_v53 = vld [vmem:[#allocation81_spill] sm:$0xff] }
 0x766   :  { %v4980_v42 = vadd.f32 %v4972_v63, %v4964_v37  ;;  %v4981_v10 = vadd.f32 %v4973_v5, %v4965_v61  ;;  %v4953_v22 = vmul.f32 %v12985_v23, %v17934_v2  ;;  %v4961_v13 = vmul.f32 %v12987_v8, %v17935_v25  ;;  %v17939_v37 = vld [vmem:[#allocation38_spill] sm:$0xff]  ;;  %v17946_v61 = vld [vmem:[#allocation52_spill] sm:$0xff] }
 0x767   :  { %v4966_v52 = vadd.f32 %v4958_v21, %v4950_v3  ;;  %v4967_v56 = vadd.f32 %v4959_v18, %v4951_v7  ;;  %v4977_v54 = vmul.f32 %v12989_v15, %v15869_v40  ;;  %v4295_v17 = vadd.f32 %v17938_v0, %v17937_v53  ;;  %v17941_v23 = vld [vmem:[#allocation66_spill] sm:$0xff]  ;;  %v17943_v3 = vld [vmem:[#allocation55_spill] sm:$0xff]  ;;  %v17945_v40 = vld [vmem:[#allocation57_spill] sm:$0xff] }
 0x768   :  { %v4969_v45 = vadd.f32 %v4961_v13, %v4953_v22  ;;  %v4300_v39 = vadd.f32 %v17940_v4, %v17939_v37  ;;  %v4290_v8 = vadd.f32 %v17941_v23, %v15983_v38  ;;  %v4310_v63 = vadd.f32 %v17943_v3, %v17942_v35  ;;  %v17944_v5 = vld [vmem:[#allocation58_spill] sm:$0xff]  ;;  %v16027_v18 = vpop.permute.xlu0 %4196 }
 0x769   :  { %v4982_v49 = vadd.f32 %v4974_v41, %v4966_v52  ;;  %v4983_v50 = vadd.f32 %v4975_v9, %v4967_v56  ;;  %v4320_v15 = vadd.f32 %v17945_v40, %v17944_v5  ;;  %v4305_v7 = vadd.f32 %v17946_v61, %v15996_v60  ;;  %v17947_v21 = vld [vmem:[#allocation54_spill] sm:$0xff]  ;;  %17948 = vst [vmem:[#allocation28_spill] sm:$0xff] %v16027_v18  ;;  %v17951_v5 = vld [vmem:[#allocation63_spill] sm:$0xff] }
 0x76a   :  { %v4985_v55 = vadd.f32 %v4977_v54, %v4969_v45  ;;  %v4315_v48 = vadd.f32 %v17947_v21, %v16010_v44  ;;  %v17949_v54 = vld [vmem:[#allocation56_spill] sm:$0xff]  ;;  %v16031_v3 = vstv %s10236_s20 }
 0x76b   :  { %v4325_v45 = vadd.f32 %v17949_v54, %v16027_v18  ;;  %17950 = vst [vmem:[#allocation41_spill] sm:$0xff] %v16031_v3  ;;  %v17956_v54 = vld [vmem:[#allocation79_spill] sm:$0xff] }
 0x76d   :  { %v12991_v12 = vpop.eup %12990 }
 0x76e   :  { %v4993_v41 = vmul.f32 %v12991_v12, %v4984_v29  ;;  %v4987_v9 = vmul.f32 %v12991_v12, %v4978_v14  ;;  %v4988_v2 = vmul.f32 %v12991_v12, %v4979_v11  ;;  %v4989_v22 = vmul.f32 %v12991_v12, %v4980_v42  ;;  %v17952_v14 = vld [vmem:[#allocation76_spill] sm:$0xff]  ;;  %v17953_v42 = vld [vmem:[#allocation78_spill] sm:$0xff] }
 0x76f   :  { %v4990_v25 = vmul.f32 %v12991_v12, %v4981_v10  ;;  %v4991_v13 = vmul.f32 %v12991_v12, %v4982_v49  ;;  %v4992_v52 = vmul.f32 %v12991_v12, %v4983_v50  ;;  %v4994_v56 = vmul.f32 %v12991_v12, %v4985_v55  ;;  %v17954_v50 = vld [vmem:[#allocation60_spill] sm:$0xff]  ;;  %v17955_v12 = vld [vmem:[#allocation62_spill] sm:$0xff] }
 0x770   :  { %v5001_v0 = vmul.f32 0.33333334, %v4993_v41  ;;  %v4995_v4 = vmul.f32 0.33333334, %v4987_v9  ;;  %v4996_v23 = vmul.f32 0.33333334, %v4988_v2 }
 0x771   :  { %v4997_v40 = vmul.f32 0.33333334, %v4989_v22  ;;  %v4998_v61 = vmul.f32 0.33333334, %v4990_v25  ;;  %v4999_v21 = vmul.f32 0.33333334, %v4991_v13 }
 0x772   :  { %v5009_v29 = vadd.f32 %v5001_v0, %v17951_v5  ;;  %v5003_v11 = vadd.f32 %v4995_v4, %v17952_v14  ;;  %v5004_v10 = vadd.f32 %v4996_v23, %v17953_v42  ;;  %v5000_v49 = vmul.f32 0.33333334, %v4992_v52  ;;  %v17957_v22 = vld [vmem:[#allocation69_spill] sm:$0xff]  ;;  %v17958_v0 = vld [vmem:[#allocation12_spill] sm:$0xff] }
 0x773   :  { %v5005_v55 = vadd.f32 %v4997_v40, %v17954_v50  ;;  %v5006_v35 = vadd.f32 %v4998_v61, %v17955_v12  ;;  %v5007_v41 = vadd.f32 %v4999_v21, %v17956_v54  ;;  %v5002_v9 = vmul.f32 0.33333334, %v4994_v56 }
 0x774   :  { %v5017_v2 = vmul.f32 0.999995, %v5009_v29  ;;  %v5011_v18 = vmul.f32 0.999995, %v5003_v11  ;;  %v5012_v24 = vmul.f32 0.999995, %v5004_v10  ;;  %v5008_v25 = vadd.f32 %v5000_v49, %v17957_v22 }
 0x775   :  { %v5013_v13 = vmul.f32 0.999995, %v5005_v55  ;;  %v5014_v44 = vmul.f32 0.999995, %v5006_v35  ;;  %v5015_v5 = vmul.f32 0.999995, %v5007_v41  ;;  %v5010_v4 = vadd.f32 %v5002_v9, %v17958_v0 }
 0x776   :  { %v5019_v14 = vadd.f32 %v5011_v18, %v4290_v8  ;;  %v5020_v23 = vadd.f32 %v5012_v24, %v4295_v17  ;;  %v5016_v52 = vmul.f32 0.999995, %v5008_v25  ;;  %v5025_v42 = vadd.f32 %v5017_v2, %v4320_v15  ;;  %v16058_v2 = vld [vmem:[%s17402_s3 + $0x180] sm:$0x7]  ;;  %v17960_v22 = vld [vmem:[#allocation17_spill] sm:$0xff] }
 0x777   :  { %v5021_v40 = vadd.f32 %v5013_v13, %v4300_v39  ;;  %v5022_v50 = vadd.f32 %v5014_v44, %v4305_v7  ;;  %v5023_v61 = vadd.f32 %v5015_v5, %v4310_v63  ;;  %v5018_v12 = vmul.f32 0.999995, %v5010_v4  ;;  %17959 = vst [vmem:[#allocation27_spill] sm:$0xff] %v16058_v2  ;;  %v17961_v13 = vld [vmem:[#allocation18_spill] sm:$0xff] }
 0x778   :  { %vm5027_vm15 = vcmp.ge.f32.partialorder %v5019_v14, 0.0  ;;  %vm5028_vm5 = vcmp.ge.f32.partialorder %v5020_v23, 0.0  ;;  %v5036_v56 = vmul.f32 %v16031_v3, %v5019_v14  ;;  %v5037_v21 = vmul.f32 %v16031_v3, %v5020_v23 }
 0x779   :  { %vm5029_vm6 = vcmp.ge.f32.partialorder %v5021_v40, 0.0  ;;  %vm5030_vm7 = vcmp.ge.f32.partialorder %v5022_v50, 0.0  ;;  %v5038_v35 = vmul.f32 %v16031_v3, %v5021_v40  ;;  %v5039_v29 = vmul.f32 %v16031_v3, %v5022_v50 }
 0x77a   :  { %v5044_v8 = vsel %vm5027_vm15, %v5019_v14, %v5036_v56  ;;  %v5045_v24 = vsel %vm5028_vm5, %v5020_v23, %v5037_v21  ;;  %v5024_v17 = vadd.f32 %v5016_v52, %v4315_v48  ;;  %vm5031_vm8 = vcmp.ge.f32.partialorder %v5023_v61, 0.0  ;;  %v17963_v23 = vld [vmem:[#allocation19_spill] sm:$0xff] }
 0x77b   :  { %v12810_v39 = vpack.c.bf16 %v5045_v24, %v5044_v8  ;;  %v5046_v44 = vsel %vm5029_vm6, %v5021_v40, %v5038_v35  ;;  %v5047_v63 = vsel %vm5030_vm7, %v5022_v50, %v5039_v29  ;;  %v5040_v15 = vmul.f32 %v16031_v3, %v5023_v61  ;;  %v16079_v50 = vld [vmem:[%s17402_s3 + $0x1c0] sm:$0x7]  ;;  %v17969_v24 = vld [vmem:[#allocation80_spill] sm:$0xff]  ;;  %s10346_s3 = sld [smem:[#allocation4 + $0x9]] }
 0x77c   :  { %v12813_v7 = vpack.c.bf16 %v5047_v63, %v5046_v44  ;;  %vm5032_vm0 = vcmp.ge.f32.partialorder %v5024_v17, 0.0  ;;  %v5041_v18 = vmul.f32 %v16031_v3, %v5024_v17  ;;  %v5026_v11 = vadd.f32 %v5018_v12, %v4325_v45  ;;  %17965 = vst [vmem:[#allocation35_spill] sm:$0xff] %v16079_v50  ;;  %v17968_v29 = vld [vmem:[#allocation34_spill] sm:$0xff] }
 0x77d   :  { %12811 = vmatpush3.bf16.msra.mxu1 %v12810_v39  ;;  %12823 = vmatpush3.bf16.msra.mxu0 %v12810_v39  ;;  %v5048_v10 = vsel %vm5031_vm8, %v5023_v61, %v5040_v15  ;;  %vm5033_vm9 = vcmp.ge.f32.partialorder %v5025_v42, 0.0  ;;  %v5042_v49 = vmul.f32 %v16031_v3, %v5025_v42  ;;  %v5989_v25 = vsub.f32 %v17960_v22, %v15669_v47  ;;  %v17970_v39 = vld [vmem:[#allocation77_spill] sm:$0xff]  ;;  %v13031_v15 = vld [vmem:[#allocation7 + $0x120] sm:$0xff] }
 0x77e   :  { %12812 = vmatprep.subr.bf16.mxu1 %v17878_v59  ;;  %12824 = vmatprep.subr.bf16.mxu0 %v17878_v59  ;;  %v5049_v48 = vsel %vm5032_vm0, %v5024_v17, %v5041_v18  ;;  %vm5034_vm10 = vcmp.ge.f32.partialorder %v5026_v11, 0.0  ;;  %v5043_v55 = vmul.f32 %v16031_v3, %v5026_v11  ;;  %v5990_v5 = vsub.f32 %v17961_v13, %v15707_v31 }
 0x77f   :  { %v12816_v54 = vpack.c.bf16 %v5049_v48, %v5048_v10  ;;  %v5050_v41 = vsel %vm5033_vm9, %v5025_v42, %v5042_v49  ;;  %v5994_v0 = vmul.f32 0.999995, %v5989_v25  ;;  %v5991_v52 = vsub.f32 %v17963_v23, %v15822_v26  ;;  %v17964_v42 = vld [vmem:[#allocation20_spill] sm:$0xff] }
 0x780   :  { %v5051_v9 = vsel %vm5034_vm10, %v5026_v11, %v5043_v55  ;;  %v5995_v4 = vmul.f32 0.999995, %v5990_v5  ;;  %v5992_v40 = vsub.f32 %v17964_v42, %v15825_v51  ;;  %v5993_v21 = vsub.f32 %v17920_v27, %v15908_v34  ;;  %v13030_v27 = vld [vmem:[#allocation7 + $0x118] sm:$0xff]  ;;  %v13032_v55 = vld [vmem:[#allocation7 + $0x128] sm:$0xff]  ;;  %v17974_v5 = vld [vmem:[#allocation68_spill] sm:$0xff] }
 0x781   :  { %12814 = vmatpush3.bf16.msra.mxu1 %v12813_v7  ;;  %12826 = vmatpush3.bf16.msra.mxu0 %v12813_v7  ;;  %v12819_v45 = vpack.c.bf16 %v5051_v9, %v5050_v41  ;;  %v5996_v61 = vmul.f32 0.999995, %v5991_v52  ;;  %v5674_v8 = vmul.f32 %v15805_v30, %v17968_v29  ;;  %v5673_v17 = vmul.f32 %v15813_v28, %v17969_v24  ;;  %v13033_v41 = vld [vmem:[#allocation7 + $0x130] sm:$0xff]  ;;  %v13034_v52 = vld [vmem:[#allocation7 + $0x138] sm:$0xff]  ;;  %v17977_v29 = vld [vmem:[#allocation14_spill] sm:$0xff] }
 0x782   :  { %12815 = vmatprep.subr.bf16.mxu1 %v17878_v59  ;;  %12827 = vmatprep.subr.bf16.mxu0 %v17878_v59  ;;  %v16070_v14 = vpack.c.bf16 %v5995_v4, %v5994_v0  ;;  %v5997_v12 = vmul.f32 0.999995, %v5992_v40  ;;  %v16093_v35 = vmul.f32 0.999995, %v5993_v21  ;;  %v5675_v44 = vmul.f32 %v15858_v1, %v17970_v39 }
 0x783   :  { %v5984_v63 = vmul.f32 0.999995, %v13030_v27  ;;  %v5985_v7 = vmul.f32 0.999995, %v13031_v15  ;;  %v5682_v18 = vsel %vm111_vm2, %v5674_v8, 0.0  ;;  %v5681_v11 = vsel %vm111_vm2, %v5673_v17, 0.0 }
 0x784   :  { %17962 = vst [vmem:[#allocation36_spill] sm:$0xff] %v16070_v14  ;;  %v16087_v56 = vpack.c.bf16 %v5997_v12, %v5996_v61  ;;  %17967 = vst [vmem:[#allocation70_spill] sm:$0xff] %v16093_v35  ;;  %v5684_v49 = vsel %vm111_vm2, %v5675_v44, 0.0  ;;  %v5683_v48 = vadd.f32 %v5682_v18, %v5681_v11  ;;  %v5987_v9 = vmul.f32 0.999995, %v13033_v41  ;;  %v17976_v61 = vld [vmem:[#allocation75_spill] sm:$0xff] }
 0x785   :  { %12817 = vmatpush3.bf16.msra.mxu1 %v12816_v54  ;;  %12829 = vmatpush3.bf16.msra.mxu0 %v12816_v54  ;;  %v16105_v10 = vpack.c.bf16 %v5985_v7, %v5984_v63  ;;  %v5986_v54 = vmul.f32 0.999995, %v13032_v55  ;;  %v5677_v0 = vmul.f32 %v15880_v6, %v17974_v5  ;;  %v16119_v42 = vmul.f32 0.999995, %v13034_v52  ;;  %v17978_v44 = vld [vmem:[#allocation10_spill] sm:$0xff] }
 0x786   :  { %12818 = vmatprep.subr.bf16.mxu1 %v17878_v59  ;;  %12830 = vmatprep.subr.bf16.mxu0 %v17878_v59  ;;  %17966 = vst [vmem:[#allocation11_spill] sm:$0xff] %v16087_v56  ;;  %v5685_v25 = vadd.f32 %v5684_v49, %v5683_v48  ;;  %v5678_v12 = vmul.f32 %v15900_v16, %v17976_v61  ;;  %v17980_v61 = vld [vmem:[#allocation13_spill] sm:$0xff] }
 0x787   :  { %17971 = vst [vmem:[#allocation30_spill] sm:$0xff] %v16105_v10  ;;  %v16112_v13 = vpack.c.bf16 %v5987_v9, %v5986_v54  ;;  %17975 = vst [vmem:[#allocation31_spill] sm:$0xff] %v16119_v42  ;;  %v5688_v40 = vsel %vm111_vm2, %v5677_v0, 0.0  ;;  %v5679_v8 = vmul.f32 %v15914_v36, %v17977_v29  ;;  %v5680_v27 = vmul.f32 %v15924_v19, %v17978_v44  ;;  %v17979_v0 = vld [vmem:[#allocation42_spill] sm:$0xff] }
 0x788   :  { %v5690_v24 = vsel %vm111_vm2, %v5678_v12, 0.0 }
 0x789   :  { %12820 = vmatpush3.bf16.msra.mxu1 %v12819_v45  ;;  %12832 = vmatpush3.bf16.msra.mxu0 %v12819_v45  ;;  %v17972_v45 = vld [vmem:[#allocation59_spill] sm:$0xff]  ;;  %17973 = vst [vmem:[#allocation47_spill] sm:$0xff] %v16112_v13  ;;  %v5692_v39 = vsel %vm111_vm2, %v5679_v8, 0.0  ;;  %v5694_v15 = vsel %vm111_vm2, %v5680_v27, 0.0 }
 0x78a   :  { %12839 = vmatprep.subr.bf16.mxu0 %v17878_v59  ;;  %12833 = vmatprep.subr.bf16.mxu1 %v17878_v59  ;;  %v5676_v22 = vmul.f32 %v15866_v43, %v17972_v45 }
 0x78c   :  { %11886 = vmatmul.mubr.msk.f32.vlgmr.msra.gmra.mrb[120].mxu1 %vm2461_vm13, %v16058_v2  ;;  %11905 = vmatmul.mubr.msk.f32.vlgmr.msra.gmra.mrb[120].mxu0 %vm2461_vm13, %v16079_v50  ;;  %v5686_v4 = vsel %vm111_vm2, %v5676_v22, 0.0 }
 0x78d   :  { %11917 = vmatprep.mubr.msk.f32.mxu1 %vm13079_vm3, %v17929_v20  ;;  %12841 = vmatpush3.bf16.msra.mxu0 %v16070_v14  ;;  %v5687_v23 = vadd.f32 %v5686_v4, %v5685_v25 }
 0x78e   :  { %11930 = vmatprep.mubr.msk.f32.mxu0 %vm13079_vm3, %v17929_v20  ;;  %12842 = vmatprep.subr.bf16.mxu0 %v17878_v59 }
 0x78f   :  { %12835 = vmatpush3.bf16.msra.mxu1 %v16105_v10  ;;  %v5689_v21 = vadd.f32 %v5688_v40, %v5687_v23  ;;  %v17983_v10 = vld [vmem:[#allocation71_spill] sm:$0xff] }
 0x790   :  { %12836 = vmatprep.subr.bf16.mxu1 %v17878_v59 }
 0x791   :  { %12844 = vmatpush3.bf16.msra.mxu0 %v16087_v56  ;;  %v5691_v17 = vadd.f32 %v5690_v24, %v5689_v21 }
 0x792   :  { %11928 = vmatprep.subr.mxu0 %v17929_v20 }
 0x793   :  { %12838 = vmatpush3.bf16.msra.mxu1 %v16112_v13  ;;  %v5693_v63 = vadd.f32 %v5692_v39, %v5691_v17 }
 0x794   :  { %11915 = vmatprep.subr.mxu1 %v17929_v20 }
 0x795   :  { %11929 = vmatpush3.msra.mxu0 %v16093_v35  ;;  %v5695_v7 = vadd.f32 %v5694_v15, %v5693_v63 }
 0x796   :  { %12851 = vmatprep.subr.bf16.mxu0 %v17878_v59 }
 0x797   :  { %11916 = vmatpush3.msra.mxu1 %v16119_v42  ;;  %v5696_v18 = vrot.slane %v5695_v7, 4 }
 0x798   :  { %12845 = vmatprep.subr.bf16.mxu1 %v17878_v59 }
 0x799   :  { %v5697_v11 = vadd.f32 %v5696_v18, %v5695_v7 }
 0x79b   :  { %v5698_v22 = vrot.slane %v5697_v11, 2 }
 0x79d   :  { %v16154_v24 = vadd.f32 %v5698_v22, %v5697_v11 }
 0x7ff   :  { %v11790_v49 = vpop.f32.mrb[104].mxu1  ;;  %v11812_v55 = vpop.f32.mrb[102].mxu0 }
 0x800   :  { %vm5392_vm11 = vcmp.ge.f32.partialorder %v11790_v49, 0.0  ;;  %v5400_v48 = vmul.f32 %v11790_v49, %v15651_v57  ;;  %v5352_v54 = vpop.f32.mrb[105].mxu1  ;;  %vm5521_vm1 = vcmp.ge.f32.partialorder %v11812_v55, 0.0  ;;  %v5529_v41 = vmul.f32 %v11812_v55, %v15651_v57  ;;  %v5481_v45 = vpop.f32.mrb[103].mxu0 }
 0x801   :  { %vm5391_vm12 = vcmp.ge.f32.partialorder %v5352_v54, 0.0  ;;  %v5399_v9 = vmul.f32 %v5352_v54, %v15651_v57  ;;  %vm5520_vm14 = vcmp.ge.f32.partialorder %v5481_v45, 0.0  ;;  %v5528_v5 = vmul.f32 %v5481_v45, %v15651_v57 }
 0x802   :  { %v16136_v25 = vsel %vm5392_vm11, %v11790_v49, %v5400_v48  ;;  %v16141_v23 = vsel %vm5521_vm1, %v11812_v55, %v5529_v41 }
 0x803   :  { %v5703_v4 = vmul.f32 %v16136_v25, %v17979_v0  ;;  %v16143_v52 = vsel %vm5391_vm12, %v5352_v54, %v5399_v9  ;;  %v5736_v40 = vmul.f32 %v16141_v23, %v17979_v0  ;;  %v16149_v21 = vsel %vm5520_vm14, %v5481_v45, %v5528_v5  ;;  %v17981_v9 = vld [vmem:[#allocation67_spill] sm:$0xff] }
 0x804   :  { %v5702_v12 = vmul.f32 %v16143_v52, %v17980_v61  ;;  %v5735_v8 = vmul.f32 %v16149_v21, %v17980_v61 }
 0x805   :  { %v5711_v29 = vsel %vm111_vm2, %v5703_v4, 0.0  ;;  %v5744_v17 = vsel %vm111_vm2, %v5736_v40, 0.0 }
 0x806   :  { %v5710_v39 = vsel %vm111_vm2, %v5702_v12, 0.0  ;;  %v11793_v44 = vpop.f32.mrb[106].mxu1  ;;  %v11815_v27 = vpop.f32.mrb[104].mxu0  ;;  %v5743_v15 = vsel %vm111_vm2, %v5735_v8, 0.0 }
 0x807   :  { %v5712_v63 = vadd.f32 %v5711_v29, %v5710_v39  ;;  %vm5394_vm4 = vcmp.ge.f32.partialorder %v11793_v44, 0.0  ;;  %v5402_v7 = vmul.f32 %v11793_v44, %v15651_v57  ;;  %v5362_v18 = vpop.f32.mrb[107].mxu1  ;;  %v5491_v49 = vpop.f32.mrb[105].mxu0  ;;  %v5745_v48 = vadd.f32 %v5744_v17, %v5743_v15  ;;  %v17982_v15 = vld [vmem:[#allocation15_spill] sm:$0xff] }
 0x808   :  { %vm5523_vm15 = vcmp.ge.f32.partialorder %v11815_v27, 0.0  ;;  %v5531_v55 = vmul.f32 %v11815_v27, %v15651_v57  ;;  %vm5393_vm5 = vcmp.ge.f32.partialorder %v5362_v18, 0.0  ;;  %v5401_v54 = vmul.f32 %v5362_v18, %v15651_v57 }
 0x809   :  { %v16161_v11 = vsel %vm5394_vm4, %v11793_v44, %v5402_v7  ;;  %vm5522_vm6 = vcmp.ge.f32.partialorder %v5491_v49, 0.0  ;;  %v5530_v41 = vmul.f32 %v5491_v49, %v15651_v57 }
 0x80a   :  { %v5705_v45 = vmul.f32 %v16161_v11, %v17981_v9  ;;  %v16167_v22 = vsel %vm5523_vm15, %v11815_v27, %v5531_v55  ;;  %v11796_v5 = vpop.f32.mrb[108].mxu1  ;;  %v11818_v4 = vpop.f32.mrb[106].mxu0  ;;  %v16172_v29 = vsel %vm5393_vm5, %v5362_v18, %v5401_v54 }
 0x80b   :  { %v5738_v12 = vmul.f32 %v16167_v22, %v17981_v9  ;;  %v16174_v8 = vsel %vm5522_vm6, %v5491_v49, %v5530_v41  ;;  %vm5396_vm7 = vcmp.ge.f32.partialorder %v11796_v5, 0.0  ;;  %v5372_v17 = vpop.f32.mrb[109].mxu1  ;;  %v5501_v39 = vpop.f32.mrb[107].mxu0  ;;  %v5704_v27 = vmul.f32 %v16172_v29, %v17982_v15 }
 0x80c   :  { %v5715_v44 = vsel %vm111_vm2, %v5705_v45, 0.0  ;;  %v5737_v7 = vmul.f32 %v16174_v8, %v17982_v15  ;;  %v5404_v55 = vmul.f32 %v11796_v5, %v15651_v57  ;;  %vm5525_vm8 = vcmp.ge.f32.partialorder %v11818_v4, 0.0 }
 0x80d   :  { %v5748_v40 = vsel %vm111_vm2, %v5738_v12, 0.0  ;;  %v5533_v18 = vmul.f32 %v11818_v4, %v15651_v57  ;;  %vm5395_vm0 = vcmp.ge.f32.partialorder %v5372_v17, 0.0  ;;  %v5713_v49 = vsel %vm111_vm2, %v5704_v27, 0.0 }
 0x80e   :  { %v5746_v54 = vsel %vm111_vm2, %v5737_v7, 0.0  ;;  %v16186_v41 = vsel %vm5396_vm7, %v11796_v5, %v5404_v55  ;;  %v5403_v45 = vmul.f32 %v5372_v17, %v15651_v57  ;;  %v11799_v42 = vpop.f32.mrb[110].mxu1  ;;  %v11821_v35 = vpop.f32.mrb[108].mxu0  ;;  %v5714_v13 = vadd.f32 %v5713_v49, %v5712_v63  ;;  %v17984_v55 = vld [vmem:[#allocation61_spill] sm:$0xff] }
 0x80f   :  { %v5747_v56 = vadd.f32 %v5746_v54, %v5745_v48  ;;  %v5707_v14 = vmul.f32 %v16186_v41, %v17983_v10  ;;  %v16191_v12 = vsel %vm5525_vm8, %v11818_v4, %v5533_v18  ;;  %v5382_v50 = vpop.f32.mrb[111].mxu1  ;;  %v5511_v2 = vpop.f32.mrb[109].mxu0  ;;  %vm5524_vm9 = vcmp.ge.f32.partialorder %v5501_v39, 0.0 }
 0x810   :  { %v5740_v27 = vmul.f32 %v16191_v12, %v17983_v10  ;;  %v16195_v19 = vsel %vm5395_vm0, %v5372_v17, %v5403_v45  ;;  %v5532_v5 = vmul.f32 %v5501_v39, %v15651_v57  ;;  %v5716_v48 = vadd.f32 %v5715_v44, %v5714_v13 }
 0x811   :  { %v5719_v7 = vsel %vm111_vm2, %v5707_v14, 0.0  ;;  %v5706_v63 = vmul.f32 %v16195_v19, %v17984_v55  ;;  %v5749_v49 = vadd.f32 %v5748_v40, %v5747_v56  ;;  %vm5398_vm10 = vcmp.ge.f32.partialorder %v11799_v42, 0.0 }
 0x812   :  { %v5752_v4 = vsel %vm111_vm2, %v5740_v27, 0.0  ;;  %v16202_v18 = vsel %vm5524_vm9, %v5501_v39, %v5532_v5  ;;  %v5406_v54 = vmul.f32 %v11799_v42, %v15651_v57  ;;  %v11834_v3 = vpop.f32.mrb[112].mxu1  ;;  %v16205_v17 = vpop.f32.mrb[110].mxu0  ;;  %vm5527_vm11 = vcmp.ge.f32.partialorder %v11821_v35, 0.0 }
 0x813   :  { %v5717_v45 = vsel %vm111_vm2, %v5706_v63, 0.0  ;;  %v5739_v14 = vmul.f32 %v16202_v18, %v17984_v55  ;;  %v5535_v16 = vmul.f32 %v11821_v35, %v15651_v57  ;;  %v5610_v13 = vpop.f32.mrb[113].mxu1  ;;  %v11856_v56 = vpop.f32.mrb[111].mxu0  ;;  %vm5397_vm1 = vcmp.ge.f32.partialorder %v5382_v50, 0.0 }
 0x814   :  { %v5718_v40 = vadd.f32 %v5717_v45, %v5716_v48  ;;  %v16211_v44 = vsel %vm5398_vm10, %v11799_v42, %v5406_v54  ;;  %v5405_v39 = vmul.f32 %v5382_v50, %v15651_v57  ;;  %vm5526_vm12 = vcmp.ge.f32.partialorder %v5511_v2, 0.0 }
 0x815   :  { %v5750_v27 = vsel %vm111_vm2, %v5739_v14, 0.0  ;;  %v5709_v5 = vmul.f32 %v16211_v44, %v15581_v58  ;;  %v16217_v63 = vsel %vm5527_vm11, %v11821_v35, %v5535_v16  ;;  %v5534_v56 = vmul.f32 %v5511_v2, %v15651_v57 }
 0x816   :  { %v5751_v6 = vadd.f32 %v5750_v27, %v5749_v49  ;;  %v5742_v43 = vmul.f32 %v16217_v63, %v15581_v58  ;;  %v16221_v1 = vsel %vm5397_vm1, %v5382_v50, %v5405_v39  ;;  %v5720_v48 = vadd.f32 %v5719_v7, %v5718_v40  ;;  %v11837_v42 = vpop.f32.mrb[114].mxu1  ;;  %v16223_v54 = vpop.f32.mrb[112].mxu0 }
 0x817   :  { %v5723_v45 = vsel %vm111_vm2, %v5709_v5, 0.0  ;;  %v5708_v14 = vmul.f32 %v16221_v1, %v15571_v33  ;;  %vm5650_vm14 = vcmp.ge.f32.partialorder %v11834_v3, 0.0  ;;  %v5620_v16 = vpop.f32.mrb[115].mxu1  ;;  %v11859_v35 = vpop.f32.mrb[113].mxu0  ;;  %v5658_v50 = vmul.f32 %v11834_v3, %v15651_v57 }
 0x818   :  { %v5756_v49 = vsel %vm111_vm2, %v5742_v43, 0.0  ;;  %v5753_v27 = vadd.f32 %v5752_v4, %v5751_v6  ;;  %vm5649_vm4 = vcmp.ge.f32.partialorder %v5610_v13, 0.0  ;;  %v16233_v40 = vsel %vm5526_vm12, %v5511_v2, %v5534_v56 }
 0x819   :  { %v5721_v7 = vsel %vm111_vm2, %v5708_v14, 0.0  ;;  %v5657_v39 = vmul.f32 %v5610_v13, %v15651_v57  ;;  %vm5652_vm15 = vcmp.ge.f32.partialorder %v11837_v42, 0.0  ;;  %v5741_v30 = vmul.f32 %v16233_v40, %v15571_v33 }
 0x81a   :  { %v5722_v5 = vadd.f32 %v5721_v7, %v5720_v48  ;;  %v16238_v28 = vsel %vm5650_vm14, %v11834_v3, %v5658_v50  ;;  %v5660_v43 = vmul.f32 %v11837_v42, %v15651_v57  ;;  %v11840_v6 = vpop.f32.mrb[116].mxu1  ;;  %v16241_v4 = vpop.f32.mrb[114].mxu0  ;;  %vm5651_vm5 = vcmp.ge.f32.partialorder %v5620_v16, 0.0 }
 0x81b   :  { %v5769_v14 = vmul.f32 %v16238_v28, %v17979_v0  ;;  %v16245_v35 = vsel %vm5649_vm4, %v5610_v13, %v5657_v39  ;;  %v5659_v2 = vmul.f32 %v5620_v16, %v15651_v57  ;;  %v5630_v56 = vpop.f32.mrb[117].mxu1  ;;  %v11862_v48 = vpop.f32.mrb[115].mxu0  ;;  %v5754_v59 = vsel %vm111_vm2, %v5741_v30, 0.0 }
 0x81c   :  { %v5724_v7 = vadd.f32 %v5723_v45, %v5722_v5  ;;  %v5768_v3 = vmul.f32 %v16245_v35, %v17980_v61  ;;  %v16252_v50 = vsel %vm5652_vm15, %v11837_v42, %v5660_v43  ;;  %v5755_v36 = vadd.f32 %v5754_v59, %v5753_v27 }
 0x81d   :  { %v5777_v20 = vsel %vm111_vm2, %v5769_v14, 0.0  ;;  %v5771_v0 = vmul.f32 %v16252_v50, %v17981_v9  ;;  %v16257_v13 = vsel %vm5651_vm5, %v5620_v16, %v5659_v2  ;;  %vm5654_vm6 = vcmp.ge.f32.partialorder %v11840_v6, 0.0 }
 0x81e   :  { %v5725_v39 = vrot.slane %v5724_v7, 4  ;;  %v5776_v48 = vsel %vm111_vm2, %v5768_v3, 0.0  ;;  %v5770_v30 = vmul.f32 %v16257_v13, %v17982_v15  ;;  %v11843_v45 = vpop.f32.mrb[118].mxu1  ;;  %v6095_v61 = vpop.f32.mrb[116].mxu0  ;;  %v5757_v5 = vadd.f32 %v5756_v49, %v5755_v36 }
 0x81f   :  { %v5778_v42 = vadd.f32 %v5777_v20, %v5776_v48  ;;  %v5781_v59 = vsel %vm111_vm2, %v5771_v0, 0.0  ;;  %v5662_v27 = vmul.f32 %v11840_v6, %v15651_v57  ;;  %v5640_v43 = vpop.f32.mrb[119].mxu1  ;;  %v11865_v14 = vpop.f32.mrb[117].mxu0  ;;  %vm5653_vm7 = vcmp.ge.f32.partialorder %v5630_v56, 0.0 }
 0x820   :  { %v5726_v9 = vadd.f32 %v5725_v39, %v5724_v7  ;;  %v5779_v16 = vsel %vm111_vm2, %v5770_v30, 0.0  ;;  %v5661_v2 = vmul.f32 %v5630_v56, %v15651_v57  ;;  %v5758_v3 = vrot.slane %v5757_v5, 4 }
 0x821   :  { %v5780_v34 = vadd.f32 %v5779_v16, %v5778_v42  ;;  %v16266_v15 = vsel %vm5654_vm6, %v11840_v6, %v5662_v27  ;;  %vm5656_vm8 = vcmp.ge.f32.partialorder %v11843_v45, 0.0  ;;  %v5664_v49 = vmul.f32 %v11843_v45, %v15651_v57 }
 0x822   :  { %v5727_v46 = vrot.slane %v5726_v9, 2  ;;  %v5773_v36 = vmul.f32 %v16266_v15, %v17983_v10  ;;  %v16270_v20 = vsel %vm5653_vm7, %v5630_v56, %v5661_v2  ;;  %v16273_v0 = vpop.f32.mrb[118].mxu0  ;;  %v5759_v7 = vadd.f32 %v5758_v3, %v5757_v5 }
 0x823   :  { %v5772_v39 = vmul.f32 %v16270_v20, %v17984_v55  ;;  %v5782_v48 = vadd.f32 %v5781_v59, %v5780_v34  ;;  %vm5655_vm0 = vcmp.ge.f32.partialorder %v5640_v43, 0.0  ;;  %v11868_v30 = vpop.f32.mrb[119].mxu0  ;;  %v17985_v6 = vrot.slane %v16154_v24, 1 }
 0x824   :  { %v5728_v27 = vadd.f32 %v5727_v46, %v5726_v9  ;;  %v16280_v14 = vsel %vm5656_vm8, %v11843_v45, %v5664_v49  ;;  %v5663_v10 = vmul.f32 %v5640_v43, %v15651_v57  ;;  %v5760_v56 = vrot.slane %v5759_v7, 2 }
 0x825   :  { %v5701_v42 = vadd.f32 %v17985_v6, %v16154_v24  ;;  %v5785_v16 = vsel %vm111_vm2, %v5773_v36, 0.0  ;;  %v5783_v5 = vsel %vm111_vm2, %v5772_v39, 0.0  ;;  %v6104_v55 = vsub.f32 %v15669_v47, %v16205_v17 }
 0x826   :  { %v5729_v34 = vrot.slane %v5728_v27, 1  ;;  %v5784_v59 = vadd.f32 %v5783_v5, %v5782_v48  ;;  %v5671_v2 = vsel %vm5655_vm0, %v5640_v43, %v5663_v10  ;;  %v6105_v3 = vsub.f32 %v15707_v31, %v16223_v54 }
 0x827   :  { %v5761_v24 = vadd.f32 %v5760_v56, %v5759_v7  ;;  %v5775_v46 = vmul.f32 %v16280_v14, %v15581_v58  ;;  %v5774_v57 = vmul.f32 %v5671_v2, %v15571_v33  ;;  %v6109_v45 = vmul.f32 0.999995, %v6104_v55 }
 0x828   :  { %v5730_v9 = vadd.f32 %v5729_v34, %v5728_v27  ;;  %v5786_v36 = vadd.f32 %v5785_v16, %v5784_v59  ;;  %v6110_v49 = vmul.f32 0.999995, %v6105_v3  ;;  %v6106_v39 = vsub.f32 %v15822_v26, %v16241_v4 }
 0x829   :  { %v5762_v47 = vrot.slane %v5761_v24, 1  ;;  %v5787_v17 = vsel %vm111_vm2, %v5774_v57, 0.0  ;;  %v6107_v43 = vsub.f32 %v15825_v51, %v6095_v61  ;;  %v5789_v33 = vsel %vm111_vm2, %v5775_v46, 0.0 }
 0x82a   :  { %v5731_v48 = vadd.f32 %v5730_v9, %v5701_v42  ;;  %v5788_v31 = vadd.f32 %v5787_v17, %v5786_v36  ;;  %v16296_v54 = vpack.c.bf16 %v6110_v49, %v6109_v45  ;;  %v6111_v7 = vmul.f32 0.999995, %v6106_v39 }
 0x82b   :  { %v5763_v58 = vadd.f32 %v5762_v47, %v5761_v24  ;;  %v6112_v30 = vmul.f32 0.999995, %v6107_v43  ;;  %vm6503_vm8 = vcmask 321536  }
 0x82c   :  { %vm5732_vm9 = vcmp.ge.f32.partialorder %v5731_v48, 0.0  ;;  %v5733_v6 = vmul.f32 %v5731_v48, %v15845_v62  ;;  %v5790_v27 = vadd.f32 %v5789_v33, %v5788_v31 }
 0x82d   :  { %v5764_v10 = vadd.f32 %v5763_v58, %v5701_v42  ;;  %v16300_v26 = vpack.c.bf16 %v6112_v30, %v6111_v7 }
 0x82e   :  { %v5791_v4 = vrot.slane %v5790_v27, 4  ;;  %v5734_v56 = vsel %vm5732_vm9, %v5731_v48, %v5733_v6 }
 0x82f   :  { %vm5765_vm10 = vcmp.ge.f32.partialorder %v5764_v10, 0.0  ;;  %v5766_v51 = vmul.f32 %v5764_v10, %v15845_v62 }
 0x830   :  { %v5792_v61 = vadd.f32 %v5791_v4, %v5790_v27 }
 0x831   :  { %v5767_v16 = vsel %vm5765_vm10, %v5764_v10, %v5766_v51 }
 0x832   :  { %v5801_v5 = vmax.f32 %v5734_v56, %v5767_v16  ;;  %v5793_v55 = vrot.slane %v5792_v61, 2 }
 0x834   :  { %v5794_v34 = vadd.f32 %v5793_v55, %v5792_v61 }
 0x836   :  { %v5795_v59 = vrot.slane %v5794_v34, 1 }
 0x838   :  { %v5796_v3 = vadd.f32 %v5795_v59, %v5794_v34 }
 0x83a   :  { %v5797_v24 = vadd.f32 %v5796_v3, %v5701_v42 }
 0x83c   :  { %vm5798_vm11 = vcmp.ge.f32.partialorder %v5797_v24, 0.0  ;;  %v5799_v46 = vmul.f32 %v5797_v24, %v15845_v62 }
 0x83e   :  { %v5800_v57 = vsel %vm5798_vm11, %v5797_v24, %v5799_v46 }
 0x83f   :  { %v5802_v45 = vmax.f32 %v5801_v5, %v5800_v57 }
 0x841   :  { %v5803_v9 = vsub.f32 %v5734_v56, %v5802_v45  ;;  %v5806_v36 = vsub.f32 %v5767_v16, %v5802_v45  ;;  %v5809_v49 = vsub.f32 %v5800_v57, %v5802_v45 }
 0x843   :  { %v5804_v39 = vmul.f32 1.442695, %v5803_v9  ;;  %v5807_v47 = vmul.f32 1.442695, %v5806_v36  ;;  %v5810_v17 = vmul.f32 1.442695, %v5809_v49  ;;  %v16327_v36 = vpop.permute.xlu0 %6122 }
 0x844   :  { %v17987_v49 = vld [vmem:[#allocation48_spill] sm:$0xff] }
 0x845   :  { %12992 = vpow2.f32 %v5804_v39  ;;  %v5224_v39 = vadd.f32 %v17987_v49, %v15983_v38  ;;  %v17989_v38 = vld [vmem:[#allocation25_spill] sm:$0xff] }
 0x846   :  { %12994 = vpow2.f32 %v5807_v47  ;;  %v18003_v49 = vld [vmem:[#allocation41_spill] sm:$0xff] }
 0x847   :  { %12996 = vpow2.f32 %v5810_v17 }
 0x84f   :  { %v12993_v43 = vpop.eup %12992 }
 0x850   :  { %v12995_v48 = vpop.eup %12994  ;;  %v5820_v31 = vmul.f32 %v12993_v43, %v16221_v1  ;;  %v5814_v42 = vmul.f32 %v12993_v43, %v16143_v52  ;;  %v5815_v7 = vmul.f32 %v12993_v43, %v16136_v25  ;;  %v5816_v62 = vmul.f32 %v12993_v43, %v16172_v29 }
 0x851   :  { %v12997_v58 = vpop.eup %12996  ;;  %v5812_v33 = vadd.f32 %v12995_v48, %v12993_v43  ;;  %v5828_v30 = vmul.f32 %v12995_v48, %v16233_v40  ;;  %v5822_v6 = vmul.f32 %v12995_v48, %v16149_v21  ;;  %v5823_v27 = vmul.f32 %v12995_v48, %v16141_v23 }
 0x852   :  { %v5844_v10 = vmul.f32 %v12997_v58, %v5671_v2  ;;  %v5838_v4 = vmul.f32 %v12997_v58, %v16245_v35  ;;  %v5839_v56 = vmul.f32 %v12997_v58, %v16238_v28  ;;  %v5817_v1 = vmul.f32 %v12993_v43, %v16161_v11 }
 0x853   :  { %v5813_v52 = vadd.f32 %v12997_v58, %v5812_v33  ;;  %v5836_v51 = vadd.f32 %v5828_v30, %v5820_v31  ;;  %v5830_v25 = vadd.f32 %v5822_v6, %v5814_v42  ;;  %v5831_v61 = vadd.f32 %v5823_v27, %v5815_v7 }
 0x854   :  { %v5824_v29 = vmul.f32 %v12995_v48, %v16174_v8  ;;  %v5825_v16 = vmul.f32 %v12995_v48, %v16167_v22  ;;  %v5840_v40 = vmul.f32 %v12997_v58, %v16257_v13  ;;  %v5841_v21 = vmul.f32 %v12997_v58, %v16252_v50 }
 0x855   :  { %v5852_v23 = vadd.f32 %v5844_v10, %v5836_v51  ;;  %12998 = vrcp.f32 %v5813_v52  ;;  %v5846_v2 = vadd.f32 %v5838_v4, %v5830_v25  ;;  %v5847_v35 = vadd.f32 %v5839_v56, %v5831_v61  ;;  %v17991_v56 = vld [vmem:[#allocation39_spill] sm:$0xff]  ;;  %v17993_v52 = vld [vmem:[#allocation44_spill] sm:$0xff] }
 0x856   :  { %v5832_v5 = vadd.f32 %v5824_v29, %v5816_v62  ;;  %v5833_v28 = vadd.f32 %v5825_v16, %v5817_v1  ;;  %v5818_v11 = vmul.f32 %v12993_v43, %v16195_v19  ;;  %v5819_v55 = vmul.f32 %v12993_v43, %v16186_v41  ;;  %v17994_v25 = vld [vmem:[#allocation51_spill] sm:$0xff]  ;;  %v17995_v29 = vld [vmem:[#allocation32_spill] sm:$0xff] }
 0x857   :  { %v5826_v34 = vmul.f32 %v12995_v48, %v16202_v18  ;;  %v5827_v8 = vmul.f32 %v12995_v48, %v16191_v12  ;;  %v5842_v22 = vmul.f32 %v12997_v58, %v16270_v20  ;;  %v5843_v13 = vmul.f32 %v12997_v58, %v16266_v15  ;;  %v17986_v20 = vld [vmem:[#allocation45_spill] sm:$0xff]  ;;  %v17996_v16 = vld [vmem:[#allocation23_spill] sm:$0xff] }
 0x858   :  { %v5848_v59 = vadd.f32 %v5840_v40, %v5832_v5  ;;  %v5849_v50 = vadd.f32 %v5841_v21, %v5833_v28  ;;  %v5821_v3 = vmul.f32 %v12993_v43, %v16211_v44  ;;  %v5829_v24 = vmul.f32 %v12995_v48, %v16217_v63  ;;  %v17988_v63 = vld [vmem:[#allocation22_spill] sm:$0xff]  ;;  %v17999_v28 = vld [vmem:[#allocation73_spill] sm:$0xff] }
 0x859   :  { %v5834_v46 = vadd.f32 %v5826_v34, %v5818_v11  ;;  %v5835_v57 = vadd.f32 %v5827_v8, %v5819_v55  ;;  %v5845_v19 = vmul.f32 %v12997_v58, %v16280_v14  ;;  %v5229_v15 = vadd.f32 %v17986_v20, %v17937_v53  ;;  %v17997_v21 = vld [vmem:[#allocation50_spill] sm:$0xff]  ;;  %v18000_v11 = vld [vmem:[#allocation37_spill] sm:$0xff] }
 0x85a   :  { %v5837_v45 = vadd.f32 %v5829_v24, %v5821_v3  ;;  %v5239_v44 = vadd.f32 %v15874_v32, %v15996_v60  ;;  %v5234_v47 = vadd.f32 %v17988_v63, %v17939_v37  ;;  %v6108_v30 = vsub.f32 %v17989_v38, %v16273_v0  ;;  %v18002_v24 = vld [vmem:[#allocation24_spill] sm:$0xff] }
 0x85b   :  { %v5850_v41 = vadd.f32 %v5842_v22, %v5834_v46  ;;  %v5851_v9 = vadd.f32 %v5843_v13, %v5835_v57  ;;  %v17990_v37 = vmov 0.0   ;;  %v17992_v0 = vmov 0.0|0.0   ;;  %v18001_v22 = vld [vmem:[#allocation65_spill] sm:$0xff] }
 0x85c   :  { %v5853_v18 = vadd.f32 %v5845_v19, %v5837_v45  ;;  %v5249_v40 = vadd.f32 %v17996_v16, %v17995_v29  ;;  %v5244_v55 = vadd.f32 %v18000_v11, %v17999_v28  ;;  %v18013_v28 = vld [vmem:[#allocation11_spill] sm:$0xff] }
 0x85d   :  { %v18014_v11 = vld [vmem:[#allocation47_spill] sm:$0xff] }
 0x85f   :  { %v12999_v12 = vpop.eup %12998  ;;  %v6194_v14 = vpop.f32.mrb[120].mxu1 }
 0x860   :  { %v5861_v17 = vmul.f32 %v12999_v12, %v5852_v23  ;;  %v16338_v43 = vadd.f32 %v6194_v14, %v16327_v36  ;;  %v5855_v48 = vmul.f32 %v12999_v12, %v5846_v2  ;;  %v5856_v31 = vmul.f32 %v12999_v12, %v5847_v35  ;;  %v11887_v42 = vpop.f32.mrb[121].mxu1  ;;  %v17998_v2 = vld [vmem:[#allocation16_spill] sm:$0xff] }
 0x861   :  { %v5857_v7 = vmul.f32 %v12999_v12, %v5848_v59  ;;  %v5858_v62 = vmul.f32 %v12999_v12, %v5849_v50  ;;  %v5859_v53 = vmul.f32 %v12999_v12, %v5850_v41  ;;  %v5860_v58 = vmul.f32 %v12999_v12, %v5851_v9 }
 0x862   :  { %v5869_v33 = vmul.f32 0.33333334, %v5861_v17  ;;  %11918 = vmatmul.mubr.msk.f32.vlgmr.msra.gmra.mrb[122].mxu1 %vm111_vm2, %v16338_v43  ;;  %11931 = vmatmul.mubr.msk.f32.vlgmr.msra.gmra.mrb[122].mxu0 %vm111_vm2, %v16338_v43  ;;  %v5863_v32 = vmul.f32 0.33333334, %v5855_v48  ;;  %v5864_v60 = vmul.f32 0.33333334, %v5856_v31  ;;  %v5862_v4 = vmul.f32 %v12999_v12, %v5853_v18 }
 0x863   :  { %12847 = vmatpush3.bf16.msra.mxu1 %v16296_v54  ;;  %11943 = vmatprep.mubr.msk.f32.mxu1 %vm13079_vm3, %v17990_v37  ;;  %v5865_v6 = vmul.f32 0.33333334, %v5857_v7  ;;  %v5866_v27 = vmul.f32 0.33333334, %v5858_v62  ;;  %v5867_v10 = vmul.f32 0.33333334, %v5859_v53 }
 0x864   :  { %v5877_v1 = vadd.f32 %v5869_v33, %v17991_v56  ;;  %12848 = vmatprep.subr.bf16.mxu1 %v17992_v0  ;;  %v5871_v51 = vadd.f32 %v5863_v32, %v17993_v52  ;;  %v5872_v61 = vadd.f32 %v5864_v60, %v17994_v25  ;;  %11962 = vmatprep.mubr.msk.f32.mxu0 %vm13079_vm3, %v17990_v37  ;;  %v5868_v5 = vmul.f32 0.33333334, %v5860_v58  ;;  %v18004_v17 = vld [vmem:[#allocation58_spill] sm:$0xff]  ;;  %v18005_v48 = vld [vmem:[#allocation33_spill] sm:$0xff] }
 0x865   :  { %v5873_v23 = vadd.f32 %v5865_v6, %v17997_v21  ;;  %v5874_v35 = vadd.f32 %v5866_v27, %v17998_v2  ;;  %v5875_v13 = vadd.f32 %v5867_v10, %v18001_v22  ;;  %v16362_v59 = vmul.f32 0.999995, %v6108_v30  ;;  %v18006_v33 = vld [vmem:[#allocation26_spill] sm:$0xff]  ;;  %v18007_v6 = vld [vmem:[#allocation28_spill] sm:$0xff]  ;;  %v18010_v2 = vld [vmem:[#allocation35_spill] sm:$0xff] }
 0x866   :  { %v5879_v34 = vmul.f32 0.999995, %v5871_v51  ;;  %v5880_v8 = vmul.f32 0.999995, %v5872_v61  ;;  %v5876_v46 = vadd.f32 %v5868_v5, %v18002_v24  ;;  %v5885_v57 = vmul.f32 0.999995, %v5877_v1 }
 0x867   :  { %12850 = vmatpush3.bf16.msra.mxu1 %v16300_v26  ;;  %v5881_v50 = vmul.f32 0.999995, %v5873_v23  ;;  %v5882_v3 = vmul.f32 0.999995, %v5874_v35  ;;  %v5883_v41 = vmul.f32 0.999995, %v5875_v13  ;;  %v5254_v31 = vadd.f32 %v18005_v48, %v18004_v17  ;;  %v16436_v13 = vpop.permute.xlu0 %6499 }
 0x868   :  { %11941 = vmatprep.subr.mxu1 %v17990_v37  ;;  %v5887_v19 = vadd.f32 %v5879_v34, %v5224_v39  ;;  %v5888_v45 = vadd.f32 %v5880_v8, %v5229_v15  ;;  %v5884_v12 = vmul.f32 0.999995, %v5876_v46  ;;  %v5870_v20 = vmul.f32 0.33333334, %v5862_v4  ;;  %v18008_v27 = vld [vmem:[#allocation40_spill] sm:$0xff]  ;;  %v18009_v23 = vld [vmem:[#allocation27_spill] sm:$0xff] }
 0x869   :  { %v5889_v9 = vadd.f32 %v5881_v50, %v5234_v47  ;;  %v5890_v18 = vadd.f32 %v5882_v3, %v5239_v44  ;;  %v5891_v62 = vadd.f32 %v5883_v41, %v5244_v55  ;;  %v5893_v30 = vadd.f32 %v5885_v57, %v5254_v31  ;;  %v18011_v35 = vld [vmem:[#allocation36_spill] sm:$0xff]  ;;  %v18012_v5 = vld [vmem:[#allocation30_spill] sm:$0xff]  ;;  %v18016_v34 = vld [vmem:[#allocation31_spill] sm:$0xff]  ;;  %v16414_v8 = vpop.f32.mrb[120].mxu0 }
 0x86a   :  { %vm5895_vm1 = vcmp.ge.f32.partialorder %v5887_v19, 0.0  ;;  %vm5896_vm12 = vcmp.ge.f32.partialorder %v5888_v45, 0.0  ;;  %v5903_v63 = vmul.f32 %v5887_v19, %v18003_v49  ;;  %v5904_v14 = vmul.f32 %v5888_v45, %v18003_v49  ;;  %v18015_v55 = vld [vmem:[#allocation70_spill] sm:$0xff]  ;;  %v11906_v22 = vpop.f32.mrb[121].mxu0 }
 0x86b   :  { %11942 = vmatpush3.msra.mxu1 %v16362_v59  ;;  %vm5897_vm14 = vcmp.ge.f32.partialorder %v5889_v9, 0.0  ;;  %vm5898_vm4 = vcmp.ge.f32.partialorder %v5890_v18, 0.0  ;;  %v5905_v15 = vmul.f32 %v5889_v9, %v18003_v49  ;;  %v5906_v47 = vmul.f32 %v5890_v18, %v18003_v49 }
 0x86c   :  { %11944 = vmatmul.mubr.msk.f32.vlgmr.msra.gmra.mrb[124].mxu1 %vm111_vm2, %v16338_v43  ;;  %12863 = vmatprep.subr.bf16.mxu1 %v17992_v0  ;;  %v5911_v39 = vsel %vm5895_vm1, %v5887_v19, %v5903_v63  ;;  %v5912_v44 = vsel %vm5896_vm12, %v5888_v45, %v5904_v14  ;;  %v5892_v58 = vadd.f32 %v5884_v12, %v5249_v40  ;;  %vm5899_vm15 = vcmp.ge.f32.partialorder %v5891_v62, 0.0  ;;  %v16449_v63 = vpop.permute.xlu0 %6512 }
 0x86d   :  { %v12852_v42 = vpack.c.bf16 %v5912_v44, %v5911_v39  ;;  %v5913_v7 = vsel %vm5897_vm14, %v5889_v9, %v5905_v15  ;;  %11981 = vmatprep.mubr.msk.f32.mxu1 %vm13079_vm3, %v17990_v37  ;;  %v5914_v53 = vsel %vm5898_vm4, %v5890_v18, %v5906_v47  ;;  %v5878_v38 = vadd.f32 %v5870_v20, %v18006_v33 }
 0x86e   :  { %v12855_v32 = vpack.c.bf16 %v5914_v53, %v5913_v7  ;;  %v5907_v60 = vmul.f32 %v5891_v62, %v18003_v49  ;;  %v5259_v10 = vadd.f32 %v18008_v27, %v18007_v6  ;;  %vm5900_vm5 = vcmp.ge.f32.partialorder %v5892_v58, 0.0 }
 0x86f   :  { %12853 = vmatpush3.bf16.msra.mxu0 %v12852_v42  ;;  %12865 = vmatpush3.bf16.msra.mxu1 %v12852_v42  ;;  %v5908_v4 = vmul.f32 %v5892_v58, %v18003_v49  ;;  %v5886_v56 = vmul.f32 0.999995, %v5878_v38  ;;  %vm5901_vm6 = vcmp.ge.f32.partialorder %v5893_v30, 0.0  ;;  %v5909_v52 = vmul.f32 %v5893_v30, %v18003_v49 }
 0x870   :  { %12854 = vmatprep.subr.bf16.mxu0 %v17992_v0  ;;  %12866 = vmatprep.subr.bf16.mxu1 %v17992_v0  ;;  %v5915_v1 = vsel %vm5899_vm15, %v5891_v62, %v5907_v60  ;;  %v6502_v50 = vmul.f32 %v16436_v13, %v16338_v43  ;;  %v16441_v46 = vstv %s10346_s3  ;;  %vm7030_vm14 = vcmask 59392  }
 0x871   :  { %v5916_v51 = vsel %vm5900_vm5, %v5892_v58, %v5908_v4  ;;  %v5894_v25 = vadd.f32 %v5886_v56, %v5259_v10  ;;  %v5917_v16 = vsel %vm5901_vm6, %v5893_v30, %v5909_v52 }
 0x872   :  { %v12858_v61 = vpack.c.bf16 %v5916_v51, %v5915_v1  ;;  %v6504_v3 = vsel %vm6503_vm8, %v6502_v50, 0.0 }
 0x873   :  { %12856 = vmatpush3.bf16.msra.mxu0 %v12855_v32  ;;  %12868 = vmatpush3.bf16.msra.mxu1 %v12855_v32  ;;  %vm5902_vm7 = vcmp.ge.f32.partialorder %v5894_v25, 0.0  ;;  %v5910_v29 = vmul.f32 %v5894_v25, %v18003_v49  ;;  %v6505_v24 = vrot.slane %v6504_v3, 4 }
 0x874   :  { %12857 = vmatprep.subr.bf16.mxu0 %v17992_v0  ;;  %12869 = vmatprep.subr.bf16.mxu1 %v17992_v0 }
 0x875   :  { %v5918_v40 = vsel %vm5902_vm7, %v5894_v25, %v5910_v29  ;;  %v6506_v57 = vadd.f32 %v6505_v24, %v6504_v3 }
 0x876   :  { %v12861_v21 = vpack.c.bf16 %v5918_v40, %v5917_v16 }
 0x877   :  { %12859 = vmatpush3.bf16.msra.mxu0 %v12858_v61  ;;  %12871 = vmatpush3.bf16.msra.mxu1 %v12858_v61  ;;  %v6507_v48 = vrot.slane %v6506_v57, 2  ;;  %v16463_v61 = vstv %s10347_s24 }
 0x878   :  { %12860 = vmatprep.subr.bf16.mxu0 %v17992_v0  ;;  %12872 = vmatprep.subr.bf16.mxu1 %v17992_v0 }
 0x879   :  { %v6508_v47 = vadd.f32 %v6507_v48, %v6506_v57  ;;  %v10367_v57 = vld [vmem:[%s17404_s5 + $0x8] sm:$0xff] }
 0x87b   :  { %12862 = vmatpush3.bf16.msra.mxu0 %v12861_v21  ;;  %12874 = vmatpush3.bf16.msra.mxu1 %v12861_v21  ;;  %v6509_v30 = vrot.slane %v6508_v47, 1 }
 0x87c   :  { %12881 = vmatprep.subr.bf16.mxu1 %v17992_v0  ;;  %12875 = vmatprep.subr.bf16.mxu0 %v17992_v0 }
 0x87d   :  { %v6510_v1 = vadd.f32 %v6509_v30, %v6508_v47  ;;  %v6577_v30 = vstv %s16503_s28 }
 0x87e   :  { %11963 = vmatmul.mubr.msk.f32.vlgmr.msra.gmra.mrb[124].mxu0 %vm2461_vm13, %v18009_v23  ;;  %11982 = vmatmul.mubr.msk.f32.vlgmr.msra.gmra.mrb[126].mxu1 %vm2461_vm13, %v18010_v2  ;;  %vm7016_vm13 = vcmask 64512  }
 0x87f   :  { %12883 = vmatpush3.bf16.msra.mxu1 %v18011_v35  ;;  %12877 = vmatpush3.bf16.msra.mxu0 %v18012_v5  ;;  %7017 = vst.msk [vmem:[#allocation3] sm:$0xff] %vm7016_vm13, %v17990_v37  ;;  %7018 = vst.msk [vmem:[#allocation3 + $0x8] sm:$0xff] %vm7016_vm13, %v17990_v37 }
 0x880   :  { %12884 = vmatprep.subr.bf16.mxu1 %v17992_v0  ;;  %12878 = vmatprep.subr.bf16.mxu0 %v17992_v0  ;;  %7019 = vst.msk [vmem:[#allocation3 + $0x10] sm:$0xff] %vm7016_vm13, %v17990_v37  ;;  %7020 = vst.msk [vmem:[#allocation3 + $0x18] sm:$0xff] %vm7016_vm13, %v17990_v37 }
 0x881   :  { %11994 = vmatprep.mubr.msk.f32.mxu0 %vm13079_vm3, %v17990_v37  ;;  %12007 = vmatprep.mubr.msk.f32.mxu1 %vm13079_vm3, %v17990_v37  ;;  %7021 = vst.msk [vmem:[#allocation3 + $0x20] sm:$0xff] %vm7016_vm13, %v17990_v37  ;;  %7022 = vst.msk [vmem:[#allocation3 + $0x28] sm:$0xff] %vm7016_vm13, %v17990_v37 }
 0x882   :  { %7023 = vst.msk [vmem:[#allocation3 + $0x30] sm:$0xff] %vm7016_vm13, %v17990_v37  ;;  %7024 = vst.msk [vmem:[#allocation3 + $0x38] sm:$0xff] %vm7016_vm13, %v17990_v37 }
 0x883   :  { %12886 = vmatpush3.bf16.msra.mxu1 %v18013_v28  ;;  %12880 = vmatpush3.bf16.msra.mxu0 %v18014_v11  ;;  %7025 = vst.msk [vmem:[#allocation3 + $0x40] sm:$0xff] %vm7016_vm13, %v17990_v37  ;;  %7026 = vst.msk [vmem:[#allocation3 + $0x48] sm:$0xff] %vm7016_vm13, %v17990_v37 }
 0x884   :  { %12005 = vmatprep.subr.mxu1 %v17990_v37  ;;  %11992 = vmatprep.subr.mxu0 %v17990_v37 }
 0x887   :  { %12006 = vmatpush3.msra.mxu1 %v18015_v55  ;;  %11993 = vmatpush3.msra.mxu0 %v18016_v34 }
 0x888   :  { %12887 = vmatprep.subr.bf16.mxu0 %v17992_v0  ;;  %12023 = vmatprep.subr.mxu1 %v17990_v37 }
 0x935   :  { %v6344_v19 = vpop.f32.mrb[122].mxu1  ;;  %v6418_v45 = vpop.f32.mrb[122].mxu0 }
 0x936   :  { %vm6348_vm0 = vcmp.ge.f32.partialorder %v6344_v19, 0.0  ;;  %v6350_v41 = vmul.f32 %v16441_v46, %v6344_v19  ;;  %vm6422_vm9 = vcmp.ge.f32.partialorder %v6418_v45, 0.0  ;;  %v6423_v9 = vmul.f32 %v6418_v45, %v16441_v46  ;;  %v11919_v18 = vpop.f32.mrb[123].mxu1  ;;  %v11932_v12 = vpop.f32.mrb[123].mxu0 }
 0x938   :  { %v16445_v20 = vsel %vm6348_vm0, %v6344_v19, %v6350_v41  ;;  %v16447_v49 = vsel %vm6422_vm9, %v6418_v45, %v6423_v9 }
 0x939   :  { %v6515_v14 = vmul.f32 %v16449_v63, %v16445_v20  ;;  %v6528_v17 = vmul.f32 %v16449_v63, %v16447_v49 }
 0x93b   :  { %v6516_v31 = vsel %vm6503_vm8, %v6515_v14, 0.0  ;;  %v6529_v15 = vsel %vm6503_vm8, %v6528_v17, 0.0 }
 0x93c   :  { %v6517_v39 = vrot.slane %v6516_v31, 4  ;;  %v6530_v44 = vrot.slane %v6529_v15, 4 }
 0x93e   :  { %v6518_v42 = vadd.f32 %v6517_v39, %v6516_v31  ;;  %v6531_v7 = vadd.f32 %v6530_v44, %v6529_v15 }
 0x93f   :  { %v6491_v62 = vpop.f32.mrb[124].mxu1 }
 0x940   :  { %v6519_v53 = vrot.slane %v6518_v42, 2  ;;  %v6532_v58 = vrot.slane %v6531_v7, 2  ;;  %vm6495_vm10 = vcmp.ge.f32.partialorder %v6491_v62, 0.0  ;;  %v6496_v33 = vmul.f32 %v6491_v62, %v16441_v46  ;;  %v11945_v38 = vpop.f32.mrb[125].mxu1 }
 0x942   :  { %v6520_v32 = vadd.f32 %v6519_v53, %v6518_v42  ;;  %v6533_v60 = vadd.f32 %v6532_v58, %v6531_v7  ;;  %v16458_v6 = vsel %vm6495_vm10, %v6491_v62, %v6496_v33  ;;  %v16505_v33 = vpop.permute.xlu0 %6199 }
 0x943   :  { %v6540_v27 = vmul.f32 %v16449_v63, %v16458_v6 }
 0x944   :  { %v6521_v10 = vrot.slane %v6520_v32, 1  ;;  %v6534_v4 = vrot.slane %v6533_v60, 1 }
 0x945   :  { %v6541_v56 = vsel %vm6503_vm8, %v6540_v27, 0.0 }
 0x946   :  { %v6522_v52 = vadd.f32 %v6521_v10, %v6520_v32  ;;  %v6535_v51 = vadd.f32 %v6534_v4, %v6533_v60  ;;  %v6542_v25 = vrot.slane %v6541_v56, 4 }
 0x948   :  { %v6523_v29 = vadd.f32 %v6522_v52, %v6510_v1  ;;  %v6536_v16 = vadd.f32 %v6535_v51, %v6510_v1  ;;  %v6543_v40 = vadd.f32 %v6542_v25, %v6541_v56 }
 0x94a   :  { %v6526_v21 = vmul.f32 %v16463_v61, %v6523_v29  ;;  %v6538_v23 = vmul.f32 %v6536_v16, %v16463_v61  ;;  %vm6524_vm11 = vcmp.ge.f32.partialorder %v6523_v29, 0.0  ;;  %vm6537_vm1 = vcmp.ge.f32.partialorder %v6536_v16, 0.0 }
 0x94b   :  { %v6544_v2 = vrot.slane %v6543_v40, 2 }
 0x94c   :  { %v6527_v35 = vsel %vm6524_vm11, %v6523_v29, %v6526_v21  ;;  %v6539_v5 = vsel %vm6537_vm1, %v6536_v16, %v6538_v23  ;;  %vm8584_vm11 = vcmask 31744  }
 0x94d   :  { %v6545_v28 = vadd.f32 %v6544_v2, %v6543_v40  ;;  %v6552_v11 = vmax.f32 %v6527_v35, %v6539_v5 }
 0x94f   :  { %v6546_v55 = vrot.slane %v6545_v28, 1 }
 0x951   :  { %v6547_v34 = vadd.f32 %v6546_v55, %v6545_v28  ;;  %v6646_v22 = vpop.f32.mrb[124].mxu0  ;;  %v16518_v56 = vpop.f32.mrb[126].mxu1 }
 0x952   :  { %v16468_v50 = vadd.f32 %v6646_v22, %v16327_v36  ;;  %v11964_v3 = vpop.f32.mrb[125].mxu0  ;;  %v11983_v51 = vpop.f32.mrb[127].mxu1 }
 0x953   :  { %v6548_v24 = vadd.f32 %v6547_v34, %v6510_v1 }
 0x954   :  { %11995 = vmatmul.mubr.msk.f32.vlgmr.msra.gmra.mrb[126].mxu0 %vm111_vm2, %v16468_v50  ;;  %12008 = vmatmul.mubr.msk.f32.vlgmr.msra.gmra.mrb[128].mxu1 %vm111_vm2, %v16468_v50  ;;  %v6942_v55 = vmul.f32 %v16468_v50, %v16436_v13 }
 0x955   :  { %vm6549_vm12 = vcmp.ge.f32.partialorder %v6548_v24, 0.0  ;;  %v6550_v19 = vmul.f32 %v6548_v24, %v16463_v61  ;;  %12889 = vmatpush3.bf16.msra.mxu0 %v16296_v54  ;;  %12020 = vmatprep.mubr.msk.f32.mxu0 %vm13079_vm3, %v17990_v37  ;;  %v7100_v54 = vld [vmem:[%s17404_s5] sm:$0xff] }
 0x956   :  { %12890 = vmatprep.subr.bf16.mxu0 %v17992_v0  ;;  %12024 = vmatpush3.msra.mxu1 %v10367_v57  ;;  %v6943_v34 = vsel %vm6503_vm8, %v6942_v55, 0.0 }
 0x957   :  { %v6551_v36 = vsel %vm6549_vm12, %v6548_v24, %v6550_v19  ;;  %12025 = vmatprep.mubr.msk.f32.mxu1 %vm13079_vm3, %v17990_v37  ;;  %12081 = vmatprep.subr.mxu1 %v17990_v37  ;;  %v6944_v22 = vrot.slane %v6943_v34, 4 }
 0x958   :  { %v6553_v45 = vmax.f32 %v6552_v11, %v6551_v36  ;;  %v7105_v11 = vld [vmem:[#allocation3 + $0x25] sm:$0xff] }
 0x959   :  { %12892 = vmatpush3.bf16.msra.mxu0 %v16300_v26  ;;  %v7091_v26 = vld [vmem:[#allocation3] sm:$0xff]  ;;  %v6945_v3 = vadd.f32 %v6944_v22, %v6943_v34 }
 0x95a   :  { %v6554_v41 = vsub.f32 %v6527_v35, %v6553_v45  ;;  %v6557_v9 = vsub.f32 %v6539_v5, %v6553_v45  ;;  %v6560_v18 = vsub.f32 %v6551_v36, %v6553_v45  ;;  %12018 = vmatprep.subr.mxu0 %v17990_v37 }
 0x95c   :  { %v6555_v0 = vmul.f32 1.442695, %v6554_v41  ;;  %v6558_v12 = vmul.f32 1.442695, %v6557_v9  ;;  %v6561_v14 = vmul.f32 1.442695, %v6560_v18 }
 0x95d   :  { %12019 = vmatpush3.msra.mxu0 %v16362_v59 }
 0x95e   :  { %13000 = vpow2.f32 %v6555_v0  ;;  %12021 = vmatmul.mubr.msk.f32.vlgmr.msra.gmra.mrb[128].mxu0 %vm111_vm2, %v16468_v50  ;;  %12052 = vmatprep.subr.mxu0 %v17990_v37  ;;  %v6946_v0 = vrot.slane %v6945_v3, 2 }
 0x95f   :  { %13002 = vpow2.f32 %v6558_v12  ;;  %12053 = vmatpush3.msra.mxu0 %v7100_v54  ;;  %12054 = vmatprep.mubr.msk.f32.mxu0 %vm13079_vm3, %v17990_v37 }
 0x960   :  { %13004 = vpow2.f32 %v6561_v14  ;;  %12110 = vmatprep.subr.mxu0 %v17990_v37 }
 0x962   :  { %12055 = vmatmul.mubr.msk.f32.vlgmr.msra.gmra.mrb[130].mxu0 %vm7016_vm13, %v7091_v26 }
 0x963   :  { %12057 = vmatprep.mubr.msk.f32.mxu0 %vm13079_vm3, %v17990_v37 }
 0x968   :  { %v13001_v59 = vpop.eup %13000 }
 0x969   :  { %v13003_v17 = vpop.eup %13002  ;;  %v6565_v48 = vmul.f32 %v13001_v59, %v16445_v20 }
 0x96a   :  { %v13005_v31 = vpop.eup %13004  ;;  %v6563_v15 = vadd.f32 %v13003_v17, %v13001_v59  ;;  %v6566_v39 = vmul.f32 %v13003_v17, %v16447_v49  ;;  %v6272_v49 = vadd.f32 %v16414_v8, %v16505_v33  ;;  %v6947_v17 = vadd.f32 %v6946_v0, %v6945_v3 }
 0x96b   :  { %v6568_v44 = vmul.f32 %v13005_v31, %v16458_v6 }
 0x96c   :  { %v6564_v47 = vadd.f32 %v13005_v31, %v6563_v15  ;;  %v6567_v42 = vadd.f32 %v6566_v39, %v6565_v48 }
 0x96e   :  { %v6569_v7 = vadd.f32 %v6568_v44, %v6567_v42  ;;  %13006 = vrcp.f32 %v6564_v47 }
 0x978   :  { %v13007_v62 = vpop.eup %13006 }
 0x979   :  { %v6571_v53 = vmul.f32 %v13007_v62, %v6569_v7  ;;  %v6948_v7 = vrot.slane %v6947_v17, 1 }
 0x97b   :  { %v6572_v58 = vmul.f32 0.33333334, %v6571_v53 }
 0x97d   :  { %v6573_v20 = vadd.f32 %v6572_v58, %v16338_v43 }
 0x97f   :  { %v6574_v38 = vmul.f32 0.999995, %v6573_v20 }
 0x981   :  { %v6575_v32 = vadd.f32 %v6574_v38, %v6272_v49 }
 0x983   :  { %vm6576_vm2 = vcmp.ge.f32.partialorder %v6575_v32, 0.0  ;;  %v6578_v60 = vmul.f32 %v6577_v30, %v6575_v32 }
 0x985   :  { %v6579_v6 = vsel %vm6576_vm2, %v6575_v32, %v6578_v60 }
 0x986   :  { %7013 = vst.msk [vmem:[#allocation2] sm:$0x7] %vm6503_vm8, %v6579_v6 }
 0x98d   :  { %v7038_v27 = vld [vmem:[#allocation2] sm:$0x7] }
 0x98e   :  { %v7032_v10 = vld [vmem:[#allocation2] sm:$0x7]  ;;  %7040 = vrot.lane.b32.xlu1 %v7038_v27, %s13084_s29  ;;  %v6949_v27 = vadd.f32 %v6948_v7, %v6947_v17 }
 0x98f   :  { %7034 = vrot.lane.b32.xlu0 %v7032_v10, %s13085_s30  ;;  %v7029_v43 = vld [vmem:[#allocation2] sm:$0x7] }
 0x990   :  { %7031 = vst.msk [vmem:[#allocation3 + $0xc] sm:$0x7] %vm7030_vm14, %v7029_v43  ;;  %v7044_v8 = vld [vmem:[#allocation2] sm:$0x7] }
 0x991   :  { %v7050_v4 = vld [vmem:[#allocation2] sm:$0x7] }
 0x993   :  { %7046 = vrot.lane.b32.xlu0 %v7044_v8, %s13086_s9 }
 0x997   :  { %7052 = vrot.lane.b32.xlu0 %v7050_v4, %s13087_s10  ;;  %v7101_v1 = vld [vmem:[#allocation3 + $0x5] sm:$0xff] }
 0x998   :  { %v7092_v52 = vld [vmem:[#allocation3 + $0x8] sm:$0xff]  ;;  %12026 = vmatmul.mubr.msk.f32.vlgmr.msra.gmra.mrb[130].mxu1 %vm7016_vm13, %v7101_v1 }
 0x999   :  { %12058 = vmatmul.mubr.msk.f32.gmra.mrb[132].mxu0 %vm7016_vm13, %v7092_v52  ;;  %12028 = vmatprep.mubr.msk.f32.mxu1 %vm13079_vm3, %v17990_v37 }
 0x99a   :  { %12060 = vmatprep.mubr.msk.f32.mxu0 %vm13079_vm3, %v17990_v37 }
 0xa00   :  { %v7041_v25 = vpop.permute.xlu1 %7040 }
 0xa01   :  { %v7035_v29 = vpop.permute.xlu0 %7034  ;;  %7043 = vst.msk [vmem:[#allocation3 + $0x16] sm:$0x7] %vm7030_vm14, %v7041_v25 }
 0xa02   :  { %7037 = vst.msk [vmem:[#allocation3 + $0x11] sm:$0x7] %vm7030_vm14, %v7035_v29 }
 0xa05   :  { %v7047_v16 = vpop.permute.xlu0 %7046 }
 0xa06   :  { %7049 = vst.msk [vmem:[#allocation3 + $0x1b] sm:$0x7] %vm7030_vm14, %v7047_v16 }
 0xa09   :  { %v7053_v40 = vpop.permute.xlu0 %7052  ;;  %v7102_v21 = vld [vmem:[#allocation3 + $0xd] sm:$0xff] }
 0xa0a   :  { %v7093_v23 = vld [vmem:[#allocation3 + $0x10] sm:$0xff]  ;;  %7055 = vst.msk [vmem:[#allocation3 + $0x20] sm:$0x7] %vm7030_vm14, %v7053_v40  ;;  %12029 = vmatmul.mubr.msk.f32.gmra.mrb[132].mxu1 %vm7016_vm13, %v7102_v21 }
 0xa0b   :  { %12061 = vmatmul.mubr.msk.f32.gmra.mrb[134].mxu0 %vm7016_vm13, %v7093_v23  ;;  %12031 = vmatprep.mubr.msk.f32.mxu1 %vm13079_vm3, %v17990_v37 }
 0xa0c   :  { %12063 = vmatprep.mubr.msk.f32.mxu0 %vm13079_vm3, %v17990_v37 }
 0xa0d   :  { %v7103_v2 = vld [vmem:[#allocation3 + $0x15] sm:$0xff] }
 0xa0e   :  { %v7094_v35 = vld [vmem:[#allocation3 + $0x18] sm:$0xff]  ;;  %12032 = vmatmul.mubr.msk.f32.gmra.mrb[134].mxu1 %vm7016_vm13, %v7103_v2 }
 0xa0f   :  { %12064 = vmatmul.mubr.msk.f32.gmra.mrb[136].mxu0 %vm7016_vm13, %v7094_v35  ;;  %12034 = vmatprep.mubr.msk.f32.mxu1 %vm13079_vm3, %v17990_v37 }
 0xa10   :  { %12066 = vmatprep.mubr.msk.f32.mxu0 %vm13079_vm3, %v17990_v37 }
 0xa11   :  { %v7104_v5 = vld [vmem:[#allocation3 + $0x1d] sm:$0xff] }
 0xa12   :  { %v7095_v28 = vld [vmem:[#allocation3 + $0x20] sm:$0xff]  ;;  %12035 = vmatmul.mubr.msk.f32.gmra.mrb[136].mxu1 %vm7016_vm13, %v7104_v5 }
 0xa13   :  { %12067 = vmatmul.mubr.msk.f32.gmra.mrb[138].mxu0 %vm7016_vm13, %v7095_v28  ;;  %12037 = vmatprep.mubr.msk.f32.mxu1 %vm13079_vm3, %v17990_v37 }
 0xa14   :  { %12069 = vmatprep.mubr.msk.f32.mxu0 %vm13079_vm3, %v17990_v37 }
 0xa16   :  { %12038 = vmatmul.mubr.msk.f32.gmra.mrb[138].mxu1 %vm7016_vm13, %v7105_v11 }
 0xa17   :  { %12040 = vmatprep.mubr.msk.f32.mxu1 %vm13079_vm3, %v17990_v37 }
 0xa27   :  { %v6789_v24 = vpop.f32.mrb[126].mxu0  ;;  %v6862_v57 = vpop.f32.mrb[128].mxu1 }
 0xa28   :  { %vm6793_vm4 = vcmp.ge.f32.partialorder %v6789_v24, 0.0  ;;  %v6794_v19 = vmul.f32 %v6789_v24, %v16441_v46  ;;  %vm6866_vm15 = vcmp.ge.f32.partialorder %v6862_v57, 0.0  ;;  %v6867_v36 = vmul.f32 %v6862_v57, %v16441_v46  ;;  %v11996_v45 = vpop.f32.mrb[127].mxu0  ;;  %v12009_v41 = vpop.f32.mrb[129].mxu1 }
 0xa2a   :  { %v6795_v9 = vsel %vm6793_vm4, %v6789_v24, %v6794_v19  ;;  %v16557_v18 = vsel %vm6866_vm15, %v6862_v57, %v6867_v36 }
 0xa2b   :  { %v6950_v54 = vmul.f32 %v6795_v9, %v16449_v63  ;;  %v6962_v13 = vmul.f32 %v16557_v18, %v16449_v63 }
 0xa2d   :  { %v6951_v12 = vsel %vm6503_vm8, %v6950_v54, 0.0  ;;  %v6963_v14 = vsel %vm6503_vm8, %v6962_v13, 0.0 }
 0xa2e   :  { %v6952_v26 = vrot.slane %v6951_v12, 4  ;;  %v6964_v59 = vrot.slane %v6963_v14, 4 }
 0xa30   :  { %v6953_v48 = vadd.f32 %v6952_v26, %v6951_v12  ;;  %v6965_v31 = vadd.f32 %v6964_v59, %v6963_v14  ;;  %v10386_v14 = vld [vmem:[%s17404_s5 + $0x10] sm:$0xff] }
 0xa31   :  { %v6935_v15 = vpop.f32.mrb[128].mxu0  ;;  %12082 = vmatpush3.msra.mxu1 %v10386_v14 }
 0xa32   :  { %v6954_v39 = vrot.slane %v6953_v48, 2  ;;  %v6966_v44 = vrot.slane %v6965_v31, 2  ;;  %vm6939_vm5 = vcmp.ge.f32.partialorder %v6935_v15, 0.0  ;;  %v6940_v47 = vmul.f32 %v6935_v15, %v16441_v46  ;;  %v12022_v42 = vpop.f32.mrb[129].mxu0  ;;  %12139 = vmatprep.subr.mxu1 %v17990_v37 }
 0xa34   :  { %v6955_v62 = vadd.f32 %v6954_v39, %v6953_v48  ;;  %v6967_v53 = vadd.f32 %v6966_v44, %v6965_v31  ;;  %v6941_v58 = vsel %vm6939_vm5, %v6935_v15, %v6940_v47  ;;  %v6717_v44 = vadd.f32 %v16518_v56, %v16505_v33  ;;  %v10396_v33 = vld [vmem:[%s17404_s5 + $0x18] sm:$0xff] }
 0xa35   :  { %v6974_v20 = vmul.f32 %v6941_v58, %v16449_v63  ;;  %v7342_v49 = vpop.f32.mrb[130].mxu0  ;;  %12111 = vmatpush3.msra.mxu0 %v10396_v33  ;;  %v7703_v33 = vld [vmem:[#allocation3 + $0x1e] sm:$0xff] }
 0xa36   :  { %v6956_v38 = vrot.slane %v6955_v62, 1  ;;  %v6968_v32 = vrot.slane %v6967_v53, 1  ;;  %v12056_v60 = vpop.f32.mrb[131].mxu0  ;;  %12168 = vmatprep.subr.mxu0 %v17990_v37 }
 0xa37   :  { %v6975_v6 = vsel %vm6503_vm8, %v6974_v20, 0.0 }
 0xa38   :  { %v6957_v10 = vadd.f32 %v6956_v38, %v6955_v62  ;;  %v6969_v43 = vadd.f32 %v6968_v32, %v6967_v53  ;;  %v6976_v8 = vrot.slane %v6975_v6, 4 }
 0xa3a   :  { %v6958_v4 = vadd.f32 %v6957_v10, %v6949_v27  ;;  %v6970_v1 = vadd.f32 %v6969_v43, %v6949_v27  ;;  %v6977_v46 = vadd.f32 %v6976_v8, %v6975_v6 }
 0xa3c   :  { %vm6959_vm6 = vcmp.ge.f32.partialorder %v6958_v4, 0.0  ;;  %v6960_v52 = vmul.f32 %v6958_v4, %v16463_v61  ;;  %vm6971_vm7 = vcmp.ge.f32.partialorder %v6970_v1, 0.0  ;;  %v6972_v51 = vmul.f32 %v6970_v1, %v16463_v61 }
 0xa3d   :  { %v6978_v63 = vrot.slane %v6977_v46, 2 }
 0xa3e   :  { %v6961_v25 = vsel %vm6959_vm6, %v6958_v4, %v6960_v52  ;;  %v6973_v29 = vsel %vm6971_vm7, %v6970_v1, %v6972_v51  ;;  %vm8593_vm7 = vcmask 29696  }
 0xa3f   :  { %v6986_v16 = vmax.f32 %v6961_v25, %v6973_v29  ;;  %v6979_v40 = vadd.f32 %v6978_v63, %v6977_v46 }
 0xa41   :  { %v6980_v21 = vrot.slane %v6979_v40, 1 }
 0xa43   :  { %v6981_v23 = vadd.f32 %v6980_v21, %v6979_v40 }
 0xa45   :  { %v6982_v2 = vadd.f32 %v6981_v23, %v6949_v27 }
 0xa47   :  { %vm6983_vm0 = vcmp.ge.f32.partialorder %v6982_v2, 0.0  ;;  %v6984_v35 = vmul.f32 %v6982_v2, %v16463_v61 }
 0xa49   :  { %v6985_v5 = vsel %vm6983_vm0, %v6982_v2, %v6984_v35 }
 0xa4a   :  { %v6987_v28 = vmax.f32 %v6986_v16, %v6985_v5 }
 0xa4c   :  { %v6988_v11 = vsub.f32 %v6961_v25, %v6987_v28  ;;  %v6991_v55 = vsub.f32 %v6973_v29, %v6987_v28  ;;  %v6994_v34 = vsub.f32 %v6985_v5, %v6987_v28 }
 0xa4e   :  { %v6989_v22 = vmul.f32 1.442695, %v6988_v11  ;;  %v6992_v3 = vmul.f32 1.442695, %v6991_v55  ;;  %v6995_v24 = vmul.f32 1.442695, %v6994_v34 }
 0xa50   :  { %13008 = vpow2.f32 %v6989_v22  ;;  %v7543_v22 = vld [vmem:[#allocation3 + $0x1] sm:$0xff] }
 0xa51   :  { %13010 = vpow2.f32 %v6992_v3 }
 0xa52   :  { %13012 = vpow2.f32 %v6995_v24  ;;  %v10416_v24 = vld [vmem:[%s17404_s5 + $0x28] sm:$0xff] }
 0xa5a   :  { %v13009_v57 = vpop.eup %13008 }
 0xa5b   :  { %v13011_v19 = vpop.eup %13010  ;;  %v6999_v36 = vmul.f32 %v13009_v57, %v6795_v9 }
 0xa5c   :  { %v13013_v45 = vpop.eup %13012  ;;  %v6997_v41 = vadd.f32 %v13011_v19, %v13009_v57  ;;  %v7000_v54 = vmul.f32 %v13011_v19, %v16557_v18  ;;  %v16635_v57 = vld [vmem:[#allocation3 + $0xa] sm:$0xff] }
 0xa5d   :  { %v7002_v13 = vmul.f32 %v13013_v45, %v6941_v58  ;;  %v7544_v19 = vld [vmem:[#allocation3 + $0x9] sm:$0xff] }
 0xa5e   :  { %v6998_v61 = vadd.f32 %v13013_v45, %v6997_v41  ;;  %v7001_v0 = vadd.f32 %v7000_v54, %v6999_v36  ;;  %v10406_v36 = vld [vmem:[%s17404_s5 + $0x20] sm:$0xff] }
 0xa5f   :  { %v16648_v45 = vld [vmem:[#allocation3 + $0x12] sm:$0xff]  ;;  %v16658_v54 = vld [vmem:[#allocation3 + $0x1a] sm:$0xff] }
 0xa60   :  { %v7003_v12 = vadd.f32 %v7002_v13, %v7001_v0  ;;  %13014 = vrcp.f32 %v6998_v61  ;;  %v7545_v41 = vld [vmem:[#allocation3 + $0x11] sm:$0xff]  ;;  %v7546_v13 = vld [vmem:[#allocation3 + $0x19] sm:$0xff]  ;;  %v16667_v61 = vld [vmem:[#allocation3 + $0x22] sm:$0xff] }
 0xa61   :  { %v7547_v0 = vld [vmem:[#allocation3 + $0x21] sm:$0xff] }
 0xa6a   :  { %v13015_v26 = vpop.eup %13014 }
 0xa6b   :  { %v7205_v59 = vpop.f32.mrb[130].mxu1  ;;  %v7005_v48 = vmul.f32 %v13015_v26, %v7003_v12  ;;  %v7082_v12 = vld [vmem:[%s17406_s7] sm:$0xff] }
 0xa6c   :  { %v7347_v17 = vpop.f32.mrb[132].mxu0  ;;  %v16574_v9 = vadd.f32 %v7342_v49, %v7205_v59  ;;  %v12027_v31 = vpop.f32.mrb[131].mxu1 }
 0xa6d   :  { %v12059_v15 = vpop.f32.mrb[133].mxu0  ;;  %v7006_v18 = vmul.f32 0.33333334, %v7005_v48 }
 0xa6f   :  { %v7007_v39 = vadd.f32 %v7006_v18, %v16468_v50 }
 0xa71   :  { %v7008_v47 = vmul.f32 0.999995, %v7007_v39  ;;  %v7394_v39 = vld [vmem:[#allocation3 + $0x4a] sm:$0x3f] }
 0xa73   :  { %v7009_v42 = vadd.f32 %v7008_v47, %v6717_v44  ;;  %v7857_v44 = vld [vmem:[#allocation3 + $0xb] sm:$0xff] }
 0xa74   :  { %v10436_v47 = vld [vmem:[%s17404_s5 + $0x38] sm:$0xff] }
 0xa75   :  { %vm7010_vm9 = vcmp.ge.f32.partialorder %v7009_v42, 0.0  ;;  %v7011_v7 = vmul.f32 %v7009_v42, %v6577_v30 }
 0xa77   :  { %v7012_v62 = vsel %vm7010_vm9, %v7009_v42, %v7011_v7  ;;  %v7700_v42 = vld [vmem:[#allocation3 + $0x6] sm:$0xff]  ;;  %v7858_v7 = vld [vmem:[#allocation3 + $0x13] sm:$0xff] }
 0xa78   :  { %7015 = vst.msk [vmem:[#allocation2 + $0x4] sm:$0x7] %vm6503_vm8, %v7012_v62  ;;  %vm7027_vm8 = vcmask 58368   ;;  %v10426_v62 = vld [vmem:[%s17404_s5 + $0x30] sm:$0xff] }
 0xa79   :  { %7028 = vst.msk [vmem:[#allocation3 + $0x50] sm:$0x3] %vm7027_vm8, %v17990_v37 }
 0xa7f   :  { %v7070_v53 = vld [vmem:[#allocation2 + $0x4] sm:$0x7] }
 0xa80   :  { %v7058_v58 = vld [vmem:[#allocation2 + $0x4] sm:$0x7]  ;;  %7072 = vrot.lane.b32.xlu1 %v7070_v53, %s13086_s9  ;;  %v7701_v53 = vld [vmem:[#allocation3 + $0xe] sm:$0xff] }
 0xa81   :  { %7060 = vrot.lane.b32.xlu0 %v7058_v58, %s13085_s30  ;;  %v7056_v20 = vld [vmem:[#allocation2 + $0x4] sm:$0x7] }
 0xa82   :  { %7057 = vst.msk [vmem:[#allocation3 + $0x2f] sm:$0x7] %vm7030_vm14, %v7056_v20  ;;  %v7064_v50 = vld [vmem:[#allocation2 + $0x4] sm:$0x7]  ;;  %v7860_v20 = vld [vmem:[#allocation3 + $0x23] sm:$0xff] }
 0xa83   :  { %v7076_v30 = vld [vmem:[#allocation2 + $0x4] sm:$0x7] }
 0xa84   :  { %8532 = vperm.xlu1 %12942, %v7082_v12   ;;  %v7859_v58 = vld [vmem:[#allocation3 + $0x1b] sm:$0xff] }
 0xa85   :  { %7066 = vrot.lane.b32.xlu0 %v7064_v50, %s13084_s29  ;;  %v7702_v50 = vld [vmem:[#allocation3 + $0x16] sm:$0xff] }
 0xa89   :  { %7078 = vrot.lane.b32.xlu0 %v7076_v30, %s13087_s10  ;;  %v7096_v56 = vld [vmem:[#allocation3 + $0x28] sm:$0xff] }
 0xa8a   :  { %12070 = vmatmul.mubr.msk.f32.gmra.mrb[140].mxu0 %vm7016_vm13, %v7096_v56  ;;  %v16679_v14 = vld [vmem:[#allocation3 + $0x2a] sm:$0xff] }
 0xa8b   :  { %12072 = vmatprep.mubr.msk.f32.mxu0 %vm13079_vm3, %v17990_v37  ;;  %v7548_v26 = vld [vmem:[#allocation3 + $0x29] sm:$0xff] }
 0xa8c   :  { %v7861_v30 = vld [vmem:[#allocation3 + $0x2b] sm:$0xff] }
 0xa8d   :  { %v7704_v56 = vld [vmem:[#allocation3 + $0x26] sm:$0xff] }
 0xadd   :  { %v7210_v49 = vpop.f32.mrb[132].mxu1 }
 0xade   :  { %v7352_v38 = vpop.f32.mrb[134].mxu0  ;;  %v16596_v32 = vadd.f32 %v7347_v17, %v7210_v49  ;;  %v12030_v60 = vpop.f32.mrb[133].mxu1 }
 0xadf   :  { %v12062_v6 = vpop.f32.mrb[135].mxu0 }
 0xae1   :  { %v7215_v27 = vpop.f32.mrb[134].mxu1 }
 0xae2   :  { %v7357_v10 = vpop.f32.mrb[136].mxu0  ;;  %v16598_v43 = vadd.f32 %v7352_v38, %v7215_v27  ;;  %v12033_v8 = vpop.f32.mrb[135].mxu1 }
 0xae3   :  { %v12065_v4 = vpop.f32.mrb[137].mxu0 }
 0xae4   :  { %v7708_v4 = vld [vmem:[#allocation3 + $0x46] sm:$0x3f] }
 0xae5   :  { %v7220_v1 = vpop.f32.mrb[136].mxu1 }
 0xae6   :  { %v7362_v46 = vpop.f32.mrb[138].mxu0  ;;  %v16600_v52 = vadd.f32 %v7357_v10, %v7220_v1  ;;  %v12036_v51 = vpop.f32.mrb[137].mxu1  ;;  %v7865_v10 = vld [vmem:[#allocation3 + $0x4b] sm:$0x3f] }
 0xae7   :  { %v12068_v63 = vpop.f32.mrb[139].mxu0  ;;  %v7084_v1 = vld [vmem:[%s17406_s7 + $0x10] sm:$0xff] }
 0xae8   :  { %8542 = vperm.xlu1 %12942, %v7084_v1   ;;  %v8014_v51 = vld [vmem:[#allocation3 + $0x2] sm:$0xff]  ;;  %v7085_v63 = vld [vmem:[%s17406_s7 + $0x18] sm:$0xff] }
 0xae9   :  { %v7225_v25 = vpop.f32.mrb[138].mxu1  ;;  %v10458_v1 = vld [vmem:[%s17404_s5 + $0x48] sm:$0xff] }
 0xaea   :  { %v16602_v29 = vadd.f32 %v7362_v46, %v7225_v25  ;;  %v12039_v16 = vpop.f32.mrb[139].mxu1  ;;  %v8171_v46 = vld [vmem:[#allocation3 + $0x7] sm:$0xff] }
 0xaeb   :  { %v7083_v25 = vld [vmem:[%s17406_s7 + $0x8] sm:$0xff]  ;;  %v8172_v16 = vld [vmem:[#allocation3 + $0xf] sm:$0xff] }
 0xaec   :  { %8547 = vperm.xlu1 %12942, %v7085_v63   ;;  %8537 = vperm.xlu0 %12943, %v7083_v25  }
 0xaf2   :  { %v7073_v40 = vpop.permute.xlu1 %7072 }
 0xaf3   :  { %v7061_v21 = vpop.permute.xlu0 %7060  ;;  %7075 = vst.msk [vmem:[#allocation3 + $0x3e] sm:$0x7] %vm7030_vm14, %v7073_v40  ;;  %v10446_v40 = vld [vmem:[%s17404_s5 + $0x40] sm:$0xff] }
 0xaf4   :  { %7063 = vst.msk [vmem:[#allocation3 + $0x34] sm:$0x7] %vm7030_vm14, %v7061_v21  ;;  %v7087_v21 = vld [vmem:[%s17406_s7 + $0x28] sm:$0xff] }
 0xaf5   :  { %8557 = vperm.xlu1 %12942, %v7087_v21  }
 0xaf7   :  { %v7067_v23 = vpop.permute.xlu0 %7066 }
 0xaf8   :  { %7069 = vst.msk [vmem:[#allocation3 + $0x39] sm:$0x7] %vm7030_vm14, %v7067_v23  ;;  %v7086_v23 = vld [vmem:[%s17406_s7 + $0x20] sm:$0xff] }
 0xaf9   :  { %8552 = vperm.xlu0 %12943, %v7086_v23  }
 0xafb   :  { %v7079_v2 = vpop.permute.xlu0 %7078  ;;  %v7106_v35 = vld [vmem:[#allocation3 + $0x2d] sm:$0xff] }
 0xafc   :  { %v7097_v5 = vld [vmem:[#allocation3 + $0x30] sm:$0xff]  ;;  %7081 = vst.msk [vmem:[#allocation3 + $0x43] sm:$0x7] %vm7030_vm14, %v7079_v2  ;;  %12041 = vmatmul.mubr.msk.f32.gmra.mrb[140].mxu1 %vm7016_vm13, %v7106_v35 }
 0xafd   :  { %12073 = vmatmul.mubr.msk.f32.gmra.mrb[142].mxu0 %vm7016_vm13, %v7097_v5  ;;  %12043 = vmatprep.mubr.msk.f32.mxu1 %vm13079_vm3, %v17990_v37  ;;  %v7549_v17 = vld [vmem:[#allocation3 + $0x31] sm:$0xff]  ;;  %v7088_v5 = vld [vmem:[%s17406_s7 + $0x30] sm:$0xff] }
 0xafe   :  { %12075 = vmatprep.mubr.msk.f32.mxu0 %vm13079_vm3, %v17990_v37  ;;  %v7705_v38 = vld [vmem:[#allocation3 + $0x2e] sm:$0xff]  ;;  %v8173_v2 = vld [vmem:[#allocation3 + $0x17] sm:$0xff]  ;;  %8562 = vperm.xlu0 %12943, %v7088_v5  }
 0xaff   :  { %v7107_v28 = vld [vmem:[#allocation3 + $0x35] sm:$0xff] }
 0xb00   :  { %v7098_v11 = vld [vmem:[#allocation3 + $0x38] sm:$0xff]  ;;  %12044 = vmatmul.mubr.msk.f32.gmra.mrb[142].mxu1 %vm7016_vm13, %v7107_v28  ;;  %v7089_v35 = vld [vmem:[%s17406_s7 + $0x38] sm:$0xff] }
 0xb01   :  { %12076 = vmatmul.mubr.msk.f32.gmra.mrb[144].mxu0 %vm7016_vm13, %v7098_v11  ;;  %12046 = vmatprep.mubr.msk.f32.mxu1 %vm13079_vm3, %v17990_v37  ;;  %v16688_v59 = vld [vmem:[#allocation3 + $0x32] sm:$0xff]  ;;  %v16697_v48 = vld [vmem:[#allocation3 + $0x3a] sm:$0xff] }
 0xb02   :  { %12078 = vmatprep.mubr.msk.f32.mxu0 %vm13079_vm3, %v17990_v37  ;;  %v7550_v31 = vld [vmem:[#allocation3 + $0x39] sm:$0xff]  ;;  %8567 = vperm.xlu1 %12942, %v7089_v35  }
 0xb03   :  { %v7108_v55 = vld [vmem:[#allocation3 + $0x3d] sm:$0xff]  ;;  %v7109_v3 = vld [vmem:[#allocation3 + $0x45] sm:$0x3f]  ;;  %v7862_v49 = vld [vmem:[#allocation3 + $0x33] sm:$0xff] }
 0xb04   :  { %v7099_v34 = vld [vmem:[#allocation3 + $0x40] sm:$0x3f]  ;;  %12047 = vmatmul.mubr.msk.f32.gmra.mrb[144].mxu1 %vm7016_vm13, %v7108_v55  ;;  %v7706_v6 = vld [vmem:[#allocation3 + $0x36] sm:$0xff]  ;;  %v8175_v55 = vld [vmem:[#allocation3 + $0x27] sm:$0xff] }
 0xb05   :  { %12079 = vmatmul.mubr.msk.f32.gmra.mrb[146].mxu0 %vm7016_vm13, %v7099_v34  ;;  %12049 = vmatprep.mubr.msk.f32.mxu1 %vm13079_vm3, %v17990_v37  ;;  %v7393_v15 = vld [vmem:[#allocation3 + $0x42] sm:$0xff]  ;;  %v7090_v34 = vld [vmem:[%s17406_s7 + $0x40] sm:$0x3f] }
 0xb06   :  { %12112 = vmatprep.mubr.msk.f32.mxu0 %vm13079_vm3, %v17990_v37  ;;  %v7551_v18 = vld [vmem:[#allocation3 + $0x41] sm:$0x3f]  ;;  %8572 = vperm.xlu0 %12943, %v7090_v34  }
 0xb07   :  { %v7863_v60 = vld [vmem:[#allocation3 + $0x3b] sm:$0xff]  ;;  %v7864_v27 = vld [vmem:[#allocation3 + $0x43] sm:$0xff] }
 0xb08   :  { %12050 = vmatmul.mubr.msk.f32.gmra.mrb[146].mxu1 %vm7016_vm13, %v7109_v3  ;;  %v7707_v8 = vld [vmem:[#allocation3 + $0x3e] sm:$0xff]  ;;  %v8176_v3 = vld [vmem:[#allocation3 + $0x2f] sm:$0xff] }
 0xb09   :  { %12113 = vmatmul.mubr.msk.f32.vlgmr.msra.gmra.mrb[148].mxu0 %vm7016_vm13, %v7543_v22  ;;  %12083 = vmatprep.mubr.msk.f32.mxu1 %vm13079_vm3, %v17990_v37  ;;  %v8174_v28 = vld [vmem:[#allocation3 + $0x1f] sm:$0xff] }
 0xb0a   :  { %12115 = vmatprep.mubr.msk.f32.mxu0 %vm13079_vm3, %v17990_v37  ;;  %12169 = vmatpush3.msra.mxu0 %v10416_v24  ;;  %v8177_v24 = vld [vmem:[#allocation3 + $0x37] sm:$0xff] }
 0xb0b   :  { %12226 = vmatprep.subr.mxu0 %v17990_v37  ;;  %v8334_v12 = vld [vmem:[#allocation3 + $0x3c] sm:$0xff] }
 0xb0c   :  { %12084 = vmatmul.mubr.msk.f32.vlgmr.msra.gmra.mrb[148].mxu1 %vm7016_vm13, %v16635_v57 }
 0xb0d   :  { %12116 = vmatmul.mubr.msk.f32.gmra.mrb[150].mxu0 %vm7016_vm13, %v7544_v19  ;;  %12086 = vmatprep.mubr.msk.f32.mxu1 %vm13079_vm3, %v17990_v37  ;;  %v8179_v19 = vld [vmem:[#allocation3 + $0x47] sm:$0x3f] }
 0xb0e   :  { %12118 = vmatprep.mubr.msk.f32.mxu0 %vm13079_vm3, %v17990_v37  ;;  %12140 = vmatpush3.msra.mxu1 %v10406_v36  ;;  %v8022_v36 = vld [vmem:[#allocation3 + $0x42] sm:$0x3f] }
 0xb0f   :  { %12197 = vmatprep.subr.mxu1 %v17990_v37 }
 0xb10   :  { %12087 = vmatmul.mubr.msk.f32.gmra.mrb[150].mxu1 %vm7016_vm13, %v16648_v45 }
 0xb11   :  { %12119 = vmatmul.mubr.msk.f32.gmra.mrb[152].mxu0 %vm7016_vm13, %v7545_v41  ;;  %12089 = vmatprep.mubr.msk.f32.mxu1 %vm13079_vm3, %v17990_v37  ;;  %v8329_v41 = vld [vmem:[#allocation3 + $0x14] sm:$0xff] }
 0xb12   :  { %12121 = vmatprep.mubr.msk.f32.mxu0 %vm13079_vm3, %v17990_v37 }
 0xb14   :  { %12090 = vmatmul.mubr.msk.f32.gmra.mrb[152].mxu1 %vm7016_vm13, %v16658_v54 }
 0xb15   :  { %12122 = vmatmul.mubr.msk.f32.gmra.mrb[154].mxu0 %vm7016_vm13, %v7546_v13  ;;  %12092 = vmatprep.mubr.msk.f32.mxu1 %vm13079_vm3, %v17990_v37  ;;  %v8331_v13 = vld [vmem:[#allocation3 + $0x24] sm:$0xff] }
 0xb16   :  { %12124 = vmatprep.mubr.msk.f32.mxu0 %vm13079_vm3, %v17990_v37 }
 0xb18   :  { %12093 = vmatmul.mubr.msk.f32.gmra.mrb[154].mxu1 %vm7016_vm13, %v16667_v61 }
 0xb19   :  { %12125 = vmatmul.mubr.msk.f32.gmra.mrb[156].mxu0 %vm7016_vm13, %v7547_v0  ;;  %12095 = vmatprep.mubr.msk.f32.mxu1 %vm13079_vm3, %v17990_v37  ;;  %v8333_v0 = vld [vmem:[#allocation3 + $0x34] sm:$0xff] }
 0xb1a   :  { %12127 = vmatprep.mubr.msk.f32.mxu0 %vm13079_vm3, %v17990_v37 }
 0xb1c   :  { %12096 = vmatmul.mubr.msk.f32.gmra.mrb[156].mxu1 %vm7016_vm13, %v16679_v14 }
 0xb1d   :  { %12128 = vmatmul.mubr.msk.f32.gmra.mrb[158].mxu0 %vm7016_vm13, %v7548_v26  ;;  %12098 = vmatprep.mubr.msk.f32.mxu1 %vm13079_vm3, %v17990_v37  ;;  %v8336_v26 = vld [vmem:[#allocation3 + $0x4c] sm:$0x3f] }
 0xb1e   :  { %12130 = vmatprep.mubr.msk.f32.mxu0 %vm13079_vm3, %v17990_v37 }
 0xb20   :  { %12099 = vmatmul.mubr.msk.f32.gmra.mrb[158].mxu1 %vm7016_vm13, %v16688_v59 }
 0xb21   :  { %12131 = vmatmul.mubr.msk.f32.gmra.mrb[160].mxu0 %vm7016_vm13, %v7549_v17  ;;  %12101 = vmatprep.mubr.msk.f32.mxu1 %vm13079_vm3, %v17990_v37 }
 0xb22   :  { %12133 = vmatprep.mubr.msk.f32.mxu0 %vm13079_vm3, %v17990_v37 }
 0xb24   :  { %12102 = vmatmul.mubr.msk.f32.gmra.mrb[160].mxu1 %vm7016_vm13, %v16697_v48 }
 0xb25   :  { %12134 = vmatmul.mubr.msk.f32.gmra.mrb[162].mxu0 %vm7016_vm13, %v7550_v31  ;;  %12104 = vmatprep.mubr.msk.f32.mxu1 %vm13079_vm3, %v17990_v37 }
 0xb26   :  { %12136 = vmatprep.mubr.msk.f32.mxu0 %vm13079_vm3, %v17990_v37 }
 0xb28   :  { %12105 = vmatmul.mubr.msk.f32.gmra.mrb[162].mxu1 %vm7016_vm13, %v7393_v15 }
 0xb29   :  { %12137 = vmatmul.mubr.msk.f32.gmra.mrb[164].mxu0 %vm7016_vm13, %v7551_v18  ;;  %12107 = vmatprep.mubr.msk.f32.mxu1 %vm13079_vm3, %v17990_v37 }
 0xb2a   :  { %12170 = vmatprep.mubr.msk.f32.mxu0 %vm13079_vm3, %v17990_v37 }
 0xb2c   :  { %12108 = vmatmul.mubr.msk.f32.gmra.mrb[164].mxu1 %vm7016_vm13, %v7394_v39 }
 0xb2d   :  { %12171 = vmatmul.mubr.msk.f32.vlgmr.msra.gmra.mrb[166].mxu0 %vm7016_vm13, %v7857_v44  ;;  %12141 = vmatprep.mubr.msk.f32.mxu1 %vm13079_vm3, %v17990_v37 }
 0xb2e   :  { %12173 = vmatprep.mubr.msk.f32.mxu0 %vm13079_vm3, %v17990_v37  ;;  %12227 = vmatpush3.msra.mxu0 %v10436_v47 }
 0xb2f   :  { %12284 = vmatprep.subr.mxu0 %v17990_v37 }
 0xb30   :  { %12142 = vmatmul.mubr.msk.f32.vlgmr.msra.gmra.mrb[166].mxu1 %vm7016_vm13, %v7700_v42 }
 0xb31   :  { %12174 = vmatmul.mubr.msk.f32.gmra.mrb[168].mxu0 %vm7016_vm13, %v7858_v7  ;;  %12144 = vmatprep.mubr.msk.f32.mxu1 %vm13079_vm3, %v17990_v37 }
 0xb32   :  { %12176 = vmatprep.mubr.msk.f32.mxu0 %vm13079_vm3, %v17990_v37  ;;  %12198 = vmatpush3.msra.mxu1 %v10426_v62 }
 0xb33   :  { %12255 = vmatprep.subr.mxu1 %v17990_v37 }
 0xb34   :  { %12145 = vmatmul.mubr.msk.f32.gmra.mrb[168].mxu1 %vm7016_vm13, %v7701_v53 }
 0xb35   :  { %12177 = vmatmul.mubr.msk.f32.gmra.mrb[170].mxu0 %vm7016_vm13, %v7859_v58  ;;  %12147 = vmatprep.mubr.msk.f32.mxu1 %vm13079_vm3, %v17990_v37 }
 0xb36   :  { %12179 = vmatprep.mubr.msk.f32.mxu0 %vm13079_vm3, %v17990_v37 }
 0xb38   :  { %12148 = vmatmul.mubr.msk.f32.gmra.mrb[170].mxu1 %vm7016_vm13, %v7702_v50 }
 0xb39   :  { %12180 = vmatmul.mubr.msk.f32.gmra.mrb[172].mxu0 %vm7016_vm13, %v7860_v20  ;;  %12150 = vmatprep.mubr.msk.f32.mxu1 %vm13079_vm3, %v17990_v37 }
 0xb3a   :  { %12182 = vmatprep.mubr.msk.f32.mxu0 %vm13079_vm3, %v17990_v37 }
 0xb3c   :  { %12151 = vmatmul.mubr.msk.f32.gmra.mrb[172].mxu1 %vm7016_vm13, %v7703_v33 }
 0xb3d   :  { %12183 = vmatmul.mubr.msk.f32.gmra.mrb[174].mxu0 %vm7016_vm13, %v7861_v30  ;;  %12153 = vmatprep.mubr.msk.f32.mxu1 %vm13079_vm3, %v17990_v37 }
 0xb3e   :  { %12185 = vmatprep.mubr.msk.f32.mxu0 %vm13079_vm3, %v17990_v37 }
 0xb40   :  { %12154 = vmatmul.mubr.msk.f32.gmra.mrb[174].mxu1 %vm7016_vm13, %v7704_v56 }
 0xb41   :  { %12186 = vmatmul.mubr.msk.f32.gmra.mrb[176].mxu0 %vm7016_vm13, %v7862_v49  ;;  %12156 = vmatprep.mubr.msk.f32.mxu1 %vm13079_vm3, %v17990_v37 }
 0xb42   :  { %12188 = vmatprep.mubr.msk.f32.mxu0 %vm13079_vm3, %v17990_v37 }
 0xb44   :  { %12157 = vmatmul.mubr.msk.f32.gmra.mrb[176].mxu1 %vm7016_vm13, %v7705_v38 }
 0xb45   :  { %12189 = vmatmul.mubr.msk.f32.gmra.mrb[178].mxu0 %vm7016_vm13, %v7863_v60  ;;  %12159 = vmatprep.mubr.msk.f32.mxu1 %vm13079_vm3, %v17990_v37 }
 0xb46   :  { %12191 = vmatprep.mubr.msk.f32.mxu0 %vm13079_vm3, %v17990_v37 }
 0xb48   :  { %12160 = vmatmul.mubr.msk.f32.gmra.mrb[178].mxu1 %vm7016_vm13, %v7706_v6 }
 0xb49   :  { %12192 = vmatmul.mubr.msk.f32.gmra.mrb[180].mxu0 %vm7016_vm13, %v7864_v27  ;;  %12162 = vmatprep.mubr.msk.f32.mxu1 %vm13079_vm3, %v17990_v37 }
 0xb4a   :  { %12194 = vmatprep.mubr.msk.f32.mxu0 %vm13079_vm3, %v17990_v37 }
 0xb4c   :  { %12163 = vmatmul.mubr.msk.f32.gmra.mrb[180].mxu1 %vm7016_vm13, %v7707_v8 }
 0xb4d   :  { %12195 = vmatmul.mubr.msk.f32.gmra.mrb[182].mxu0 %vm7016_vm13, %v7865_v10  ;;  %12165 = vmatprep.mubr.msk.f32.mxu1 %vm13079_vm3, %v17990_v37 }
 0xb4e   :  { %12228 = vmatprep.mubr.msk.f32.mxu0 %vm13079_vm3, %v17990_v37 }
 0xb50   :  { %12166 = vmatmul.mubr.msk.f32.gmra.mrb[182].mxu1 %vm7016_vm13, %v7708_v4 }
 0xb51   :  { %12229 = vmatmul.mubr.msk.f32.vlgmr.msra.gmra.mrb[184].mxu0 %vm7016_vm13, %v8171_v46  ;;  %12199 = vmatprep.mubr.msk.f32.mxu1 %vm13079_vm3, %v17990_v37 }
 0xb52   :  { %12231 = vmatprep.mubr.msk.f32.mxu0 %vm13079_vm3, %v17990_v37 }
 0xb54   :  { %12200 = vmatmul.mubr.msk.f32.vlgmr.msra.gmra.mrb[184].mxu1 %vm7016_vm13, %v8014_v51 }
 0xb55   :  { %12232 = vmatmul.mubr.msk.f32.gmra.mrb[186].mxu0 %vm7016_vm13, %v8172_v16  ;;  %12202 = vmatprep.mubr.msk.f32.mxu1 %vm13079_vm3, %v17990_v37 }
 0xb56   :  { %12234 = vmatprep.mubr.msk.f32.mxu0 %vm13079_vm3, %v17990_v37  ;;  %12256 = vmatpush3.msra.mxu1 %v10446_v40 }
 0xb57   :  { %12313 = vmatprep.subr.mxu1 %v17990_v37 }
 0xb58   :  { %12203 = vmatmul.mubr.msk.f32.gmra.mrb[186].mxu1 %vm7016_vm13, %v16635_v57  ;;  %v8178_v57 = vld [vmem:[#allocation3 + $0x3f] sm:$0xff] }
 0xb59   :  { %12235 = vmatmul.mubr.msk.f32.gmra.mrb[188].mxu0 %vm7016_vm13, %v8173_v2  ;;  %12205 = vmatprep.mubr.msk.f32.mxu1 %vm13079_vm3, %v17990_v37 }
 0xb5a   :  { %12237 = vmatprep.mubr.msk.f32.mxu0 %vm13079_vm3, %v17990_v37 }
 0xb5c   :  { %12206 = vmatmul.mubr.msk.f32.gmra.mrb[188].mxu1 %vm7016_vm13, %v16648_v45  ;;  %v8328_v45 = vld [vmem:[#allocation3 + $0xc] sm:$0xff] }
 0xb5d   :  { %12238 = vmatmul.mubr.msk.f32.gmra.mrb[190].mxu0 %vm7016_vm13, %v8174_v28  ;;  %v16821_v11 = vpop.f32.mrb[140].mxu0  ;;  %12208 = vmatprep.mubr.msk.f32.mxu1 %vm13079_vm3, %v17990_v37 }
 0xb5e   :  { %12240 = vmatprep.mubr.msk.f32.mxu0 %vm13079_vm3, %v17990_v37  ;;  %v12071_v22 = vpop.f32.mrb[141].mxu0 }
 0xb60   :  { %12209 = vmatmul.mubr.msk.f32.gmra.mrb[190].mxu1 %vm7016_vm13, %v16658_v54  ;;  %v8330_v54 = vld [vmem:[#allocation3 + $0x1c] sm:$0xff] }
 0xb61   :  { %12241 = vmatmul.mubr.msk.f32.gmra.mrb[192].mxu0 %vm7016_vm13, %v8175_v55  ;;  %12211 = vmatprep.mubr.msk.f32.mxu1 %vm13079_vm3, %v17990_v37 }
 0xb62   :  { %12243 = vmatprep.mubr.msk.f32.mxu0 %vm13079_vm3, %v17990_v37 }
 0xb64   :  { %12212 = vmatmul.mubr.msk.f32.gmra.mrb[192].mxu1 %vm7016_vm13, %v16667_v61  ;;  %v8332_v61 = vld [vmem:[#allocation3 + $0x2c] sm:$0xff] }
 0xb65   :  { %12244 = vmatmul.mubr.msk.f32.gmra.mrb[194].mxu0 %vm7016_vm13, %v8176_v3  ;;  %12214 = vmatprep.mubr.msk.f32.mxu1 %vm13079_vm3, %v17990_v37 }
 0xb66   :  { %12246 = vmatprep.mubr.msk.f32.mxu0 %vm13079_vm3, %v17990_v37 }
 0xb68   :  { %12215 = vmatmul.mubr.msk.f32.gmra.mrb[194].mxu1 %vm7016_vm13, %v16679_v14  ;;  %v8335_v14 = vld [vmem:[#allocation3 + $0x44] sm:$0xff] }
 0xb69   :  { %12247 = vmatmul.mubr.msk.f32.gmra.mrb[196].mxu0 %vm7016_vm13, %v8177_v24  ;;  %12217 = vmatprep.mubr.msk.f32.mxu1 %vm13079_vm3, %v17990_v37 }
 0xb6a   :  { %12249 = vmatprep.mubr.msk.f32.mxu0 %vm13079_vm3, %v17990_v37 }
 0xb6c   :  { %12218 = vmatmul.mubr.msk.f32.gmra.mrb[196].mxu1 %vm7016_vm13, %v16688_v59  ;;  %v10459_v59 = vld [vmem:[%s17404_s5 + $0x50] sm:$0xff] }
 0xb6d   :  { %12250 = vmatmul.mubr.msk.f32.gmra.mrb[198].mxu0 %vm7016_vm13, %v8178_v57  ;;  %12220 = vmatprep.mubr.msk.f32.mxu1 %vm13079_vm3, %v17990_v37 }
 0xb6e   :  { %12252 = vmatprep.mubr.msk.f32.mxu0 %vm13079_vm3, %v17990_v37  ;;  %12285 = vmatpush3.msra.mxu0 %v10459_v59 }
 0xb6f   :  { %12342 = vmatprep.subr.mxu0 %v17990_v37 }
 0xb70   :  { %12221 = vmatmul.mubr.msk.f32.gmra.mrb[198].mxu1 %vm7016_vm13, %v16697_v48 }
 0xb71   :  { %12253 = vmatmul.mubr.msk.f32.gmra.mrb[200].mxu0 %vm7016_vm13, %v8179_v19  ;;  %12223 = vmatprep.mubr.msk.f32.mxu1 %vm13079_vm3, %v17990_v37 }
 0xb72   :  { %12286 = vmatprep.mubr.msk.f32.mxu0 %vm13079_vm3, %v17990_v37 }
 0xb74   :  { %12224 = vmatmul.mubr.msk.f32.gmra.mrb[200].mxu1 %vm7016_vm13, %v8022_v36 }
 0xb75   :  { %12257 = vmatprep.mubr.msk.f32.mxu1 %vm13079_vm3, %v17990_v37 }
 0xb78   :  { %12258 = vmatmul.mubr.msk.f32.vlgmr.msra.gmra.mrb[202].mxu1 %vm7016_vm13, %v8328_v45 }
 0xb79   :  { %12260 = vmatprep.mubr.msk.f32.mxu1 %vm13079_vm3, %v17990_v37  ;;  %12314 = vmatpush3.msra.mxu1 %v10458_v1 }
 0xb7a   :  { %12371 = vmatprep.subr.mxu1 %v17990_v37 }
 0xb7c   :  { %12261 = vmatmul.mubr.msk.f32.gmra.mrb[204].mxu1 %vm7016_vm13, %v8329_v41 }
 0xb7d   :  { %12263 = vmatprep.mubr.msk.f32.mxu1 %vm13079_vm3, %v17990_v37 }
 0xb80   :  { %12264 = vmatmul.mubr.msk.f32.gmra.mrb[206].mxu1 %vm7016_vm13, %v8330_v54 }
 0xb81   :  { %12266 = vmatprep.mubr.msk.f32.mxu1 %vm13079_vm3, %v17990_v37 }
 0xb84   :  { %12267 = vmatmul.mubr.msk.f32.gmra.mrb[208].mxu1 %vm7016_vm13, %v8331_v13 }
 0xb85   :  { %12269 = vmatprep.mubr.msk.f32.mxu1 %vm13079_vm3, %v17990_v37 }
 0xb88   :  { %12270 = vmatmul.mubr.msk.f32.gmra.mrb[210].mxu1 %vm7016_vm13, %v8332_v61 }
 0xb89   :  { %12272 = vmatprep.mubr.msk.f32.mxu1 %vm13079_vm3, %v17990_v37 }
 0xb8c   :  { %12273 = vmatmul.mubr.msk.f32.gmra.mrb[212].mxu1 %vm7016_vm13, %v8333_v0 }
 0xb8d   :  { %12275 = vmatprep.mubr.msk.f32.mxu1 %vm13079_vm3, %v17990_v37 }
 0xb90   :  { %12276 = vmatmul.mubr.msk.f32.gmra.mrb[214].mxu1 %vm7016_vm13, %v8334_v12 }
 0xb91   :  { %12278 = vmatprep.mubr.msk.f32.mxu1 %vm13079_vm3, %v17990_v37 }
 0xb94   :  { %12279 = vmatmul.mubr.msk.f32.gmra.mrb[216].mxu1 %vm7016_vm13, %v8335_v14 }
 0xb95   :  { %12281 = vmatprep.mubr.msk.f32.mxu1 %vm13079_vm3, %v17990_v37 }
 0xb98   :  { %12282 = vmatmul.mubr.msk.f32.gmra.mrb[218].mxu1 %vm7016_vm13, %v8336_v26 }
 0xb99   :  { %12315 = vmatprep.mubr.msk.f32.mxu1 %vm13079_vm3, %v17990_v37 }
 0xbcf   :  { %v7230_v17 = vpop.f32.mrb[140].mxu1 }
 0xbd0   :  { %v7372_v48 = vpop.f32.mrb[142].mxu0  ;;  %v7368_v31 = vadd.f32 %v16821_v11, %v7230_v17  ;;  %v12042_v15 = vpop.f32.mrb[141].mxu1 }
 0xbd1   :  { %v12074_v18 = vpop.f32.mrb[143].mxu0 }
 0xbd3   :  { %v7235_v39 = vpop.f32.mrb[142].mxu1 }
 0xbd4   :  { %v7377_v44 = vpop.f32.mrb[144].mxu0  ;;  %v7373_v47 = vadd.f32 %v7372_v48, %v7235_v39  ;;  %v12045_v42 = vpop.f32.mrb[143].mxu1 }
 0xbd5   :  { %v12077_v7 = vpop.f32.mrb[145].mxu0 }
 0xbd7   :  { %v7240_v62 = vpop.f32.mrb[144].mxu1 }
 0xbd8   :  { %v7382_v53 = vpop.f32.mrb[146].mxu0  ;;  %v7378_v58 = vadd.f32 %v7377_v44, %v7240_v62  ;;  %v12048_v20 = vpop.f32.mrb[145].mxu1 }
 0xbd9   :  { %v12080_v50 = vpop.f32.mrb[147].mxu0 }
 0xbdb   :  { %v7245_v33 = vpop.f32.mrb[146].mxu1 }
 0xbdc   :  { %v7647_v30 = vpop.f32.mrb[148].mxu0  ;;  %v7383_v56 = vadd.f32 %v7382_v53, %v7245_v33  ;;  %v12051_v49 = vpop.f32.mrb[147].mxu1 }
 0xbdd   :  { %v12114_v38 = vpop.f32.mrb[149].mxu0 }
 0xbdf   :  { %v7490_v60 = vpop.f32.mrb[148].mxu1 }
 0xbe0   :  { %v7652_v6 = vpop.f32.mrb[150].mxu0  ;;  %v7534_v27 = vadd.f32 %v7490_v60, %v16574_v9  ;;  %v12085_v10 = vpop.f32.mrb[149].mxu1 }
 0xbe1   :  { %v12117_v8 = vpop.f32.mrb[151].mxu0 }
 0xbe2   :  { %v7691_v4 = vadd.f32 %v7647_v30, %v7534_v27 }
 0xbe3   :  { %v7495_v46 = vpop.f32.mrb[150].mxu1 }
 0xbe4   :  { %v7657_v51 = vpop.f32.mrb[152].mxu0  ;;  %v7535_v63 = vadd.f32 %v7495_v46, %v16596_v32  ;;  %v12088_v25 = vpop.f32.mrb[151].mxu1 }
 0xbe5   :  { %v12120_v16 = vpop.f32.mrb[153].mxu0 }
 0xbe6   :  { %v7692_v40 = vadd.f32 %v7652_v6, %v7535_v63 }
 0xbe7   :  { %v7500_v21 = vpop.f32.mrb[152].mxu1 }
 0xbe8   :  { %v7662_v23 = vpop.f32.mrb[154].mxu0  ;;  %v7536_v9 = vadd.f32 %v7500_v21, %v16598_v43  ;;  %v12091_v2 = vpop.f32.mrb[153].mxu1 }
 0xbe9   :  { %v12123_v35 = vpop.f32.mrb[155].mxu0 }
 0xbea   :  { %v7693_v5 = vadd.f32 %v7657_v51, %v7536_v9 }
 0xbeb   :  { %v7505_v28 = vpop.f32.mrb[154].mxu1 }
 0xbec   :  { %v7667_v11 = vpop.f32.mrb[156].mxu0  ;;  %v7537_v55 = vadd.f32 %v7505_v28, %v16600_v52  ;;  %v12094_v34 = vpop.f32.mrb[155].mxu1 }
 0xbed   :  { %v12126_v22 = vpop.f32.mrb[157].mxu0 }
 0xbee   :  { %v7694_v3 = vadd.f32 %v7662_v23, %v7537_v55 }
 0xbef   :  { %v7510_v32 = vpop.f32.mrb[156].mxu1 }
 0xbf0   :  { %v7672_v24 = vpop.f32.mrb[158].mxu0  ;;  %v7538_v57 = vadd.f32 %v7510_v32, %v16602_v29  ;;  %v12097_v19 = vpop.f32.mrb[157].mxu1 }
 0xbf1   :  { %v12129_v36 = vpop.f32.mrb[159].mxu0 }
 0xbf2   :  { %v7695_v45 = vadd.f32 %v7667_v11, %v7538_v57 }
 0xbf3   :  { %v7515_v41 = vpop.f32.mrb[158].mxu1 }
 0xbf4   :  { %v7677_v54 = vpop.f32.mrb[160].mxu0  ;;  %v7539_v43 = vadd.f32 %v7515_v41, %v7368_v31  ;;  %v12100_v13 = vpop.f32.mrb[159].mxu1 }
 0xbf5   :  { %v12132_v61 = vpop.f32.mrb[161].mxu0 }
 0xbf6   :  { %v7696_v0 = vadd.f32 %v7672_v24, %v7539_v43 }
 0xbf7   :  { %v7520_v12 = vpop.f32.mrb[160].mxu1 }
 0xbf8   :  { %v7682_v14 = vpop.f32.mrb[162].mxu0  ;;  %v7540_v26 = vadd.f32 %v7520_v12, %v7373_v47  ;;  %v12103_v52 = vpop.f32.mrb[161].mxu1 }
 0xbf9   :  { %v12135_v59 = vpop.f32.mrb[163].mxu0 }
 0xbfa   :  { %v7697_v17 = vadd.f32 %v7677_v54, %v7540_v26 }
 0xbfb   :  { %v7525_v48 = vpop.f32.mrb[162].mxu1 }
 0xbfc   :  { %v7687_v15 = vpop.f32.mrb[164].mxu0  ;;  %v7541_v18 = vadd.f32 %v7525_v48, %v7378_v58  ;;  %v12106_v39 = vpop.f32.mrb[163].mxu1 }
 0xbfd   :  { %v12138_v29 = vpop.f32.mrb[165].mxu0 }
 0xbfe   :  { %v7698_v44 = vadd.f32 %v7682_v14, %v7541_v18 }
 0xbff   :  { %v7530_v42 = vpop.f32.mrb[164].mxu1 }
 0xc00   :  { %v7961_v7 = vpop.f32.mrb[166].mxu0  ;;  %v7542_v62 = vadd.f32 %v7530_v42, %v7383_v56  ;;  %v12109_v31 = vpop.f32.mrb[165].mxu1 }
 0xc01   :  { %v12172_v53 = vpop.f32.mrb[167].mxu0 }
 0xc02   :  { %v7699_v20 = vadd.f32 %v7687_v15, %v7542_v62 }
 0xc03   :  { %v7804_v50 = vpop.f32.mrb[166].mxu1 }
 0xc04   :  { %v7966_v33 = vpop.f32.mrb[168].mxu0  ;;  %v7848_v30 = vadd.f32 %v7804_v50, %v7691_v4  ;;  %v12143_v49 = vpop.f32.mrb[167].mxu1 }
 0xc05   :  { %v12175_v47 = vpop.f32.mrb[169].mxu0 }
 0xc06   :  { %v8005_v38 = vadd.f32 %v7961_v7, %v7848_v30 }
 0xc07   :  { %v7809_v60 = vpop.f32.mrb[168].mxu1 }
 0xc08   :  { %v7971_v6 = vpop.f32.mrb[170].mxu0  ;;  %v7849_v27 = vadd.f32 %v7809_v60, %v7692_v40  ;;  %v12146_v10 = vpop.f32.mrb[169].mxu1 }
 0xc09   :  { %v12178_v58 = vpop.f32.mrb[171].mxu0 }
 0xc0a   :  { %v8006_v8 = vadd.f32 %v7966_v33, %v7849_v27 }
 0xc0b   :  { %v7814_v1 = vpop.f32.mrb[170].mxu1 }
 0xc0c   :  { %v7976_v46 = vpop.f32.mrb[172].mxu0  ;;  %v7850_v51 = vadd.f32 %v7814_v1, %v7693_v5  ;;  %v12149_v63 = vpop.f32.mrb[171].mxu1 }
 0xc0d   :  { %v12181_v56 = vpop.f32.mrb[173].mxu0 }
 0xc0e   :  { %v8007_v25 = vadd.f32 %v7971_v6, %v7850_v51 }
 0xc0f   :  { %v7819_v16 = vpop.f32.mrb[172].mxu1 }
 0xc10   :  { %v7981_v21 = vpop.f32.mrb[174].mxu0  ;;  %v7851_v23 = vadd.f32 %v7819_v16, %v7694_v3  ;;  %v12152_v9 = vpop.f32.mrb[173].mxu1 }
 0xc11   :  { %v12184_v4 = vpop.f32.mrb[175].mxu0 }
 0xc12   :  { %v8008_v2 = vadd.f32 %v7976_v46, %v7851_v23 }
 0xc13   :  { %v7824_v35 = vpop.f32.mrb[174].mxu1 }
 0xc14   :  { %v7986_v28 = vpop.f32.mrb[176].mxu0  ;;  %v7852_v11 = vadd.f32 %v7824_v35, %v7695_v45  ;;  %v12155_v40 = vpop.f32.mrb[175].mxu1 }
 0xc15   :  { %v12187_v55 = vpop.f32.mrb[177].mxu0 }
 0xc16   :  { %v8009_v34 = vadd.f32 %v7981_v21, %v7852_v11 }
 0xc17   :  { %v7829_v22 = vpop.f32.mrb[176].mxu1 }
 0xc18   :  { %v7991_v32 = vpop.f32.mrb[178].mxu0  ;;  %v7853_v24 = vadd.f32 %v7829_v22, %v7696_v0  ;;  %v12158_v57 = vpop.f32.mrb[177].mxu1 }
 0xc19   :  { %v12190_v5 = vpop.f32.mrb[179].mxu0 }
 0xc1a   :  { %v8010_v19 = vadd.f32 %v7986_v28, %v7853_v24 }
 0xc1b   :  { %v7834_v36 = vpop.f32.mrb[178].mxu1 }
 0xc1c   :  { %v7996_v41 = vpop.f32.mrb[180].mxu0  ;;  %v7854_v54 = vadd.f32 %v7834_v36, %v7697_v17  ;;  %v12161_v43 = vpop.f32.mrb[179].mxu1 }
 0xc1d   :  { %v12193_v3 = vpop.f32.mrb[181].mxu0 }
 0xc1e   :  { %v8011_v13 = vadd.f32 %v7991_v32, %v7854_v54 }
 0xc1f   :  { %v7839_v61 = vpop.f32.mrb[180].mxu1 }
 0xc20   :  { %v8001_v12 = vpop.f32.mrb[182].mxu0  ;;  %v7855_v14 = vadd.f32 %v7839_v61, %v7698_v44  ;;  %v12164_v26 = vpop.f32.mrb[181].mxu1 }
 0xc21   :  { %v12196_v45 = vpop.f32.mrb[183].mxu0 }
 0xc22   :  { %v8012_v52 = vadd.f32 %v7996_v41, %v7855_v14 }
 0xc23   :  { %v7844_v59 = vpop.f32.mrb[182].mxu1 }
 0xc24   :  { %v8275_v48 = vpop.f32.mrb[184].mxu0  ;;  %v7856_v15 = vadd.f32 %v7844_v59, %v7699_v20  ;;  %v12167_v0 = vpop.f32.mrb[183].mxu1  ;;  %v16924_v59 = vstv %s10457_s18 }
 0xc25   :  { %v12230_v18 = vpop.f32.mrb[185].mxu0 }
 0xc26   :  { %v8013_v39 = vadd.f32 %v8001_v12, %v7856_v15 }
 0xc27   :  { %v8118_v29 = vpop.f32.mrb[184].mxu1 }
 0xc28   :  { %v8280_v42 = vpop.f32.mrb[186].mxu0  ;;  %v8162_v7 = vadd.f32 %v8118_v29, %v8005_v38  ;;  %v12201_v17 = vpop.f32.mrb[185].mxu1 }
 0xc29   :  { %v12233_v62 = vpop.f32.mrb[187].mxu0 }
 0xc2a   :  { %v8319_v53 = vadd.f32 %v8275_v48, %v8162_v7 }
 0xc2b   :  { %v8123_v31 = vpop.f32.mrb[186].mxu1 }
 0xc2c   :  { %v8285_v50 = vpop.f32.mrb[188].mxu0  ;;  %v8163_v33 = vadd.f32 %v8123_v31, %v8006_v8  ;;  %v12204_v30 = vpop.f32.mrb[187].mxu1 }
 0xc2d   :  { %v12236_v44 = vpop.f32.mrb[189].mxu0 }
 0xc2e   :  { %v8320_v49 = vadd.f32 %v8280_v42, %v8163_v33 }
 0xc2f   :  { %v8128_v47 = vpop.f32.mrb[188].mxu1 }
 0xc30   :  { %v8290_v60 = vpop.f32.mrb[190].mxu0  ;;  %v8164_v6 = vadd.f32 %v8128_v47, %v8007_v25  ;;  %v12207_v27 = vpop.f32.mrb[189].mxu1 }
 0xc31   :  { %v12239_v20 = vpop.f32.mrb[191].mxu0 }
 0xc32   :  { %v8321_v10 = vadd.f32 %v8285_v50, %v8164_v6  ;;  %v16937_v50 = vpop.permute.xlu0 %8537 }
 0xc33   :  { %v8133_v58 = vpop.f32.mrb[190].mxu1 }
 0xc34   :  { %v8295_v1 = vpop.f32.mrb[192].mxu0  ;;  %v8165_v46 = vadd.f32 %v8133_v58, %v8008_v2  ;;  %v12210_v51 = vpop.f32.mrb[191].mxu1 }
 0xc35   :  { %v12242_v38 = vpop.f32.mrb[193].mxu0 }
 0xc36   :  { %v8322_v63 = vadd.f32 %v8290_v60, %v8165_v46  ;;  %v10478_v46 = vld [vmem:[%s17404_s5 + $0x58] sm:$0xff] }
 0xc37   :  { %v8138_v56 = vpop.f32.mrb[192].mxu1 }
 0xc38   :  { %v8300_v16 = vpop.f32.mrb[194].mxu0  ;;  %v8166_v21 = vadd.f32 %v8138_v56, %v8009_v34  ;;  %v12213_v23 = vpop.f32.mrb[193].mxu1 }
 0xc39   :  { %v12245_v8 = vpop.f32.mrb[195].mxu0 }
 0xc3a   :  { %v16909_v9 = vadd.f32 %v8295_v1, %v8166_v21  ;;  %v10488_v21 = vld [vmem:[%s17404_s5 + $0x60] sm:$0xff] }
 0xc3b   :  { %v8143_v4 = vpop.f32.mrb[194].mxu1 }
 0xc3c   :  { %v8305_v35 = vpop.f32.mrb[196].mxu0  ;;  %v8167_v28 = vadd.f32 %v8143_v4, %v8010_v19  ;;  %v12216_v25 = vpop.f32.mrb[195].mxu1 }
 0xc3d   :  { %v12248_v11 = vpop.f32.mrb[197].mxu0 }
 0xc3e   :  { %v16911_v55 = vadd.f32 %v8300_v16, %v8167_v28 }
 0xc3f   :  { %v8148_v40 = vpop.f32.mrb[196].mxu1 }
 0xc40   :  { %v8310_v22 = vpop.f32.mrb[198].mxu0  ;;  %v8168_v2 = vadd.f32 %v8148_v40, %v8011_v13  ;;  %v12219_v32 = vpop.f32.mrb[197].mxu1  ;;  %v16922_v13 = vld [vmem:[%s17405_s6] ss:$0 sm:$0xff] }
 0xc41   :  { %v12251_v24 = vpop.f32.mrb[199].mxu0 }
 0xc42   :  { %v16913_v57 = vadd.f32 %v8305_v35, %v8168_v2  ;;  %v16982_v2 = vpop.permute.xlu0 %8552 }
 0xc43   :  { %v8153_v5 = vpop.f32.mrb[198].mxu1 }
 0xc44   :  { %v8315_v34 = vpop.f32.mrb[200].mxu0  ;;  %v8169_v36 = vadd.f32 %v8153_v5, %v8012_v52  ;;  %v12222_v41 = vpop.f32.mrb[199].mxu1 }
 0xc45   :  { %v12254_v54 = vpop.f32.mrb[201].mxu0 }
 0xc46   :  { %v16915_v43 = vadd.f32 %v8310_v22, %v8169_v36 }
 0xc47   :  { %v8158_v19 = vpop.f32.mrb[200].mxu1 }
 0xc48   :  { %v8170_v3 = vadd.f32 %v8158_v19, %v8013_v39  ;;  %v12225_v61 = vpop.f32.mrb[201].mxu1  ;;  %v16928_v39 = vpop.permute.xlu1 %8532 }
 0xc4a   :  { %v16917_v12 = vadd.f32 %v8315_v34, %v8170_v3 }
 0xc4b   :  { %v8432_v14 = vpop.f32.mrb[202].mxu1 }
 0xc4c   :  { %v8476_v26 = vadd.f32 %v8432_v14, %v8319_v53  ;;  %v12259_v45 = vpop.f32.mrb[203].mxu1  ;;  %v16943_v47 = vpop.permute.xlu1 %8542 }
 0xc4e   :  { %v8492_v52 = vadd.f32 %v16922_v13, %v8476_v26 }
 0xc4f   :  { %v8437_v48 = vpop.f32.mrb[204].mxu1 }
 0xc50   :  { %vm8502_vm10 = vcmp.ge.f32.partialorder %v8492_v52, 0.0  ;;  %v8512_v15 = vmul.f32 %v16924_v59, %v8492_v52  ;;  %v8477_v18 = vadd.f32 %v8437_v48, %v8320_v49  ;;  %v12262_v0 = vpop.f32.mrb[205].mxu1  ;;  %v16964_v23 = vpop.permute.xlu1 %8547 }
 0xc51   :  { %v17014_v0 = vpop.permute.xlu0 %8562 }
 0xc52   :  { %v8521_v29 = vsel %vm8502_vm10, %v8492_v52, %v8512_v15  ;;  %v8493_v42 = vadd.f32 %v16922_v13, %v8477_v18 }
 0xc53   :  { %v16932_v7 = vmul.f32 %v16928_v39, %v8521_v29  ;;  %v8442_v62 = vpop.f32.mrb[206].mxu1 }
 0xc54   :  { %v8513_v17 = vmul.f32 %v16924_v59, %v8493_v42  ;;  %vm8503_vm1 = vcmp.ge.f32.partialorder %v8493_v42, 0.0  ;;  %v8478_v53 = vadd.f32 %v8442_v62, %v8321_v10  ;;  %v12265_v31 = vpop.f32.mrb[207].mxu1  ;;  %v16998_v3 = vpop.permute.xlu1 %8557 }
 0xc55   :  { %8585 = vst.msk [vmem:[#allocation3 + $0x6] sm:$0xff] %vm8584_vm11, %v16932_v7 }
 0xc56   :  { %v8522_v33 = vsel %vm8503_vm1, %v8493_v42, %v8513_v17  ;;  %v8494_v30 = vadd.f32 %v16922_v13, %v8478_v53 }
 0xc57   :  { %v16941_v44 = vmul.f32 %v16937_v50, %v8522_v33  ;;  %v8447_v49 = vpop.f32.mrb[208].mxu1 }
 0xc58   :  { %vm8504_vm12 = vcmp.ge.f32.partialorder %v8494_v30, 0.0  ;;  %v8514_v60 = vmul.f32 %v16924_v59, %v8494_v30  ;;  %v8479_v6 = vadd.f32 %v8447_v49, %v8322_v63  ;;  %v12268_v27 = vpop.f32.mrb[209].mxu1  ;;  %v17030_v49 = vpop.permute.xlu1 %8567 }
 0xc59   :  { %8586 = vst.msk [vmem:[#allocation3 + $0xe] sm:$0xff] %vm8584_vm11, %v16941_v44 }
 0xc5a   :  { %v8523_v20 = vsel %vm8504_vm12, %v8494_v30, %v8514_v60  ;;  %v8495_v10 = vadd.f32 %v16922_v13, %v8479_v6 }
 0xc5b   :  { %v16950_v58 = vmul.f32 %v16943_v47, %v8523_v20  ;;  %v8452_v1 = vpop.f32.mrb[210].mxu1 }
 0xc5c   :  { %vm8505_vm2 = vcmp.ge.f32.partialorder %v8495_v10, 0.0  ;;  %v8515_v51 = vmul.f32 %v16924_v59, %v8495_v10  ;;  %v8480_v38 = vadd.f32 %v8452_v1, %v16909_v9  ;;  %v12271_v63 = vpop.f32.mrb[211].mxu1  ;;  %v8606_v56 = vld [vmem:[#allocation3 + $0x5] sm:$0xff] }
 0xc5d   :  { %v8595_v16 = vld [vmem:[#allocation3] sm:$0xff]  ;;  %12287 = vmatmul.mubr.msk.f32.vlgmr.msra.gmra.mrb[202].mxu0 %vm7016_vm13, %v8606_v56  ;;  %8587 = vst.msk [vmem:[#allocation3 + $0x16] sm:$0xff] %vm8584_vm11, %v16950_v58 }
 0xc5e   :  { %12316 = vmatmul.mubr.msk.f32.vlgmr.msra.gmra.mrb[220].mxu1 %vm7016_vm13, %v8595_v16  ;;  %v8524_v8 = vsel %vm8505_vm2, %v8495_v10, %v8515_v51  ;;  %v8496_v4 = vadd.f32 %v16922_v13, %v8480_v38  ;;  %12289 = vmatprep.mubr.msk.f32.mxu0 %vm13079_vm3, %v17990_v37 }
 0xc5f   :  { %12318 = vmatprep.mubr.msk.f32.mxu1 %vm13079_vm3, %v17990_v37  ;;  %v16972_v9 = vmul.f32 %v16964_v23, %v8524_v8  ;;  %v8457_v35 = vpop.f32.mrb[212].mxu1  ;;  %12343 = vmatpush3.msra.mxu0 %v10478_v46 }
 0xc60   :  { %12372 = vmatpush3.msra.mxu1 %v10488_v21  ;;  %vm8506_vm14 = vcmp.ge.f32.partialorder %v8496_v4, 0.0  ;;  %v8516_v28 = vmul.f32 %v16924_v59, %v8496_v4  ;;  %v8481_v25 = vadd.f32 %v8457_v35, %v16911_v55  ;;  %v12274_v11 = vpop.f32.mrb[213].mxu1  ;;  %v8607_v40 = vld [vmem:[#allocation3 + $0xd] sm:$0xff]  ;;  %12400 = vmatprep.subr.mxu0 %v17990_v37  ;;  %v10498_v21 = vld [vmem:[%s17404_s5 + $0x68] sm:$0xff] }
 0xc61   :  { %v8596_v22 = vld [vmem:[#allocation3 + $0x8] sm:$0xff]  ;;  %12429 = vmatprep.subr.mxu1 %v17990_v37  ;;  %8588 = vst.msk [vmem:[#allocation3 + $0x1e] sm:$0xff] %vm8584_vm11, %v16972_v9  ;;  %12290 = vmatmul.mubr.msk.f32.gmra.mrb[204].mxu0 %vm7016_vm13, %v8607_v40 }
 0xc62   :  { %12319 = vmatmul.mubr.msk.f32.gmra.mrb[222].mxu1 %vm7016_vm13, %v8596_v22  ;;  %v8525_v32 = vsel %vm8506_vm14, %v8496_v4, %v8516_v28  ;;  %v8497_v24 = vadd.f32 %v16922_v13, %v8481_v25  ;;  %12292 = vmatprep.mubr.msk.f32.mxu0 %vm13079_vm3, %v17990_v37  ;;  %v17077_v8 = vld [vmem:[#allocation3 + $0xa] sm:$0xff]  ;;  %v9048_v4 = vld [vmem:[#allocation3 + $0x1] sm:$0xff] }
 0xc63   :  { %12321 = vmatprep.mubr.msk.f32.mxu1 %vm13079_vm3, %v17990_v37  ;;  %v16990_v55 = vmul.f32 %v16982_v2, %v8525_v32  ;;  %v8462_v5 = vpop.f32.mrb[214].mxu1  ;;  %v10508_v35 = vld [vmem:[%s17404_s5 + $0x70] sm:$0xff] }
 0xc64   :  { %vm8507_vm4 = vcmp.ge.f32.partialorder %v8497_v24, 0.0  ;;  %v8517_v34 = vmul.f32 %v16924_v59, %v8497_v24  ;;  %v8482_v36 = vadd.f32 %v8462_v5, %v16913_v57  ;;  %v12277_v41 = vpop.f32.mrb[215].mxu1  ;;  %v8608_v54 = vld [vmem:[#allocation3 + $0x15] sm:$0xff]  ;;  %v9049_v25 = vld [vmem:[#allocation3 + $0x9] sm:$0xff] }
 0xc65   :  { %v8597_v19 = vld [vmem:[#allocation3 + $0x10] sm:$0xff]  ;;  %8589 = vst.msk [vmem:[#allocation3 + $0x26] sm:$0xff] %vm8584_vm11, %v16990_v55  ;;  %12293 = vmatmul.mubr.msk.f32.gmra.mrb[206].mxu0 %vm7016_vm13, %v8608_v54 }
 0xc66   :  { %12322 = vmatmul.mubr.msk.f32.gmra.mrb[224].mxu1 %vm7016_vm13, %v8597_v19  ;;  %v8526_v61 = vsel %vm8507_vm4, %v8497_v24, %v8517_v34  ;;  %v8498_v14 = vadd.f32 %v16922_v13, %v8482_v36  ;;  %12295 = vmatprep.mubr.msk.f32.mxu0 %vm13079_vm3, %v17990_v37  ;;  %v17089_v28 = vld [vmem:[#allocation3 + $0x12] sm:$0xff] }
 0xc67   :  { %12324 = vmatprep.mubr.msk.f32.mxu1 %vm13079_vm3, %v17990_v37  ;;  %v17006_v57 = vmul.f32 %v16998_v3, %v8526_v61  ;;  %v8467_v26 = vpop.f32.mrb[216].mxu1  ;;  %v9050_v40 = vld [vmem:[#allocation3 + $0x11] sm:$0xff] }
 0xc68   :  { %vm8508_vm15 = vcmp.ge.f32.partialorder %v8498_v14, 0.0  ;;  %v8518_v45 = vmul.f32 %v16924_v59, %v8498_v14  ;;  %v8483_v52 = vadd.f32 %v8467_v26, %v16915_v43  ;;  %v12280_v48 = vpop.f32.mrb[217].mxu1  ;;  %v8609_v15 = vld [vmem:[#allocation3 + $0x1d] sm:$0xff] }
 0xc69   :  { %v8598_v18 = vld [vmem:[#allocation3 + $0x18] sm:$0xff]  ;;  %8590 = vst.msk [vmem:[#allocation3 + $0x2e] sm:$0xff] %vm8584_vm11, %v17006_v57  ;;  %12296 = vmatmul.mubr.msk.f32.gmra.mrb[208].mxu0 %vm7016_vm13, %v8609_v15  ;;  %v9362_v48 = vld [vmem:[#allocation3 + $0xb] sm:$0xff] }
 0xc6a   :  { %12325 = vmatmul.mubr.msk.f32.gmra.mrb[226].mxu1 %vm7016_vm13, %v8598_v18  ;;  %v8527_v29 = vsel %vm8508_vm15, %v8498_v14, %v8518_v45  ;;  %v8499_v42 = vadd.f32 %v16922_v13, %v8483_v52  ;;  %12298 = vmatprep.mubr.msk.f32.mxu0 %vm13079_vm3, %v17990_v37  ;;  %v17100_v11 = vld [vmem:[#allocation3 + $0x1a] sm:$0xff]  ;;  %v10518_v45 = vld [vmem:[%s17404_s5 + $0x78] sm:$0xff]  ;;  %v9205_v52 = vld [vmem:[#allocation3 + $0x6] sm:$0xff] }
 0xc6b   :  { %12327 = vmatprep.mubr.msk.f32.mxu1 %vm13079_vm3, %v17990_v37  ;;  %v17022_v43 = vmul.f32 %v17014_v0, %v8527_v29  ;;  %v8472_v62 = vpop.f32.mrb[218].mxu1  ;;  %v9051_v32 = vld [vmem:[#allocation3 + $0x19] sm:$0xff]  ;;  %v9206_v18 = vld [vmem:[#allocation3 + $0xe] sm:$0xff] }
 0xc6c   :  { %vm8509_vm5 = vcmp.ge.f32.partialorder %v8499_v42, 0.0  ;;  %v8519_v17 = vmul.f32 %v16924_v59, %v8499_v42  ;;  %v8484_v53 = vadd.f32 %v8472_v62, %v16917_v12  ;;  %v8610_v31 = vld [vmem:[#allocation3 + $0x25] sm:$0xff]  ;;  %v12283_v30 = vpop.f32.mrb[219].mxu1  ;;  %v10528_v15 = vld [vmem:[%s17404_s5 + $0x80] sm:$0xff] }
 0xc6d   :  { %v8599_v33 = vld [vmem:[#allocation3 + $0x20] sm:$0xff]  ;;  %8591 = vst.msk [vmem:[#allocation3 + $0x36] sm:$0xff] %vm8584_vm11, %v17022_v43  ;;  %12299 = vmatmul.mubr.msk.f32.gmra.mrb[210].mxu0 %vm7016_vm13, %v8610_v31  ;;  %v9363_v29 = vld [vmem:[#allocation3 + $0x13] sm:$0xff] }
 0xc6e   :  { %12328 = vmatmul.mubr.msk.f32.gmra.mrb[228].mxu1 %vm7016_vm13, %v8599_v33  ;;  %v8528_v60 = vsel %vm8509_vm5, %v8499_v42, %v8519_v17  ;;  %v8500_v6 = vadd.f32 %v16922_v13, %v8484_v53  ;;  %12301 = vmatprep.mubr.msk.f32.mxu0 %vm13079_vm3, %v17990_v37  ;;  %v17045_v13 = vpop.permute.xlu0 %8572  ;;  %v17109_v22 = vld [vmem:[#allocation3 + $0x22] sm:$0xff]  ;;  %v9207_v42 = vld [vmem:[#allocation3 + $0x16] sm:$0xff] }
 0xc6f   :  { %12330 = vmatprep.mubr.msk.f32.mxu1 %vm13079_vm3, %v17990_v37  ;;  %v17038_v12 = vmul.f32 %v17030_v49, %v8528_v60  ;;  %v9052_v5 = vld [vmem:[#allocation3 + $0x21] sm:$0xff] }
 0xc70   :  { %vm8510_vm6 = vcmp.ge.f32.partialorder %v8500_v6, 0.0  ;;  %v8520_v27 = vmul.f32 %v16924_v59, %v8500_v6  ;;  %v8611_v20 = vld [vmem:[#allocation3 + $0x2d] sm:$0xff]  ;;  %v9364_v62 = vld [vmem:[#allocation3 + $0x1b] sm:$0xff]  ;;  %v9365_v53 = vld [vmem:[#allocation3 + $0x23] sm:$0xff] }
 0xc71   :  { %v8600_v10 = vld [vmem:[#allocation3 + $0x28] sm:$0xff]  ;;  %8592 = vst.msk [vmem:[#allocation3 + $0x3e] sm:$0xff] %vm8584_vm11, %v17038_v12  ;;  %12302 = vmatmul.mubr.msk.f32.gmra.mrb[212].mxu0 %vm7016_vm13, %v8611_v20  ;;  %v9208_v17 = vld [vmem:[#allocation3 + $0x1e] sm:$0xff] }
 0xc72   :  { %12331 = vmatmul.mubr.msk.f32.gmra.mrb[230].mxu1 %vm7016_vm13, %v8600_v10  ;;  %v8529_v1 = vsel %vm8510_vm6, %v8500_v6, %v8520_v27  ;;  %12304 = vmatprep.mubr.msk.f32.mxu0 %vm13079_vm3, %v17990_v37  ;;  %v17118_v24 = vld [vmem:[#allocation3 + $0x2a] sm:$0xff] }
 0xc73   :  { %12333 = vmatprep.mubr.msk.f32.mxu1 %vm13079_vm3, %v17990_v37  ;;  %v17052_v59 = vmul.f32 %v17045_v13, %v8529_v1  ;;  %v9053_v36 = vld [vmem:[#allocation3 + $0x29] sm:$0xff] }
 0xc74   :  { %v8612_v46 = vld [vmem:[#allocation3 + $0x35] sm:$0xff]  ;;  %v9209_v31 = vld [vmem:[#allocation3 + $0x26] sm:$0xff] }
 0xc75   :  { %v8601_v51 = vld [vmem:[#allocation3 + $0x30] sm:$0xff]  ;;  %12305 = vmatmul.mubr.msk.f32.gmra.mrb[214].mxu0 %vm7016_vm13, %v8612_v46  ;;  %8594 = vst.msk [vmem:[#allocation3 + $0x46] sm:$0x3f] %vm8593_vm7, %v17052_v59 }
 0xc76   :  { %12334 = vmatmul.mubr.msk.f32.gmra.mrb[232].mxu1 %vm7016_vm13, %v8601_v51  ;;  %12307 = vmatprep.mubr.msk.f32.mxu0 %vm13079_vm3, %v17990_v37  ;;  %v17127_v34 = vld [vmem:[#allocation3 + $0x32] sm:$0xff]  ;;  %v9519_v51 = vld [vmem:[#allocation3 + $0x2] sm:$0xff] }
 0xc77   :  { %12336 = vmatprep.mubr.msk.f32.mxu1 %vm13079_vm3, %v17990_v37  ;;  %v9054_v54 = vld [vmem:[#allocation3 + $0x31] sm:$0xff] }
 0xc78   :  { %v8613_v38 = vld [vmem:[#allocation3 + $0x3d] sm:$0xff]  ;;  %v9366_v33 = vld [vmem:[#allocation3 + $0x2b] sm:$0xff]  ;;  %v9367_v60 = vld [vmem:[#allocation3 + $0x33] sm:$0xff] }
 0xc79   :  { %v8602_v63 = vld [vmem:[#allocation3 + $0x38] sm:$0xff]  ;;  %12308 = vmatmul.mubr.msk.f32.gmra.mrb[216].mxu0 %vm7016_vm13, %v8613_v38  ;;  %v8603_v16 = vld [vmem:[#allocation3 + $0x40] sm:$0x3f]  ;;  %v9210_v30 = vld [vmem:[#allocation3 + $0x2e] sm:$0xff] }
 0xc7a   :  { %12337 = vmatmul.mubr.msk.f32.gmra.mrb[234].mxu1 %vm7016_vm13, %v8602_v63  ;;  %12310 = vmatprep.mubr.msk.f32.mxu0 %vm13079_vm3, %v17990_v37  ;;  %v17136_v41 = vld [vmem:[#allocation3 + $0x3a] sm:$0xff]  ;;  %v9676_v38 = vld [vmem:[#allocation3 + $0x7] sm:$0xff] }
 0xc7b   :  { %12339 = vmatprep.mubr.msk.f32.mxu1 %vm13079_vm3, %v17990_v37  ;;  %v9055_v61 = vld [vmem:[#allocation3 + $0x39] sm:$0xff] }
 0xc7c   :  { %v8614_v56 = vld [vmem:[#allocation3 + $0x45] sm:$0x3f]  ;;  %v9211_v6 = vld [vmem:[#allocation3 + $0x36] sm:$0xff]  ;;  %v9370_v46 = vld [vmem:[#allocation3 + $0x4b] sm:$0x3f] }
 0xc7d   :  { %12311 = vmatmul.mubr.msk.f32.gmra.mrb[218].mxu0 %vm7016_vm13, %v8614_v56  ;;  %v8898_v19 = vld [vmem:[#allocation3 + $0x42] sm:$0xff]  ;;  %v8899_v14 = vld [vmem:[#allocation3 + $0x4a] sm:$0x3f] }
 0xc7e   :  { %12340 = vmatmul.mubr.msk.f32.gmra.mrb[236].mxu1 %vm7016_vm13, %v8603_v16  ;;  %12344 = vmatprep.mubr.msk.f32.mxu0 %vm13079_vm3, %v17990_v37  ;;  %v9056_v26 = vld [vmem:[#allocation3 + $0x41] sm:$0x3f]  ;;  %v9677_v56 = vld [vmem:[#allocation3 + $0xf] sm:$0xff]  ;;  %v9678_v16 = vld [vmem:[#allocation3 + $0x17] sm:$0xff] }
 0xc7f   :  { %12373 = vmatprep.mubr.msk.f32.mxu1 %vm13079_vm3, %v17990_v37  ;;  %v9368_v27 = vld [vmem:[#allocation3 + $0x3b] sm:$0xff]  ;;  %v9369_v10 = vld [vmem:[#allocation3 + $0x43] sm:$0xff] }
 0xc80   :  { %v9212_v20 = vld [vmem:[#allocation3 + $0x3e] sm:$0xff]  ;;  %v9213_v1 = vld [vmem:[#allocation3 + $0x46] sm:$0x3f] }
 0xc81   :  { %12345 = vmatmul.mubr.msk.f32.vlgmr.msra.gmra.mrb[220].mxu0 %vm7016_vm13, %v17077_v8  ;;  %v10538_v63 = vld [vmem:[%s17404_s5 + $0x88] sm:$0xff]  ;;  %s10550_s5 = sld [smem:[#allocation4 + $0xd]] }
 0xc82   :  { %12374 = vmatmul.mubr.msk.f32.vlgmr.msra.gmra.mrb[238].mxu1 %vm7016_vm13, %v9048_v4  ;;  %12347 = vmatprep.mubr.msk.f32.mxu0 %vm13079_vm3, %v17990_v37  ;;  %v9681_v4 = vld [vmem:[#allocation3 + $0x2f] sm:$0xff] }
 0xc83   :  { %12376 = vmatprep.mubr.msk.f32.mxu1 %vm13079_vm3, %v17990_v37  ;;  %12401 = vmatpush3.msra.mxu0 %v10498_v21  ;;  %v9679_v21 = vld [vmem:[#allocation3 + $0x1f] sm:$0xff] }
 0xc84   :  { %12430 = vmatpush3.msra.mxu1 %v10508_v35  ;;  %12458 = vmatprep.subr.mxu0 %v17990_v37  ;;  %v9682_v35 = vld [vmem:[#allocation3 + $0x37] sm:$0xff] }
 0xc85   :  { %12487 = vmatprep.subr.mxu1 %v17990_v37  ;;  %12348 = vmatmul.mubr.msk.f32.gmra.mrb[222].mxu0 %vm7016_vm13, %v17089_v28 }
 0xc86   :  { %12377 = vmatmul.mubr.msk.f32.gmra.mrb[240].mxu1 %vm7016_vm13, %v9049_v25  ;;  %12350 = vmatprep.mubr.msk.f32.mxu0 %vm13079_vm3, %v17990_v37  ;;  %v9527_v25 = vld [vmem:[#allocation3 + $0x42] sm:$0x3f] }
 0xc87   :  { %12379 = vmatprep.mubr.msk.f32.mxu1 %vm13079_vm3, %v17990_v37 }
 0xc89   :  { %12351 = vmatmul.mubr.msk.f32.gmra.mrb[224].mxu0 %vm7016_vm13, %v17100_v11 }
 0xc8a   :  { %12380 = vmatmul.mubr.msk.f32.gmra.mrb[242].mxu1 %vm7016_vm13, %v9050_v40  ;;  %12353 = vmatprep.mubr.msk.f32.mxu0 %vm13079_vm3, %v17990_v37  ;;  %v9833_v40 = vld [vmem:[#allocation3 + $0xc] sm:$0xff] }
 0xc8b   :  { %12382 = vmatprep.mubr.msk.f32.mxu1 %vm13079_vm3, %v17990_v37 }
 0xc8d   :  { %12354 = vmatmul.mubr.msk.f32.gmra.mrb[226].mxu0 %vm7016_vm13, %v17109_v22 }
 0xc8e   :  { %12383 = vmatmul.mubr.msk.f32.gmra.mrb[244].mxu1 %vm7016_vm13, %v9051_v32  ;;  %12356 = vmatprep.mubr.msk.f32.mxu0 %vm13079_vm3, %v17990_v37  ;;  %v9835_v32 = vld [vmem:[#allocation3 + $0x1c] sm:$0xff] }
 0xc8f   :  { %12385 = vmatprep.mubr.msk.f32.mxu1 %vm13079_vm3, %v17990_v37 }
 0xc91   :  { %12357 = vmatmul.mubr.msk.f32.gmra.mrb[228].mxu0 %vm7016_vm13, %v17118_v24 }
 0xc92   :  { %12386 = vmatmul.mubr.msk.f32.gmra.mrb[246].mxu1 %vm7016_vm13, %v9052_v5  ;;  %12359 = vmatprep.mubr.msk.f32.mxu0 %vm13079_vm3, %v17990_v37  ;;  %v9837_v5 = vld [vmem:[#allocation3 + $0x2c] sm:$0xff] }
 0xc93   :  { %12388 = vmatprep.mubr.msk.f32.mxu1 %vm13079_vm3, %v17990_v37 }
 0xc95   :  { %12360 = vmatmul.mubr.msk.f32.gmra.mrb[230].mxu0 %vm7016_vm13, %v17127_v34 }
 0xc96   :  { %12389 = vmatmul.mubr.msk.f32.gmra.mrb[248].mxu1 %vm7016_vm13, %v9053_v36  ;;  %12362 = vmatprep.mubr.msk.f32.mxu0 %vm13079_vm3, %v17990_v37  ;;  %v9839_v36 = vld [vmem:[#allocation3 + $0x3c] sm:$0xff] }
 0xc97   :  { %12391 = vmatprep.mubr.msk.f32.mxu1 %vm13079_vm3, %v17990_v37 }
 0xc99   :  { %12363 = vmatmul.mubr.msk.f32.gmra.mrb[232].mxu0 %vm7016_vm13, %v17136_v41 }
 0xc9a   :  { %12392 = vmatmul.mubr.msk.f32.gmra.mrb[250].mxu1 %vm7016_vm13, %v9054_v54  ;;  %12365 = vmatprep.mubr.msk.f32.mxu0 %vm13079_vm3, %v17990_v37  ;;  %v9841_v54 = vld [vmem:[#allocation3 + $0x4c] sm:$0x3f] }
 0xc9b   :  { %12394 = vmatprep.mubr.msk.f32.mxu1 %vm13079_vm3, %v17990_v37 }
 0xc9d   :  { %12366 = vmatmul.mubr.msk.f32.gmra.mrb[234].mxu0 %vm7016_vm13, %v8898_v19 }
 0xc9e   :  { %12395 = vmatmul.mubr.msk.f32.gmra.mrb[252].mxu1 %vm7016_vm13, %v9055_v61  ;;  %12368 = vmatprep.mubr.msk.f32.mxu0 %vm13079_vm3, %v17990_v37 }
 0xc9f   :  { %12397 = vmatprep.mubr.msk.f32.mxu1 %vm13079_vm3, %v17990_v37 }
 0xca1   :  { %12369 = vmatmul.mubr.msk.f32.gmra.mrb[236].mxu0 %vm7016_vm13, %v8899_v14 }
 0xca2   :  { %12398 = vmatmul.mubr.msk.f32.gmra.mrb[254].mxu1 %vm7016_vm13, %v9056_v26  ;;  %12402 = vmatprep.mubr.msk.f32.mxu0 %vm13079_vm3, %v17990_v37 }
 0xca3   :  { %12431 = vmatprep.mubr.msk.f32.mxu1 %vm13079_vm3, %v17990_v37 }
 0xca5   :  { %12403 = vmatmul.mubr.msk.f32.vlgmr.msra.gmra.mrb[238].mxu0 %vm7016_vm13, %v9205_v52 }
 0xca6   :  { %12432 = vmatmul.mubr.msk.f32.vlgmr.msra.gmra.mrb[0].mxu1 %vm7016_vm13, %v9362_v48  ;;  %12405 = vmatprep.mubr.msk.f32.mxu0 %vm13079_vm3, %v17990_v37 }
 0xca7   :  { %12434 = vmatprep.mubr.msk.f32.mxu1 %vm13079_vm3, %v17990_v37  ;;  %12459 = vmatpush3.msra.mxu0 %v10518_v45 }
 0xca8   :  { %12488 = vmatpush3.msra.mxu1 %v10528_v15  ;;  %12516 = vmatprep.subr.mxu0 %v17990_v37 }
 0xca9   :  { %12406 = vmatmul.mubr.msk.f32.gmra.mrb[240].mxu0 %vm7016_vm13, %v9206_v18 }
 0xcaa   :  { %12435 = vmatmul.mubr.msk.f32.gmra.mrb[2].mxu1 %vm7016_vm13, %v9363_v29  ;;  %12408 = vmatprep.mubr.msk.f32.mxu0 %vm13079_vm3, %v17990_v37 }
 0xcab   :  { %12437 = vmatprep.mubr.msk.f32.mxu1 %vm13079_vm3, %v17990_v37 }
 0xcad   :  { %12409 = vmatmul.mubr.msk.f32.gmra.mrb[242].mxu0 %vm7016_vm13, %v9207_v42 }
 0xcae   :  { %12438 = vmatmul.mubr.msk.f32.gmra.mrb[4].mxu1 %vm7016_vm13, %v9364_v62  ;;  %12411 = vmatprep.mubr.msk.f32.mxu0 %vm13079_vm3, %v17990_v37 }
 0xcaf   :  { %12440 = vmatprep.mubr.msk.f32.mxu1 %vm13079_vm3, %v17990_v37 }
 0xcb1   :  { %12412 = vmatmul.mubr.msk.f32.gmra.mrb[244].mxu0 %vm7016_vm13, %v9208_v17 }
 0xcb2   :  { %12441 = vmatmul.mubr.msk.f32.gmra.mrb[6].mxu1 %vm7016_vm13, %v9365_v53  ;;  %12414 = vmatprep.mubr.msk.f32.mxu0 %vm13079_vm3, %v17990_v37 }
 0xcb3   :  { %12443 = vmatprep.mubr.msk.f32.mxu1 %vm13079_vm3, %v17990_v37 }
 0xcb5   :  { %12415 = vmatmul.mubr.msk.f32.gmra.mrb[246].mxu0 %vm7016_vm13, %v9209_v31 }
 0xcb6   :  { %12444 = vmatmul.mubr.msk.f32.gmra.mrb[8].mxu1 %vm7016_vm13, %v9366_v33  ;;  %12417 = vmatprep.mubr.msk.f32.mxu0 %vm13079_vm3, %v17990_v37 }
 0xcb7   :  { %12446 = vmatprep.mubr.msk.f32.mxu1 %vm13079_vm3, %v17990_v37 }
 0xcb9   :  { %12418 = vmatmul.mubr.msk.f32.gmra.mrb[248].mxu0 %vm7016_vm13, %v9210_v30 }
 0xcba   :  { %12447 = vmatmul.mubr.msk.f32.gmra.mrb[10].mxu1 %vm7016_vm13, %v9367_v60  ;;  %12420 = vmatprep.mubr.msk.f32.mxu0 %vm13079_vm3, %v17990_v37 }
 0xcbb   :  { %12449 = vmatprep.mubr.msk.f32.mxu1 %vm13079_vm3, %v17990_v37 }
 0xcbd   :  { %12421 = vmatmul.mubr.msk.f32.gmra.mrb[250].mxu0 %vm7016_vm13, %v9211_v6 }
 0xcbe   :  { %12450 = vmatmul.mubr.msk.f32.gmra.mrb[12].mxu1 %vm7016_vm13, %v9368_v27  ;;  %12423 = vmatprep.mubr.msk.f32.mxu0 %vm13079_vm3, %v17990_v37 }
 0xcbf   :  { %12452 = vmatprep.mubr.msk.f32.mxu1 %vm13079_vm3, %v17990_v37 }
 0xcc1   :  { %12424 = vmatmul.mubr.msk.f32.gmra.mrb[252].mxu0 %vm7016_vm13, %v9212_v20 }
 0xcc2   :  { %12453 = vmatmul.mubr.msk.f32.gmra.mrb[14].mxu1 %vm7016_vm13, %v9369_v10  ;;  %12426 = vmatprep.mubr.msk.f32.mxu0 %vm13079_vm3, %v17990_v37 }
 0xcc3   :  { %12455 = vmatprep.mubr.msk.f32.mxu1 %vm13079_vm3, %v17990_v37 }
 0xcc5   :  { %12427 = vmatmul.mubr.msk.f32.gmra.mrb[254].mxu0 %vm7016_vm13, %v9213_v1 }
 0xcc6   :  { %12456 = vmatmul.mubr.msk.f32.gmra.mrb[16].mxu1 %vm7016_vm13, %v9370_v46  ;;  %12460 = vmatprep.mubr.msk.f32.mxu0 %vm13079_vm3, %v17990_v37 }
 0xcc7   :  { %12489 = vmatprep.mubr.msk.f32.mxu1 %vm13079_vm3, %v17990_v37 }
 0xcc9   :  { %12461 = vmatmul.mubr.msk.f32.vlgmr.msra.gmra.mrb[0].mxu0 %vm7016_vm13, %v9519_v51 }
 0xcca   :  { %12490 = vmatmul.mubr.msk.f32.vlgmr.msra.gmra.mrb[18].mxu1 %vm7016_vm13, %v9676_v38  ;;  %12463 = vmatprep.mubr.msk.f32.mxu0 %vm13079_vm3, %v17990_v37 }
 0xccb   :  { %12492 = vmatprep.mubr.msk.f32.mxu1 %vm13079_vm3, %v17990_v37  ;;  %12517 = vmatpush3.msra.mxu0 %v10538_v63 }
 0xccd   :  { %12464 = vmatmul.mubr.msk.f32.gmra.mrb[2].mxu0 %vm7016_vm13, %v17077_v8  ;;  %v9680_v8 = vld [vmem:[#allocation3 + $0x27] sm:$0xff] }
 0xcce   :  { %12493 = vmatmul.mubr.msk.f32.gmra.mrb[20].mxu1 %vm7016_vm13, %v9677_v56  ;;  %12466 = vmatprep.mubr.msk.f32.mxu0 %vm13079_vm3, %v17990_v37 }
 0xccf   :  { %12495 = vmatprep.mubr.msk.f32.mxu1 %vm13079_vm3, %v17990_v37 }
 0xcd1   :  { %12467 = vmatmul.mubr.msk.f32.gmra.mrb[4].mxu0 %vm7016_vm13, %v17089_v28  ;;  %v9683_v28 = vld [vmem:[#allocation3 + $0x3f] sm:$0xff] }
 0xcd2   :  { %12496 = vmatmul.mubr.msk.f32.gmra.mrb[22].mxu1 %vm7016_vm13, %v9678_v16  ;;  %12469 = vmatprep.mubr.msk.f32.mxu0 %vm13079_vm3, %v17990_v37 }
 0xcd3   :  { %12498 = vmatprep.mubr.msk.f32.mxu1 %vm13079_vm3, %v17990_v37 }
 0xcd5   :  { %12470 = vmatmul.mubr.msk.f32.gmra.mrb[6].mxu0 %vm7016_vm13, %v17100_v11  ;;  %v9684_v11 = vld [vmem:[#allocation3 + $0x47] sm:$0x3f] }
 0xcd6   :  { %12499 = vmatmul.mubr.msk.f32.gmra.mrb[24].mxu1 %vm7016_vm13, %v9679_v21  ;;  %12472 = vmatprep.mubr.msk.f32.mxu0 %vm13079_vm3, %v17990_v37 }
 0xcd7   :  { %12501 = vmatprep.mubr.msk.f32.mxu1 %vm13079_vm3, %v17990_v37 }
 0xcd9   :  { %12473 = vmatmul.mubr.msk.f32.gmra.mrb[8].mxu0 %vm7016_vm13, %v17109_v22  ;;  %v9834_v22 = vld [vmem:[#allocation3 + $0x14] sm:$0xff] }
 0xcda   :  { %12502 = vmatmul.mubr.msk.f32.gmra.mrb[26].mxu1 %vm7016_vm13, %v9680_v8  ;;  %12475 = vmatprep.mubr.msk.f32.mxu0 %vm13079_vm3, %v17990_v37 }
 0xcdb   :  { %12504 = vmatprep.mubr.msk.f32.mxu1 %vm13079_vm3, %v17990_v37 }
 0xcdd   :  { %12476 = vmatmul.mubr.msk.f32.gmra.mrb[10].mxu0 %vm7016_vm13, %v17118_v24  ;;  %v9836_v24 = vld [vmem:[#allocation3 + $0x24] sm:$0xff] }
 0xcde   :  { %12505 = vmatmul.mubr.msk.f32.gmra.mrb[28].mxu1 %vm7016_vm13, %v9681_v4  ;;  %12478 = vmatprep.mubr.msk.f32.mxu0 %vm13079_vm3, %v17990_v37 }
 0xcdf   :  { %12507 = vmatprep.mubr.msk.f32.mxu1 %vm13079_vm3, %v17990_v37 }
 0xce1   :  { %12479 = vmatmul.mubr.msk.f32.gmra.mrb[12].mxu0 %vm7016_vm13, %v17127_v34  ;;  %v9838_v34 = vld [vmem:[#allocation3 + $0x34] sm:$0xff] }
 0xce2   :  { %12508 = vmatmul.mubr.msk.f32.gmra.mrb[30].mxu1 %vm7016_vm13, %v9682_v35  ;;  %12481 = vmatprep.mubr.msk.f32.mxu0 %vm13079_vm3, %v17990_v37 }
 0xce3   :  { %12510 = vmatprep.mubr.msk.f32.mxu1 %vm13079_vm3, %v17990_v37 }
 0xce5   :  { %12482 = vmatmul.mubr.msk.f32.gmra.mrb[14].mxu0 %vm7016_vm13, %v17136_v41  ;;  %v9840_v41 = vld [vmem:[#allocation3 + $0x44] sm:$0xff] }
 0xce6   :  { %12511 = vmatmul.mubr.msk.f32.gmra.mrb[32].mxu1 %vm7016_vm13, %v9683_v28  ;;  %12484 = vmatprep.mubr.msk.f32.mxu0 %vm13079_vm3, %v17990_v37 }
 0xce7   :  { %12513 = vmatprep.mubr.msk.f32.mxu1 %vm13079_vm3, %v17990_v37 }
 0xce9   :  { %12485 = vmatmul.mubr.msk.f32.gmra.mrb[16].mxu0 %vm7016_vm13, %v9527_v25 }
 0xcea   :  { %12514 = vmatmul.mubr.msk.f32.gmra.mrb[34].mxu1 %vm7016_vm13, %v9684_v11  ;;  %12518 = vmatprep.mubr.msk.f32.mxu0 %vm13079_vm3, %v17990_v37 }
 0xced   :  { %12519 = vmatmul.mubr.msk.f32.vlgmr.msra.gmra.mrb[18].mxu0 %vm7016_vm13, %v9833_v40 }
 0xcee   :  { %12521 = vmatprep.mubr.msk.f32.mxu0 %vm13079_vm3, %v17990_v37 }
 0xcf1   :  { %12522 = vmatmul.mubr.msk.f32.gmra.mrb[20].mxu0 %vm7016_vm13, %v9834_v22 }
 0xcf2   :  { %12524 = vmatprep.mubr.msk.f32.mxu0 %vm13079_vm3, %v17990_v37 }
 0xcf5   :  { %12525 = vmatmul.mubr.msk.f32.gmra.mrb[22].mxu0 %vm7016_vm13, %v9835_v32 }
 0xcf6   :  { %12527 = vmatprep.mubr.msk.f32.mxu0 %vm13079_vm3, %v17990_v37 }
 0xcf9   :  { %12528 = vmatmul.mubr.msk.f32.gmra.mrb[24].mxu0 %vm7016_vm13, %v9836_v24 }
 0xcfa   :  { %12530 = vmatprep.mubr.msk.f32.mxu0 %vm13079_vm3, %v17990_v37 }
 0xcfd   :  { %12531 = vmatmul.mubr.msk.f32.gmra.mrb[26].mxu0 %vm7016_vm13, %v9837_v5 }
 0xcfe   :  { %12533 = vmatprep.mubr.msk.f32.mxu0 %vm13079_vm3, %v17990_v37 }
 0xd01   :  { %12534 = vmatmul.mubr.msk.f32.gmra.mrb[28].mxu0 %vm7016_vm13, %v9838_v34 }
 0xd02   :  { %12536 = vmatprep.mubr.msk.f32.mxu0 %vm13079_vm3, %v17990_v37 }
 0xd05   :  { %12537 = vmatmul.mubr.msk.f32.gmra.mrb[30].mxu0 %vm7016_vm13, %v9839_v36 }
 0xd06   :  { %12539 = vmatprep.mubr.msk.f32.mxu0 %vm13079_vm3, %v17990_v37 }
 0xd09   :  { %12540 = vmatmul.mubr.msk.f32.gmra.mrb[32].mxu0 %vm7016_vm13, %v9840_v41 }
 0xd0a   :  { %12542 = vmatprep.mubr.msk.f32.mxu0 %vm13079_vm3, %v17990_v37 }
 0xd0d   :  { %12543 = vmatmul.mubr.msk.f32.gmra.mrb[34].mxu0 %vm7016_vm13, %v9841_v54 }
 0xd30   :  { %v8710_v19 = vpop.f32.mrb[202].mxu0 }
 0xd31   :  { %v8847_v61 = vpop.f32.mrb[220].mxu1  ;;  %v12288_v26 = vpop.f32.mrb[203].mxu0 }
 0xd32   :  { %v8848_v14 = vadd.f32 %v8847_v61, %v8710_v19  ;;  %v12317_v45 = vpop.f32.mrb[221].mxu1 }
 0xd34   :  { %v8715_v52 = vpop.f32.mrb[204].mxu0 }
 0xd35   :  { %v8852_v48 = vpop.f32.mrb[222].mxu1  ;;  %v12291_v18 = vpop.f32.mrb[205].mxu0 }
 0xd36   :  { %v8853_v15 = vadd.f32 %v8852_v48, %v8715_v52  ;;  %v12320_v29 = vpop.f32.mrb[223].mxu1 }
 0xd38   :  { %v8720_v42 = vpop.f32.mrb[206].mxu0 }
 0xd39   :  { %v8857_v62 = vpop.f32.mrb[224].mxu1  ;;  %v12294_v53 = vpop.f32.mrb[207].mxu0 }
 0xd3a   :  { %v8858_v17 = vadd.f32 %v8857_v62, %v8720_v42  ;;  %v12323_v31 = vpop.f32.mrb[225].mxu1 }
 0xd3c   :  { %v8725_v33 = vpop.f32.mrb[208].mxu0 }
 0xd3d   :  { %v8862_v37 = vpop.f32.mrb[226].mxu1  ;;  %v12297_v60 = vpop.f32.mrb[209].mxu0 }
 0xd3e   :  { %v8863_v30 = vadd.f32 %v8862_v37, %v8725_v33  ;;  %v12326_v6 = vpop.f32.mrb[227].mxu1 }
 0xd40   :  { %v8730_v27 = vpop.f32.mrb[210].mxu0 }
 0xd41   :  { %v8867_v20 = vpop.f32.mrb[228].mxu1  ;;  %v12300_v1 = vpop.f32.mrb[211].mxu0 }
 0xd42   :  { %v8868_v10 = vadd.f32 %v8867_v20, %v8730_v27  ;;  %v12329_v46 = vpop.f32.mrb[229].mxu1 }
 0xd44   :  { %v8735_v51 = vpop.f32.mrb[212].mxu0 }
 0xd45   :  { %v8872_v38 = vpop.f32.mrb[230].mxu1  ;;  %v12303_v56 = vpop.f32.mrb[213].mxu0 }
 0xd46   :  { %v8873_v63 = vadd.f32 %v8872_v38, %v8735_v51  ;;  %v12332_v16 = vpop.f32.mrb[231].mxu1 }
 0xd48   :  { %v8740_v21 = vpop.f32.mrb[214].mxu0 }
 0xd49   :  { %v8877_v8 = vpop.f32.mrb[232].mxu1  ;;  %v12306_v35 = vpop.f32.mrb[215].mxu0 }
 0xd4a   :  { %v8878_v4 = vadd.f32 %v8877_v8, %v8740_v21  ;;  %v12335_v28 = vpop.f32.mrb[233].mxu1 }
 0xd4c   :  { %v8745_v25 = vpop.f32.mrb[216].mxu0 }
 0xd4d   :  { %v8882_v11 = vpop.f32.mrb[234].mxu1  ;;  %v12309_v22 = vpop.f32.mrb[217].mxu0 }
 0xd4e   :  { %v8883_v40 = vadd.f32 %v8882_v11, %v8745_v25  ;;  %v12338_v32 = vpop.f32.mrb[235].mxu1 }
 0xd50   :  { %v8750_v24 = vpop.f32.mrb[218].mxu0 }
 0xd51   :  { %v8887_v5 = vpop.f32.mrb[236].mxu1  ;;  %v12312_v36 = vpop.f32.mrb[219].mxu0 }
 0xd52   :  { %v8888_v34 = vadd.f32 %v8887_v5, %v8750_v24  ;;  %v12341_v41 = vpop.f32.mrb[237].mxu1 }
 0xd54   :  { %v8995_v54 = vpop.f32.mrb[220].mxu0 }
 0xd55   :  { %v9152_v19 = vpop.f32.mrb[238].mxu1  ;;  %v9039_v61 = vadd.f32 %v8995_v54, %v8848_v14  ;;  %v12346_v26 = vpop.f32.mrb[221].mxu0 }
 0xd56   :  { %v12375_v45 = vpop.f32.mrb[239].mxu1 }
 0xd57   :  { %v9196_v52 = vadd.f32 %v9152_v19, %v9039_v61 }
 0xd58   :  { %v9000_v48 = vpop.f32.mrb[222].mxu0 }
 0xd59   :  { %v9157_v18 = vpop.f32.mrb[240].mxu1  ;;  %v9040_v29 = vadd.f32 %v9000_v48, %v8853_v15  ;;  %v12349_v42 = vpop.f32.mrb[223].mxu0 }
 0xd5a   :  { %v12378_v62 = vpop.f32.mrb[241].mxu1 }
 0xd5b   :  { %v9197_v53 = vadd.f32 %v9157_v18, %v9040_v29 }
 0xd5c   :  { %v9005_v31 = vpop.f32.mrb[224].mxu0 }
 0xd5d   :  { %v9162_v33 = vpop.f32.mrb[242].mxu1  ;;  %v9041_v37 = vadd.f32 %v9005_v31, %v8858_v17  ;;  %v12352_v60 = vpop.f32.mrb[225].mxu0 }
 0xd5e   :  { %v12381_v6 = vpop.f32.mrb[243].mxu1 }
 0xd5f   :  { %v9198_v27 = vadd.f32 %v9162_v33, %v9041_v37 }
 0xd60   :  { %v9010_v20 = vpop.f32.mrb[226].mxu0 }
 0xd61   :  { %v9167_v1 = vpop.f32.mrb[244].mxu1  ;;  %v9042_v46 = vadd.f32 %v9010_v20, %v8863_v30  ;;  %v12355_v51 = vpop.f32.mrb[227].mxu0 }
 0xd62   :  { %v12384_v14 = vpop.f32.mrb[245].mxu1 }
 0xd63   :  { %v9199_v38 = vadd.f32 %v9167_v1, %v9042_v46 }
 0xd64   :  { %v9015_v56 = vpop.f32.mrb[228].mxu0 }
 0xd65   :  { %v9172_v16 = vpop.f32.mrb[246].mxu1  ;;  %v9043_v21 = vadd.f32 %v9015_v56, %v8868_v10  ;;  %v12358_v8 = vpop.f32.mrb[229].mxu0 }
 0xd66   :  { %v12387_v15 = vpop.f32.mrb[247].mxu1 }
 0xd67   :  { %v9200_v35 = vadd.f32 %v9172_v16, %v9043_v21 }
 0xd68   :  { %v9020_v28 = vpop.f32.mrb[230].mxu0 }
 0xd69   :  { %v9177_v25 = vpop.f32.mrb[248].mxu1  ;;  %v9044_v11 = vadd.f32 %v9020_v28, %v8873_v63  ;;  %v12361_v22 = vpop.f32.mrb[231].mxu0 }
 0xd6a   :  { %v12390_v17 = vpop.f32.mrb[249].mxu1 }
 0xd6b   :  { %v9201_v32 = vadd.f32 %v9177_v25, %v9044_v11 }
 0xd6c   :  { %v9025_v24 = vpop.f32.mrb[232].mxu0 }
 0xd6d   :  { %v9182_v5 = vpop.f32.mrb[250].mxu1  ;;  %v9045_v36 = vadd.f32 %v9025_v24, %v8878_v4  ;;  %v12364_v41 = vpop.f32.mrb[233].mxu0 }
 0xd6e   :  { %v12393_v30 = vpop.f32.mrb[251].mxu1 }
 0xd6f   :  { %v9202_v54 = vadd.f32 %v9182_v5, %v9045_v36 }
 0xd70   :  { %v9030_v19 = vpop.f32.mrb[234].mxu0 }
 0xd71   :  { %v9187_v61 = vpop.f32.mrb[252].mxu1  ;;  %v9046_v26 = vadd.f32 %v9030_v19, %v8883_v40  ;;  %v12367_v45 = vpop.f32.mrb[235].mxu0 }
 0xd72   :  { %v12396_v10 = vpop.f32.mrb[253].mxu1 }
 0xd73   :  { %v9203_v48 = vadd.f32 %v9187_v61, %v9046_v26 }
 0xd74   :  { %v9035_v18 = vpop.f32.mrb[236].mxu0 }
 0xd75   :  { %v9192_v29 = vpop.f32.mrb[254].mxu1  ;;  %v9047_v42 = vadd.f32 %v9035_v18, %v8888_v34  ;;  %v12370_v62 = vpop.f32.mrb[237].mxu0 }
 0xd76   :  { %v12399_v63 = vpop.f32.mrb[255].mxu1 }
 0xd77   :  { %v9204_v31 = vadd.f32 %v9192_v29, %v9047_v42 }
 0xd78   :  { %v9309_v33 = vpop.f32.mrb[238].mxu0 }
 0xd79   :  { %v9466_v37 = vpop.f32.mrb[0].mxu1  ;;  %v9353_v60 = vadd.f32 %v9309_v33, %v9196_v52  ;;  %v12404_v6 = vpop.f32.mrb[239].mxu0 }
 0xd7a   :  { %v12433_v4 = vpop.f32.mrb[1].mxu1 }
 0xd7b   :  { %v9510_v20 = vadd.f32 %v9466_v37, %v9353_v60 }
 0xd7c   :  { %v9314_v1 = vpop.f32.mrb[240].mxu0 }
 0xd7d   :  { %v9471_v46 = vpop.f32.mrb[2].mxu1  ;;  %v9354_v51 = vadd.f32 %v9314_v1, %v9197_v53  ;;  %v12407_v14 = vpop.f32.mrb[241].mxu0 }
 0xd7e   :  { %v12436_v40 = vpop.f32.mrb[3].mxu1 }
 0xd7f   :  { %v9511_v56 = vadd.f32 %v9471_v46, %v9354_v51 }
 0xd80   :  { %v9319_v16 = vpop.f32.mrb[242].mxu0 }
 0xd81   :  { %v9476_v21 = vpop.f32.mrb[4].mxu1  ;;  %v9355_v8 = vadd.f32 %v9319_v16, %v9198_v27  ;;  %v12410_v15 = vpop.f32.mrb[243].mxu0 }
 0xd82   :  { %v12439_v34 = vpop.f32.mrb[5].mxu1 }
 0xd83   :  { %v9512_v28 = vadd.f32 %v9476_v21, %v9355_v8 }
 0xd84   :  { %v9324_v25 = vpop.f32.mrb[244].mxu0 }
 0xd85   :  { %v9481_v11 = vpop.f32.mrb[6].mxu1  ;;  %v9356_v22 = vadd.f32 %v9324_v25, %v9199_v38  ;;  %v12413_v17 = vpop.f32.mrb[245].mxu0 }
 0xd86   :  { %v12442_v52 = vpop.f32.mrb[7].mxu1 }
 0xd87   :  { %v9513_v24 = vadd.f32 %v9481_v11, %v9356_v22 }
 0xd88   :  { %v9329_v5 = vpop.f32.mrb[246].mxu0 }
 0xd89   :  { %v9486_v36 = vpop.f32.mrb[8].mxu1  ;;  %v9357_v41 = vadd.f32 %v9329_v5, %v9200_v35  ;;  %v12416_v30 = vpop.f32.mrb[247].mxu0 }
 0xd8a   :  { %v12445_v53 = vpop.f32.mrb[9].mxu1 }
 0xd8b   :  { %v9514_v19 = vadd.f32 %v9486_v36, %v9357_v41 }
 0xd8c   :  { %v9334_v61 = vpop.f32.mrb[248].mxu0 }
 0xd8d   :  { %v9491_v26 = vpop.f32.mrb[10].mxu1  ;;  %v9358_v45 = vadd.f32 %v9334_v61, %v9201_v32  ;;  %v12419_v10 = vpop.f32.mrb[249].mxu0 }
 0xd8e   :  { %v12448_v27 = vpop.f32.mrb[11].mxu1 }
 0xd8f   :  { %v9515_v18 = vadd.f32 %v9491_v26, %v9358_v45 }
 0xd90   :  { %v9339_v29 = vpop.f32.mrb[250].mxu0 }
 0xd91   :  { %v9496_v42 = vpop.f32.mrb[12].mxu1  ;;  %v9359_v62 = vadd.f32 %v9339_v29, %v9202_v54  ;;  %v12422_v63 = vpop.f32.mrb[251].mxu0 }
 0xd92   :  { %v12451_v38 = vpop.f32.mrb[13].mxu1 }
 0xd93   :  { %v9516_v33 = vadd.f32 %v9496_v42, %v9359_v62 }
 0xd94   :  { %v9344_v37 = vpop.f32.mrb[252].mxu0 }
 0xd95   :  { %v9501_v60 = vpop.f32.mrb[14].mxu1  ;;  %v9360_v6 = vadd.f32 %v9344_v37, %v9203_v48  ;;  %v12425_v4 = vpop.f32.mrb[253].mxu0 }
 0xd96   :  { %v12454_v35 = vpop.f32.mrb[15].mxu1 }
 0xd97   :  { %v9517_v1 = vadd.f32 %v9501_v60, %v9360_v6 }
 0xd98   :  { %v9349_v46 = vpop.f32.mrb[254].mxu0 }
 0xd99   :  { %v9506_v51 = vpop.f32.mrb[16].mxu1  ;;  %v9361_v14 = vadd.f32 %v9349_v46, %v9204_v31  ;;  %v12428_v40 = vpop.f32.mrb[255].mxu0 }
 0xd9a   :  { %v12457_v32 = vpop.f32.mrb[17].mxu1 }
 0xd9b   :  { %v9518_v16 = vadd.f32 %v9506_v51, %v9361_v14 }
 0xd9c   :  { %v9623_v21 = vpop.f32.mrb[0].mxu0 }
 0xd9d   :  { %v9780_v8 = vpop.f32.mrb[18].mxu1  ;;  %v9667_v15 = vadd.f32 %v9623_v21, %v9510_v20  ;;  %v12462_v34 = vpop.f32.mrb[1].mxu0 }
 0xd9e   :  { %v12491_v54 = vpop.f32.mrb[19].mxu1 }
 0xd9f   :  { %v9824_v25 = vadd.f32 %v9780_v8, %v9667_v15 }
 0xda0   :  { %v9628_v11 = vpop.f32.mrb[2].mxu0 }
 0xda1   :  { %v9785_v22 = vpop.f32.mrb[20].mxu1  ;;  %v9668_v17 = vadd.f32 %v9628_v11, %v9511_v56  ;;  %v12465_v52 = vpop.f32.mrb[3].mxu0 }
 0xda2   :  { %v12494_v48 = vpop.f32.mrb[21].mxu1 }
 0xda3   :  { %v9825_v5 = vadd.f32 %v9785_v22, %v9668_v17 }
 0xda4   :  { %v9633_v36 = vpop.f32.mrb[4].mxu0 }
 0xda5   :  { %v9790_v41 = vpop.f32.mrb[22].mxu1  ;;  %v9669_v30 = vadd.f32 %v9633_v36, %v9512_v28  ;;  %v12468_v53 = vpop.f32.mrb[5].mxu0 }
 0xda6   :  { %v12497_v31 = vpop.f32.mrb[23].mxu1  ;;  %v17320_v53 = vstv %s10550_s5 }
 0xda7   :  { %v9826_v61 = vadd.f32 %v9790_v41, %v9669_v30  ;;  %v17318_v41 = vld [vmem:[%s17405_s6 + $0x1] ss:$0 sm:$0xff] }
 0xda8   :  { %v9638_v26 = vpop.f32.mrb[6].mxu0 }
 0xda9   :  { %v9795_v45 = vpop.f32.mrb[24].mxu1  ;;  %v9670_v10 = vadd.f32 %v9638_v26, %v9513_v24  ;;  %v12471_v27 = vpop.f32.mrb[7].mxu0 }
 0xdaa   :  { %v12500_v20 = vpop.f32.mrb[25].mxu1 }
 0xdab   :  { %v9827_v29 = vadd.f32 %v9795_v45, %v9670_v10 }
 0xdac   :  { %v9643_v42 = vpop.f32.mrb[8].mxu0 }
 0xdad   :  { %v9800_v62 = vpop.f32.mrb[26].mxu1  ;;  %v9671_v63 = vadd.f32 %v9643_v42, %v9514_v19  ;;  %v12474_v38 = vpop.f32.mrb[9].mxu0 }
 0xdae   :  { %v12503_v56 = vpop.f32.mrb[27].mxu1 }
 0xdaf   :  { %v17305_v37 = vadd.f32 %v9800_v62, %v9671_v63 }
 0xdb0   :  { %v9648_v60 = vpop.f32.mrb[10].mxu0 }
 0xdb1   :  { %v9805_v6 = vpop.f32.mrb[28].mxu1  ;;  %v9672_v4 = vadd.f32 %v9648_v60, %v9515_v18  ;;  %v12477_v28 = vpop.f32.mrb[11].mxu0 }
 0xdb2   :  { %v12506_v35 = vpop.f32.mrb[29].mxu1 }
 0xdb3   :  { %v17307_v46 = vadd.f32 %v9805_v6, %v9672_v4 }
 0xdb4   :  { %v9653_v51 = vpop.f32.mrb[12].mxu0 }
 0xdb5   :  { %v9810_v14 = vpop.f32.mrb[30].mxu1  ;;  %v9673_v24 = vadd.f32 %v9653_v51, %v9516_v33  ;;  %v12480_v40 = vpop.f32.mrb[13].mxu0 }
 0xdb6   :  { %v12509_v32 = vpop.f32.mrb[31].mxu1 }
 0xdb7   :  { %v17309_v21 = vadd.f32 %v9810_v14, %v9673_v24 }
 0xdb8   :  { %v9658_v8 = vpop.f32.mrb[14].mxu0 }
 0xdb9   :  { %v9815_v19 = vpop.f32.mrb[32].mxu1  ;;  %v9674_v15 = vadd.f32 %v9658_v8, %v9517_v1  ;;  %v12483_v34 = vpop.f32.mrb[15].mxu0 }
 0xdba   :  { %v12512_v54 = vpop.f32.mrb[33].mxu1 }
 0xdbb   :  { %v17311_v11 = vadd.f32 %v9815_v19, %v9674_v15 }
 0xdbc   :  { %v9663_v18 = vpop.f32.mrb[16].mxu0 }
 0xdbd   :  { %v9820_v22 = vpop.f32.mrb[34].mxu1  ;;  %v9675_v17 = vadd.f32 %v9663_v18, %v9518_v16  ;;  %v12486_v52 = vpop.f32.mrb[17].mxu0 }
 0xdbe   :  { %v12515_v48 = vpop.f32.mrb[35].mxu1 }
 0xdbf   :  { %v17313_v36 = vadd.f32 %v9820_v22, %v9675_v17 }
 0xdc0   :  { %v9937_v33 = vpop.f32.mrb[18].mxu0 }
 0xdc1   :  { %v9981_v30 = vadd.f32 %v9937_v33, %v9824_v25  ;;  %v12520_v1 = vpop.f32.mrb[19].mxu0 }
 0xdc3   :  { %v9998_v31 = vadd.f32 %v17318_v41, %v9981_v30 }
 0xdc4   :  { %v9942_v26 = vpop.f32.mrb[20].mxu0 }
 0xdc5   :  { %vm10008_vm3 = vcmp.ge.f32.partialorder %v9998_v31, 0.0  ;;  %v10018_v16 = vmul.f32 %v17320_v53, %v9998_v31  ;;  %v9982_v45 = vadd.f32 %v9942_v26, %v9825_v5  ;;  %v12523_v10 = vpop.f32.mrb[21].mxu0 }
 0xdc7   :  { %v10027_v27 = vsel %vm10008_vm3, %v9998_v31, %v10018_v16  ;;  %v9999_v20 = vadd.f32 %v17318_v41, %v9982_v45 }
 0xdc8   :  { %v10036_v42 = vadd.f32 %v10027_v27, %v16932_v7  ;;  %v9947_v62 = vpop.f32.mrb[22].mxu0 }
 0xdc9   :  { %vm10009_vm13 = vcmp.ge.f32.partialorder %v9999_v20, 0.0  ;;  %v10019_v25 = vmul.f32 %v17320_v53, %v9999_v20  ;;  %v9983_v63 = vadd.f32 %v9947_v62, %v9826_v61  ;;  %v12526_v38 = vpop.f32.mrb[23].mxu0 }
 0xdca   :  { %v10045_v56 = vmul.f32 %v10036_v42, %v16928_v39 }
 0xdcb   :  { %v10028_v60 = vsel %vm10009_vm13, %v9999_v20, %v10019_v25  ;;  %v10000_v6 = vadd.f32 %v17318_v41, %v9983_v63 }
 0xdcc   :  { %10054 = vst.msk [vmem:[%s17407_s8] sm:$0xff] %vm8584_vm11, %v10045_v56  ;;  %v10037_v5 = vadd.f32 %v10028_v60, %v16941_v44  ;;  %v9952_v4 = vpop.f32.mrb[24].mxu0 }
 0xdcd   :  { %vm10010_vm0 = vcmp.ge.f32.partialorder %v10000_v6, 0.0  ;;  %v10020_v7 = vmul.f32 %v17320_v53, %v10000_v6  ;;  %v9984_v28 = vadd.f32 %v9952_v4, %v9827_v29  ;;  %v12529_v35 = vpop.f32.mrb[25].mxu0 }
 0xdce   :  { %v10046_v61 = vmul.f32 %v10037_v5, %v16937_v50 }
 0xdcf   :  { %v10029_v51 = vsel %vm10010_vm0, %v10000_v6, %v10020_v7  ;;  %v10001_v39 = vadd.f32 %v17318_v41, %v9984_v28 }
 0xdd0   :  { %10055 = vst.msk [vmem:[%s17407_s8 + $0x8] sm:$0xff] %vm8584_vm11, %v10046_v61  ;;  %v10038_v14 = vadd.f32 %v10029_v51, %v16950_v58  ;;  %v9957_v24 = vpop.f32.mrb[26].mxu0 }
 0xdd1   :  { %vm10011_vm9 = vcmp.ge.f32.partialorder %v10001_v39, 0.0  ;;  %v10021_v44 = vmul.f32 %v17320_v53, %v10001_v39  ;;  %v9985_v40 = vadd.f32 %v9957_v24, %v17305_v37  ;;  %v12532_v29 = vpop.f32.mrb[27].mxu0 }
 0xdd2   :  { %v10047_v32 = vmul.f32 %v10038_v14, %v16943_v47 }
 0xdd3   :  { %v10030_v50 = vsel %vm10011_vm9, %v10001_v39, %v10021_v44  ;;  %v10002_v8 = vadd.f32 %v17318_v41, %v9985_v40 }
 0xdd4   :  { %10056 = vst.msk [vmem:[%s17407_s8 + $0x10] sm:$0xff] %vm8584_vm11, %v10047_v32  ;;  %v10039_v19 = vadd.f32 %v10030_v50, %v16972_v9  ;;  %v9962_v58 = vpop.f32.mrb[28].mxu0 }
 0xdd5   :  { %vm10012_vm8 = vcmp.ge.f32.partialorder %v10002_v8, 0.0  ;;  %v10022_v15 = vmul.f32 %v17320_v53, %v10002_v8  ;;  %v9986_v34 = vadd.f32 %v9962_v58, %v17307_v46  ;;  %v12535_v37 = vpop.f32.mrb[29].mxu0 }
 0xdd6   :  { %v10048_v54 = vmul.f32 %v10039_v19, %v16964_v23 }
 0xdd7   :  { %v10031_v47 = vsel %vm10012_vm8, %v10002_v8, %v10022_v15  ;;  %v10003_v18 = vadd.f32 %v17318_v41, %v9986_v34 }
 0xdd8   :  { %10057 = vst.msk [vmem:[%s17407_s8 + $0x18] sm:$0xff] %vm8584_vm11, %v10048_v54  ;;  %v10040_v22 = vadd.f32 %v10031_v47, %v16990_v55  ;;  %v9967_v9 = vpop.f32.mrb[30].mxu0 }
 0xdd9   :  { %vm10013_vm10 = vcmp.ge.f32.partialorder %v10003_v18, 0.0  ;;  %v10023_v17 = vmul.f32 %v17320_v53, %v10003_v18  ;;  %v9987_v52 = vadd.f32 %v9967_v9, %v17309_v21  ;;  %v12538_v46 = vpop.f32.mrb[31].mxu0 }
 0xdda   :  { %v10049_v48 = vmul.f32 %v10040_v22, %v16982_v2 }
 0xddb   :  { %v10032_v23 = vsel %vm10013_vm10, %v10003_v18, %v10023_v17  ;;  %v10004_v33 = vadd.f32 %v17318_v41, %v9987_v52 }
 0xddc   :  { %10058 = vst.msk [vmem:[%s17407_s8 + $0x20] sm:$0xff] %vm8584_vm11, %v10049_v48  ;;  %v10041_v30 = vadd.f32 %v10032_v23, %v17006_v57  ;;  %v9972_v55 = vpop.f32.mrb[32].mxu0 }
 0xddd   :  { %vm10014_vm1 = vcmp.ge.f32.partialorder %v10004_v33, 0.0  ;;  %v10024_v1 = vmul.f32 %v17320_v53, %v10004_v33  ;;  %v9988_v31 = vadd.f32 %v9972_v55, %v17311_v11  ;;  %v12541_v21 = vpop.f32.mrb[33].mxu0 }
 0xdde   :  { %v10050_v26 = vmul.f32 %v10041_v30, %v16998_v3 }
 0xddf   :  { %v10033_v2 = vsel %vm10014_vm1, %v10004_v33, %v10024_v1  ;;  %v10005_v16 = vadd.f32 %v17318_v41, %v9988_v31 }
 0xde0   :  { %10059 = vst.msk [vmem:[%s17407_s8 + $0x28] sm:$0xff] %vm8584_vm11, %v10050_v26  ;;  %v10042_v45 = vadd.f32 %v10033_v2, %v17022_v43  ;;  %v9977_v57 = vpop.f32.mrb[34].mxu0 }
 0xde1   :  { %vm10015_vm12 = vcmp.ge.f32.partialorder %v10005_v16, 0.0  ;;  %v10025_v10 = vmul.f32 %v17320_v53, %v10005_v16  ;;  %v9989_v27 = vadd.f32 %v9977_v57, %v17313_v36  ;;  %v12544_v11 = vpop.f32.mrb[35].mxu0 }
 0xde2   :  { %v10051_v20 = vmul.f32 %v10042_v45, %v17014_v0 }
 0xde3   :  { %v10034_v3 = vsel %vm10015_vm12, %v10005_v16, %v10025_v10  ;;  %v10006_v42 = vadd.f32 %v17318_v41, %v9989_v27 }
 0xde4   :  { %10060 = vst.msk [vmem:[%s17407_s8 + $0x30] sm:$0xff] %vm8584_vm11, %v10051_v20  ;;  %v10043_v62 = vadd.f32 %v10034_v3, %v17038_v12 }
 0xde5   :  { %vm10016_vm2 = vcmp.ge.f32.partialorder %v10006_v42, 0.0  ;;  %v10026_v43 = vmul.f32 %v17320_v53, %v10006_v42 }
 0xde6   :  { %v10052_v25 = vmul.f32 %v10043_v62, %v17030_v49 }
 0xde7   :  { %v10035_v63 = vsel %vm10016_vm2, %v10006_v42, %v10026_v43 }
 0xde8   :  { %10061 = vst.msk [vmem:[%s17407_s8 + $0x38] sm:$0xff] %vm8584_vm11, %v10052_v25  ;;  %v10044_v0 = vadd.f32 %v10035_v63, %v17052_v59 }
 0xdea   :  { %v10053_v36 = vmul.f32 %v10044_v0, %v17045_v13 }
 0xdec   :  { %10062 = vst.msk [vmem:[%s17407_s8 + $0x40] sm:$0x3f] %vm8593_vm7, %v10053_v36 }
 0xded   :  { %10067 = vsyncpa [#allocation5], 1 }
 0xdee   :  { %10068 = vsyncpa [#allocation6], 1 }

</bundles_post_ra>
